<compile_context>
chip_gen: v5e
topology: v5e:2x2
jax: 0.10.0
libtpu: 0.0.40
codegen_flags: <defaults>
</compile_context>

<pallas_src>
import numpy as np
import jax
import jax.numpy as jnp
from jax.experimental import pallas as pl
from jax.experimental.pallas import tpu as pltpu

# ---------------------------------------------------------------------------
# Config (mirrors cfg['flow'] in the PyTorch module)
# ---------------------------------------------------------------------------
CFG = {
    "flow": {
        "input_dims": 16,   # D
        "layer_dims": 32,   # hidden width of subnet_fc
        "n_blocks": 2,
        "clamping": 2.0,
    }
}

PARAMS_PER_BLOCK = 14  # 12 subnet tensors + 2 permutation half-matrices


def _round_up(n, m):
    return ((n + m - 1) // m) * m


# ---------------------------------------------------------------------------
# In-kernel atan (Cephes single-precision polynomial; VPU-only ops).
# Avoids relying on a Mosaic lowering for lax.atan/atan2.
# ---------------------------------------------------------------------------
_TAN_3PI_8 = 2.414213562373095
_TAN_PI_8 = 0.4142135623730950
_HALF_PI = float(np.pi / 2.0)
_QUARTER_PI = float(np.pi / 4.0)


def _atan(x):
    ax = jnp.abs(x)
    big = ax > _TAN_3PI_8
    mid = ax > _TAN_PI_8
    xr = jnp.where(big, -1.0 / (ax + 1e-30),
                   jnp.where(mid, (ax - 1.0) / (ax + 1.0), ax))
    y0 = jnp.where(big, _HALF_PI, jnp.where(mid, _QUARTER_PI, 0.0))
    z = xr * xr
    p = (((8.05374449538e-2 * z - 1.38776856032e-1) * z + 1.99777106478e-1) * z
         - 3.33329491539e-1) * z * xr + xr
    r = y0 + p
    return jnp.where(x < 0, -r, r)


# ---------------------------------------------------------------------------
# Fused RNVP forward kernel (all coupling blocks + permutations)
# ---------------------------------------------------------------------------
def make_rnvp_kernel(n_blocks, L1, L2, clamp, mxu_dtype=jnp.float32):
    clamp = float(clamp)
    alpha = clamp * 0.636          # hoisted constant multiplier
    inv_clamp = 1.0 / clamp        # divide -> multiply

    def mlp(v, wa, ba, wb, bb, wc, bc):
        # 3-layer subnet; single fused (s|t) head matmul. Accumulation in f32.
        v = v.astype(mxu_dtype)
        h = jnp.dot(v, wa[...].astype(mxu_dtype),
                    preferred_element_type=jnp.float32) + ba[...]
        h = jnp.maximum(h, 0.0)
        h = jnp.dot(h.astype(mxu_dtype), wb[...].astype(mxu_dtype),
                    preferred_element_type=jnp.float32) + bb[...]
        h = jnp.maximum(h, 0.0)
        return jnp.dot(h.astype(mxu_dtype), wc[...].astype(mxu_dtype),
                       preferred_element_type=jnp.float32) + bc[...]

    def soft_exp(s):
        # FrEIA clamped scale: exp(clamp * 0.636 * atan(s / clamp))
        return jnp.exp(alpha * _atan(s * inv_clamp))

    def kernel(x_ref, *refs):
        o_ref = refs[-1]
        w = refs[:-1]

        x = x_ref[...].astype(jnp.float32)   # (TB, D)
        for blk in range(n_blocks):
            (w2a, b2a, w2b, b2b, w2c, b2c,
             w1a, b1a, w1b, b1b, w1c, b1c,
             p_top, p_bot) = w[blk * PARAMS_PER_BLOCK:(blk + 1) * PARAMS_PER_BLOCK]

            x1 = x[:, :L1]
            x2 = x[:, L1:]

            # y1 = e(s2(x2)) * x1 + t2(x2)
            r2 = mlp(x2, w2a, b2a, w2b, b2b, w2c, b2c)         # (TB, 2*L1)
            y1 = soft_exp(r2[:, :L1]) * x1 + r2[:, L1:]

            # y2 = e(s1(y1)) * x2 + t1(y1)
            r1 = mlp(y1, w1a, b1a, w1b, b1b, w1c, b1c)         # (TB, 2*L2)
            y2 = soft_exp(r1[:, :L2]) * x2 + r1[:, L2:]

            # PermuteRandom fused: x_next = concat(y1, y2)[:, perm]
            #                             = y1 @ P[:L1] + y2 @ P[L1:]
            x = (jnp.dot(y1.astype(mxu_dtype), p_top[...].astype(mxu_dtype),
                         preferred_element_type=jnp.float32)
                 + jnp.dot(y2.astype(mxu_dtype), p_bot[...].astype(mxu_dtype),
                           preferred_element_type=jnp.float32))

        o_ref[...] = x.astype(o_ref.dtype)

    return kernel


def rnvp_forward(x, params, cfg, *, block_batch=128, mxu_dtype=jnp.float32):
    """Fused RNVP forward: one pallas_call, batch-tiled grid, weights resident."""
    D = cfg["flow"]["input_dims"]
    n_blocks = cfg["flow"]["n_blocks"]
    clamp = cfg["flow"]["clamping"]
    L1, L2 = D // 2, D - D // 2
    assert len(params) == PARAMS_PER_BLOCK * n_blocks

    B = x.shape[0]
    # Batch tile: sublane-aligned, capped at block_batch; pad B up to a multiple.
    TB = min(block_batch, _round_up(B, 8))
    Bp = _round_up(B, TB)
    xp = jnp.pad(x, ((0, Bp - B), (0, 0))) if Bp != B else x

    kernel = make_rnvp_kernel(n_blocks, L1, L2, clamp, mxu_dtype)

    # Activations tiled along batch; all weights use full-array blocks with a
    # constant index_map so they stay in VMEM across the whole grid.
    in_specs = [pl.BlockSpec((TB, D), lambda i: (i, 0))]
    in_specs += [pl.BlockSpec(p.shape, lambda i: (0, 0)) for p in params]

    z = pl.pallas_call(
        kernel,
        grid=(Bp // TB,),
        in_specs=in_specs,
        out_specs=pl.BlockSpec((TB, D), lambda i: (i, 0)),
        out_shape=jax.ShapeDtypeStruct((Bp, D), x.dtype),
        compiler_params=pltpu.CompilerParams(
            dimension_semantics=("parallel",)),
    )(xp, *params)
    return z[:B]


# ---------------------------------------------------------------------------
# Parameter construction (0.05 * randn like the PyTorch init)
# ---------------------------------------------------------------------------
def init_subnet(key, c_in, hidden, c_out):
    """3-layer MLP params; the (s|t) head is kept as ONE (hidden, c_out) weight."""
    ks = jax.random.split(key, 6)
    wa = 0.05 * jax.random.normal(ks[0], (c_in, hidden), jnp.float32)
    ba = 0.05 * jax.random.normal(ks[1], (1, hidden), jnp.float32)
    wb = 0.05 * jax.random.normal(ks[2], (hidden, hidden), jnp.float32)
    bb = 0.05 * jax.random.normal(ks[3], (1, hidden), jnp.float32)
    wc = 0.05 * jax.random.normal(ks[4], (hidden, c_out), jnp.float32)
    bc = 0.05 * jax.random.normal(ks[5], (1, c_out), jnp.float32)
    return [wa, ba, wb, bb, wc, bc]


def build_rnvp_params(key, cfg):
    D = cfg["flow"]["input_dims"]
    H = cfg["flow"]["layer_dims"]
    L1, L2 = D // 2, D - D // 2
    params = []
    for k in range(cfg["flow"]["n_blocks"]):
        key, k1, k2 = jax.random.split(key, 3)
        params += init_subnet(k1, L2, H, 2 * L1)   # s2 : x2 -> (s2 | t2)
        params += init_subnet(k2, L1, H, 2 * L2)   # s1 : y1 -> (s1 | t1)
        # PermuteRandom(seed=k): x_next[:, j] = y[:, perm[j]]  <=>  x_next = y @ P
        # with P[perm[j], j] = 1.  Split P into the rows fed by y1 / y2 so the
        # kernel applies the permutation as two tiny constant matmuls.
        perm = np.random.RandomState(k).permutation(D)
        P = np.zeros((D, D), np.float32)
        P[perm, np.arange(D)] = 1.0
        params.append(jnp.asarray(P[:L1, :]))      # (L1, D)
        params.append(jnp.asarray(P[L1:, :]))      # (L2, D)
    return params


# ---------------------------------------------------------------------------
# Pure-JAX reference (exact math incl. jnp.arctan, for correctness check)
# ---------------------------------------------------------------------------
def rnvp_forward_ref(x, params, cfg):
    D = cfg["flow"]["input_dims"]
    clamp = float(cfg["flow"]["clamping"])
    L1, L2 = D // 2, D - D // 2
    for blk in range(cfg["flow"]["n_blocks"]):
        (w2a, b2a, w2b, b2b, w2c, b2c,
         w1a, b1a, w1b, b1b, w1c, b1c,
         p_top, p_bot) = params[blk * PARAMS_PER_BLOCK:(blk + 1) * PARAMS_PER_BLOCK]

        def mlp(v, wa, ba, wb, bb, wc, bc):
            h = jnp.maximum(v @ wa + ba, 0.0)
            h = jnp.maximum(h @ wb + bb, 0.0)
            return h @ wc + bc

        x1, x2 = x[:, :L1], x[:, L1:]
        r2 = mlp(x2, w2a, b2a, w2b, b2b, w2c, b2c)
        y1 = jnp.exp(clamp * 0.636 * jnp.arctan(r2[:, :L1] / clamp)) * x1 + r2[:, L1:]
        r1 = mlp(y1, w1a, b1a, w1b, b1b, w1c, b1c)
        y2 = jnp.exp(clamp * 0.636 * jnp.arctan(r1[:, :L2] / clamp)) * x2 + r1[:, L2:]
        x = y1 @ p_top + y2 @ p_bot
    return x


if __name__ == "__main__":
    key = jax.random.PRNGKey(0)
    key, pkey, xkey = jax.random.split(key, 3)

    params = build_rnvp_params(pkey, CFG)

    B = 256                                  # two 128-row batch tiles -> grid=(2,)
    D = CFG["flow"]["input_dims"]
    x = jax.random.normal(xkey, (B, D), jnp.float32)

    z = jax.block_until_ready(rnvp_forward(x, params, CFG))

    assert z.shape == (B, D) and z.dtype == jnp.float32
    assert bool(jnp.all(jnp.isfinite(z)))

    z_ref = rnvp_forward_ref(x, params, CFG)
    assert bool(jnp.allclose(z, z_ref, rtol=2e-2, atol=2e-2))

    print("KERNEL_OK")
</pallas_src>

<mosaic_0001>
module attributes {stable_mosaic.version = 11 : i64} {
  func.func @kernel(%arg0: i32, %arg1: memref<128x16xf32, #tpu.memory_space<vmem>>, %arg2: memref<8x32xf32, #tpu.memory_space<vmem>>, %arg3: memref<1x32xf32, #tpu.memory_space<vmem>>, %arg4: memref<32x32xf32, #tpu.memory_space<vmem>>, %arg5: memref<1x32xf32, #tpu.memory_space<vmem>>, %arg6: memref<32x16xf32, #tpu.memory_space<vmem>>, %arg7: memref<1x16xf32, #tpu.memory_space<vmem>>, %arg8: memref<8x32xf32, #tpu.memory_space<vmem>>, %arg9: memref<1x32xf32, #tpu.memory_space<vmem>>, %arg10: memref<32x32xf32, #tpu.memory_space<vmem>>, %arg11: memref<1x32xf32, #tpu.memory_space<vmem>>, %arg12: memref<32x16xf32, #tpu.memory_space<vmem>>, %arg13: memref<1x16xf32, #tpu.memory_space<vmem>>, %arg14: memref<8x16xf32, #tpu.memory_space<vmem>>, %arg15: memref<8x16xf32, #tpu.memory_space<vmem>>, %arg16: memref<8x32xf32, #tpu.memory_space<vmem>>, %arg17: memref<1x32xf32, #tpu.memory_space<vmem>>, %arg18: memref<32x32xf32, #tpu.memory_space<vmem>>, %arg19: memref<1x32xf32, #tpu.memory_space<vmem>>, %arg20: memref<32x16xf32, #tpu.memory_space<vmem>>, %arg21: memref<1x16xf32, #tpu.memory_space<vmem>>, %arg22: memref<8x32xf32, #tpu.memory_space<vmem>>, %arg23: memref<1x32xf32, #tpu.memory_space<vmem>>, %arg24: memref<32x32xf32, #tpu.memory_space<vmem>>, %arg25: memref<1x32xf32, #tpu.memory_space<vmem>>, %arg26: memref<32x16xf32, #tpu.memory_space<vmem>>, %arg27: memref<1x16xf32, #tpu.memory_space<vmem>>, %arg28: memref<8x16xf32, #tpu.memory_space<vmem>>, %arg29: memref<8x16xf32, #tpu.memory_space<vmem>>, %arg30: memref<128x16xf32, #tpu.memory_space<vmem>>) attributes {dimension_semantics = [#tpu.dimension_semantics<parallel>], iteration_bounds = array<i64: 2>, scalar_prefetch = 0 : i64, scratch_operands = 0 : i64, tpu.core_type = #tpu.core_type<tc>, window_params = [{transform_indices = @transform_0, window_bounds = array<i64: 128, 16>}, {pipeline_mode = #tpu.pipeline_mode<synchronous>, transform_indices = @transform_1, window_bounds = array<i64: 8, 32>}, {pipeline_mode = #tpu.pipeline_mode<synchronous>, transform_indices = @transform_2, window_bounds = array<i64: 1, 32>}, {pipeline_mode = #tpu.pipeline_mode<synchronous>, transform_indices = @transform_3, window_bounds = array<i64: 32, 32>}, {pipeline_mode = #tpu.pipeline_mode<synchronous>, transform_indices = @transform_4, window_bounds = array<i64: 1, 32>}, {pipeline_mode = #tpu.pipeline_mode<synchronous>, transform_indices = @transform_5, window_bounds = array<i64: 32, 16>}, {pipeline_mode = #tpu.pipeline_mode<synchronous>, transform_indices = @transform_6, window_bounds = array<i64: 1, 16>}, {pipeline_mode = #tpu.pipeline_mode<synchronous>, transform_indices = @transform_7, window_bounds = array<i64: 8, 32>}, {pipeline_mode = #tpu.pipeline_mode<synchronous>, transform_indices = @transform_8, window_bounds = array<i64: 1, 32>}, {pipeline_mode = #tpu.pipeline_mode<synchronous>, transform_indices = @transform_9, window_bounds = array<i64: 32, 32>}, {pipeline_mode = #tpu.pipeline_mode<synchronous>, transform_indices = @transform_10, window_bounds = array<i64: 1, 32>}, {pipeline_mode = #tpu.pipeline_mode<synchronous>, transform_indices = @transform_11, window_bounds = array<i64: 32, 16>}, {pipeline_mode = #tpu.pipeline_mode<synchronous>, transform_indices = @transform_12, window_bounds = array<i64: 1, 16>}, {pipeline_mode = #tpu.pipeline_mode<synchronous>, transform_indices = @transform_13, window_bounds = array<i64: 8, 16>}, {pipeline_mode = #tpu.pipeline_mode<synchronous>, transform_indices = @transform_14, window_bounds = array<i64: 8, 16>}, {pipeline_mode = #tpu.pipeline_mode<synchronous>, transform_indices = @transform_15, window_bounds = array<i64: 8, 32>}, {pipeline_mode = #tpu.pipeline_mode<synchronous>, transform_indices = @transform_16, window_bounds = array<i64: 1, 32>}, {pipeline_mode = #tpu.pipeline_mode<synchronous>, transform_indices = @transform_17, window_bounds = array<i64: 32, 32>}, {pipeline_mode = #tpu.pipeline_mode<synchronous>, transform_indices = @transform_18, window_bounds = array<i64: 1, 32>}, {pipeline_mode = #tpu.pipeline_mode<synchronous>, transform_indices = @transform_19, window_bounds = array<i64: 32, 16>}, {pipeline_mode = #tpu.pipeline_mode<synchronous>, transform_indices = @transform_20, window_bounds = array<i64: 1, 16>}, {pipeline_mode = #tpu.pipeline_mode<synchronous>, transform_indices = @transform_21, window_bounds = array<i64: 8, 32>}, {pipeline_mode = #tpu.pipeline_mode<synchronous>, transform_indices = @transform_22, window_bounds = array<i64: 1, 32>}, {pipeline_mode = #tpu.pipeline_mode<synchronous>, transform_indices = @transform_23, window_bounds = array<i64: 32, 32>}, {pipeline_mode = #tpu.pipeline_mode<synchronous>, transform_indices = @transform_24, window_bounds = array<i64: 1, 32>}, {pipeline_mode = #tpu.pipeline_mode<synchronous>, transform_indices = @transform_25, window_bounds = array<i64: 32, 16>}, {pipeline_mode = #tpu.pipeline_mode<synchronous>, transform_indices = @transform_26, window_bounds = array<i64: 1, 16>}, {pipeline_mode = #tpu.pipeline_mode<synchronous>, transform_indices = @transform_27, window_bounds = array<i64: 8, 16>}, {pipeline_mode = #tpu.pipeline_mode<synchronous>, transform_indices = @transform_28, window_bounds = array<i64: 8, 16>}, {transform_indices = @transform_29, window_bounds = array<i64: 128, 16>}]} {
    %c0 = arith.constant 0 : index
    %c0_0 = arith.constant 0 : index
    %0 = vector.load %arg1[%c0, %c0_0] : memref<128x16xf32, #tpu.memory_space<vmem>>, vector<128x16xf32>
    %1 = vector.extract_strided_slice %0 {offsets = [0, 0], sizes = [128, 8], strides = [1, 1]} : vector<128x16xf32> to vector<128x8xf32>
    %2 = vector.extract_strided_slice %0 {offsets = [0, 8], sizes = [128, 8], strides = [1, 1]} : vector<128x16xf32> to vector<128x8xf32>
    %c0_1 = arith.constant 0 : index
    %c0_2 = arith.constant 0 : index
    %3 = vector.load %arg2[%c0_1, %c0_2] : memref<8x32xf32, #tpu.memory_space<vmem>>, vector<8x32xf32>
    %cst = arith.constant dense<0.000000e+00> : vector<128x32xf32>
    %4 = tpu.matmul %2, %3, %cst {dimension_numbers = #tpu.dot_dimension_numbers<[1], [0], [0], [1], [0, 0, 1, 1], [], []>} : vector<128x8xf32>, vector<8x32xf32>, vector<128x32xf32> -> vector<128x32xf32>
    %c0_3 = arith.constant 0 : index
    %c0_4 = arith.constant 0 : index
    %5 = vector.load %arg3[%c0_3, %c0_4] : memref<1x32xf32, #tpu.memory_space<vmem>>, vector<1x32xf32>
    %6 = vector.broadcast %5 : vector<1x32xf32> to vector<128x32xf32>
    %7 = arith.addf %4, %6 : vector<128x32xf32>
    %cst_5 = arith.constant 0.000000e+00 : f32
    %8 = vector.broadcast %cst_5 : f32 to vector<128x32xf32>
    %9 = arith.maximumf %7, %8 : vector<128x32xf32>
    %c0_6 = arith.constant 0 : index
    %c0_7 = arith.constant 0 : index
    %10 = vector.load %arg4[%c0_6, %c0_7] : memref<32x32xf32, #tpu.memory_space<vmem>>, vector<32x32xf32>
    %cst_8 = arith.constant dense<0.000000e+00> : vector<128x32xf32>
    %11 = tpu.matmul %9, %10, %cst_8 {dimension_numbers = #tpu.dot_dimension_numbers<[1], [0], [0], [1], [0, 0, 1, 1], [], []>} : vector<128x32xf32>, vector<32x32xf32>, vector<128x32xf32> -> vector<128x32xf32>
    %c0_9 = arith.constant 0 : index
    %c0_10 = arith.constant 0 : index
    %12 = vector.load %arg5[%c0_9, %c0_10] : memref<1x32xf32, #tpu.memory_space<vmem>>, vector<1x32xf32>
    %13 = vector.broadcast %12 : vector<1x32xf32> to vector<128x32xf32>
    %14 = arith.addf %11, %13 : vector<128x32xf32>
    %cst_11 = arith.constant 0.000000e+00 : f32
    %15 = vector.broadcast %cst_11 : f32 to vector<128x32xf32>
    %16 = arith.maximumf %14, %15 : vector<128x32xf32>
    %c0_12 = arith.constant 0 : index
    %c0_13 = arith.constant 0 : index
    %17 = vector.load %arg6[%c0_12, %c0_13] : memref<32x16xf32, #tpu.memory_space<vmem>>, vector<32x16xf32>
    %cst_14 = arith.constant dense<0.000000e+00> : vector<128x16xf32>
    %18 = tpu.matmul %16, %17, %cst_14 {dimension_numbers = #tpu.dot_dimension_numbers<[1], [0], [0], [1], [0, 0, 1, 1], [], []>} : vector<128x32xf32>, vector<32x16xf32>, vector<128x16xf32> -> vector<128x16xf32>
    %c0_15 = arith.constant 0 : index
    %c0_16 = arith.constant 0 : index
    %19 = vector.load %arg7[%c0_15, %c0_16] : memref<1x16xf32, #tpu.memory_space<vmem>>, vector<1x16xf32>
    %20 = vector.broadcast %19 : vector<1x16xf32> to vector<128x16xf32>
    %21 = arith.addf %18, %20 : vector<128x16xf32>
    %22 = vector.extract_strided_slice %21 {offsets = [0, 0], sizes = [128, 8], strides = [1, 1]} : vector<128x16xf32> to vector<128x8xf32>
    %cst_17 = arith.constant 5.000000e-01 : f32
    %23 = vector.broadcast %cst_17 : f32 to vector<128x8xf32>
    %24 = arith.mulf %22, %23 : vector<128x8xf32>
    %25 = math.absf %24 : vector<128x8xf32>
    %cst_18 = arith.constant 2.41421366 : f32
    %26 = vector.broadcast %cst_18 : f32 to vector<128x8xf32>
    %27 = arith.cmpf ogt, %25, %26 : vector<128x8xf32>
    %cst_19 = arith.constant 0.414213568 : f32
    %28 = vector.broadcast %cst_19 : f32 to vector<128x8xf32>
    %29 = arith.cmpf ogt, %25, %28 : vector<128x8xf32>
    %cst_20 = arith.constant 1.000000e-30 : f32
    %30 = vector.broadcast %cst_20 : f32 to vector<128x8xf32>
    %31 = arith.addf %25, %30 : vector<128x8xf32>
    %cst_21 = arith.constant -1.000000e+00 : f32
    %32 = vector.broadcast %cst_21 : f32 to vector<128x8xf32>
    %33 = arith.divf %32, %31 : vector<128x8xf32>
    %cst_22 = arith.constant 1.000000e+00 : f32
    %34 = vector.broadcast %cst_22 : f32 to vector<128x8xf32>
    %35 = arith.subf %25, %34 : vector<128x8xf32>
    %cst_23 = arith.constant 1.000000e+00 : f32
    %36 = vector.broadcast %cst_23 : f32 to vector<128x8xf32>
    %37 = arith.addf %25, %36 : vector<128x8xf32>
    %38 = arith.divf %35, %37 : vector<128x8xf32>
    %39 = arith.select %29, %38, %25 : vector<128x8xi1>, vector<128x8xf32>
    %40 = arith.select %27, %33, %39 : vector<128x8xi1>, vector<128x8xf32>
    %cst_24 = arith.constant 0.785398185 : f32
    %cst_25 = arith.constant 0.000000e+00 : f32
    %41 = vector.broadcast %cst_24 : f32 to vector<128x8xf32>
    %42 = vector.broadcast %cst_25 : f32 to vector<128x8xf32>
    %43 = arith.select %29, %41, %42 : vector<128x8xi1>, vector<128x8xf32>
    %cst_26 = arith.constant 1.57079637 : f32
    %44 = vector.broadcast %cst_26 : f32 to vector<128x8xf32>
    %45 = arith.select %27, %44, %43 : vector<128x8xi1>, vector<128x8xf32>
    %46 = arith.mulf %40, %40 : vector<128x8xf32>
    %cst_27 = arith.constant 0.0805374458 : f32
    %47 = vector.broadcast %cst_27 : f32 to vector<128x8xf32>
    %48 = arith.mulf %47, %46 : vector<128x8xf32>
    %cst_28 = arith.constant 0.138776854 : f32
    %49 = vector.broadcast %cst_28 : f32 to vector<128x8xf32>
    %50 = arith.subf %48, %49 : vector<128x8xf32>
    %51 = arith.mulf %50, %46 : vector<128x8xf32>
    %cst_29 = arith.constant 0.199777111 : f32
    %52 = vector.broadcast %cst_29 : f32 to vector<128x8xf32>
    %53 = arith.addf %51, %52 : vector<128x8xf32>
    %54 = arith.mulf %53, %46 : vector<128x8xf32>
    %cst_30 = arith.constant 0.333329499 : f32
    %55 = vector.broadcast %cst_30 : f32 to vector<128x8xf32>
    %56 = arith.subf %54, %55 : vector<128x8xf32>
    %57 = arith.mulf %56, %46 : vector<128x8xf32>
    %58 = arith.mulf %57, %40 : vector<128x8xf32>
    %59 = arith.addf %58, %40 : vector<128x8xf32>
    %60 = arith.addf %45, %59 : vector<128x8xf32>
    %cst_31 = arith.constant 0.000000e+00 : f32
    %61 = vector.broadcast %cst_31 : f32 to vector<128x8xf32>
    %62 = arith.cmpf olt, %24, %61 : vector<128x8xf32>
    %cst_32 = arith.constant 0.000000e+00 : f32
    %63 = vector.broadcast %cst_32 : f32 to vector<128x8xf32>
    %64 = arith.subf %63, %60 : vector<128x8xf32>
    %65 = arith.select %62, %64, %60 : vector<128x8xi1>, vector<128x8xf32>
    %cst_33 = arith.constant 1.272000e+00 : f32
    %66 = vector.broadcast %cst_33 : f32 to vector<128x8xf32>
    %67 = arith.mulf %66, %65 : vector<128x8xf32>
    %68 = math.exp %67 : vector<128x8xf32>
    %69 = arith.mulf %68, %1 : vector<128x8xf32>
    %70 = vector.extract_strided_slice %21 {offsets = [0, 8], sizes = [128, 8], strides = [1, 1]} : vector<128x16xf32> to vector<128x8xf32>
    %71 = arith.addf %69, %70 : vector<128x8xf32>
    %c0_34 = arith.constant 0 : index
    %c0_35 = arith.constant 0 : index
    %72 = vector.load %arg8[%c0_34, %c0_35] : memref<8x32xf32, #tpu.memory_space<vmem>>, vector<8x32xf32>
    %cst_36 = arith.constant dense<0.000000e+00> : vector<128x32xf32>
    %73 = tpu.matmul %71, %72, %cst_36 {dimension_numbers = #tpu.dot_dimension_numbers<[1], [0], [0], [1], [0, 0, 1, 1], [], []>} : vector<128x8xf32>, vector<8x32xf32>, vector<128x32xf32> -> vector<128x32xf32>
    %c0_37 = arith.constant 0 : index
    %c0_38 = arith.constant 0 : index
    %74 = vector.load %arg9[%c0_37, %c0_38] : memref<1x32xf32, #tpu.memory_space<vmem>>, vector<1x32xf32>
    %75 = vector.broadcast %74 : vector<1x32xf32> to vector<128x32xf32>
    %76 = arith.addf %73, %75 : vector<128x32xf32>
    %cst_39 = arith.constant 0.000000e+00 : f32
    %77 = vector.broadcast %cst_39 : f32 to vector<128x32xf32>
    %78 = arith.maximumf %76, %77 : vector<128x32xf32>
    %c0_40 = arith.constant 0 : index
    %c0_41 = arith.constant 0 : index
    %79 = vector.load %arg10[%c0_40, %c0_41] : memref<32x32xf32, #tpu.memory_space<vmem>>, vector<32x32xf32>
    %cst_42 = arith.constant dense<0.000000e+00> : vector<128x32xf32>
    %80 = tpu.matmul %78, %79, %cst_42 {dimension_numbers = #tpu.dot_dimension_numbers<[1], [0], [0], [1], [0, 0, 1, 1], [], []>} : vector<128x32xf32>, vector<32x32xf32>, vector<128x32xf32> -> vector<128x32xf32>
    %c0_43 = arith.constant 0 : index
    %c0_44 = arith.constant 0 : index
    %81 = vector.load %arg11[%c0_43, %c0_44] : memref<1x32xf32, #tpu.memory_space<vmem>>, vector<1x32xf32>
    %82 = vector.broadcast %81 : vector<1x32xf32> to vector<128x32xf32>
    %83 = arith.addf %80, %82 : vector<128x32xf32>
    %cst_45 = arith.constant 0.000000e+00 : f32
    %84 = vector.broadcast %cst_45 : f32 to vector<128x32xf32>
    %85 = arith.maximumf %83, %84 : vector<128x32xf32>
    %c0_46 = arith.constant 0 : index
    %c0_47 = arith.constant 0 : index
    %86 = vector.load %arg12[%c0_46, %c0_47] : memref<32x16xf32, #tpu.memory_space<vmem>>, vector<32x16xf32>
    %cst_48 = arith.constant dense<0.000000e+00> : vector<128x16xf32>
    %87 = tpu.matmul %85, %86, %cst_48 {dimension_numbers = #tpu.dot_dimension_numbers<[1], [0], [0], [1], [0, 0, 1, 1], [], []>} : vector<128x32xf32>, vector<32x16xf32>, vector<128x16xf32> -> vector<128x16xf32>
    %c0_49 = arith.constant 0 : index
    %c0_50 = arith.constant 0 : index
    %88 = vector.load %arg13[%c0_49, %c0_50] : memref<1x16xf32, #tpu.memory_space<vmem>>, vector<1x16xf32>
    %89 = vector.broadcast %88 : vector<1x16xf32> to vector<128x16xf32>
    %90 = arith.addf %87, %89 : vector<128x16xf32>
    %91 = vector.extract_strided_slice %90 {offsets = [0, 0], sizes = [128, 8], strides = [1, 1]} : vector<128x16xf32> to vector<128x8xf32>
    %cst_51 = arith.constant 5.000000e-01 : f32
    %92 = vector.broadcast %cst_51 : f32 to vector<128x8xf32>
    %93 = arith.mulf %91, %92 : vector<128x8xf32>
    %94 = math.absf %93 : vector<128x8xf32>
    %cst_52 = arith.constant 2.41421366 : f32
    %95 = vector.broadcast %cst_52 : f32 to vector<128x8xf32>
    %96 = arith.cmpf ogt, %94, %95 : vector<128x8xf32>
    %cst_53 = arith.constant 0.414213568 : f32
    %97 = vector.broadcast %cst_53 : f32 to vector<128x8xf32>
    %98 = arith.cmpf ogt, %94, %97 : vector<128x8xf32>
    %cst_54 = arith.constant 1.000000e-30 : f32
    %99 = vector.broadcast %cst_54 : f32 to vector<128x8xf32>
    %100 = arith.addf %94, %99 : vector<128x8xf32>
    %cst_55 = arith.constant -1.000000e+00 : f32
    %101 = vector.broadcast %cst_55 : f32 to vector<128x8xf32>
    %102 = arith.divf %101, %100 : vector<128x8xf32>
    %cst_56 = arith.constant 1.000000e+00 : f32
    %103 = vector.broadcast %cst_56 : f32 to vector<128x8xf32>
    %104 = arith.subf %94, %103 : vector<128x8xf32>
    %cst_57 = arith.constant 1.000000e+00 : f32
    %105 = vector.broadcast %cst_57 : f32 to vector<128x8xf32>
    %106 = arith.addf %94, %105 : vector<128x8xf32>
    %107 = arith.divf %104, %106 : vector<128x8xf32>
    %108 = arith.select %98, %107, %94 : vector<128x8xi1>, vector<128x8xf32>
    %109 = arith.select %96, %102, %108 : vector<128x8xi1>, vector<128x8xf32>
    %cst_58 = arith.constant 0.785398185 : f32
    %cst_59 = arith.constant 0.000000e+00 : f32
    %110 = vector.broadcast %cst_58 : f32 to vector<128x8xf32>
    %111 = vector.broadcast %cst_59 : f32 to vector<128x8xf32>
    %112 = arith.select %98, %110, %111 : vector<128x8xi1>, vector<128x8xf32>
    %cst_60 = arith.constant 1.57079637 : f32
    %113 = vector.broadcast %cst_60 : f32 to vector<128x8xf32>
    %114 = arith.select %96, %113, %112 : vector<128x8xi1>, vector<128x8xf32>
    %115 = arith.mulf %109, %109 : vector<128x8xf32>
    %cst_61 = arith.constant 0.0805374458 : f32
    %116 = vector.broadcast %cst_61 : f32 to vector<128x8xf32>
    %117 = arith.mulf %116, %115 : vector<128x8xf32>
    %cst_62 = arith.constant 0.138776854 : f32
    %118 = vector.broadcast %cst_62 : f32 to vector<128x8xf32>
    %119 = arith.subf %117, %118 : vector<128x8xf32>
    %120 = arith.mulf %119, %115 : vector<128x8xf32>
    %cst_63 = arith.constant 0.199777111 : f32
    %121 = vector.broadcast %cst_63 : f32 to vector<128x8xf32>
    %122 = arith.addf %120, %121 : vector<128x8xf32>
    %123 = arith.mulf %122, %115 : vector<128x8xf32>
    %cst_64 = arith.constant 0.333329499 : f32
    %124 = vector.broadcast %cst_64 : f32 to vector<128x8xf32>
    %125 = arith.subf %123, %124 : vector<128x8xf32>
    %126 = arith.mulf %125, %115 : vector<128x8xf32>
    %127 = arith.mulf %126, %109 : vector<128x8xf32>
    %128 = arith.addf %127, %109 : vector<128x8xf32>
    %129 = arith.addf %114, %128 : vector<128x8xf32>
    %cst_65 = arith.constant 0.000000e+00 : f32
    %130 = vector.broadcast %cst_65 : f32 to vector<128x8xf32>
    %131 = arith.cmpf olt, %93, %130 : vector<128x8xf32>
    %cst_66 = arith.constant 0.000000e+00 : f32
    %132 = vector.broadcast %cst_66 : f32 to vector<128x8xf32>
    %133 = arith.subf %132, %129 : vector<128x8xf32>
    %134 = arith.select %131, %133, %129 : vector<128x8xi1>, vector<128x8xf32>
    %cst_67 = arith.constant 1.272000e+00 : f32
    %135 = vector.broadcast %cst_67 : f32 to vector<128x8xf32>
    %136 = arith.mulf %135, %134 : vector<128x8xf32>
    %137 = math.exp %136 : vector<128x8xf32>
    %138 = arith.mulf %137, %2 : vector<128x8xf32>
    %139 = vector.extract_strided_slice %90 {offsets = [0, 8], sizes = [128, 8], strides = [1, 1]} : vector<128x16xf32> to vector<128x8xf32>
    %140 = arith.addf %138, %139 : vector<128x8xf32>
    %c0_68 = arith.constant 0 : index
    %c0_69 = arith.constant 0 : index
    %141 = vector.load %arg14[%c0_68, %c0_69] : memref<8x16xf32, #tpu.memory_space<vmem>>, vector<8x16xf32>
    %cst_70 = arith.constant dense<0.000000e+00> : vector<128x16xf32>
    %142 = tpu.matmul %71, %141, %cst_70 {dimension_numbers = #tpu.dot_dimension_numbers<[1], [0], [0], [1], [0, 0, 1, 1], [], []>} : vector<128x8xf32>, vector<8x16xf32>, vector<128x16xf32> -> vector<128x16xf32>
    %c0_71 = arith.constant 0 : index
    %c0_72 = arith.constant 0 : index
    %143 = vector.load %arg15[%c0_71, %c0_72] : memref<8x16xf32, #tpu.memory_space<vmem>>, vector<8x16xf32>
    %cst_73 = arith.constant dense<0.000000e+00> : vector<128x16xf32>
    %144 = tpu.matmul %140, %143, %cst_73 {dimension_numbers = #tpu.dot_dimension_numbers<[1], [0], [0], [1], [0, 0, 1, 1], [], []>} : vector<128x8xf32>, vector<8x16xf32>, vector<128x16xf32> -> vector<128x16xf32>
    %145 = arith.addf %142, %144 : vector<128x16xf32>
    %146 = vector.extract_strided_slice %145 {offsets = [0, 0], sizes = [128, 8], strides = [1, 1]} : vector<128x16xf32> to vector<128x8xf32>
    %147 = vector.extract_strided_slice %145 {offsets = [0, 8], sizes = [128, 8], strides = [1, 1]} : vector<128x16xf32> to vector<128x8xf32>
    %c0_74 = arith.constant 0 : index
    %c0_75 = arith.constant 0 : index
    %148 = vector.load %arg16[%c0_74, %c0_75] : memref<8x32xf32, #tpu.memory_space<vmem>>, vector<8x32xf32>
    %cst_76 = arith.constant dense<0.000000e+00> : vector<128x32xf32>
    %149 = tpu.matmul %147, %148, %cst_76 {dimension_numbers = #tpu.dot_dimension_numbers<[1], [0], [0], [1], [0, 0, 1, 1], [], []>} : vector<128x8xf32>, vector<8x32xf32>, vector<128x32xf32> -> vector<128x32xf32>
    %c0_77 = arith.constant 0 : index
    %c0_78 = arith.constant 0 : index
    %150 = vector.load %arg17[%c0_77, %c0_78] : memref<1x32xf32, #tpu.memory_space<vmem>>, vector<1x32xf32>
    %151 = vector.broadcast %150 : vector<1x32xf32> to vector<128x32xf32>
    %152 = arith.addf %149, %151 : vector<128x32xf32>
    %cst_79 = arith.constant 0.000000e+00 : f32
    %153 = vector.broadcast %cst_79 : f32 to vector<128x32xf32>
    %154 = arith.maximumf %152, %153 : vector<128x32xf32>
    %c0_80 = arith.constant 0 : index
    %c0_81 = arith.constant 0 : index
    %155 = vector.load %arg18[%c0_80, %c0_81] : memref<32x32xf32, #tpu.memory_space<vmem>>, vector<32x32xf32>
    %cst_82 = arith.constant dense<0.000000e+00> : vector<128x32xf32>
    %156 = tpu.matmul %154, %155, %cst_82 {dimension_numbers = #tpu.dot_dimension_numbers<[1], [0], [0], [1], [0, 0, 1, 1], [], []>} : vector<128x32xf32>, vector<32x32xf32>, vector<128x32xf32> -> vector<128x32xf32>
    %c0_83 = arith.constant 0 : index
    %c0_84 = arith.constant 0 : index
    %157 = vector.load %arg19[%c0_83, %c0_84] : memref<1x32xf32, #tpu.memory_space<vmem>>, vector<1x32xf32>
    %158 = vector.broadcast %157 : vector<1x32xf32> to vector<128x32xf32>
    %159 = arith.addf %156, %158 : vector<128x32xf32>
    %cst_85 = arith.constant 0.000000e+00 : f32
    %160 = vector.broadcast %cst_85 : f32 to vector<128x32xf32>
    %161 = arith.maximumf %159, %160 : vector<128x32xf32>
    %c0_86 = arith.constant 0 : index
    %c0_87 = arith.constant 0 : index
    %162 = vector.load %arg20[%c0_86, %c0_87] : memref<32x16xf32, #tpu.memory_space<vmem>>, vector<32x16xf32>
    %cst_88 = arith.constant dense<0.000000e+00> : vector<128x16xf32>
    %163 = tpu.matmul %161, %162, %cst_88 {dimension_numbers = #tpu.dot_dimension_numbers<[1], [0], [0], [1], [0, 0, 1, 1], [], []>} : vector<128x32xf32>, vector<32x16xf32>, vector<128x16xf32> -> vector<128x16xf32>
    %c0_89 = arith.constant 0 : index
    %c0_90 = arith.constant 0 : index
    %164 = vector.load %arg21[%c0_89, %c0_90] : memref<1x16xf32, #tpu.memory_space<vmem>>, vector<1x16xf32>
    %165 = vector.broadcast %164 : vector<1x16xf32> to vector<128x16xf32>
    %166 = arith.addf %163, %165 : vector<128x16xf32>
    %167 = vector.extract_strided_slice %166 {offsets = [0, 0], sizes = [128, 8], strides = [1, 1]} : vector<128x16xf32> to vector<128x8xf32>
    %cst_91 = arith.constant 5.000000e-01 : f32
    %168 = vector.broadcast %cst_91 : f32 to vector<128x8xf32>
    %169 = arith.mulf %167, %168 : vector<128x8xf32>
    %170 = math.absf %169 : vector<128x8xf32>
    %cst_92 = arith.constant 2.41421366 : f32
    %171 = vector.broadcast %cst_92 : f32 to vector<128x8xf32>
    %172 = arith.cmpf ogt, %170, %171 : vector<128x8xf32>
    %cst_93 = arith.constant 0.414213568 : f32
    %173 = vector.broadcast %cst_93 : f32 to vector<128x8xf32>
    %174 = arith.cmpf ogt, %170, %173 : vector<128x8xf32>
    %cst_94 = arith.constant 1.000000e-30 : f32
    %175 = vector.broadcast %cst_94 : f32 to vector<128x8xf32>
    %176 = arith.addf %170, %175 : vector<128x8xf32>
    %cst_95 = arith.constant -1.000000e+00 : f32
    %177 = vector.broadcast %cst_95 : f32 to vector<128x8xf32>
    %178 = arith.divf %177, %176 : vector<128x8xf32>
    %cst_96 = arith.constant 1.000000e+00 : f32
    %179 = vector.broadcast %cst_96 : f32 to vector<128x8xf32>
    %180 = arith.subf %170, %179 : vector<128x8xf32>
    %cst_97 = arith.constant 1.000000e+00 : f32
    %181 = vector.broadcast %cst_97 : f32 to vector<128x8xf32>
    %182 = arith.addf %170, %181 : vector<128x8xf32>
    %183 = arith.divf %180, %182 : vector<128x8xf32>
    %184 = arith.select %174, %183, %170 : vector<128x8xi1>, vector<128x8xf32>
    %185 = arith.select %172, %178, %184 : vector<128x8xi1>, vector<128x8xf32>
    %cst_98 = arith.constant 0.785398185 : f32
    %cst_99 = arith.constant 0.000000e+00 : f32
    %186 = vector.broadcast %cst_98 : f32 to vector<128x8xf32>
    %187 = vector.broadcast %cst_99 : f32 to vector<128x8xf32>
    %188 = arith.select %174, %186, %187 : vector<128x8xi1>, vector<128x8xf32>
    %cst_100 = arith.constant 1.57079637 : f32
    %189 = vector.broadcast %cst_100 : f32 to vector<128x8xf32>
    %190 = arith.select %172, %189, %188 : vector<128x8xi1>, vector<128x8xf32>
    %191 = arith.mulf %185, %185 : vector<128x8xf32>
    %cst_101 = arith.constant 0.0805374458 : f32
    %192 = vector.broadcast %cst_101 : f32 to vector<128x8xf32>
    %193 = arith.mulf %192, %191 : vector<128x8xf32>
    %cst_102 = arith.constant 0.138776854 : f32
    %194 = vector.broadcast %cst_102 : f32 to vector<128x8xf32>
    %195 = arith.subf %193, %194 : vector<128x8xf32>
    %196 = arith.mulf %195, %191 : vector<128x8xf32>
    %cst_103 = arith.constant 0.199777111 : f32
    %197 = vector.broadcast %cst_103 : f32 to vector<128x8xf32>
    %198 = arith.addf %196, %197 : vector<128x8xf32>
    %199 = arith.mulf %198, %191 : vector<128x8xf32>
    %cst_104 = arith.constant 0.333329499 : f32
    %200 = vector.broadcast %cst_104 : f32 to vector<128x8xf32>
    %201 = arith.subf %199, %200 : vector<128x8xf32>
    %202 = arith.mulf %201, %191 : vector<128x8xf32>
    %203 = arith.mulf %202, %185 : vector<128x8xf32>
    %204 = arith.addf %203, %185 : vector<128x8xf32>
    %205 = arith.addf %190, %204 : vector<128x8xf32>
    %cst_105 = arith.constant 0.000000e+00 : f32
    %206 = vector.broadcast %cst_105 : f32 to vector<128x8xf32>
    %207 = arith.cmpf olt, %169, %206 : vector<128x8xf32>
    %cst_106 = arith.constant 0.000000e+00 : f32
    %208 = vector.broadcast %cst_106 : f32 to vector<128x8xf32>
    %209 = arith.subf %208, %205 : vector<128x8xf32>
    %210 = arith.select %207, %209, %205 : vector<128x8xi1>, vector<128x8xf32>
    %cst_107 = arith.constant 1.272000e+00 : f32
    %211 = vector.broadcast %cst_107 : f32 to vector<128x8xf32>
    %212 = arith.mulf %211, %210 : vector<128x8xf32>
    %213 = math.exp %212 : vector<128x8xf32>
    %214 = arith.mulf %213, %146 : vector<128x8xf32>
    %215 = vector.extract_strided_slice %166 {offsets = [0, 8], sizes = [128, 8], strides = [1, 1]} : vector<128x16xf32> to vector<128x8xf32>
    %216 = arith.addf %214, %215 : vector<128x8xf32>
    %c0_108 = arith.constant 0 : index
    %c0_109 = arith.constant 0 : index
    %217 = vector.load %arg22[%c0_108, %c0_109] : memref<8x32xf32, #tpu.memory_space<vmem>>, vector<8x32xf32>
    %cst_110 = arith.constant dense<0.000000e+00> : vector<128x32xf32>
    %218 = tpu.matmul %216, %217, %cst_110 {dimension_numbers = #tpu.dot_dimension_numbers<[1], [0], [0], [1], [0, 0, 1, 1], [], []>} : vector<128x8xf32>, vector<8x32xf32>, vector<128x32xf32> -> vector<128x32xf32>
    %c0_111 = arith.constant 0 : index
    %c0_112 = arith.constant 0 : index
    %219 = vector.load %arg23[%c0_111, %c0_112] : memref<1x32xf32, #tpu.memory_space<vmem>>, vector<1x32xf32>
    %220 = vector.broadcast %219 : vector<1x32xf32> to vector<128x32xf32>
    %221 = arith.addf %218, %220 : vector<128x32xf32>
    %cst_113 = arith.constant 0.000000e+00 : f32
    %222 = vector.broadcast %cst_113 : f32 to vector<128x32xf32>
    %223 = arith.maximumf %221, %222 : vector<128x32xf32>
    %c0_114 = arith.constant 0 : index
    %c0_115 = arith.constant 0 : index
    %224 = vector.load %arg24[%c0_114, %c0_115] : memref<32x32xf32, #tpu.memory_space<vmem>>, vector<32x32xf32>
    %cst_116 = arith.constant dense<0.000000e+00> : vector<128x32xf32>
    %225 = tpu.matmul %223, %224, %cst_116 {dimension_numbers = #tpu.dot_dimension_numbers<[1], [0], [0], [1], [0, 0, 1, 1], [], []>} : vector<128x32xf32>, vector<32x32xf32>, vector<128x32xf32> -> vector<128x32xf32>
    %c0_117 = arith.constant 0 : index
    %c0_118 = arith.constant 0 : index
    %226 = vector.load %arg25[%c0_117, %c0_118] : memref<1x32xf32, #tpu.memory_space<vmem>>, vector<1x32xf32>
    %227 = vector.broadcast %226 : vector<1x32xf32> to vector<128x32xf32>
    %228 = arith.addf %225, %227 : vector<128x32xf32>
    %cst_119 = arith.constant 0.000000e+00 : f32
    %229 = vector.broadcast %cst_119 : f32 to vector<128x32xf32>
    %230 = arith.maximumf %228, %229 : vector<128x32xf32>
    %c0_120 = arith.constant 0 : index
    %c0_121 = arith.constant 0 : index
    %231 = vector.load %arg26[%c0_120, %c0_121] : memref<32x16xf32, #tpu.memory_space<vmem>>, vector<32x16xf32>
    %cst_122 = arith.constant dense<0.000000e+00> : vector<128x16xf32>
    %232 = tpu.matmul %230, %231, %cst_122 {dimension_numbers = #tpu.dot_dimension_numbers<[1], [0], [0], [1], [0, 0, 1, 1], [], []>} : vector<128x32xf32>, vector<32x16xf32>, vector<128x16xf32> -> vector<128x16xf32>
    %c0_123 = arith.constant 0 : index
    %c0_124 = arith.constant 0 : index
    %233 = vector.load %arg27[%c0_123, %c0_124] : memref<1x16xf32, #tpu.memory_space<vmem>>, vector<1x16xf32>
    %234 = vector.broadcast %233 : vector<1x16xf32> to vector<128x16xf32>
    %235 = arith.addf %232, %234 : vector<128x16xf32>
    %236 = vector.extract_strided_slice %235 {offsets = [0, 0], sizes = [128, 8], strides = [1, 1]} : vector<128x16xf32> to vector<128x8xf32>
    %cst_125 = arith.constant 5.000000e-01 : f32
    %237 = vector.broadcast %cst_125 : f32 to vector<128x8xf32>
    %238 = arith.mulf %236, %237 : vector<128x8xf32>
    %239 = math.absf %238 : vector<128x8xf32>
    %cst_126 = arith.constant 2.41421366 : f32
    %240 = vector.broadcast %cst_126 : f32 to vector<128x8xf32>
    %241 = arith.cmpf ogt, %239, %240 : vector<128x8xf32>
    %cst_127 = arith.constant 0.414213568 : f32
    %242 = vector.broadcast %cst_127 : f32 to vector<128x8xf32>
    %243 = arith.cmpf ogt, %239, %242 : vector<128x8xf32>
    %cst_128 = arith.constant 1.000000e-30 : f32
    %244 = vector.broadcast %cst_128 : f32 to vector<128x8xf32>
    %245 = arith.addf %239, %244 : vector<128x8xf32>
    %cst_129 = arith.constant -1.000000e+00 : f32
    %246 = vector.broadcast %cst_129 : f32 to vector<128x8xf32>
    %247 = arith.divf %246, %245 : vector<128x8xf32>
    %cst_130 = arith.constant 1.000000e+00 : f32
    %248 = vector.broadcast %cst_130 : f32 to vector<128x8xf32>
    %249 = arith.subf %239, %248 : vector<128x8xf32>
    %cst_131 = arith.constant 1.000000e+00 : f32
    %250 = vector.broadcast %cst_131 : f32 to vector<128x8xf32>
    %251 = arith.addf %239, %250 : vector<128x8xf32>
    %252 = arith.divf %249, %251 : vector<128x8xf32>
    %253 = arith.select %243, %252, %239 : vector<128x8xi1>, vector<128x8xf32>
    %254 = arith.select %241, %247, %253 : vector<128x8xi1>, vector<128x8xf32>
    %cst_132 = arith.constant 0.785398185 : f32
    %cst_133 = arith.constant 0.000000e+00 : f32
    %255 = vector.broadcast %cst_132 : f32 to vector<128x8xf32>
    %256 = vector.broadcast %cst_133 : f32 to vector<128x8xf32>
    %257 = arith.select %243, %255, %256 : vector<128x8xi1>, vector<128x8xf32>
    %cst_134 = arith.constant 1.57079637 : f32
    %258 = vector.broadcast %cst_134 : f32 to vector<128x8xf32>
    %259 = arith.select %241, %258, %257 : vector<128x8xi1>, vector<128x8xf32>
    %260 = arith.mulf %254, %254 : vector<128x8xf32>
    %cst_135 = arith.constant 0.0805374458 : f32
    %261 = vector.broadcast %cst_135 : f32 to vector<128x8xf32>
    %262 = arith.mulf %261, %260 : vector<128x8xf32>
    %cst_136 = arith.constant 0.138776854 : f32
    %263 = vector.broadcast %cst_136 : f32 to vector<128x8xf32>
    %264 = arith.subf %262, %263 : vector<128x8xf32>
    %265 = arith.mulf %264, %260 : vector<128x8xf32>
    %cst_137 = arith.constant 0.199777111 : f32
    %266 = vector.broadcast %cst_137 : f32 to vector<128x8xf32>
    %267 = arith.addf %265, %266 : vector<128x8xf32>
    %268 = arith.mulf %267, %260 : vector<128x8xf32>
    %cst_138 = arith.constant 0.333329499 : f32
    %269 = vector.broadcast %cst_138 : f32 to vector<128x8xf32>
    %270 = arith.subf %268, %269 : vector<128x8xf32>
    %271 = arith.mulf %270, %260 : vector<128x8xf32>
    %272 = arith.mulf %271, %254 : vector<128x8xf32>
    %273 = arith.addf %272, %254 : vector<128x8xf32>
    %274 = arith.addf %259, %273 : vector<128x8xf32>
    %cst_139 = arith.constant 0.000000e+00 : f32
    %275 = vector.broadcast %cst_139 : f32 to vector<128x8xf32>
    %276 = arith.cmpf olt, %238, %275 : vector<128x8xf32>
    %cst_140 = arith.constant 0.000000e+00 : f32
    %277 = vector.broadcast %cst_140 : f32 to vector<128x8xf32>
    %278 = arith.subf %277, %274 : vector<128x8xf32>
    %279 = arith.select %276, %278, %274 : vector<128x8xi1>, vector<128x8xf32>
    %cst_141 = arith.constant 1.272000e+00 : f32
    %280 = vector.broadcast %cst_141 : f32 to vector<128x8xf32>
    %281 = arith.mulf %280, %279 : vector<128x8xf32>
    %282 = math.exp %281 : vector<128x8xf32>
    %283 = arith.mulf %282, %147 : vector<128x8xf32>
    %284 = vector.extract_strided_slice %235 {offsets = [0, 8], sizes = [128, 8], strides = [1, 1]} : vector<128x16xf32> to vector<128x8xf32>
    %285 = arith.addf %283, %284 : vector<128x8xf32>
    %c0_142 = arith.constant 0 : index
    %c0_143 = arith.constant 0 : index
    %286 = vector.load %arg28[%c0_142, %c0_143] : memref<8x16xf32, #tpu.memory_space<vmem>>, vector<8x16xf32>
    %cst_144 = arith.constant dense<0.000000e+00> : vector<128x16xf32>
    %287 = tpu.matmul %216, %286, %cst_144 {dimension_numbers = #tpu.dot_dimension_numbers<[1], [0], [0], [1], [0, 0, 1, 1], [], []>} : vector<128x8xf32>, vector<8x16xf32>, vector<128x16xf32> -> vector<128x16xf32>
    %c0_145 = arith.constant 0 : index
    %c0_146 = arith.constant 0 : index
    %288 = vector.load %arg29[%c0_145, %c0_146] : memref<8x16xf32, #tpu.memory_space<vmem>>, vector<8x16xf32>
    %cst_147 = arith.constant dense<0.000000e+00> : vector<128x16xf32>
    %289 = tpu.matmul %285, %288, %cst_147 {dimension_numbers = #tpu.dot_dimension_numbers<[1], [0], [0], [1], [0, 0, 1, 1], [], []>} : vector<128x8xf32>, vector<8x16xf32>, vector<128x16xf32> -> vector<128x16xf32>
    %290 = arith.addf %287, %289 : vector<128x16xf32>
    %c0_148 = arith.constant 0 : index
    %c0_149 = arith.constant 0 : index
    %291 = vector.load %arg30[%c0_148, %c0_149] : memref<128x16xf32, #tpu.memory_space<vmem>>, vector<128x16xf32>
    tpu.vector_store %arg30[%c0_148, %c0_149], %290 {strides = array<i32>} : memref<128x16xf32, #tpu.memory_space<vmem>>, vector<128x16xf32>,
    return
  }
  func.func @transform_0(%arg0: i32) -> (i32, i32) {
    %c0_i32 = arith.constant 0 : i32
    %c0_i32_0 = arith.constant 0 : i32
    return %arg0, %c0_i32 : i32, i32
  }
  func.func @transform_1(%arg0: i32) -> (i32, i32) {
    %c0_i32 = arith.constant 0 : i32
    %c0_i32_0 = arith.constant 0 : i32
    %c0_i32_1 = arith.constant 0 : i32
    return %c0_i32, %c0_i32_0 : i32, i32
  }
  func.func @transform_2(%arg0: i32) -> (i32, i32) {
    %c0_i32 = arith.constant 0 : i32
    %c0_i32_0 = arith.constant 0 : i32
    %c0_i32_1 = arith.constant 0 : i32
    return %c0_i32, %c0_i32_0 : i32, i32
  }
  func.func @transform_3(%arg0: i32) -> (i32, i32) {
    %c0_i32 = arith.constant 0 : i32
    %c0_i32_0 = arith.constant 0 : i32
    %c0_i32_1 = arith.constant 0 : i32
    return %c0_i32, %c0_i32_0 : i32, i32
  }
  func.func @transform_4(%arg0: i32) -> (i32, i32) {
    %c0_i32 = arith.constant 0 : i32
    %c0_i32_0 = arith.constant 0 : i32
    %c0_i32_1 = arith.constant 0 : i32
    return %c0_i32, %c0_i32_0 : i32, i32
  }
  func.func @transform_5(%arg0: i32) -> (i32, i32) {
    %c0_i32 = arith.constant 0 : i32
    %c0_i32_0 = arith.constant 0 : i32
    %c0_i32_1 = arith.constant 0 : i32
    return %c0_i32, %c0_i32_0 : i32, i32
  }
  func.func @transform_6(%arg0: i32) -> (i32, i32) {
    %c0_i32 = arith.constant 0 : i32
    %c0_i32_0 = arith.constant 0 : i32
    %c0_i32_1 = arith.constant 0 : i32
    return %c0_i32, %c0_i32_0 : i32, i32
  }
  func.func @transform_7(%arg0: i32) -> (i32, i32) {
    %c0_i32 = arith.constant 0 : i32
    %c0_i32_0 = arith.constant 0 : i32
    %c0_i32_1 = arith.constant 0 : i32
    return %c0_i32, %c0_i32_0 : i32, i32
  }
  func.func @transform_8(%arg0: i32) -> (i32, i32) {
    %c0_i32 = arith.constant 0 : i32
    %c0_i32_0 = arith.constant 0 : i32
    %c0_i32_1 = arith.constant 0 : i32
    return %c0_i32, %c0_i32_0 : i32, i32
  }
  func.func @transform_9(%arg0: i32) -> (i32, i32) {
    %c0_i32 = arith.constant 0 : i32
    %c0_i32_0 = arith.constant 0 : i32
    %c0_i32_1 = arith.constant 0 : i32
    return %c0_i32, %c0_i32_0 : i32, i32
  }
  func.func @transform_10(%arg0: i32) -> (i32, i32) {
    %c0_i32 = arith.constant 0 : i32
    %c0_i32_0 = arith.constant 0 : i32
    %c0_i32_1 = arith.constant 0 : i32
    return %c0_i32, %c0_i32_0 : i32, i32
  }
  func.func @transform_11(%arg0: i32) -> (i32, i32) {
    %c0_i32 = arith.constant 0 : i32
    %c0_i32_0 = arith.constant 0 : i32
    %c0_i32_1 = arith.constant 0 : i32
    return %c0_i32, %c0_i32_0 : i32, i32
  }
  func.func @transform_12(%arg0: i32) -> (i32, i32) {
    %c0_i32 = arith.constant 0 : i32
    %c0_i32_0 = arith.constant 0 : i32
    %c0_i32_1 = arith.constant 0 : i32
    return %c0_i32, %c0_i32_0 : i32, i32
  }
  func.func @transform_13(%arg0: i32) -> (i32, i32) {
    %c0_i32 = arith.constant 0 : i32
    %c0_i32_0 = arith.constant 0 : i32
    %c0_i32_1 = arith.constant 0 : i32
    return %c0_i32, %c0_i32_0 : i32, i32
  }
  func.func @transform_14(%arg0: i32) -> (i32, i32) {
    %c0_i32 = arith.constant 0 : i32
    %c0_i32_0 = arith.constant 0 : i32
    %c0_i32_1 = arith.constant 0 : i32
    return %c0_i32, %c0_i32_0 : i32, i32
  }
  func.func @transform_15(%arg0: i32) -> (i32, i32) {
    %c0_i32 = arith.constant 0 : i32
    %c0_i32_0 = arith.constant 0 : i32
    %c0_i32_1 = arith.constant 0 : i32
    return %c0_i32, %c0_i32_0 : i32, i32
  }
  func.func @transform_16(%arg0: i32) -> (i32, i32) {
    %c0_i32 = arith.constant 0 : i32
    %c0_i32_0 = arith.constant 0 : i32
    %c0_i32_1 = arith.constant 0 : i32
    return %c0_i32, %c0_i32_0 : i32, i32
  }
  func.func @transform_17(%arg0: i32) -> (i32, i32) {
    %c0_i32 = arith.constant 0 : i32
    %c0_i32_0 = arith.constant 0 : i32
    %c0_i32_1 = arith.constant 0 : i32
    return %c0_i32, %c0_i32_0 : i32, i32
  }
  func.func @transform_18(%arg0: i32) -> (i32, i32) {
    %c0_i32 = arith.constant 0 : i32
    %c0_i32_0 = arith.constant 0 : i32
    %c0_i32_1 = arith.constant 0 : i32
    return %c0_i32, %c0_i32_0 : i32, i32
  }
  func.func @transform_19(%arg0: i32) -> (i32, i32) {
    %c0_i32 = arith.constant 0 : i32
    %c0_i32_0 = arith.constant 0 : i32
    %c0_i32_1 = arith.constant 0 : i32
    return %c0_i32, %c0_i32_0 : i32, i32
  }
  func.func @transform_20(%arg0: i32) -> (i32, i32) {
    %c0_i32 = arith.constant 0 : i32
    %c0_i32_0 = arith.constant 0 : i32
    %c0_i32_1 = arith.constant 0 : i32
    return %c0_i32, %c0_i32_0 : i32, i32
  }
  func.func @transform_21(%arg0: i32) -> (i32, i32) {
    %c0_i32 = arith.constant 0 : i32
    %c0_i32_0 = arith.constant 0 : i32
    %c0_i32_1 = arith.constant 0 : i32
    return %c0_i32, %c0_i32_0 : i32, i32
  }
  func.func @transform_22(%arg0: i32) -> (i32, i32) {
    %c0_i32 = arith.constant 0 : i32
    %c0_i32_0 = arith.constant 0 : i32
    %c0_i32_1 = arith.constant 0 : i32
    return %c0_i32, %c0_i32_0 : i32, i32
  }
  func.func @transform_23(%arg0: i32) -> (i32, i32) {
    %c0_i32 = arith.constant 0 : i32
    %c0_i32_0 = arith.constant 0 : i32
    %c0_i32_1 = arith.constant 0 : i32
    return %c0_i32, %c0_i32_0 : i32, i32
  }
  func.func @transform_24(%arg0: i32) -> (i32, i32) {
    %c0_i32 = arith.constant 0 : i32
    %c0_i32_0 = arith.constant 0 : i32
    %c0_i32_1 = arith.constant 0 : i32
    return %c0_i32, %c0_i32_0 : i32, i32
  }
  func.func @transform_25(%arg0: i32) -> (i32, i32) {
    %c0_i32 = arith.constant 0 : i32
    %c0_i32_0 = arith.constant 0 : i32
    %c0_i32_1 = arith.constant 0 : i32
    return %c0_i32, %c0_i32_0 : i32, i32
  }
  func.func @transform_26(%arg0: i32) -> (i32, i32) {
    %c0_i32 = arith.constant 0 : i32
    %c0_i32_0 = arith.constant 0 : i32
    %c0_i32_1 = arith.constant 0 : i32
    return %c0_i32, %c0_i32_0 : i32, i32
  }
  func.func @transform_27(%arg0: i32) -> (i32, i32) {
    %c0_i32 = arith.constant 0 : i32
    %c0_i32_0 = arith.constant 0 : i32
    %c0_i32_1 = arith.constant 0 : i32
    return %c0_i32, %c0_i32_0 : i32, i32
  }
  func.func @transform_28(%arg0: i32) -> (i32, i32) {
    %c0_i32 = arith.constant 0 : i32
    %c0_i32_0 = arith.constant 0 : i32
    %c0_i32_1 = arith.constant 0 : i32
    return %c0_i32, %c0_i32_0 : i32, i32
  }
  func.func @transform_29(%arg0: i32) -> (i32, i32) {
    %c0_i32 = arith.constant 0 : i32
    %c0_i32_0 = arith.constant 0 : i32
    return %arg0, %c0_i32 : i32, i32
  }
}

</mosaic_0001>

<bundles_post_ra>
// kernel: tpu_custom_call.1
= control target key start
LH: loop header
LB: loop body
LE: loop exit
PB: predicated region body
PF: predicated region fallthrough
CT: control target
= control target key end

     0   :  { %s8068_s6 = smov 1   ;;  %s8069_s10 = smov 2   ;;  %s14195_s0 = inlined_call_operand.smem [shape: u32[30], index: -1, kind: input, shape index: {}] }
   0x1   :  { %s8107_s5 = sld [smem:[%s14195_s0]]   ;;  %s8070_s14 = smov 3  }
   0x2   :  { %s8112_s9 = sld [smem:[%s14195_s0 + %s8068_s6]]   ;;  %s8071_s18 = smov 4  }
   0x3   :  { %s8117_s13 = sld [smem:[%s14195_s0 + %s8069_s10]]   ;;  %s8072_s22 = smov 5  }
   0x4   :  { %s8122_s17 = sld [smem:[%s14195_s0 + %s8070_s14]]   ;;  %s8073_s26 = smov 6  }
   0x5   :  { %s8127_s21 = sld [smem:[%s14195_s0 + %s8071_s18]]   ;;  %s8074_s30 = smov 7  }
   0x6   :  { %s8132_s25 = sld [smem:[%s14195_s0 + %s8072_s22]]   ;;  %s8075_s4 = smov 8  }
   0x7   :  { %s8137_s29 = sld [smem:[%s14195_s0 + %s8073_s26]]   ;;  %s8076_s10 = smov 9  }
   0x8   :  { %s8142_s3 = sld [smem:[%s14195_s0 + %s8074_s30]]   ;;  %s8077_s15 = smov 10  }
   0x9   :  { %s8147_s8 = sld [smem:[%s14195_s0 + %s8075_s4]]   ;;  %s8078_s20 = smov 11  }
   0xa   :  { %s8152_s14 = sld [smem:[%s14195_s0 + %s8076_s10]]   ;;  %s8079_s26 = smov 12  }
   0xb   :  { %s8157_s19 = sld [smem:[%s14195_s0 + %s8077_s15]]   ;;  %s8080_s1 = smov 13  }
   0xc   :  { %s8162_s24 = sld [smem:[%s14195_s0 + %s8078_s20]]   ;;  %s8081_s7 = smov 14  }
   0xd   :  { %s8167_s30 = sld [smem:[%s14195_s0 + %s8079_s26]]   ;;  %s8082_s15 = smov 15  }
   0xe   :  { %s8172_s6 = sld [smem:[%s14195_s0 + %s8080_s1]]   ;;  %s8083_s22 = smov 16  }
   0xf   :  { %s8177_s12 = sld [smem:[%s14195_s0 + %s8081_s7]]   ;;  %s8084_s28 = smov 17  }
  0x10   :  { %s8182_s20 = sld [smem:[%s14195_s0 + %s8082_s15]]   ;;  %s8085_s7 = smov 18  }
  0x11   :  { %s8187_s27 = sld [smem:[%s14195_s0 + %s8083_s22]]   ;;  %s8086_s15 = smov 19  }
  0x12   :  { %s8192_s4 = sld [smem:[%s14195_s0 + %s8084_s28]]   ;;  %s8087_s22 = smov 20  }
  0x13   :  { %14259 = sst [smem:[#allocation2_spill]] %s8167_s30  ;;  %s8088_s28 = smov 21  }
  0x14   :  { %s8197_s30 = sld [smem:[%s14195_s0 + %s8085_s7]]   ;;  %s8089_s7 = smov 22  }
  0x16   :  { %14260 = sst [smem:[#allocation3_spill]] %s8182_s20 }
  0x17   :  { %14261 = sst [smem:[#allocation4_spill]] %s8187_s27 }
  0x18   :  { %14262 = sst [smem:[#allocation5_spill]] %s8192_s4 }
  0x19   :  { %s8202_s20 = sld [smem:[%s14195_s0 + %s8086_s15]]   ;;  %s8090_s15 = smov 23  }
  0x1a   :  { %14263 = sst [smem:[#allocation6_spill]] %s8197_s30 }
  0x1b   :  { %s8207_s27 = sld [smem:[%s14195_s0 + %s8087_s22]]   ;;  %s8091_s22 = smov 24  }
  0x1c   :  { %s8212_s4 = sld [smem:[%s14195_s0 + %s8088_s28]]   ;;  %s8092_s28 = smov 25  }
  0x1d   :  { %s8217_s30 = sld [smem:[%s14195_s0 + %s8089_s7]]   ;;  %s8093_s7 = smov 26  }
  0x1f   :  { %14264 = sst [smem:[#allocation7_spill]] %s8202_s20 }
  0x20   :  { %s8222_s20 = sld [smem:[%s14195_s0 + %s8090_s15]]   ;;  %s8094_s15 = smov 27  }
  0x21   :  { %14265 = sst [smem:[#allocation8_spill]] %s8207_s27 }
  0x22   :  { %14266 = sst [smem:[#allocation9_spill]] %s8212_s4 }
  0x23   :  { %14267 = sst [smem:[#allocation10_spill]] %s8217_s30 }
  0x24   :  { %s8227_s27 = sld [smem:[%s14195_s0 + %s8091_s22]]   ;;  %s8095_s22 = smov 28  }
  0x25   :  { %s8232_s4 = sld [smem:[%s14195_s0 + %s8092_s28]]   ;;  %s8096_s28 = smov 29  }
  0x26   :  { %14268 = sst [smem:[#allocation11_spill]] %s8222_s20 }
  0x27   :  { %s8237_s30 = sld [smem:[%s14195_s0 + %s8093_s7]]   ;;  %s8254_s7 = smov 0  }
  0x28   :  { %s8242_s20 = sld [smem:[%s14195_s0 + %s8094_s15]]  }
  0x2a   :  { %14269 = sst [smem:[#allocation12_spill]] %s8227_s27 }
  0x2b   :  { %14270 = sst [smem:[#allocation13_spill]] %s8232_s4 }
  0x2c   :  { %s8247_s27 = sld [smem:[%s14195_s0 + %s8095_s22]]  }
  0x2d   :  { %s8252_s4 = sld [smem:[%s14195_s0 + %s8096_s28]]  }
  0x2e LB: > { %s7146_s10 = sadd.s32 4294967295, %s8066_s7   ;;  %p7150_p0 = scmp.ge.s32.totalorder %s8066_s7, 1  ;;  %s8066_s7 = sphi %s8254_s7, %s69_s7  }
  0x2f   : > { %p818_p1 = scmp.lt.s32.totalorder %s8066_s7, 3 }
  0x31   : > { %p819_p2 = pnand %p7150_p0, %p818_p1 }
  0x33   : > { %822 = sbr.rel (%p819_p2) target bundleno = 2953 (0xb89), region = 136 }
  0x38   : > { %s7151_s11 = sshll.u32 %s7146_s10, 4  ;;  %s8097_s16 = smov 120   ;;  %v922_v3 = vld [vmem:[%s8112_s9] sm:$0xff]  ;;  %vm14255_vm0 = vcmask 64512   ;;  %v1092_v29 = vld [vmem:[%s8122_s17 + $0x18] sm:$0xff]  ;;  %v1091_v30 = vld [vmem:[%s8122_s17 + $0x10] sm:$0xff] }
  0x39   : > { %p895_p3 = scmp.lt.s32.totalorder %s7151_s11, 31  ;;  %1023 = vmatpush.msra.mxu0 %v922_v3  ;;  %1158 = vmatpush.msra.mxu1 %v1092_v29  ;;  %v1090_v32 = vld [vmem:[%s8122_s17 + $0x8] sm:$0xff]  ;;  %v1089_v33 = vld [vmem:[%s8122_s17] sm:$0xff]  ;;  %vm14221_vm1 = vcmask 261120   ;;  %s14388_s18 = sld [smem:[#allocation2_spill]] }
  0x3a   : > { %v8372_v37 = vld [vmem:[%s8117_s13] ss:$0 sm:$0xff]  ;;  %s14468_s22 = sld [smem:[#allocation3_spill]] }
  0x3b   : > { %s14732_s11 = smov (!%p895_p3, %s7151_s11), 31  ;;  %1159 = vmatpush.msra.mxu1 %v1091_v30  ;;  %s14479_s23 = sld [smem:[#allocation5_spill]] }
  0x3c   : > { %s7152_s0 = sshll.u32 %s14732_s11, 3  ;;  %s14490_s26 = sld [smem:[#allocation4_spill]] }
  0x3d   : > { %s8268_s15 = scalar_lea.vmem %s8107_s5, %s7152_s0  ;;  %1160 = vmatpush.msra.mxu1 %v1090_v32  ;;  %s14497_s28 = sld [smem:[#allocation7_spill]] }
  0x3e   : > { %v906_v0 = vld [vmem:[%s8268_s15] sm:$0xff]  ;;  %v908_v1 = vld [vmem:[%s8268_s15 + $0x10] sm:$0xff]  ;;  %v907_v4 = vld [vmem:[%s8268_s15 + $0x8] sm:$0xff]  ;;  %s14512_s1 = sld [smem:[#allocation6_spill]] }
  0x3f   : > { %943 = vrot.lane.b32.xlu0 %v906_v0, %s8097_s16  ;;  %947 = vrot.lane.b32.xlu1 %v908_v1, %s8097_s16  ;;  %v910_v2 = vld [vmem:[%s8268_s15 + $0x20] sm:$0xff]  ;;  %v909_v5 = vld [vmem:[%s8268_s15 + $0x18] sm:$0xff]  ;;  %s14527_s2 = sld [smem:[#allocation8_spill]] }
  0x40   : > { %951 = vrot.lane.b32.xlu2 %v910_v2, %s8097_s16  ;;  %v911_v6 = vld [vmem:[%s8268_s15 + $0x28] sm:$0xff]  ;;  %v912_v7 = vld [vmem:[%s8268_s15 + $0x30] sm:$0xff]  ;;  %v913_v8 = vld [vmem:[%s8268_s15 + $0x38] sm:$0xff]  ;;  %1161 = vmatpush.msra.mxu1 %v1089_v33  ;;  %s14532_s10 = sld [smem:[#allocation9_spill]] }
  0x41   : > { %v914_v9 = vld [vmem:[%s8268_s15 + $0x40] sm:$0xff]  ;;  %v915_v10 = vld [vmem:[%s8268_s15 + $0x48] sm:$0xff]  ;;  %v916_v11 = vld [vmem:[%s8268_s15 + $0x50] sm:$0xff] }
  0x42   : > { %v917_v12 = vld [vmem:[%s8268_s15 + $0x58] sm:$0xff]  ;;  %v918_v13 = vld [vmem:[%s8268_s15 + $0x60] sm:$0xff]  ;;  %v919_v14 = vld [vmem:[%s8268_s15 + $0x68] sm:$0xff] }
  0x43   : > { %v921_v15 = vld [vmem:[%s8268_s15 + $0x78] sm:$0xff]  ;;  %v920_v16 = vld [vmem:[%s8268_s15 + $0x70] sm:$0xff] }
  0x47   : > { %945 = vrot.lane.b32.xlu0 %v907_v4, %s8097_s16  ;;  %949 = vrot.lane.b32.xlu1 %v909_v5, %s8097_s16 }
  0x48   : > { %953 = vrot.lane.b32.xlu2 %v911_v6, %s8097_s16 }
  0x4f   : > { %955 = vrot.lane.b32.xlu0 %v912_v7, %s8097_s16  ;;  %957 = vrot.lane.b32.xlu1 %v913_v8, %s8097_s16 }
  0x50   : > { %959 = vrot.lane.b32.xlu2 %v914_v9, %s8097_s16 }
  0x57   : > { %961 = vrot.lane.b32.xlu0 %v915_v10, %s8097_s16  ;;  %963 = vrot.lane.b32.xlu1 %v916_v11, %s8097_s16  ;;  %v1230_v10 = vld [vmem:[%s8132_s25 + $0x18] sm:$0xff] }
  0x58   : > { %965 = vrot.lane.b32.xlu2 %v917_v12, %s8097_s16  ;;  %1295 = vmatpush.msra.mxu2 %v1230_v10 }
  0x5f   : > { %967 = vrot.lane.b32.xlu0 %v918_v13, %s8097_s16  ;;  %969 = vrot.lane.b32.xlu1 %v919_v14, %s8097_s16  ;;  %v1229_v13 = vld [vmem:[%s8132_s25 + $0x10] sm:$0xff] }
  0x60   : > { %971 = vrot.lane.b32.xlu2 %v920_v16, %s8097_s16  ;;  %1296 = vmatpush.msra.mxu2 %v1229_v13  ;;  %v1227_v16 = vld [vmem:[%s8132_s25] sm:$0xff] }
  0x67   : > { %973 = vrot.lane.b32.xlu0 %v921_v15, %s8097_s16  ;;  %v1228_v15 = vld [vmem:[%s8132_s25 + $0x8] sm:$0xff] }
  0x68   : > { %1297 = vmatpush.msra.mxu2 %v1228_v15 }
  0x6a   : > { %1298 = vmatpush.msra.mxu2 %v1227_v16 }
  0x9a   : > { %v8319_v21 = vpop.permute.xlu2 %951 }
  0x9b   : > { %14275 = vst [vmem:[#allocation18_spill] sm:$0xff] %v8319_v21 }
  0xa2   : > { %v8323_v22 = vpop.permute.xlu2 %953 }
  0xa3   : > { %14276 = vst [vmem:[#allocation19_spill] sm:$0xff] %v8323_v22 }
  0xaa   : > { %v8335_v25 = vpop.permute.xlu2 %959 }
  0xab   : > { %14279 = vst [vmem:[#allocation22_spill] sm:$0xff] %v8335_v25 }
  0xb1   : > { %v8303_v17 = vpop.permute.xlu0 %943  ;;  %v8311_v19 = vpop.permute.xlu1 %947 }
  0xb2   : > { %14271 = vst [vmem:[#allocation14_spill] sm:$0xff] %v8303_v17  ;;  %7155 = vmatmul.msk.f32.vlgmr.msra.gmra.mxu0 %vm14255_vm0, %v8303_v17  ;;  %v8347_v28 = vpop.permute.xlu2 %965 }
  0xb3   : > { %14273 = vst [vmem:[#allocation16_spill] sm:$0xff] %v8311_v19 }
  0xb4   : > { %14282 = vst [vmem:[#allocation25_spill] sm:$0xff] %v8347_v28 }
  0xb9   : > { %v8307_v18 = vpop.permute.xlu0 %945  ;;  %v8315_v20 = vpop.permute.xlu1 %949 }
  0xba   : > { %14272 = vst [vmem:[#allocation15_spill] sm:$0xff] %v8307_v18  ;;  %7156 = vmatmul.msk.f32.gmra.mxu0 %vm14255_vm0, %v8307_v18  ;;  %v8363_v35 = vpop.permute.xlu2 %971 }
  0xbb   : > { %14274 = vst [vmem:[#allocation17_spill] sm:$0xff] %v8315_v20 }
  0xbc   : > { %14285 = vst [vmem:[#allocation28_spill] sm:$0xff] %v8363_v35 }
  0xc1   : > { %v8327_v23 = vpop.permute.xlu0 %955  ;;  %v8331_v24 = vpop.permute.xlu1 %957 }
  0xc2   : > { %7157 = vmatmul.msk.f32.gmra.mxu0 %vm14255_vm0, %v8311_v19  ;;  %14277 = vst [vmem:[#allocation20_spill] sm:$0xff] %v8327_v23 }
  0xc3   : > { %14278 = vst [vmem:[#allocation21_spill] sm:$0xff] %v8331_v24 }
  0xc9   : > { %v8339_v26 = vpop.permute.xlu0 %961  ;;  %v8343_v27 = vpop.permute.xlu1 %963 }
  0xca   : > { %7158 = vmatmul.msk.f32.gmra.mxu0 %vm14255_vm0, %v8315_v20  ;;  %14280 = vst [vmem:[#allocation23_spill] sm:$0xff] %v8339_v26 }
  0xcb   : > { %14281 = vst [vmem:[#allocation24_spill] sm:$0xff] %v8343_v27 }
  0xd1   : > { %v8353_v31 = vpop.permute.xlu0 %967  ;;  %v8359_v34 = vpop.permute.xlu1 %969 }
  0xd2   : > { %7159 = vmatmul.msk.f32.gmra.mxu0 %vm14255_vm0, %v8319_v21  ;;  %14283 = vst [vmem:[#allocation26_spill] sm:$0xff] %v8353_v31 }
  0xd3   : > { %14284 = vst [vmem:[#allocation27_spill] sm:$0xff] %v8359_v34 }
  0xd9   : > { %v8367_v36 = vpop.permute.xlu0 %973 }
  0xda   : > { %7160 = vmatmul.msk.f32.gmra.mxu0 %vm14255_vm0, %v8323_v22  ;;  %14286 = vst [vmem:[#allocation29_spill] sm:$0xff] %v8367_v36 }
  0xe2   : > { %7161 = vmatmul.msk.f32.gmra.mxu0 %vm14255_vm0, %v8327_v23 }
  0xea   : > { %7162 = vmatmul.msk.f32.gmra.mxu0 %vm14255_vm0, %v8331_v24 }
  0xf2   : > { %7163 = vmatmul.msk.f32.gmra.mxu0 %vm14255_vm0, %v8335_v25 }
  0xfa   : > { %7164 = vmatmul.msk.f32.gmra.mxu0 %vm14255_vm0, %v8339_v26 }
 0x102   : > { %7165 = vmatmul.msk.f32.gmra.mxu0 %vm14255_vm0, %v8343_v27 }
 0x10a   : > { %7166 = vmatmul.msk.f32.gmra.mxu0 %vm14255_vm0, %v8347_v28 }
 0x112   : > { %7167 = vmatmul.msk.f32.gmra.mxu0 %vm14255_vm0, %v8353_v31 }
 0x11a   : > { %7168 = vmatmul.msk.f32.gmra.mxu0 %vm14255_vm0, %v8359_v34 }
 0x122   : > { %7169 = vmatmul.msk.f32.gmra.mxu0 %vm14255_vm0, %v8363_v35 }
 0x12a   : > { %7170 = vmatmul.msk.f32.gmra.mxu0 %vm14255_vm0, %v8367_v36 }
 0x12f   : > { %v1025_v38 = vpop.f32.mrf.mxu0 }
 0x130   : > { %v1026_v39 = vadd.f32 %v8372_v37, %v1025_v38 }
 0x132   : > { %v1073_v40 = vmax.f32 %v1026_v39, 0.0 }
 0x134   : > { %7171 = vmatmul.msk.f32.vlgmr.msra.gmra.mxu1 %vm14221_vm1, %v1073_v40 }
 0x137   : > { %v1028_v41 = vpop.f32.mrf.mxu0 }
 0x138   : > { %v1029_v42 = vadd.f32 %v8372_v37, %v1028_v41 }
 0x13a   : > { %v1074_v43 = vmax.f32 %v1029_v42, 0.0 }
 0x13c   : > { %7172 = vmatmul.msk.f32.gmra.mxu1 %vm14221_vm1, %v1074_v43  ;;  %v7645_v43 = vld [vmem:[%s8127_s21] ss:$0 sm:$0xff] }
 0x13f   : > { %v1031_v44 = vpop.f32.mrf.mxu0 }
 0x140   : > { %v1032_v45 = vadd.f32 %v8372_v37, %v1031_v44 }
 0x142   : > { %v1075_v46 = vmax.f32 %v1032_v45, 0.0 }
 0x144   : > { %7173 = vmatmul.msk.f32.gmra.mxu1 %vm14221_vm1, %v1075_v46 }
 0x147   : > { %v1034_v47 = vpop.f32.mrf.mxu0 }
 0x148   : > { %v1035_v48 = vadd.f32 %v8372_v37, %v1034_v47 }
 0x14a   : > { %v1076_v49 = vmax.f32 %v1035_v48, 0.0 }
 0x14c   : > { %7174 = vmatmul.msk.f32.gmra.mxu1 %vm14221_vm1, %v1076_v49 }
 0x14f   : > { %v1037_v50 = vpop.f32.mrf.mxu0 }
 0x150   : > { %v1038_v51 = vadd.f32 %v8372_v37, %v1037_v50 }
 0x152   : > { %v1077_v52 = vmax.f32 %v1038_v51, 0.0 }
 0x154   : > { %7175 = vmatmul.msk.f32.gmra.mxu1 %vm14221_vm1, %v1077_v52 }
 0x157   : > { %v1040_v53 = vpop.f32.mrf.mxu0 }
 0x158   : > { %v1041_v54 = vadd.f32 %v8372_v37, %v1040_v53 }
 0x15a   : > { %v1078_v55 = vmax.f32 %v1041_v54, 0.0 }
 0x15c   : > { %7176 = vmatmul.msk.f32.gmra.mxu1 %vm14221_vm1, %v1078_v55 }
 0x15f   : > { %v1043_v56 = vpop.f32.mrf.mxu0 }
 0x160   : > { %v1044_v57 = vadd.f32 %v8372_v37, %v1043_v56 }
 0x162   : > { %v1079_v58 = vmax.f32 %v1044_v57, 0.0 }
 0x164   : > { %7177 = vmatmul.msk.f32.gmra.mxu1 %vm14221_vm1, %v1079_v58 }
 0x167   : > { %v1046_v59 = vpop.f32.mrf.mxu0 }
 0x168   : > { %v1047_v60 = vadd.f32 %v8372_v37, %v1046_v59 }
 0x16a   : > { %v1080_v61 = vmax.f32 %v1047_v60, 0.0 }
 0x16c   : > { %7178 = vmatmul.msk.f32.gmra.mxu1 %vm14221_vm1, %v1080_v61 }
 0x16f   : > { %v1049_v62 = vpop.f32.mrf.mxu0 }
 0x170   : > { %v1050_v63 = vadd.f32 %v8372_v37, %v1049_v62 }
 0x172   : > { %v1081_v0 = vmax.f32 %v1050_v63, 0.0 }
 0x174   : > { %7179 = vmatmul.msk.f32.gmra.mxu1 %vm14221_vm1, %v1081_v0 }
 0x177   : > { %v1052_v1 = vpop.f32.mrf.mxu0 }
 0x178   : > { %v1053_v2 = vadd.f32 %v8372_v37, %v1052_v1 }
 0x17a   : > { %v1082_v3 = vmax.f32 %v1053_v2, 0.0 }
 0x17c   : > { %7180 = vmatmul.msk.f32.gmra.mxu1 %vm14221_vm1, %v1082_v3 }
 0x17f   : > { %v1055_v4 = vpop.f32.mrf.mxu0 }
 0x180   : > { %v1056_v5 = vadd.f32 %v8372_v37, %v1055_v4 }
 0x182   : > { %v1083_v6 = vmax.f32 %v1056_v5, 0.0 }
 0x184   : > { %7181 = vmatmul.msk.f32.gmra.mxu1 %vm14221_vm1, %v1083_v6 }
 0x187   : > { %v1058_v7 = vpop.f32.mrf.mxu0 }
 0x188   : > { %v1059_v8 = vadd.f32 %v8372_v37, %v1058_v7 }
 0x18a   : > { %v1084_v9 = vmax.f32 %v1059_v8, 0.0 }
 0x18c   : > { %7182 = vmatmul.msk.f32.gmra.mxu1 %vm14221_vm1, %v1084_v9 }
 0x18f   : > { %v1061_v11 = vpop.f32.mrf.mxu0 }
 0x190   : > { %v1062_v12 = vadd.f32 %v8372_v37, %v1061_v11 }
 0x192   : > { %v1085_v14 = vmax.f32 %v1062_v12, 0.0 }
 0x194   : > { %7183 = vmatmul.msk.f32.gmra.mxu1 %vm14221_vm1, %v1085_v14 }
 0x197   : > { %v1064_v29 = vpop.f32.mrf.mxu0 }
 0x198   : > { %v1065_v30 = vadd.f32 %v8372_v37, %v1064_v29 }
 0x19a   : > { %v1086_v32 = vmax.f32 %v1065_v30, 0.0 }
 0x19c   : > { %7184 = vmatmul.msk.f32.gmra.mxu1 %vm14221_vm1, %v1086_v32 }
 0x19f   : > { %v1067_v33 = vpop.f32.mrf.mxu0 }
 0x1a0   : > { %v1068_v38 = vadd.f32 %v8372_v37, %v1067_v33 }
 0x1a2   : > { %v1087_v39 = vmax.f32 %v1068_v38, 0.0 }
 0x1a4   : > { %7185 = vmatmul.msk.f32.gmra.mxu1 %vm14221_vm1, %v1087_v39 }
 0x1a7   : > { %v1070_v40 = vpop.f32.mrf.mxu0 }
 0x1a8   : > { %v1071_v41 = vadd.f32 %v8372_v37, %v1070_v40 }
 0x1aa   : > { %v1088_v42 = vmax.f32 %v1071_v41, 0.0 }
 0x1ac   : > { %7186 = vmatmul.msk.f32.gmra.mxu1 %vm14221_vm1, %v1088_v42 }
 0x1b1   : > { %v1163_v44 = vpop.f32.mrf.mxu1 }
 0x1b2   : > { %v1164_v45 = vadd.f32 %v7645_v43, %v1163_v44 }
 0x1b4   : > { %v1211_v46 = vmax.f32 %v1164_v45, 0.0  ;;  %v8428_v45 = vld [vmem:[%s8137_s29] ss:$0 sm:$0xff] }
 0x1b6   : > { %7187 = vmatmul.msk.f32.vlgmr.msra.gmra.mxu2 %vm14221_vm1, %v1211_v46 }
 0x1b9   : > { %v1166_v47 = vpop.f32.mrf.mxu1 }
 0x1ba   : > { %v1167_v48 = vadd.f32 %v7645_v43, %v1166_v47 }
 0x1bc   : > { %v1212_v49 = vmax.f32 %v1167_v48, 0.0 }
 0x1be   : > { %7188 = vmatmul.msk.f32.gmra.mxu2 %vm14221_vm1, %v1212_v49 }
 0x1c1   : > { %v1169_v50 = vpop.f32.mrf.mxu1 }
 0x1c2   : > { %v1170_v51 = vadd.f32 %v7645_v43, %v1169_v50 }
 0x1c4   : > { %v1213_v52 = vmax.f32 %v1170_v51, 0.0 }
 0x1c6   : > { %7189 = vmatmul.msk.f32.gmra.mxu2 %vm14221_vm1, %v1213_v52 }
 0x1c9   : > { %v1172_v37 = vpop.f32.mrf.mxu1 }
 0x1ca   : > { %v1173_v53 = vadd.f32 %v7645_v43, %v1172_v37 }
 0x1cc   : > { %v1214_v54 = vmax.f32 %v1173_v53, 0.0 }
 0x1ce   : > { %7190 = vmatmul.msk.f32.gmra.mxu2 %vm14221_vm1, %v1214_v54 }
 0x1d1   : > { %v1175_v55 = vpop.f32.mrf.mxu1 }
 0x1d2   : > { %v1176_v56 = vadd.f32 %v7645_v43, %v1175_v55 }
 0x1d4   : > { %v1215_v57 = vmax.f32 %v1176_v56, 0.0 }
 0x1d6   : > { %7191 = vmatmul.msk.f32.gmra.mxu2 %vm14221_vm1, %v1215_v57 }
 0x1d9   : > { %v1178_v58 = vpop.f32.mrf.mxu1 }
 0x1da   : > { %v1179_v59 = vadd.f32 %v7645_v43, %v1178_v58 }
 0x1dc   : > { %v1216_v60 = vmax.f32 %v1179_v59, 0.0 }
 0x1de   : > { %7192 = vmatmul.msk.f32.gmra.mxu2 %vm14221_vm1, %v1216_v60 }
 0x1e1   : > { %v1181_v61 = vpop.f32.mrf.mxu1 }
 0x1e2   : > { %v1182_v62 = vadd.f32 %v7645_v43, %v1181_v61 }
 0x1e4   : > { %v1217_v63 = vmax.f32 %v1182_v62, 0.0 }
 0x1e6   : > { %7193 = vmatmul.msk.f32.gmra.mxu2 %vm14221_vm1, %v1217_v63 }
 0x1e9   : > { %v1184_v0 = vpop.f32.mrf.mxu1 }
 0x1ea   : > { %v1185_v1 = vadd.f32 %v7645_v43, %v1184_v0 }
 0x1ec   : > { %v1218_v2 = vmax.f32 %v1185_v1, 0.0 }
 0x1ee   : > { %7194 = vmatmul.msk.f32.gmra.mxu2 %vm14221_vm1, %v1218_v2 }
 0x1f1   : > { %v1187_v3 = vpop.f32.mrf.mxu1 }
 0x1f2   : > { %v1188_v4 = vadd.f32 %v7645_v43, %v1187_v3 }
 0x1f4   : > { %v1219_v5 = vmax.f32 %v1188_v4, 0.0 }
 0x1f6   : > { %7195 = vmatmul.msk.f32.gmra.mxu2 %vm14221_vm1, %v1219_v5 }
 0x1f9   : > { %v1190_v6 = vpop.f32.mrf.mxu1 }
 0x1fa   : > { %v1191_v7 = vadd.f32 %v7645_v43, %v1190_v6 }
 0x1fc   : > { %v1220_v8 = vmax.f32 %v1191_v7, 0.0 }
 0x1fe   : > { %7196 = vmatmul.msk.f32.gmra.mxu2 %vm14221_vm1, %v1220_v8 }
 0x201   : > { %v1193_v9 = vpop.f32.mrf.mxu1 }
 0x202   : > { %v1194_v10 = vadd.f32 %v7645_v43, %v1193_v9 }
 0x204   : > { %v1221_v11 = vmax.f32 %v1194_v10, 0.0 }
 0x206   : > { %7197 = vmatmul.msk.f32.gmra.mxu2 %vm14221_vm1, %v1221_v11 }
 0x209   : > { %v1196_v12 = vpop.f32.mrf.mxu1 }
 0x20a   : > { %v1197_v13 = vadd.f32 %v7645_v43, %v1196_v12 }
 0x20c   : > { %v1222_v14 = vmax.f32 %v1197_v13, 0.0 }
 0x20e   : > { %7198 = vmatmul.msk.f32.gmra.mxu2 %vm14221_vm1, %v1222_v14 }
 0x211   : > { %v1199_v15 = vpop.f32.mrf.mxu1 }
 0x212   : > { %v1200_v16 = vadd.f32 %v7645_v43, %v1199_v15 }
 0x214   : > { %v1223_v29 = vmax.f32 %v1200_v16, 0.0 }
 0x216   : > { %7199 = vmatmul.msk.f32.gmra.mxu2 %vm14221_vm1, %v1223_v29 }
 0x219   : > { %v1202_v30 = vpop.f32.mrf.mxu1 }
 0x21a   : > { %v1203_v32 = vadd.f32 %v7645_v43, %v1202_v30 }
 0x21c   : > { %v1224_v33 = vmax.f32 %v1203_v32, 0.0 }
 0x21e   : > { %7200 = vmatmul.msk.f32.gmra.mxu2 %vm14221_vm1, %v1224_v33 }
 0x221   : > { %v1205_v38 = vpop.f32.mrf.mxu1 }
 0x222   : > { %v1206_v39 = vadd.f32 %v7645_v43, %v1205_v38 }
 0x224   : > { %v1225_v40 = vmax.f32 %v1206_v39, 0.0 }
 0x226   : > { %7201 = vmatmul.msk.f32.gmra.mxu2 %vm14221_vm1, %v1225_v40 }
 0x229   : > { %v1208_v41 = vpop.f32.mrf.mxu1 }
 0x22a   : > { %v1209_v42 = vadd.f32 %v7645_v43, %v1208_v41 }
 0x22c   : > { %v1226_v44 = vmax.f32 %v1209_v42, 0.0 }
 0x22e   : > { %7202 = vmatmul.msk.f32.gmra.mxu2 %vm14221_vm1, %v1226_v44 }
 0x239   : > { %v1300_v46 = vpop.f32.mrf.mxu2 }
 0x23a   : > { %v1301_v47 = vadd.f32 %v8428_v45, %v1300_v46 }
 0x23c   : > { %2308 = vrot.lane.b32.xlu1 %v1301_v47, %s8097_s16  ;;  %v8434_v51 = vmul.f32 0.5, %v1301_v47 }
 0x23e   : > { %v8438_v52 = vand.u32 2147483647, %v8434_v51 }
 0x240   : > { %v1684_v54 = vadd.f32 1.0, %v8438_v52  ;;  %v8449_v57 = vadd.f32 1e-30, %v8438_v52 }
 0x241   : > { %v1303_v48 = vpop.f32.mrf.mxu2 }
 0x242   : > { %v1304_v49 = vadd.f32 %v8428_v45, %v1303_v48  ;;  %7656 = vrcp.f32 %v1684_v54  ;;  %vm1705_vm3 = vweird.f32 %v1684_v54  ;;  %v1709_v29 = vand.u32 2147483647, %v1684_v54 }
 0x243   : > { %7658 = vrcp.f32 %v8449_v57  ;;  %v1711_v30 = vand.u32 2147483648, %v1684_v54  ;;  %v1439_v44 = vand.u32 2147483648, %v8449_v57  ;;  %vm1433_vm6 = vweird.f32 %v8449_v57 }
 0x244   : > { %2310 = vrot.lane.b32.xlu2 %v1304_v49, %s8097_s16  ;;  %v8441_v37 = vmul.f32 0.5, %v1304_v49  ;;  %v1437_v48 = vand.u32 2147483647, %v8449_v57  ;;  %vm1710_vm8 = vcmp.eq.f32.partialorder %v1709_v29, 8.507059e+37 }
 0x245   : > { %v1712_v49 = vor.u32 1.1754944e-38, %v1711_v30 }
 0x246   : > { %v8446_v56 = vand.u32 2147483647, %v8441_v37  ;;  %vm1438_vm11 = vcmp.eq.f32.partialorder %v1437_v48, 8.507059e+37 }
 0x248   : > { %v8453_v58 = vadd.f32 1.0, %v8446_v56  ;;  %v8457_v60 = vadd.f32 1e-30, %v8446_v56  ;;  %v7657_v61 = vpop.eup %7656 }
 0x249   : > { %v1306_v50 = vpop.f32.mrf.mxu2  ;;  %v7659_v63 = vpop.eup %7658  ;;  %v1701_v0 = vmul.f32 %v7657_v61, %v1684_v54  ;;  %vm1706_vm2 = vweird.f32 %v7657_v61 }
 0x24a   : > { %v1307_v43 = vadd.f32 %v8428_v45, %v1306_v50  ;;  %7660 = vrcp.f32 %v8453_v58  ;;  %v1429_v3 = vmul.f32 %v7659_v63, %v8449_v57  ;;  %vm1434_vm4 = vweird.f32 %v7659_v63  ;;  %vm8493_vm5 = vmor %vm1705_vm3, %vm1706_vm2 }
 0x24b   : > { %7662 = vrcp.f32 %v8457_v60  ;;  %v1702_v5 = vsub.f32 1.0, %v1701_v0  ;;  %vm8510_vm7 = vmor %vm1433_vm6, %vm1434_vm4  ;;  %vm1720_vm10 = vweird.f32 %v8453_v58  ;;  %v1724_v0 = vand.u32 2147483647, %v8453_v58 }
 0x24c   : > { %2312 = vrot.lane.b32.xlu0 %v1307_v43, %s8097_s16  ;;  %v8469_v4 = vmul.f32 0.5, %v1307_v43  ;;  %v1430_v8 = vsub.f32 1.0, %v1429_v3  ;;  %vm1448_vm14 = vweird.f32 %v8457_v60  ;;  %vm1396_vm3 = vcmp.gt.f32.partialorder %v8438_v52, 0.41421357 }
 0x24d   : > { %v1703_v10 = vmul.f32 %v7657_v61, %v1702_v5  ;;  %vm1725_vm2 = vcmp.eq.f32.partialorder %v1724_v0, 8.507059e+37  ;;  %vm1380_vm4 = vcmp.gt.f32.partialorder %v8438_v52, 2.4142137  ;;  %vm1397_vm6 = vcmp.gt.f32.partialorder %v8446_v56, 0.41421357 }
 0x24e   : > { %v8476_v9 = vand.u32 2147483647, %v8469_v4  ;;  %v1431_v13 = vmul.f32 %v7659_v63, %v1430_v8 }
 0x24f   : > { %v1704_v16 = vadd.f32 %v7657_v61, %v1703_v10  ;;  %v1454_v10 = vand.u32 2147483648, %v8457_v60 }
 0x250   : > { %v8466_v2 = vpop.eup %7660  ;;  %v8481_v14 = vadd.f32 1.0, %v8476_v9  ;;  %v8485_v38 = vadd.f32 1e-30, %v8476_v9  ;;  %v1432_v41 = vadd.f32 %v7659_v63, %v1431_v13 }
 0x251   : > { %v1309_v53 = vpop.f32.mrf.mxu2  ;;  %v8471_v6 = vpop.eup %7662  ;;  %v1716_v7 = vmul.f32 %v8466_v2, %v8453_v58  ;;  %v1708_v46 = vsel %vm8493_vm5, %v7657_v61, %v1704_v16  ;;  %vm1721_vm9 = vweird.f32 %v8466_v2  ;;  %v1440_v61 = vor.u32 1.1754944e-38, %v1439_v44 }
 0x252   : > { %v1310_v55 = vadd.f32 %v8428_v45, %v1309_v53  ;;  %v1444_v11 = vmul.f32 %v8471_v6, %v8457_v60  ;;  %7664 = vrcp.f32 %v8481_v14  ;;  %v1436_v54 = vsel %vm8510_vm7, %v7659_v63, %v1432_v41  ;;  %vm8530_vm13 = vmor %vm1720_vm10, %vm1721_vm9 }
 0x253   : > { %v1717_v12 = vsub.f32 1.0, %v1716_v7  ;;  %7666 = vrcp.f32 %v8485_v38  ;;  %v1713_v57 = vsel %vm1710_vm8, %v1712_v49, %v1708_v46  ;;  %vm1449_vm12 = vweird.f32 %v8471_v6 }
 0x254   : > { %2314 = vrot.lane.b32.xlu1 %v1310_v55, %s8097_s16  ;;  %v1445_v32 = vsub.f32 1.0, %v1444_v11  ;;  %v8501_v47 = vmul.f32 0.5, %v1310_v55  ;;  %v7203_v55 = vadd.f32 -1.0, %v8438_v52  ;;  %v1441_v7 = vsel %vm1438_vm11, %v1440_v61, %v1436_v54  ;;  %vm8542_vm15 = vmor %vm1448_vm14, %vm1449_vm12 }
 0x255   : > { %v1718_v33 = vmul.f32 %v8466_v2, %v1717_v12  ;;  %v1452_v11 = vand.u32 2147483647, %v8457_v60  ;;  %v7204_v41 = vadd.f32 -1.0, %v8446_v56  ;;  %vm1381_vm7 = vcmp.gt.f32.partialorder %v8446_v56, 2.4142137 }
 0x256   : > { %v1446_v50 = vmul.f32 %v8471_v6, %v1445_v32  ;;  %v1714_v8 = vmul.f32 %v7203_v55, %v1713_v57  ;;  %vm1735_vm9 = vweird.f32 %v8481_v14  ;;  %vm1463_vm12 = vweird.f32 %v8485_v38 }
 0x257   : > { %v1719_v53 = vadd.f32 %v8466_v2, %v1718_v33  ;;  %v1455_v33 = vor.u32 1.1754944e-38, %v1454_v10  ;;  %vm1453_vm5 = vcmp.eq.f32.partialorder %v1452_v11, 8.507059e+37 }
 0x258   : > { %v8526_v3 = vpop.eup %7664  ;;  %v1447_v5 = vadd.f32 %v8471_v6, %v1446_v50  ;;  %v1940_v32 = vsel %vm1396_vm3, %v1714_v8, %v8438_v52  ;;  %v1741_v8 = vand.u32 2147483648, %v8481_v14 }
 0x259   : > { %v1312_v59 = vpop.f32.mrf.mxu2  ;;  %v8540_v13 = vpop.eup %7666  ;;  %v1731_v16 = vmul.f32 %v8526_v3, %v8481_v14  ;;  %vm1736_vm8 = vweird.f32 %v8526_v3 }
 0x25a   : > { %v8461_v62 = vadd.f32 %v8428_v45, %v1312_v59  ;;  %v1726_v59 = vand.u32 2147483648, %v8453_v58  ;;  %v1723_v58 = vsel %vm8530_vm13, %v8466_v2, %v1719_v53  ;;  %v1442_v2 = vmul.f32 -1.0, %v1441_v7  ;;  %vm8613_vm11 = vmor %vm1735_vm9, %vm1736_vm8 }
 0x25b   : > { %v1451_v60 = vsel %vm8542_vm15, %v8471_v6, %v1447_v5  ;;  %v1459_v44 = vmul.f32 %v8540_v13, %v8485_v38  ;;  %v1732_v6 = vsub.f32 1.0, %v1731_v16  ;;  %vm1464_vm10 = vweird.f32 %v8540_v13 }
 0x25c   : > { %2316 = vrot.lane.b32.xlu2 %v8461_v62, %s8097_s16  ;;  %v1727_v12 = vor.u32 1.1754944e-38, %v1726_v59  ;;  %v1456_v46 = vsel %vm1453_vm5, %v1455_v33, %v1451_v60  ;;  %v8568_v49 = vsel %vm1380_vm4, %v1442_v2, %v1940_v32  ;;  %v8581_v57 = vmul.f32 0.5, %v8461_v62  ;;  %vm1465_vm13 = vmor %vm1463_vm12, %vm1464_vm10 }
 0x25d   : > { %v1457_v50 = vmul.f32 -1.0, %v1456_v46  ;;  %v1460_v43 = vsub.f32 1.0, %v1459_v44  ;;  %v8574_v53 = vmul.f32 %v8568_v49, %v8568_v49  ;;  %v1733_v55 = vmul.f32 %v8526_v3, %v1732_v6 }
 0x25e   : > { %v1728_v30 = vsel %vm1725_vm2, %v1727_v12, %v1723_v58  ;;  %v8597_v62 = vand.u32 2147483647, %v8581_v57  ;;  %v1739_v12 = vand.u32 2147483647, %v8481_v14  ;;  %v1469_v16 = vand.u32 2147483648, %v8485_v38 }
 0x25f   : > { %v1729_v48 = vmul.f32 %v7204_v41, %v1728_v30  ;;  %v1461_v0 = vmul.f32 %v8540_v13, %v1460_v43  ;;  %v2020_v63 = vmul.f32 0.080537446, %v8574_v53  ;;  %v1734_v7 = vadd.f32 %v8526_v3, %v1733_v55 }
 0x260   : > { %v8623_v14 = vadd.f32 1.0, %v8597_v62  ;;  %v1467_v41 = vand.u32 2147483647, %v8485_v38  ;;  %v1742_v44 = vor.u32 1.1754944e-38, %v1741_v8  ;;  %vm1740_vm14 = vcmp.eq.f32.partialorder %v1739_v12, 8.507059e+37 }
 0x261   : > { %v1315_v1 = vpop.f32.mrf.mxu2  ;;  %v1941_v54 = vsel %vm1397_vm6, %v1729_v48, %v8446_v56  ;;  %v7219_v30 = vadd.f32 -0.13877685, %v2020_v63  ;;  %v1738_v32 = vsel %vm8613_vm11, %v8526_v3, %v1734_v7  ;;  %v8632_v6 = vadd.f32 1e-30, %v8597_v62 }
 0x262   : > { %v8488_v39 = vadd.f32 %v8428_v45, %v1315_v1  ;;  %v8524_v1 = vand.u32 2147483647, %v8501_v47  ;;  %v8588_v61 = vsel %vm1381_vm7, %v1457_v50, %v1941_v54  ;;  %v7205_v50 = vadd.f32 -1.0, %v8476_v9 }
 0x263   : > { %v8606_v11 = vmul.f32 %v8588_v61, %v8588_v61  ;;  %v1743_v43 = vsel %vm1740_vm14, %v1742_v44, %v1738_v32  ;;  %v2052_v54 = vmul.f32 %v7219_v30, %v8574_v53  ;;  %v1470_v55 = vor.u32 1.1754944e-38, %v1469_v16 }
 0x264   : > { %2318 = vrot.lane.b32.xlu0 %v8488_v39, %s8097_s16  ;;  %v8549_v29 = vadd.f32 1.0, %v8524_v1  ;;  %v8560_v42 = vadd.f32 1e-30, %v8524_v1  ;;  %v8626_v33 = vmul.f32 0.5, %v8488_v39  ;;  %vm1468_vm15 = vcmp.eq.f32.partialorder %v1467_v41, 8.507059e+37 }
 0x265   : > { %v2021_v48 = vmul.f32 0.080537446, %v8606_v11  ;;  %v1744_v8 = vmul.f32 %v7205_v50, %v1743_v43  ;;  %vm1382_vm2 = vcmp.gt.f32.partialorder %v8476_v9, 2.4142137  ;;  %vm1398_vm5 = vcmp.gt.f32.partialorder %v8476_v9, 0.41421357 }
 0x266   : > { %7668 = vrcp.f32 %v8549_v29  ;;  %v8639_v38 = vand.u32 2147483647, %v8626_v33  ;;  %vm1750_vm8 = vweird.f32 %v8549_v29  ;;  %v1756_v41 = vand.u32 2147483648, %v8549_v29 }
 0x267   : > { %7670 = vrcp.f32 %v8560_v42  ;;  %v7220_v63 = vadd.f32 -0.13877685, %v2021_v48  ;;  %v1754_v48 = vand.u32 2147483647, %v8549_v29  ;;  %vm1478_vm11 = vweird.f32 %v8560_v42 }
 0x268   : > { %7672 = vrcp.f32 %v8623_v14  ;;  %v8650_v16 = vadd.f32 1.0, %v8639_v38  ;;  %v8663_v44 = vadd.f32 1e-30, %v8639_v38  ;;  %v1771_v56 = vand.u32 2147483648, %v8623_v14 }
 0x269   : > { %v1318_v15 = vpop.f32.mrf.mxu2  ;;  %7674 = vrcp.f32 %v8632_v6  ;;  %v2053_v32 = vmul.f32 %v7220_v63, %v8606_v11  ;;  %vm1755_vm14 = vcmp.eq.f32.partialorder %v1754_v48, 8.507059e+37  ;;  %v7207_v27 = vadd.f32 -1.0, %v8597_v62 }
 0x26a   : > { %v8491_v40 = vadd.f32 %v8428_v45, %v1318_v15  ;;  %v1462_v15 = vadd.f32 %v8540_v13, %v1461_v0  ;;  %7676 = vrcp.f32 %v8650_v16 }
 0x26b   : > { %7678 = vrcp.f32 %v8663_v44 }
 0x26c   : > { %2320 = vrot.lane.b32.xlu1 %v8491_v40, %s8097_s16  ;;  %v8583_v59 = vpop.eup %7668  ;;  %v1466_v3 = vsel %vm1465_vm13, %v8540_v13, %v1462_v15  ;;  %v2068_v15 = vadd.f32 0.19977711, %v2052_v54 }
 0x26d   : > { %v8591_v5 = vpop.eup %7670  ;;  %v1746_v10 = vmul.f32 %v8583_v59, %v8549_v29  ;;  %v1471_v7 = vsel %vm1468_vm15, %v1470_v55, %v1466_v3  ;;  %vm1751_vm9 = vweird.f32 %v8583_v59  ;;  %v2069_v29 = vadd.f32 0.19977711, %v2053_v32 }
 0x26e   : > { %v1474_v60 = vmul.f32 %v8591_v5, %v8560_v42  ;;  %v1472_v2 = vmul.f32 -1.0, %v1471_v7  ;;  %v8655_v30 = vpop.eup %7672  ;;  %vm1479_vm10 = vweird.f32 %v8591_v5  ;;  %v2084_v43 = vmul.f32 %v2068_v15, %v8574_v53  ;;  %vm8678_vm12 = vmor %vm1750_vm8, %vm1751_vm9 }
 0x26f   : > { %v1747_v46 = vsub.f32 1.0, %v1746_v10  ;;  %v8646_v10 = vmul.f32 0.5, %v8491_v40  ;;  %v1942_v40 = vsel %vm1398_vm5, %v1744_v8, %v8476_v9  ;;  %v8671_v50 = vpop.eup %7674  ;;  %v1761_v7 = vmul.f32 %v8655_v30, %v8623_v14  ;;  %vm8693_vm13 = vmor %vm1478_vm11, %vm1479_vm10 }
 0x270   : > { %v1475_v39 = vsub.f32 1.0, %v1474_v60  ;;  %v8685_v55 = vsel %vm1382_vm2, %v1472_v2, %v1942_v40  ;;  %v7235_v40 = vadd.f32 -0.3333295, %v2084_v43  ;;  %vm1494_vm8 = vweird.f32 %v8671_v50 }
 0x271   : > { %v8602_v58 = vpop.f32.mrf.mxu2  ;;  %v1748_v0 = vmul.f32 %v8583_v59, %v1747_v46  ;;  %v8669_v3 = vand.u32 2147483647, %v8646_v10  ;;  %v8708_v2 = vmul.f32 %v8685_v55, %v8685_v55  ;;  %v1762_v54 = vsub.f32 1.0, %v1761_v7 }
 0x272   : > { %v1476_v13 = vmul.f32 %v8591_v5, %v1475_v39  ;;  %v1484_v39 = vand.u32 2147483648, %v8560_v42  ;;  %v8719_v35 = vadd.f32 %v8428_v45, %v8602_v58  ;;  %v14204_v7 = vmov 0.0  }
 0x273   : > { %v1749_v60 = vadd.f32 %v8583_v59, %v1748_v0  ;;  %v1482_v0 = vand.u32 2147483647, %v8560_v42  ;;  %v1489_v42 = vmul.f32 %v8671_v50, %v8632_v6  ;;  %v8715_v36 = vadd.f32 1e-30, %v8669_v3 }
 0x274   : > { %v1477_v46 = vadd.f32 %v8591_v5, %v1476_v13  ;;  %v1757_v13 = vor.u32 1.1754944e-38, %v1756_v41  ;;  %v7206_v41 = vadd.f32 -1.0, %v8524_v1  ;;  %2322 = vrot.lane.b32.xlu2 %v8719_v35, %s8097_s16  ;;  %vm1493_vm9 = vweird.f32 %v8632_v6 }
 0x275   : > { %v1753_v63 = vsel %vm8678_vm12, %v8583_v59, %v1749_v60  ;;  %v8704_v59 = vadd.f32 1.0, %v8669_v3  ;;  %v1485_v60 = vor.u32 1.1754944e-38, %v1484_v39  ;;  %vm1483_vm15 = vcmp.eq.f32.partialorder %v1482_v0, 8.507059e+37  ;;  %vm8805_vm11 = vmor %vm1493_vm9, %vm1494_vm8 }
 0x276   : > { %v1481_v15 = vsel %vm8693_vm13, %v8591_v5, %v1477_v46  ;;  %v1758_v32 = vsel %vm1755_vm14, %v1757_v13, %v1753_v63  ;;  %v8711_v5 = vpop.eup %7676  ;;  %v2085_v46 = vmul.f32 %v2069_v29, %v8606_v11  ;;  %v1490_v63 = vsub.f32 1.0, %v1489_v42 }
 0x277   : > { %v1486_v48 = vsel %vm1483_vm15, %v1485_v60, %v1481_v15  ;;  %v1759_v39 = vmul.f32 %v7206_v41, %v1758_v32  ;;  %7680 = vrcp.f32 %v8704_v59  ;;  %v8725_v0 = vpop.eup %7678  ;;  %v1972_v29 = vsel %vm1396_vm3, 0.7853982, %v14204_v7 }
 0x278   : > { %v2022_v13 = vmul.f32 0.080537446, %v8708_v2  ;;  %v2116_v15 = vmul.f32 %v7235_v40, %v8574_v53  ;;  %v1763_v42 = vmul.f32 %v8655_v30, %v1762_v54  ;;  %v1776_v60 = vmul.f32 %v8711_v5, %v8650_v16 }
 0x279   : > { %v1324_v12 = vpop.f32.mrf.mxu2  ;;  %v7236_v32 = vadd.f32 -0.3333295, %v2085_v46  ;;  %vm1399_vm3 = vcmp.gt.f32.partialorder %v8524_v1, 0.41421357  ;;  %v1487_v41 = vmul.f32 -1.0, %v1486_v48  ;;  %7682 = vrcp.f32 %v8715_v36 }
 0x27a   : > { %v8723_v43 = vadd.f32 %v8428_v45, %v1324_v12  ;;  %v1973_v12 = vsel %vm1397_vm6, 0.7853982, %v14204_v7  ;;  %v8751_v53 = vsel %vm1380_vm4, 1.5707964, %v1972_v29  ;;  %v1943_v40 = vsel %vm1399_vm3, %v1759_v39, %v8524_v1 }
 0x27b   : > { %v1491_v54 = vmul.f32 %v8671_v50, %v1490_v63  ;;  %v8761_v46 = vsel %vm1381_vm7, 1.5707964, %v1973_v12  ;;  %v7221_v48 = vadd.f32 -0.13877685, %v2022_v13  ;;  %vm1383_vm6 = vcmp.gt.f32.partialorder %v8524_v1, 2.4142137 }
 0x27c   : > { %2324 = vrot.lane.b32.xlu0 %v8723_v43, %s8097_s16  ;;  %v2132_v52 = vmul.f32 %v2116_v15, %v8568_v49  ;;  %v1764_v29 = vadd.f32 %v8655_v30, %v1763_v42  ;;  %vm1766_vm4 = vweird.f32 %v8655_v30  ;;  %v1777_v39 = vsub.f32 1.0, %v1776_v60 }
 0x27d   : > { %v8764_v7 = vpop.eup %7680  ;;  %v2117_v63 = vmul.f32 %v7236_v32, %v8606_v11  ;;  %v8772_v34 = vsel %vm1383_vm6, %v1487_v41, %v1943_v40  ;;  %vm1765_vm7 = vweird.f32 %v8623_v14  ;;  %v1492_v13 = vadd.f32 %v8671_v50, %v1491_v54 }
 0x27e   : > { %v1769_v15 = vand.u32 2147483647, %v8623_v14  ;;  %v2054_v60 = vmul.f32 %v7221_v48, %v8708_v2  ;;  %v1499_v11 = vand.u32 2147483648, %v8632_v6  ;;  %vm8784_vm10 = vmor %vm1765_vm7, %vm1766_vm4  ;;  %v1791_v41 = vmul.f32 %v8764_v7, %v8704_v59 }
 0x27f   : > { %v8779_v42 = vpop.eup %7682  ;;  %v8792_v40 = vmul.f32 %v8772_v34, %v8772_v34  ;;  %v1497_v14 = vand.u32 2147483647, %v8632_v6  ;;  %v1768_v54 = vsel %vm8784_vm10, %v8655_v30, %v1764_v29  ;;  %v8800_v48 = vadd.f32 %v2132_v52, %v8568_v49 }
 0x280   : > { %v2133_v31 = vmul.f32 %v2117_v63, %v8588_v61  ;;  %v1772_v6 = vor.u32 1.1754944e-38, %v1771_v56  ;;  %v1496_v30 = vsel %vm8805_vm11, %v8671_v50, %v1492_v13  ;;  %vm1770_vm12 = vcmp.eq.f32.partialorder %v1769_v15, 8.507059e+37 }
 0x281   : > { %v1327_v8 = vpop.f32.mrf.mxu2  ;;  %v1519_v49 = vmul.f32 %v8779_v42, %v8715_v36  ;;  %v2070_v52 = vadd.f32 0.19977711, %v2054_v60  ;;  %v1792_v32 = vsub.f32 1.0, %v1791_v41  ;;  %v2023_v26 = vmul.f32 0.080537446, %v8792_v40 }
 0x282   : > { %v8734_v58 = vadd.f32 %v8428_v45, %v1327_v8  ;;  %v1504_v8 = vmul.f32 %v8725_v0, %v8663_v44  ;;  %v1773_v63 = vsel %vm1770_vm12, %v1772_v6, %v1768_v54  ;;  %vm1384_vm13 = vcmp.gt.f32.partialorder %v8597_v62, 2.4142137 }
 0x283   : > { %vm1498_vm14 = vcmp.eq.f32.partialorder %v1497_v14, 8.507059e+37  ;;  %vm1781_vm15 = vweird.f32 %v8711_v5  ;;  %vm1780_vm4 = vweird.f32 %v8650_v16  ;;  %v1784_v50 = vand.u32 2147483647, %v8650_v16 }
 0x284   : > { %2326 = vrot.lane.b32.xlu1 %v8734_v58, %s8097_s16  ;;  %v1505_v12 = vsub.f32 1.0, %v1504_v8  ;;  %v1778_v8 = vmul.f32 %v8711_v5, %v1777_v39  ;;  %v1500_v39 = vor.u32 1.1754944e-38, %v1499_v11  ;;  %v1786_v13 = vand.u32 2147483648, %v8650_v16  ;;  %vm8829_vm9 = vmor %vm1780_vm4, %vm1781_vm15 }
 0x285   : > { %v1774_v15 = vmul.f32 %v7207_v27, %v1773_v63  ;;  %vm1509_vm7 = vweird.f32 %v8725_v0  ;;  %v1520_v60 = vsub.f32 1.0, %v1519_v49  ;;  %v8826_v11 = vadd.f32 %v2133_v31, %v8588_v61 }
 0x286   : > { %v1506_v29 = vmul.f32 %v8725_v0, %v1505_v12  ;;  %v1779_v56 = vadd.f32 %v8711_v5, %v1778_v8  ;;  %v1501_v28 = vsel %vm1498_vm14, %v1500_v39, %v1496_v30  ;;  %vm1400_vm8 = vcmp.gt.f32.partialorder %v8597_v62, 0.41421357 }
 0x287   : > { %v1793_v14 = vmul.f32 %v8764_v7, %v1792_v32  ;;  %v8835_v54 = vmul.f32 0.5, %v8719_v35  ;;  %v7222_v27 = vadd.f32 -0.13877685, %v2023_v26  ;;  %vm1508_vm10 = vweird.f32 %v8663_v44 }
 0x288   : > { %v1507_v12 = vadd.f32 %v8725_v0, %v1506_v29  ;;  %v1514_v16 = vand.u32 2147483648, %v8663_v44  ;;  %v1783_v31 = vsel %vm8829_vm9, %v8711_v5, %v1779_v56  ;;  %v2086_v61 = vmul.f32 %v2070_v52, %v8708_v2  ;;  %vm8843_vm11 = vmor %vm1508_vm10, %vm1509_vm7 }
 0x289   : > { %v1502_v8 = vmul.f32 -1.0, %v1501_v28  ;;  %v1512_v30 = vand.u32 2147483647, %v8663_v44  ;;  %v1787_v35 = vor.u32 1.1754944e-38, %v1786_v13  ;;  %v1944_v26 = vsel %vm1400_vm8, %v1774_v15, %v8597_v62  ;;  %v8855_v49 = vpop.f32.mrf.mxu2 }
 0x28a   : > { %v1511_v29 = vsel %vm8843_vm11, %v8725_v0, %v1507_v12  ;;  %vm1785_vm12 = vcmp.eq.f32.partialorder %v1784_v50, 8.507059e+37  ;;  %v1521_v5 = vmul.f32 %v8779_v42, %v1520_v60  ;;  %v1794_v39 = vadd.f32 %v8764_v7, %v1793_v14 }
 0x28b   : > { %v1788_v52 = vsel %vm1785_vm12, %v1787_v35, %v1783_v31  ;;  %vm1796_vm14 = vweird.f32 %v8764_v7  ;;  %v8860_v44 = vand.u32 2147483647, %v8835_v54  ;;  %v2055_v63 = vmul.f32 %v7222_v27, %v8792_v40 }
 0x28c   : > { %v1515_v32 = vor.u32 1.1754944e-38, %v1514_v16  ;;  %v7208_v56 = vadd.f32 -1.0, %v8639_v38  ;;  %v1801_v0 = vand.u32 2147483648, %v8704_v59  ;;  %v8867_v28 = vsel %vm1384_vm13, %v1502_v8, %v1944_v26 }
 0x28d   : > { %vm1513_vm15 = vcmp.eq.f32.partialorder %v1512_v30, 8.507059e+37  ;;  %vm1795_vm4 = vweird.f32 %v8704_v59  ;;  %v1799_v50 = vand.u32 2147483647, %v8704_v59  ;;  %v1522_v12 = vadd.f32 %v8779_v42, %v1521_v5 }
 0x28e   : > { %v1516_v13 = vsel %vm1513_vm15, %v1515_v32, %v1511_v29  ;;  %v1789_v15 = vmul.f32 %v7208_v56, %v1788_v52  ;;  %vm1524_vm7 = vweird.f32 %v8779_v42  ;;  %vm8873_vm9 = vmor %vm1795_vm4, %vm1796_vm14  ;;  %vm1401_vm10 = vcmp.gt.f32.partialorder %v8639_v38, 0.41421357 }
 0x28f   : > { %v1529_v41 = vand.u32 2147483648, %v8715_v36  ;;  %v1798_v14 = vsel %vm8873_vm9, %v8764_v7, %v1794_v39  ;;  %v8883_v59 = vadd.f32 1.0, %v8860_v44  ;;  %vm1523_vm11 = vweird.f32 %v8715_v36 }
 0x290   : > { %v1527_v27 = vand.u32 2147483647, %v8715_v36  ;;  %v1802_v16 = vor.u32 1.1754944e-38, %v1801_v0  ;;  %v8888_v31 = vmul.f32 0.5, %v8723_v43  ;;  %v2071_v8 = vadd.f32 0.19977711, %v2055_v63  ;;  %vm8894_vm12 = vmor %vm1523_vm11, %vm1524_vm7 }
 0x291   : > { %v8892_v6 = vmul.f32 %v8867_v28, %v8867_v28  ;;  %v1517_v30 = vmul.f32 -1.0, %v1516_v13  ;;  %vm1800_vm14 = vcmp.eq.f32.partialorder %v1799_v50, 8.507059e+37  ;;  %v1945_v7 = vsel %vm1401_vm10, %v1789_v15, %v8639_v38 }
 0x292   : > { %v1526_v36 = vsel %vm8894_vm12, %v8779_v42, %v1522_v12  ;;  %v1803_v43 = vsel %vm1800_vm14, %v1802_v16, %v1798_v14  ;;  %v8905_v26 = vadd.f32 1e-30, %v8860_v44  ;;  %v7237_v29 = vadd.f32 -0.3333295, %v2086_v61  ;;  %v1333_v42 = vpop.f32.mrf.mxu2 }
 0x293   : > { %v1530_v5 = vor.u32 1.1754944e-38, %v1529_v41  ;;  %v7209_v52 = vadd.f32 -1.0, %v8669_v3  ;;  %7684 = vrcp.f32 %v8883_v59  ;;  %v2164_v39 = vadd.f32 %v8800_v48, %v8751_v53 }
 0x294   : > { %vm1385_vm15 = vcmp.gt.f32.partialorder %v8639_v38, 2.4142137  ;;  %vm1528_vm4 = vcmp.eq.f32.partialorder %v1527_v27, 8.507059e+37  ;;  %v8913_v63 = vand.u32 2147483647, %v8888_v31  ;;  %v2087_v32 = vmul.f32 %v2071_v8, %v8792_v40 }
 0x295   : > { %v8918_v61 = vsel %vm1385_vm15, %v1517_v30, %v1945_v7  ;;  %v1531_v56 = vsel %vm1528_vm4, %v1530_v5, %v1526_v36  ;;  %v1804_v0 = vmul.f32 %v7209_v52, %v1803_v43  ;;  %v2165_v50 = vadd.f32 %v8826_v11, %v8761_v46 }
 0x296   : > { %v2024_v53 = vmul.f32 0.080537446, %v8892_v6  ;;  %7686 = vrcp.f32 %v8905_v26  ;;  %v8926_v48 = vmul.f32 %v8918_v61, %v8918_v61  ;;  %vm1402_vm7 = vcmp.gt.f32.partialorder %v8669_v3, 0.41421357 }
 0x297   : > { %v1532_v13 = vmul.f32 -1.0, %v1531_v56  ;;  %v8930_v15 = vadd.f32 1.0, %v8913_v63  ;;  %v2196_v60 = vsub.f32 0.0, %v2164_v39  ;;  %v2118_v41 = vmul.f32 %v7237_v29, %v8708_v2 }
 0x298   : > { %v7238_v46 = vadd.f32 -0.3333295, %v2087_v32  ;;  %v1946_v11 = vsel %vm1402_vm7, %v1804_v0, %v8669_v3  ;;  %v2197_v14 = vsub.f32 0.0, %v2165_v50  ;;  %v7223_v27 = vadd.f32 -0.13877685, %v2024_v53 }
 0x299   : > { %v8932_v12 = vpop.eup %7684  ;;  %vm2180_vm9 = vcmp.lt.f32.partialorder %v8434_v51, 0.0  ;;  %vm2181_vm11 = vcmp.lt.f32.partialorder %v8441_v37, 0.0  ;;  %vm1386_vm12 = vcmp.gt.f32.partialorder %v8669_v3, 2.4142137  ;;  %v8942_v16 = vadd.f32 1e-30, %v8913_v63 }
 0x29a   : > { %v2025_v2 = vmul.f32 0.080537446, %v8926_v48  ;;  %v8949_v30 = vsel %vm1386_vm12, %v1532_v13, %v1946_v11  ;;  %v1806_v35 = vmul.f32 %v8932_v12, %v8883_v59  ;;  %7688 = vrcp.f32 %v8930_v15  ;;  %v1336_v56 = vpop.f32.mrf.mxu2 }
 0x29b   : > { %v2212_v51 = vsel %vm2180_vm9, %v2196_v60, %v2164_v39  ;;  %v14313_v37 = vmov 0.0   ;;  %v2134_v36 = vmul.f32 %v2118_v41, %v8685_v55  ;;  %v2119_v43 = vmul.f32 %v7238_v46, %v8792_v40 }
 0x29c   : > { %v8944_v8 = vpop.eup %7686  ;;  %v1974_v7 = vsel %vm1398_vm5, 0.7853982, %v14313_v37  ;;  %v2213_v29 = vsel %vm2181_vm11, %v2197_v14, %v2165_v50  ;;  %v1975_v5 = vsel %vm1399_vm3, 0.7853982, %v14313_v37  ;;  %v2056_v52 = vmul.f32 %v7223_v27, %v8892_v6 }
 0x29d   : > { %v8964_v32 = vmul.f32 0.5, %v8734_v58  ;;  %v8968_v39 = vmul.f32 %v8949_v30, %v8949_v30  ;;  %v1534_v0 = vmul.f32 %v8944_v8, %v8905_v26  ;;  %7690 = vrcp.f32 %v8942_v16 }
 0x29e   : > { %v8975_v40 = vadd.f32 %v8428_v45, %v8855_v49  ;;  %v2228_v50 = vmul.f32 1.272, %v2212_v51  ;;  %v7224_v53 = vadd.f32 -0.13877685, %v2025_v2  ;;  %v1807_v13 = vsub.f32 1.0, %v1806_v35 }
 0x29f   : > { %v2150_v58 = vadd.f32 %v2134_v36, %v8685_v55  ;;  %v2135_v60 = vmul.f32 %v2119_v43, %v8772_v34  ;;  %v8982_v41 = vadd.f32 %v8428_v45, %v1333_v42  ;;  %v8985_v46 = vadd.f32 %v8428_v45, %v1336_v56 }
 0x2a0   : > { %2328 = vrot.lane.b32.xlu2 %v8975_v40, %s8097_s16  ;;  %v8987_v11 = vpop.eup %7688  ;;  %v2229_v49 = vmul.f32 1.272, %v2213_v29  ;;  %v1976_v14 = vsel %vm1400_vm8, 0.7853982, %v14313_v37  ;;  %v2072_v27 = vadd.f32 0.19977711, %v2056_v52  ;;  %v2057_v42 = vmul.f32 %v7224_v53, %v8926_v48 }
 0x2a1   : > { %v2026_v55 = vmul.f32 0.080537446, %v8968_v39  ;;  %v1535_v2 = vsub.f32 1.0, %v1534_v0  ;;  %v8994_v35 = vand.u32 2147483647, %v8964_v32  ;;  %2330 = vrot.lane.b32.xlu0 %v8982_v41, %s8097_s16  ;;  %2332 = vrot.lane.b32.xlu1 %v8985_v46, %s8097_s16  ;;  %v1808_v51 = vmul.f32 %v8932_v12, %v1807_v13 }
 0x2a2   : > { %v1990_v45 = vsel %vm1382_vm2, 1.5707964, %v1974_v7  ;;  %vm2182_vm5 = vcmp.lt.f32.partialorder %v8469_v4, 0.0  ;;  %v2151_v29 = vadd.f32 %v2135_v60, %v8772_v34  ;;  %v1821_v52 = vmul.f32 %v8987_v11, %v8930_v15 }
 0x2a3   : > { %v9004_v36 = vpop.eup %7690  ;;  %v2166_v43 = vadd.f32 %v2150_v58, %v1990_v45  ;;  %v9010_v56 = vmul.f32 1.442695, %v2228_v50  ;;  %v1991_v9 = vsel %vm1383_vm6, 1.5707964, %v1975_v5  ;;  %v9016_v7 = vsel %vm1384_vm13, 1.5707964, %v1976_v14 }
 0x2a4   : > { %v2088_v0 = vmul.f32 %v2072_v27, %v8892_v6  ;;  %v9019_v53 = vmul.f32 1.442695, %v2229_v49  ;;  %v7225_v13 = vadd.f32 -0.13877685, %v2026_v55  ;;  %v1536_v58 = vmul.f32 %v8944_v8, %v1535_v2 }
 0x2a5   : > { %v9023_v34 = vadd.f32 1.0, %v8994_v35  ;;  %v2073_v60 = vadd.f32 0.19977711, %v2057_v42  ;;  %v1809_v50 = vadd.f32 %v8932_v12, %v1808_v51  ;;  %vm1811_vm2 = vweird.f32 %v8932_v12 }
 0x2a6   : > { %v1549_v1 = vmul.f32 %v9004_v36, %v8942_v16  ;;  %v2198_v62 = vsub.f32 0.0, %v2166_v43  ;;  %v9029_v5 = vadd.f32 %v2151_v29, %v1991_v9  ;;  %v1816_v49 = vand.u32 2147483648, %v8883_v59 }
 0x2a7   : > { %v1822_v14 = vsub.f32 1.0, %v1821_v52  ;;  %v7239_v27 = vadd.f32 -0.3333295, %v2088_v0  ;;  %vm1810_vm3 = vweird.f32 %v8883_v59  ;;  %v1814_v55 = vand.u32 2147483647, %v8883_v59 }
 0x2a8   : > { %v9035_v2 = vadd.f32 1e-30, %v8994_v35  ;;  %v2058_v45 = vmul.f32 %v7225_v13, %v8968_v39  ;;  %v1537_v42 = vadd.f32 %v8944_v8, %v1536_v58  ;;  %vm1539_vm6 = vweird.f32 %v8944_v8  ;;  %vm9040_vm13 = vmor %vm1810_vm3, %vm1811_vm2 }
 0x2a9   : > { %7692 = vrcp.f32 %v9023_v34  ;;  %v2089_v29 = vmul.f32 %v2073_v60, %v8926_v48  ;;  %v1544_v52 = vand.u32 2147483648, %v8905_v26  ;;  %v1813_v59 = vsel %vm9040_vm13, %v8932_v12, %v1809_v50 }
 0x2aa   : > { %v1550_v9 = vsub.f32 1.0, %v1549_v1  ;;  %vm1538_vm8 = vweird.f32 %v8905_v26  ;;  %v1542_v0 = vand.u32 2147483647, %v8905_v26  ;;  %v1817_v13 = vor.u32 1.1754944e-38, %v1816_v49 }
 0x2ab   : > { %v1823_v58 = vmul.f32 %v8987_v11, %v1822_v14  ;;  %v2214_v25 = vsel %vm2182_vm5, %v2198_v62, %v2166_v43  ;;  %v2120_v24 = vmul.f32 %v7239_v27, %v8892_v6  ;;  %vm9056_vm14 = vmor %vm1538_vm8, %vm1539_vm6  ;;  %vm1815_vm4 = vcmp.eq.f32.partialorder %v1814_v55, 8.507059e+37 }
 0x2ac   : > { %7694 = vrcp.f32 %v9035_v2  ;;  %v2199_v12 = vsub.f32 0.0, %v9029_v5  ;;  %v2074_v50 = vadd.f32 0.19977711, %v2058_v45  ;;  %v1541_v26 = vsel %vm9056_vm14, %v8944_v8, %v1537_v42 }
 0x2ad   : > { %v1818_v1 = vsel %vm1815_vm4, %v1817_v13, %v1813_v59  ;;  %v7240_v49 = vadd.f32 -0.3333295, %v2089_v29  ;;  %v1545_v4 = vor.u32 1.1754944e-38, %v1544_v52  ;;  %v7210_v43 = vadd.f32 -1.0, %v8860_v44 }
 0x2ae   : > { %v1551_v6 = vmul.f32 %v9004_v36, %v1550_v9  ;;  %vm2183_vm9 = vcmp.lt.f32.partialorder %v8501_v47, 0.0  ;;  %vm1543_vm11 = vcmp.eq.f32.partialorder %v1542_v0, 8.507059e+37  ;;  %v1824_v14 = vadd.f32 %v8987_v11, %v1823_v58 }
 0x2af   : > { %v9067_v62 = vpop.eup %7692  ;;  %vm1826_vm5 = vweird.f32 %v8987_v11  ;;  %v9073_v27 = vmul.f32 0.5, %v8975_v40  ;;  %v2136_v8 = vmul.f32 %v2120_v24, %v8867_v28  ;;  %v1546_v55 = vsel %vm1543_vm11, %v1545_v4, %v1541_v26 }
 0x2b0   : > { %v1819_v45 = vmul.f32 %v7210_v43, %v1818_v1  ;;  %v1831_v42 = vand.u32 2147483648, %v8930_v15  ;;  %v2090_v51 = vmul.f32 %v2074_v50, %v8968_v39  ;;  %vm1403_vm2 = vcmp.gt.f32.partialorder %v8860_v44, 0.41421357 }
 0x2b1   : > { %vm1825_vm3 = vweird.f32 %v8930_v15  ;;  %v1829_v29 = vand.u32 2147483647, %v8930_v15  ;;  %v2121_v59 = vmul.f32 %v7240_v49, %v8926_v48  ;;  %v1552_v40 = vadd.f32 %v9004_v36, %v1551_v6 }
 0x2b2   : > { %v9081_v52 = vpop.eup %7694  ;;  %vm1554_vm6 = vweird.f32 %v9004_v36  ;;  %vm9086_vm13 = vmor %vm1825_vm3, %vm1826_vm5  ;;  %v1836_v9 = vmul.f32 %v9067_v62, %v9023_v34  ;;  %v1547_v0 = vmul.f32 -1.0, %v1546_v55  ;;  %v1559_v13 = vand.u32 2147483648, %v8942_v16  ;;  %v1339_v55 = vpop.f32.mrf.mxu2 }
 0x2b3   : > { %v1828_v15 = vsel %vm9086_vm13, %v8987_v11, %v1824_v14  ;;  %v9097_v48 = vand.u32 2147483647, %v9073_v27  ;;  %v1947_v58 = vsel %vm1403_vm2, %v1819_v45, %v8860_v44  ;;  %vm1553_vm8 = vweird.f32 %v8942_v16 }
 0x2b4   : > { %v1557_v60 = vand.u32 2147483647, %v8942_v16  ;;  %v1832_v50 = vor.u32 1.1754944e-38, %v1831_v42  ;;  %v2152_v26 = vadd.f32 %v2136_v8, %v8867_v28  ;;  %v7241_v1 = vadd.f32 -0.3333295, %v2090_v51  ;;  %vm9105_vm14 = vmor %vm1553_vm8, %vm1554_vm6 }
 0x2b5   : > { %vm1830_vm4 = vcmp.eq.f32.partialorder %v1829_v29, 8.507059e+37  ;;  %v1564_v11 = vmul.f32 %v9081_v52, %v9035_v2  ;;  %vm1387_vm11 = vcmp.gt.f32.partialorder %v8860_v44, 2.4142137  ;;  %v1556_v4 = vsel %vm9105_vm14, %v9004_v36, %v1552_v40 }
 0x2b6   : > { %v1833_v43 = vsel %vm1830_vm4, %v1832_v50, %v1828_v15  ;;  %v1837_v16 = vsub.f32 1.0, %v1836_v9  ;;  %v9117_v28 = vsel %vm1387_vm11, %v1547_v0, %v1947_v58  ;;  %v1560_v6 = vor.u32 1.1754944e-38, %v1559_v13 }
 0x2b7   : > { %v7211_v14 = vadd.f32 -1.0, %v8913_v63  ;;  %v9121_v8 = vadd.f32 1.0, %v9097_v48  ;;  %v2215_v45 = vsel %vm2183_vm9, %v2199_v12, %v9029_v5  ;;  %v1977_v36 = vsel %vm1401_vm10, 0.7853982, %v14313_v37 }
 0x2b8   : > { %v2137_v42 = vmul.f32 %v2121_v59, %v8918_v61  ;;  %vm1558_vm5 = vcmp.eq.f32.partialorder %v1557_v60, 8.507059e+37  ;;  %v2122_v51 = vmul.f32 %v7241_v1, %v8968_v39  ;;  %v1565_v24 = vsub.f32 1.0, %v1564_v11 }
 0x2b9   : > { %v1561_v29 = vsel %vm1558_vm5, %v1560_v6, %v1556_v4  ;;  %v1834_v40 = vmul.f32 %v7211_v14, %v1833_v43  ;;  %v9131_v9 = vmul.f32 1.272, %v2214_v25  ;;  %v9135_v0 = vmul.f32 %v9117_v28, %v9117_v28 }
 0x2ba   : > { %v1838_v47 = vmul.f32 %v9067_v62, %v1837_v16  ;;  %v9139_v5 = vadd.f32 1e-30, %v9097_v48  ;;  %v2168_v12 = vadd.f32 %v2152_v26, %v9016_v7  ;;  %v1993_v59 = vsel %vm1385_vm15, 1.5707964, %v1977_v36 }
 0x2bb   : > { %v1978_v39 = vsel %vm1402_vm7, 0.7853982, %v14313_v37  ;;  %7696 = vrcp.f32 %v9121_v8  ;;  %v9148_v25 = vmul.f32 1.272, %v2215_v45  ;;  %vm2184_vm10 = vcmp.lt.f32.partialorder %v8581_v57, 0.0 }
 0x2bc   : > { %vm1404_vm9 = vcmp.gt.f32.partialorder %v8913_v63, 0.41421357  ;;  %v1562_v13 = vmul.f32 -1.0, %v1561_v29  ;;  %v9153_v15 = vmul.f32 0.5, %v8982_v41  ;;  %v2153_v7 = vadd.f32 %v2137_v42, %v8918_v61 }
 0x2bd   : > { %v2138_v38 = vmul.f32 %v2122_v51, %v8949_v30  ;;  %v1948_v58 = vsel %vm1404_vm9, %v1834_v40, %v8913_v63  ;;  %v1566_v60 = vmul.f32 %v9081_v52, %v1565_v24  ;;  %v2027_v50 = vmul.f32 0.080537446, %v9135_v0  ;;  %v9201_v40 = vld [vmem:[%s8137_s29] ss:$0 sm:$0xff] }
 0x2be   : > { %v1839_v26 = vadd.f32 %v9067_v62, %v1838_v47  ;;  %vm1841_vm15 = vweird.f32 %v9067_v62  ;;  %7698 = vrcp.f32 %v9139_v5  ;;  %v2200_v41 = vsub.f32 0.0, %v2168_v12 }
 0x2bf   : > { %v1994_v61 = vsel %vm1386_vm12, 1.5707964, %v1978_v39  ;;  %vm1388_vm7 = vcmp.gt.f32.partialorder %v8913_v63, 2.4142137  ;;  %v1846_v1 = vand.u32 2147483648, %v9023_v34  ;;  %vm1840_vm3 = vweird.f32 %v9023_v34  ;;  %v2372_v63 = vld [vmem:[%s8142_s3] sm:$0xff] }
 0x2c0   : > { %v9171_v49 = vsel %vm1388_vm7, %v1562_v13, %v1948_v58  ;;  %v1844_v11 = vand.u32 2147483647, %v9023_v34  ;;  %v9176_v4 = vand.u32 2147483647, %v9153_v15  ;;  %v2169_v3 = vadd.f32 %v2153_v7, %v1993_v59  ;;  %vm9186_vm13 = vmor %vm1840_vm3, %vm1841_vm15  ;;  %v1342_v34 = vpop.f32.mrf.mxu2  ;;  %2440 = vmatpush.msra.mxu3 %v2372_v63 }
 0x2c1   : > { %v9178_v43 = vpop.eup %7696  ;;  %vm2185_vm12 = vcmp.lt.f32.partialorder %v8626_v33, 0.0  ;;  %v2154_v16 = vadd.f32 %v2138_v38, %v8949_v30  ;;  %v1567_v6 = vadd.f32 %v9081_v52, %v1566_v60  ;;  %vm1569_vm6 = vweird.f32 %v9081_v52 }
 0x2c2   : > { %v7226_v45 = vadd.f32 -0.13877685, %v2027_v50  ;;  %vm1568_vm8 = vweird.f32 %v9035_v2  ;;  %v1574_v36 = vand.u32 2147483648, %v9035_v2  ;;  %v1843_v30 = vsel %vm9186_vm13, %v9067_v62, %v1839_v26 }
 0x2c3   : > { %v9197_v42 = vmul.f32 %v9171_v49, %v9171_v49  ;;  %v1572_v51 = vand.u32 2147483647, %v9035_v2  ;;  %v1847_v29 = vor.u32 1.1754944e-38, %v1846_v1  ;;  %v9204_v24 = vadd.f32 %v9201_v40, %v1339_v55  ;;  %vm9208_vm14 = vmor %vm1568_vm8, %vm1569_vm6 }
 0x2c4   : > { %v9206_v47 = vpop.eup %7698  ;;  %vm1845_vm4 = vcmp.eq.f32.partialorder %v1844_v11, 8.507059e+37  ;;  %v1851_v62 = vmul.f32 %v9178_v43, %v9121_v8  ;;  %v9215_v39 = vadd.f32 1.0, %v9176_v4  ;;  %v9218_v2 = vadd.f32 %v9201_v40, %v1342_v34 }
 0x2c5   : > { %v2216_v55 = vsel %vm2184_vm10, %v2200_v41, %v2168_v12  ;;  %v2201_v13 = vsub.f32 0.0, %v2169_v3  ;;  %v1571_v7 = vsel %vm9208_vm14, %v9081_v52, %v1567_v6  ;;  %v1848_v38 = vsel %vm1845_vm4, %v1847_v29, %v1843_v30  ;;  %2334 = vrot.lane.b32.xlu2 %v9204_v24, %s8097_s16 }
 0x2c6   : > { %v2170_v58 = vadd.f32 %v2154_v16, %v1994_v61  ;;  %v2059_v60 = vmul.f32 %v7226_v45, %v9135_v0  ;;  %v1575_v50 = vor.u32 1.1754944e-38, %v1574_v36  ;;  %v7212_v26 = vadd.f32 -1.0, %v8994_v35  ;;  %2336 = vrot.lane.b32.xlu0 %v9218_v2, %s8097_s16 }
 0x2c7   : > { %v2028_v57 = vmul.f32 0.080537446, %v9197_v42  ;;  %vm1573_vm5 = vcmp.eq.f32.partialorder %v1572_v51, 8.507059e+37  ;;  %v1579_v12 = vmul.f32 %v9206_v47, %v9139_v5  ;;  %v9235_v52 = vadd.f32 1e-30, %v9176_v4 }
 0x2c8   : > { %v1576_v41 = vsel %vm1573_vm5, %v1575_v50, %v1571_v7  ;;  %v1849_v1 = vmul.f32 %v7212_v26, %v1848_v38  ;;  %v1852_v61 = vsub.f32 1.0, %v1851_v62  ;;  %7700 = vrcp.f32 %v9215_v39 }
 0x2c9   : > { %7702 = vpow2.f32 %v9010_v56  ;;  %v2248_v11 = vmul.f32 1.442695, %v9131_v9  ;;  %v2250_v16 = vmul.f32 1.442695, %v9148_v25  ;;  %v2232_v6 = vmul.f32 1.272, %v2216_v55 }
 0x2ca   : > { %v2217_v14 = vsel %vm2185_vm12, %v2201_v13, %v2169_v3  ;;  %v2202_v34 = vsub.f32 0.0, %v2170_v58  ;;  %v2075_v45 = vadd.f32 0.19977711, %v2059_v60  ;;  %vm1405_vm10 = vcmp.gt.f32.partialorder %v8994_v35, 0.41421357 }
 0x2cb   : > { %v7227_v36 = vadd.f32 -0.13877685, %v2028_v57  ;;  %v1577_v30 = vmul.f32 -1.0, %v1576_v41  ;;  %v1580_v51 = vsub.f32 1.0, %v1579_v12  ;;  %7704 = vrcp.f32 %v9235_v52 }
 0x2cc   : > { %7706 = vpow2.f32 %v9019_v53  ;;  %v1949_v56 = vsel %vm1405_vm10, %v1849_v1, %v8994_v35  ;;  %v1853_v9 = vmul.f32 %v9178_v43, %v1852_v61  ;;  %v9251_v33 = vmul.f32 0.5, %v8985_v46 }
 0x2cd   : > { %7708 = vpow2.f32 %v2248_v11  ;;  %v2233_v25 = vmul.f32 1.272, %v2217_v14  ;;  %vm2186_vm15 = vcmp.lt.f32.partialorder %v8646_v10, 0.0  ;;  %v1979_v3 = vsel %vm1403_vm2, 0.7853982, %v14313_v37 }
 0x2ce   : > { %v9257_v29 = vpop.eup %7700  ;;  %7710 = vpow2.f32 %v2250_v16  ;;  %v2252_v53 = vmul.f32 1.442695, %v2232_v6  ;;  %v2218_v59 = vsel %vm2186_vm15, %v2202_v34, %v2170_v58  ;;  %vm1389_vm3 = vcmp.gt.f32.partialorder %v8994_v35, 2.4142137 }
 0x2cf   : > { %v9260_v62 = vpop.eup %7702  ;;  %v2091_v46 = vmul.f32 %v2075_v45, %v9135_v0  ;;  %v2060_v55 = vmul.f32 %v7227_v36, %v9197_v42  ;;  %v9266_v10 = vsel %vm1389_vm3, %v1577_v30, %v1949_v56  ;;  %v1581_v13 = vmul.f32 %v9206_v47, %v1580_v51 }
 0x2d0   : > { %v9271_v7 = vsel %vm1387_vm11, 1.5707964, %v1979_v3  ;;  %v1854_v38 = vadd.f32 %v9178_v43, %v1853_v9  ;;  %vm1856_vm2 = vweird.f32 %v9178_v43  ;;  %v9276_v58 = vand.u32 2147483647, %v9251_v33 }
 0x2d1   : > { %v9278_v60 = vpop.eup %7704  ;;  %v2254_v50 = vmul.f32 1.442695, %v2233_v25  ;;  %v1980_v26 = vsel %vm1404_vm9, 0.7853982, %v14313_v37  ;;  %v1861_v57 = vand.u32 2147483648, %v9121_v8  ;;  %v1866_v44 = vmul.f32 %v9257_v29, %v9215_v39 }
 0x2d2   : > { %v9286_v12 = vpop.eup %7706  ;;  %v2234_v41 = vmul.f32 1.272, %v2218_v59  ;;  %v9290_v1 = vmul.f32 %v9266_v10, %v9266_v10  ;;  %vm1855_vm11 = vweird.f32 %v9121_v8  ;;  %v1859_v61 = vand.u32 2147483647, %v9121_v8 }
 0x2d3   : > { %v9294_v11 = vpop.eup %7708  ;;  %v7242_v16 = vadd.f32 -0.3333295, %v2091_v46  ;;  %v2076_v6 = vadd.f32 0.19977711, %v2060_v55  ;;  %v1582_v14 = vadd.f32 %v9206_v47, %v1581_v13  ;;  %vm1584_vm9 = vweird.f32 %v9206_v47  ;;  %vm9300_vm12 = vmor %vm1855_vm11, %vm1856_vm2 }
 0x2d4   : > { %v9304_v45 = vpop.eup %7710  ;;  %v1589_v36 = vand.u32 2147483648, %v9139_v5  ;;  %v1858_v8 = vsel %vm9300_vm12, %v9178_v43, %v1854_v38  ;;  %v1594_v30 = vmul.f32 %v9278_v60, %v9235_v52  ;;  %v9313_v51 = vadd.f32 1.0, %v9276_v58 }
 0x2d5   : > { %vm1583_vm6 = vweird.f32 %v9139_v5  ;;  %v1587_v56 = vand.u32 2147483647, %v9139_v5  ;;  %v1862_v9 = vor.u32 1.1754944e-38, %v1861_v57  ;;  %v1867_v25 = vsub.f32 1.0, %v1866_v44 }
 0x2d6   : > { %7712 = vpow2.f32 %v2252_v53  ;;  %v2029_v3 = vmul.f32 0.080537446, %v9290_v1  ;;  %vm9318_vm13 = vmor %vm1583_vm6, %vm1584_vm9  ;;  %vm1860_vm8 = vcmp.eq.f32.partialorder %v1859_v61, 8.507059e+37  ;;  %v9323_v43 = vadd.f32 1e-30, %v9276_v58 }
 0x2d7   : > { %v2123_v46 = vmul.f32 %v7242_v16, %v9135_v0  ;;  %v2092_v55 = vmul.f32 %v2076_v6, %v9197_v42  ;;  %v1586_v5 = vsel %vm9318_vm13, %v9206_v47, %v1582_v14  ;;  %v1863_v13 = vsel %vm1860_vm8, %v1862_v9, %v1858_v8 }
 0x2d8   : > { %v1590_v53 = vor.u32 1.1754944e-38, %v1589_v36  ;;  %v7213_v38 = vadd.f32 -1.0, %v9097_v48  ;;  %v1595_v57 = vsub.f32 1.0, %v1594_v30  ;;  %7714 = vrcp.f32 %v9313_v51 }
 0x2d9   : > { %v9334_v44 = vsel %vm1388_vm7, 1.5707964, %v1980_v26  ;;  %vm1588_vm14 = vcmp.eq.f32.partialorder %v1587_v56, 8.507059e+37  ;;  %v1868_v0 = vmul.f32 %v9257_v29, %v1867_v25  ;;  %v9338_v61 = vmul.f32 0.5, %v9204_v24  ;;  %v3804_v26 = vld [vmem:[%s8172_s6] sm:$0xff] }
 0x2da   : > { %v7228_v47 = vadd.f32 -0.13877685, %v2029_v3  ;;  %v1591_v16 = vsel %vm1588_vm14, %v1590_v53, %v1586_v5  ;;  %v1864_v6 = vmul.f32 %v7213_v38, %v1863_v13  ;;  %7716 = vrcp.f32 %v9323_v43  ;;  %3934 = vmatpush.msrb.mxu2 %v3804_v26  ;;  %v2309_v26 = vpop.permute.xlu1 %2308 }
 0x2db   : > { %7718 = vpow2.f32 %v2254_v50  ;;  %v7243_v14 = vadd.f32 -0.3333295, %v2092_v55  ;;  %v9344_v34 = vsel %vm1405_vm10, 0.7853982, %v14313_v37  ;;  %v9350_v8 = vmul.f32 1.442695, %v2234_v41 }
 0x2dc   : > { %v9348_v36 = vpop.eup %7712  ;;  %v2139_v24 = vmul.f32 %v2123_v46, %v9117_v28  ;;  %vm1406_vm7 = vcmp.gt.f32.partialorder %v9097_v48, 0.41421357  ;;  %v1596_v30 = vmul.f32 %v9278_v60, %v1595_v57  ;;  %v1592_v50 = vmul.f32 -1.0, %v1591_v16 }
 0x2dd   : > { %v1869_v56 = vadd.f32 %v9257_v29, %v1868_v0  ;;  %vm1871_vm4 = vweird.f32 %v9257_v29  ;;  %v9358_v9 = vand.u32 2147483647, %v9338_v61  ;;  %v2061_v41 = vmul.f32 %v7228_v47, %v9290_v1 }
 0x2de   : > { %v9360_v25 = vpop.eup %7714  ;;  %vm1390_vm5 = vcmp.gt.f32.partialorder %v9097_v48, 2.4142137  ;;  %v1950_v3 = vsel %vm1406_vm7, %v1864_v6, %v9097_v48  ;;  %v1876_v59 = vand.u32 2147483648, %v9215_v39  ;;  %v2124_v46 = vmul.f32 %v7243_v14, %v9197_v42 }
 0x2df   : > { %vm1870_vm10 = vweird.f32 %v9215_v39  ;;  %v1874_v55 = vand.u32 2147483647, %v9215_v39  ;;  %v9372_v5 = vmul.f32 0.5, %v9218_v2  ;;  %v1597_v53 = vadd.f32 %v9278_v60, %v1596_v30  ;;  %v1345_v30 = vpop.f32.mrf.mxu2 }
 0x2e0   : > { %v9374_v13 = vpop.eup %7716  ;;  %vm1598_vm15 = vweird.f32 %v9235_v52  ;;  %vm1599_vm2 = vweird.f32 %v9278_v60  ;;  %v1602_v38 = vand.u32 2147483647, %v9235_v52  ;;  %vm9382_vm11 = vmor %vm1870_vm10, %vm1871_vm4  ;;  %v9390_v2 = vsel %vm1390_vm5, %v1592_v50, %v1950_v3 }
 0x2e1   : > { %v9386_v39 = vpop.eup %7718  ;;  %v1873_v57 = vsel %vm9382_vm11, %v9257_v29, %v1869_v56  ;;  %v1881_v0 = vmul.f32 %v9360_v25, %v9313_v51  ;;  %v9398_v47 = vadd.f32 1.0, %v9358_v9  ;;  %v2077_v16 = vadd.f32 0.19977711, %v2061_v41  ;;  %vm9406_vm9 = vmor %vm1598_vm15, %vm1599_vm2  ;;  %v8041_v41 = vld [vmem:[%s8268_s15] sm:$0xff] }
 0x2e2   : > { %v1604_v6 = vand.u32 2147483648, %v9235_v52  ;;  %v1877_v14 = vor.u32 1.1754944e-38, %v1876_v59  ;;  %v9402_v63 = vadd.f32 1e-30, %v9358_v9  ;;  %vm1875_vm12 = vcmp.eq.f32.partialorder %v1874_v55, 8.507059e+37 }
 0x2e3   : > { %v1609_v29 = vmul.f32 %v9374_v13, %v9323_v43  ;;  %v9413_v56 = vand.u32 2147483647, %v9372_v5  ;;  %v2276_v3 = vmul.f32 %v8041_v41, %v9260_v62  ;;  %v2155_v59 = vadd.f32 %v2139_v24, %v9117_v28 }
 0x2e4   : > { %v9420_v42 = vmul.f32 %v9390_v2, %v9390_v2  ;;  %v1601_v52 = vsel %vm9406_vm9, %v9278_v60, %v1597_v53  ;;  %v1878_v55 = vsel %vm1875_vm12, %v1877_v14, %v1873_v57  ;;  %v1882_v23 = vsub.f32 1.0, %v1881_v0 }
 0x2e5   : > { %7720 = vrcp.f32 %v9398_v47  ;;  %v2356_v22 = vadd.f32 %v2309_v26, %v2276_v3  ;;  %v1346_v21 = vadd.f32 %v9201_v40, %v1345_v30  ;;  %v2140_v19 = vmul.f32 %v2124_v46, %v9171_v49 }
 0x2e6   : > { %v1605_v62 = vor.u32 1.1754944e-38, %v1604_v6  ;;  %v7214_v28 = vadd.f32 -1.0, %v9176_v4  ;;  %7722 = vrcp.f32 %v9402_v63  ;;  %v2093_v24 = vmul.f32 %v2077_v16, %v9290_v1  ;;  %v2311_v16 = vpop.permute.xlu2 %2310  ;;  %v8042_v6 = vld [vmem:[%s8268_s15 + $0x8] sm:$0xff] }
 0x2e7   : > { %vm1603_vm6 = vcmp.eq.f32.partialorder %v1602_v38, 8.507059e+37  ;;  %v1610_v50 = vsub.f32 1.0, %v1609_v29  ;;  %v9432_v60 = vadd.f32 1.0, %v9413_v56  ;;  %7251 = vmatmul.msk.f32.vlgmr.msra.gmra.mxu3 %vm14255_vm0, %v2356_v22  ;;  %7363 = vmatmul.msk.f32.vlgmr.msrb.gmra.mxu2 %vm14255_vm0, %v2356_v22  ;;  %v2030_v40 = vmul.f32 0.080537446, %v9420_v42 }
 0x2e8   : > { %v1606_v46 = vsel %vm1603_vm6, %v1605_v62, %v1601_v52  ;;  %v1879_v53 = vmul.f32 %v7214_v28, %v1878_v55  ;;  %v9437_v57 = vmul.f32 0.5, %v1346_v21  ;;  %2338 = vrot.lane.b32.xlu1 %v1346_v21, %s8097_s16  ;;  %7724 = vpow2.f32 %v9350_v8 }
 0x2e9   : > { %v9442_v38 = vadd.f32 %v2155_v59, %v9271_v7  ;;  %v1883_v0 = vmul.f32 %v9360_v25, %v1882_v23  ;;  %v2277_v14 = vmul.f32 %v8042_v6, %v9286_v12  ;;  %v2156_v22 = vadd.f32 %v2140_v19, %v9171_v49 }
 0x2ea   : > { %14334 = vst [vmem:[#allocation30_spill] sm:$0xff] %v9437_v57  ;;  %vm1391_vm13 = vcmp.gt.f32.partialorder %v9176_v4, 2.4142137  ;;  %vm1407_vm8 = vcmp.gt.f32.partialorder %v9176_v4, 0.41421357  ;;  %v1607_v8 = vmul.f32 -1.0, %v1606_v46  ;;  %v1611_v7 = vmul.f32 %v9374_v13, %v1610_v50 }
 0x2eb   : > { %v9451_v26 = vadd.f32 1e-30, %v9413_v56  ;;  %v9453_v21 = vpop.eup %7720  ;;  %7726 = vrcp.f32 %v9432_v60  ;;  %v9458_v23 = vand.u32 2147483647, %v9437_v57  ;;  %v7244_v19 = vadd.f32 -0.3333295, %v2093_v24 }
 0x2ec   : > { %v9460_v12 = vpop.eup %7722  ;;  %v7229_v49 = vadd.f32 -0.13877685, %v2030_v40  ;;  %v1951_v30 = vsel %vm1407_vm8, %v1879_v53, %v9176_v4  ;;  %v2357_v29 = vadd.f32 %v2311_v16, %v2277_v14  ;;  %vm1614_vm14 = vweird.f32 %v9374_v13 }
 0x2ed   : > { %v1884_v41 = vadd.f32 %v9360_v25, %v1883_v0  ;;  %vm1885_vm4 = vweird.f32 %v9313_v51  ;;  %vm1886_vm10 = vweird.f32 %v9360_v25  ;;  %v1889_v3 = vand.u32 2147483647, %v9313_v51 }
 0x2ee   : > { %v1891_v59 = vand.u32 2147483648, %v9313_v51  ;;  %v1896_v52 = vmul.f32 %v9453_v21, %v9398_v47  ;;  %7728 = vrcp.f32 %v9451_v26  ;;  %v9474_v55 = vpop.eup %7724  ;;  %v9478_v62 = vsel %vm1391_vm13, %v1607_v8, %v1951_v30  ;;  %vm9498_vm15 = vmor %vm1885_vm4, %vm1886_vm10 }
 0x2ef   : > { %v1612_v28 = vadd.f32 %v9374_v13, %v1611_v7  ;;  %v1624_v24 = vmul.f32 %v9460_v12, %v9402_v63  ;;  %v9484_v50 = vadd.f32 1.0, %v9458_v23  ;;  %7252 = vmatmul.msk.f32.gmra.mxu3 %vm14255_vm0, %v2357_v29  ;;  %7364 = vmatmul.msk.f32.gmra.mxu2 %vm14255_vm0, %v2357_v29  ;;  %v9490_v46 = vadd.f32 %v2156_v22, %v9334_v44 }
 0x2f0   : > { %v2125_v53 = vmul.f32 %v7244_v19, %v9290_v1  ;;  %v1619_v0 = vand.u32 2147483648, %v9323_v43  ;;  %v2062_v14 = vmul.f32 %v7229_v49, %v9420_v42  ;;  %vm1613_vm2 = vweird.f32 %v9323_v43 }
 0x2f1   : > { %v9502_v6 = vpop.eup %7726  ;;  %v1617_v44 = vand.u32 2147483647, %v9323_v43  ;;  %v1888_v1 = vsel %vm9498_vm15, %v9360_v25, %v1884_v41  ;;  %v9512_v22 = vmul.f32 %v9478_v62, %v9478_v62  ;;  %vm9516_vm11 = vmor %vm1613_vm2, %vm1614_vm14  ;;  %v1892_v8 = vor.u32 1.1754944e-38, %v1891_v59 }
 0x2f2   : > { %v1897_v7 = vsub.f32 1.0, %v1896_v52  ;;  %v9521_v19 = vadd.f32 1e-30, %v9458_v23  ;;  %v1616_v43 = vsel %vm9516_vm11, %v9374_v13, %v1612_v28  ;;  %vm1890_vm9 = vcmp.eq.f32.partialorder %v1889_v3, 8.507059e+37 }
 0x2f3   : > { %v1625_v25 = vsub.f32 1.0, %v1624_v24  ;;  %7730 = vrcp.f32 %v9484_v50  ;;  %v9530_v30 = vmul.f32 %v2125_v53, %v9266_v10  ;;  %v1620_v29 = vor.u32 1.1754944e-38, %v1619_v0 }
 0x2f4   : > { %v9527_v49 = vpop.eup %7728  ;;  %v1893_v41 = vsel %vm1890_vm9, %v1892_v8, %v1888_v1  ;;  %v1911_v59 = vmul.f32 %v9502_v6, %v9432_v60  ;;  %v2078_v52 = vadd.f32 0.19977711, %v2062_v14  ;;  %vm14222_vm12 = vcmp.gt.f32.partialorder %v9276_v58, 2.4142137 }
 0x2f5   : > { %vm1408_vm6 = vcmp.gt.f32.partialorder %v9276_v58, 0.41421357  ;;  %vm1618_vm14 = vcmp.eq.f32.partialorder %v1617_v44, 8.507059e+37  ;;  %v7215_v13 = vadd.f32 -1.0, %v9276_v58  ;;  %v2031_v3 = vmul.f32 0.080537446, %v9512_v22 }
 0x2f6   : > { %v1621_v28 = vsel %vm1618_vm14, %v1620_v29, %v1616_v43  ;;  %v1898_v24 = vmul.f32 %v9453_v21, %v1897_v7  ;;  %7732 = vrcp.f32 %v9521_v19  ;;  %v1626_v0 = vmul.f32 %v9460_v12, %v1625_v25  ;;  %v2313_v43 = vpop.permute.xlu0 %2312 }
 0x2f7   : > { %v1894_v53 = vmul.f32 %v7215_v13, %v1893_v41  ;;  %vm1628_vm4 = vweird.f32 %v9402_v63  ;;  %v1639_v16 = vmul.f32 %v9527_v49, %v9451_v26  ;;  %v1632_v14 = vand.u32 2147483647, %v9402_v63  ;;  %v8043_v13 = vld [vmem:[%s8268_s15 + $0x10] sm:$0xff] }
 0x2f8   : > { %vm1900_vm10 = vweird.f32 %v9398_v47  ;;  %vm1901_vm15 = vweird.f32 %v9453_v21  ;;  %v1912_v44 = vsub.f32 1.0, %v1911_v59  ;;  %vm1629_vm2 = vweird.f32 %v9460_v12 }
 0x2f9   : > { %v9547_v1 = vpop.eup %7730  ;;  %v1634_v51 = vand.u32 2147483648, %v9402_v63  ;;  %v1904_v8 = vand.u32 2147483647, %v9398_v47  ;;  %v1906_v7 = vand.u32 2147483648, %v9398_v47  ;;  %v9554_v25 = vmul.f32 %v2078_v52, %v9420_v42  ;;  %vm9567_vm11 = vmor %vm1900_vm10, %vm1901_vm15  ;;  %v2509_v52 = vld [vmem:[%s8152_s14 + $0x18] sm:$0xff] }
 0x2fa   : > { %v1622_v29 = vmul.f32 -1.0, %v1621_v28  ;;  %v1899_v41 = vadd.f32 %v9453_v21, %v1898_v24  ;;  %v2278_v59 = vmul.f32 %v8043_v13, %v9294_v11  ;;  %v7230_v40 = vadd.f32 -0.13877685, %v2031_v3  ;;  %vm9577_vm9 = vmor %vm1628_vm4, %vm1629_vm2  ;;  %2574 = vmatpush.msrb.mxu0 %v2509_v52 }
 0x2fb   : > { %v1952_v18 = vsel %vm1408_vm6, %v1894_v53, %v9276_v58  ;;  %v1627_v20 = vadd.f32 %v9460_v12, %v1626_v0  ;;  %v1640_v28 = vsub.f32 1.0, %v1639_v16  ;;  %v7216_v3 = vadd.f32 -1.0, %v9358_v9 }
 0x2fc   : > { %v9571_v24 = vpop.eup %7732  ;;  %v1913_v53 = vmul.f32 %v9502_v6, %v1912_v44  ;;  %v1926_v47 = vmul.f32 %v9547_v1, %v9484_v50  ;;  %v2358_v0 = vadd.f32 %v2313_v43, %v2278_v59  ;;  %vm9585_vm14 = vcmp.eq.f32.partialorder %v1632_v14, 8.507059e+37 }
 0x2fd   : > { %v1635_v13 = vor.u32 1.1754944e-38, %v1634_v51  ;;  %vm9589_vm10 = vcmp.eq.f32.partialorder %v1904_v8, 8.507059e+37  ;;  %v1907_v17 = vor.u32 1.1754944e-38, %v1906_v7  ;;  %v9595_v57 = vsel %vm14222_vm12, %v1622_v29, %v1952_v18  ;;  %v8044_v29 = vld [vmem:[%s8268_s15 + $0x18] sm:$0xff] }
 0x2fe   : > { %v1903_v44 = vsel %vm9567_vm11, %v9453_v21, %v1899_v41  ;;  %vm1915_vm4 = vweird.f32 %v9432_v60  ;;  %vm1916_vm15 = vweird.f32 %v9502_v6  ;;  %7253 = vmatmul.msk.f32.gmra.mxu3 %vm14255_vm0, %v2358_v0  ;;  %7365 = vmatmul.msk.f32.gmra.mxu2 %vm14255_vm0, %v2358_v0  ;;  %v1631_v14 = vsel %vm9577_vm9, %v9460_v12, %v1627_v20  ;;  %v8045_v12 = vld [vmem:[%s8268_s15 + $0x20] sm:$0xff] }
 0x2ff   : > { %v1641_v18 = vmul.f32 %v9527_v49, %v1640_v28  ;;  %v1921_v51 = vand.u32 2147483648, %v9432_v60  ;;  %v1654_v21 = vmul.f32 %v9571_v24, %v9521_v19  ;;  %v1914_v8 = vadd.f32 %v9502_v6, %v1913_v53  ;;  %vm9624_vm9 = vmor %vm1915_vm4, %vm1916_vm15  ;;  %v2315_v28 = vpop.permute.xlu1 %2314 }
 0x300   : > { %v1919_v7 = vand.u32 2147483647, %v9432_v60  ;;  %v1927_v43 = vsub.f32 1.0, %v1926_v47  ;;  %v2279_v41 = vmul.f32 %v8044_v29, %v9304_v45  ;;  %v1908_v59 = vsel %vm9589_vm10, %v1907_v17, %v1903_v44  ;;  %v2508_v45 = vld [vmem:[%s8152_s14 + $0x10] sm:$0xff] }
 0x301   : > { %vm1643_vm2 = vweird.f32 %v9451_v26  ;;  %vm1644_vm11 = vweird.f32 %v9527_v49  ;;  %v1647_v20 = vand.u32 2147483647, %v9451_v26  ;;  %v9632_v17 = vmul.f32 %v9595_v57, %v9595_v57  ;;  %2575 = vmatpush.msrb.mxu0 %v2508_v45 }
 0x302   : > { %vm1393_vm10 = vcmp.gt.f32.partialorder %v9358_v9, 2.4142137  ;;  %v1649_v11 = vand.u32 2147483648, %v9451_v26  ;;  %v2359_v53 = vadd.f32 %v2315_v28, %v2279_v41  ;;  %v1636_v60 = vsel %vm9585_vm14, %v1635_v13, %v1631_v14  ;;  %vm9644_vm15 = vmor %vm1643_vm2, %vm1644_vm11  ;;  %v2317_v28 = vpop.permute.xlu2 %2316 }
 0x303   : > { %v1642_v47 = vadd.f32 %v9527_v49, %v1641_v18  ;;  %v1922_v0 = vor.u32 1.1754944e-38, %v1921_v51  ;;  %v1655_v63 = vsub.f32 1.0, %v1654_v21  ;;  %vm2187_vm4 = vcmp.lt.f32.partialorder %v8835_v54, 0.0 }
 0x304   : > { %v1909_v44 = vmul.f32 %v7216_v3, %v1908_v59  ;;  %v1918_v16 = vsel %vm9624_vm9, %v9502_v6, %v1914_v8  ;;  %vm1920_vm14 = vcmp.eq.f32.partialorder %v1919_v7, 8.507059e+37  ;;  %v1928_v13 = vmul.f32 %v9547_v1, %v1927_v43 }
 0x305   : > { %v2063_v14 = vmul.f32 %v7230_v40, %v9512_v22  ;;  %vm14223_vm1 = vcmp.gt.f32.partialorder %v9358_v9, 0.41421357  ;;  %vm9654_vm12 = vcmp.eq.f32.partialorder %v1647_v20, 8.507059e+37  ;;  %v7217_v26 = vadd.f32 -1.0, %v9413_v56 }
 0x306   : > { %v1637_v18 = vmul.f32 -1.0, %v1636_v60  ;;  %v1650_v51 = vor.u32 1.1754944e-38, %v1649_v11  ;;  %vm1930_vm2 = vweird.f32 %v9484_v50  ;;  %vm1931_vm11 = vweird.f32 %v9547_v1  ;;  %7254 = vmatmul.msk.f32.gmra.mxu3 %vm14255_vm0, %v2359_v53  ;;  %7366 = vmatmul.msk.f32.gmra.mxu2 %vm14255_vm0, %v2359_v53 }
 0x307   : > { %v1646_v40 = vsel %vm9644_vm15, %v9527_v49, %v1642_v47  ;;  %v1923_v6 = vsel %vm1920_vm14, %v1922_v0, %v1918_v16  ;;  %v1656_v21 = vmul.f32 %v9571_v24, %v1655_v63  ;;  %v1936_v8 = vand.u32 2147483648, %v9484_v50  ;;  %vm9678_vm14 = vmor %vm1930_vm2, %vm1931_vm11 }
 0x308   : > { %v2032_v7 = vmul.f32 0.080537446, %v9632_v17  ;;  %v1953_v43 = vsel %vm14223_vm1, %v1909_v44, %v9358_v9  ;;  %v1929_v41 = vadd.f32 %v9547_v1, %v1928_v13  ;;  %v1934_v59 = vand.u32 2147483647, %v9484_v50 }
 0x309   : > { %v2079_v20 = vadd.f32 0.19977711, %v2063_v14  ;;  %vm1658_vm9 = vweird.f32 %v9521_v19  ;;  %vm1659_vm15 = vweird.f32 %v9571_v24  ;;  %v2280_v52 = vmul.f32 %v8045_v12, %v9348_v36 }
 0x30a   : > { %vm1410_vm1 = vcmp.gt.f32.partialorder %v9413_v56, 0.41421357  ;;  %v1651_v45 = vsel %vm9654_vm12, %v1650_v51, %v1646_v40  ;;  %v1924_v11 = vmul.f32 %v7217_v26, %v1923_v6  ;;  %v1664_v53 = vand.u32 2147483648, %v9521_v19  ;;  %vm9696_vm2 = vmor %vm1658_vm9, %vm1659_vm15  ;;  %v2319_v51 = vpop.permute.xlu0 %2318 }
 0x30b   : > { %v9690_v60 = vsel %vm1393_vm10, %v1637_v18, %v1953_v43  ;;  %v1657_v50 = vadd.f32 %v9571_v24, %v1656_v21  ;;  %v1662_v47 = vand.u32 2147483647, %v9521_v19  ;;  %v1937_v0 = vor.u32 1.1754944e-38, %v1936_v8  ;;  %v8046_v8 = vld [vmem:[%s8268_s15 + $0x28] sm:$0xff] }
 0x30c   : > { %v7231_v63 = vadd.f32 -0.13877685, %v2032_v7  ;;  %v1933_v44 = vsel %vm9678_vm14, %v9547_v1, %v1929_v41  ;;  %vm1935_vm12 = vcmp.eq.f32.partialorder %v1934_v59, 8.507059e+37  ;;  %v2360_v29 = vadd.f32 %v2317_v28, %v2280_v52 }
 0x30d   : > { %v14357_v16 = vsub.f32 0.0, %v9442_v38  ;;  %v7245_v14 = vadd.f32 -0.3333295, %v9554_v25  ;;  %vm1394_vm11 = vcmp.gt.f32.partialorder %v9413_v56, 2.4142137  ;;  %v1652_v19 = vmul.f32 -1.0, %v1651_v45 }
 0x30e   : > { %v9712_v3 = vmul.f32 %v9690_v60, %v9690_v60  ;;  %v1954_v1 = vsel %vm1410_vm1, %v1924_v11, %v9413_v56  ;;  %v1665_v26 = vor.u32 1.1754944e-38, %v1664_v53  ;;  %v7218_v18 = vadd.f32 -1.0, %v9458_v23  ;;  %7255 = vmatmul.msk.f32.gmra.mxu3 %vm14255_vm0, %v2360_v29  ;;  %7367 = vmatmul.msk.f32.gmra.mxu2 %vm14255_vm0, %v2360_v29 }
 0x30f   : > { %v2219_v13 = vsel %vm2187_vm4, %v14357_v16, %v9442_v38  ;;  %v2095_v54 = vmul.f32 %v2079_v20, %v9512_v22  ;;  %v1661_v38 = vsel %vm9696_vm2, %v9571_v24, %v1657_v50  ;;  %vm1663_vm4 = vcmp.eq.f32.partialorder %v1662_v47, 8.507059e+37  ;;  %v2321_v47 = vpop.permute.xlu1 %2320 }
 0x310   : > { %v1938_v25 = vsel %vm1935_vm12, %v1937_v0, %v1933_v44  ;;  %v2204_v40 = vsub.f32 0.0, %v9490_v46  ;;  %v2157_v6 = vadd.f32 %v9530_v30, %v9266_v10  ;;  %v2064_v21 = vmul.f32 %v7231_v63, %v9632_v17  ;;  %v8047_v44 = vld [vmem:[%s8268_s15 + $0x30] sm:$0xff] }
 0x311   : > { %v2281_v7 = vmul.f32 %v8046_v8, %v9386_v39  ;;  %v2235_v43 = vmul.f32 1.272, %v2219_v13  ;;  %vm2188_vm9 = vcmp.lt.f32.partialorder %v8888_v31, 0.0  ;;  %v2126_v41 = vmul.f32 %v7245_v14, %v9420_v42 }
 0x312   : > { %v9734_v24 = vsel %vm1394_vm11, %v1652_v19, %v1954_v1  ;;  %v2033_v59 = vmul.f32 0.080537446, %v9712_v3  ;;  %v1666_v20 = vsel %vm1663_vm4, %v1665_v26, %v1661_v38  ;;  %v1939_v49 = vmul.f32 %v7218_v18, %v1938_v25 }
 0x313   : > { %v2361_v12 = vadd.f32 %v2319_v51, %v2281_v7  ;;  %v1997_v10 = vsel %vm1389_vm3, 1.5707964, %v9344_v34  ;;  %v7246_v39 = vadd.f32 -0.3333295, %v2095_v54  ;;  %vm1411_vm15 = vcmp.gt.f32.partialorder %v9458_v23, 0.41421357 }
 0x314   : > { %v2220_v31 = vsel %vm2188_vm9, %v2204_v40, %v9490_v46  ;;  %v2173_v42 = vadd.f32 %v2157_v6, %v1997_v10  ;;  %v2080_v30 = vadd.f32 0.19977711, %v2064_v21  ;;  %v9744_v52 = vmul.f32 %v9734_v24, %v9734_v24  ;;  %v2507_v34 = vld [vmem:[%s8152_s14 + $0x8] sm:$0xff] }
 0x315   : > { %v2258_v28 = vmul.f32 1.442695, %v2235_v43  ;;  %v1667_v45 = vmul.f32 -1.0, %v1666_v20  ;;  %v2142_v11 = vmul.f32 %v2126_v41, %v9390_v2  ;;  %v7232_v53 = vadd.f32 -0.13877685, %v2033_v59  ;;  %2576 = vmatpush.msrb.mxu0 %v2507_v34  ;;  %v2323_v43 = vpop.permute.xlu2 %2322 }
 0x316   : > { %vm1395_vm14 = vcmp.gt.f32.partialorder %v9458_v23, 2.4142137  ;;  %v1955_v35 = vsel %vm1411_vm15, %v1939_v49, %v9458_v23  ;;  %7256 = vmatmul.msk.f32.gmra.mxu3 %vm14255_vm0, %v2361_v12  ;;  %7368 = vmatmul.msk.f32.gmra.mxu2 %vm14255_vm0, %v2361_v12  ;;  %v2236_v46 = vmul.f32 1.272, %v2220_v31  ;;  %v2127_v50 = vmul.f32 %v7246_v39, %v9512_v22  ;;  %v8048_v49 = vld [vmem:[%s8268_s15 + $0x38] sm:$0xff]  ;;  %v14360_v23 = vld [vmem:[#allocation30_spill] sm:$0xff] }
 0x317   : > { %v2205_v0 = vsub.f32 0.0, %v2173_v42  ;;  %v2096_v63 = vmul.f32 %v2080_v30, %v9632_v17  ;;  %v2034_v36 = vmul.f32 0.080537446, %v9744_v52  ;;  %v2282_v29 = vmul.f32 %v8047_v44, %v9474_v55 }
 0x318   : > { %7734 = vpow2.f32 %v2258_v28  ;;  %v9761_v16 = vsel %vm1395_vm14, %v1667_v45, %v1955_v35  ;;  %v1982_v13 = vsel %vm1406_vm7, 0.7853982, %v14313_v37  ;;  %v2158_v22 = vadd.f32 %v2142_v11, %v9390_v2 }
 0x319   : > { %v2065_v14 = vmul.f32 %v7232_v53, %v9712_v3  ;;  %v2362_v19 = vadd.f32 %v2321_v47, %v2282_v29  ;;  %v2260_v1 = vmul.f32 1.442695, %v2236_v46  ;;  %vm2189_vm3 = vcmp.lt.f32.partialorder %v8964_v32, 0.0  ;;  %v2325_v53 = vpop.permute.xlu0 %2324 }
 0x31a   : > { %v2143_v26 = vmul.f32 %v2127_v50, %v9478_v62  ;;  %v2221_v55 = vsel %vm2189_vm3, %v2205_v0, %v2173_v42  ;;  %v7247_v18 = vadd.f32 -0.3333295, %v2096_v63  ;;  %v7233_v54 = vadd.f32 -0.13877685, %v2034_v36 }
 0x31b   : > { %v9772_v38 = vmul.f32 %v9761_v16, %v9761_v16  ;;  %v1998_v25 = vsel %vm1390_vm5, 1.5707964, %v1982_v13  ;;  %v2081_v2 = vadd.f32 0.19977711, %v2065_v14  ;;  %7736 = vpow2.f32 %v2260_v1  ;;  %v2327_v1 = vpop.permute.xlu1 %2326 }
 0x31c   : > { %v2174_v51 = vadd.f32 %v2158_v22, %v1998_v25  ;;  %v2237_v40 = vmul.f32 1.272, %v2221_v55  ;;  %v1983_v6 = vsel %vm1407_vm8, 0.7853982, %v14313_v37  ;;  %v2159_v21 = vadd.f32 %v2143_v26, %v9478_v62  ;;  %v8050_v55 = vld [vmem:[%s8268_s15 + $0x48] sm:$0xff] }
 0x31d   : > { %v2128_v8 = vmul.f32 %v7247_v18, %v9632_v17  ;;  %v2066_v48 = vmul.f32 %v7233_v54, %v9744_v52  ;;  %v2035_v7 = vmul.f32 0.080537446, %v9772_v38  ;;  %v1999_v59 = vsel %vm1391_vm13, 1.5707964, %v1983_v6 }
 0x31e   : > { %7257 = vmatmul.msk.f32.gmra.mxu3 %vm14255_vm0, %v2362_v19  ;;  %7369 = vmatmul.msk.f32.gmra.mxu2 %vm14255_vm0, %v2362_v19  ;;  %v7735_v32 = vpop.eup %7734  ;;  %v2206_v41 = vsub.f32 0.0, %v2174_v51  ;;  %v2097_v20 = vmul.f32 %v2081_v2, %v9712_v3  ;;  %v2262_v10 = vmul.f32 1.442695, %v2237_v40  ;;  %v2175_v39 = vadd.f32 %v2159_v21, %v1999_v59  ;;  %v8051_v59 = vld [vmem:[%s8268_s15 + $0x50] sm:$0xff] }
 0x31f   : > { %v2283_v12 = vmul.f32 %v8048_v49, %v7735_v32  ;;  %v2144_v31 = vmul.f32 %v2128_v8, %v9595_v57  ;;  %v2082_v62 = vadd.f32 0.19977711, %v2066_v48  ;;  %v7234_v17 = vadd.f32 -0.13877685, %v2035_v7  ;;  %v2506_v8 = vld [vmem:[%s8152_s14] sm:$0xff] }
 0x320   : > { %vm2190_vm7 = vcmp.lt.f32.partialorder %v9073_v27, 0.0  ;;  %v7248_v45 = vadd.f32 -0.3333295, %v2097_v20  ;;  %7738 = vpow2.f32 %v2262_v10  ;;  %v2207_v4 = vsub.f32 0.0, %v2175_v39  ;;  %v8049_v27 = vld [vmem:[%s8268_s15 + $0x40] sm:$0xff]  ;;  %2577 = vmatpush.msrb.mxu0 %v2506_v8 }
 0x321   : > { %v2363_v42 = vadd.f32 %v2323_v43, %v2283_v12  ;;  %v7737_v30 = vpop.eup %7736  ;;  %v2222_v28 = vsel %vm2190_vm7, %v2206_v41, %v2174_v51  ;;  %v1984_v11 = vsel %vm1408_vm6, 0.7853982, %v14313_v37  ;;  %v2160_v35 = vadd.f32 %v2144_v31, %v9595_v57 }
 0x322   : > { %v2098_v34 = vmul.f32 %v2082_v62, %v9744_v52  ;;  %v2067_v46 = vmul.f32 %v7234_v17, %v9772_v38  ;;  %v2284_v50 = vmul.f32 %v8049_v27, %v7737_v30  ;;  %v2238_v47 = vmul.f32 1.272, %v2222_v28  ;;  %v8052_v30 = vld [vmem:[%s8268_s15 + $0x58] sm:$0xff] }
 0x323   : > { %v2129_v0 = vmul.f32 %v7248_v45, %v9712_v3  ;;  %vm2191_vm5 = vcmp.lt.f32.partialorder %v9153_v15, 0.0  ;;  %vm14358_vm13 = vcmp.gt.f32.partialorder %v9276_v58, 2.4142137  ;;  %vm14359_vm8 = vcmp.gt.f32.partialorder %v9358_v9, 0.41421357  ;;  %v2329_v9 = vpop.permute.xlu2 %2328 }
 0x324   : > { %v2364_v63 = vadd.f32 %v2325_v53, %v2284_v50  ;;  %v2000_v36 = vsel %vm14358_vm13, 1.5707964, %v1984_v11  ;;  %v2223_v44 = vsel %vm2191_vm5, %v2207_v4, %v2175_v39  ;;  %v7249_v13 = vadd.f32 -0.3333295, %v2098_v34  ;;  %v8053_v50 = vld [vmem:[%s8268_s15 + $0x60] sm:$0xff] }
 0x325   : > { %v2176_v29 = vadd.f32 %v2160_v35, %v2000_v36  ;;  %v2083_v57 = vadd.f32 0.19977711, %v2067_v46  ;;  %v2264_v14 = vmul.f32 1.442695, %v2238_v47  ;;  %v2145_v19 = vmul.f32 %v2129_v0, %v9690_v60  ;;  %v2333_v46 = vpop.permute.xlu1 %2332 }
 0x326   : > { %7258 = vmatmul.msk.f32.gmra.mxu3 %vm14255_vm0, %v2363_v42  ;;  %7370 = vmatmul.msk.f32.gmra.mxu2 %vm14255_vm0, %v2363_v42  ;;  %v7739_v22 = vpop.eup %7738  ;;  %v2239_v3 = vmul.f32 1.272, %v2223_v44  ;;  %v2130_v15 = vmul.f32 %v7249_v13, %v9744_v52  ;;  %v1985_v54 = vsel %vm14359_vm8, 0.7853982, %v14313_v37  ;;  %vm2192_vm6 = vcmp.lt.f32.partialorder %v9251_v33, 0.0 }
 0x327   : > { %v2208_v26 = vsub.f32 0.0, %v2176_v29  ;;  %v2099_v58 = vmul.f32 %v2083_v57, %v9772_v38  ;;  %v2285_v18 = vmul.f32 %v8050_v55, %v7739_v22  ;;  %7740 = vpow2.f32 %v2264_v14  ;;  %v8054_v57 = vld [vmem:[%s8268_s15 + $0x68] sm:$0xff] }
 0x328   : > { %v2161_v25 = vadd.f32 %v2145_v19, %v9690_v60  ;;  %v2266_v2 = vmul.f32 1.442695, %v2239_v3  ;;  %v2146_v40 = vmul.f32 %v2130_v15, %v9734_v24  ;;  %v2001_v6 = vsel %vm1393_vm10, 1.5707964, %v1985_v54  ;;  %v8056_v54 = vld [vmem:[%s8268_s15 + $0x78] sm:$0xff] }
 0x329   : > { %v2365_v51 = vadd.f32 %v2327_v1, %v2285_v18  ;;  %v2224_v32 = vsel %vm2192_vm6, %v2208_v26, %v2176_v29  ;;  %v7250_v52 = vadd.f32 -0.3333295, %v2099_v58  ;;  %v1986_v33 = vsel %vm1410_vm1, 0.7853982, %v14313_v37  ;;  %v2646_v29 = vld [vmem:[%s8162_s24 + $0x18] sm:$0xff]  ;;  %v8055_v26 = vld [vmem:[%s8268_s15 + $0x70] sm:$0xff] }
 0x32a   : > { %v2177_v21 = vadd.f32 %v2161_v25, %v2001_v6  ;;  %7742 = vpow2.f32 %v2266_v2  ;;  %v2240_v60 = vmul.f32 1.272, %v2224_v32  ;;  %v2162_v7 = vadd.f32 %v2146_v40, %v9734_v24  ;;  %2711 = vmatpush.msrb.mxu3 %v2646_v29  ;;  %v9858_v2 = vld [vmem:[%s8147_s8] ss:$0 sm:$0xff]  ;;  %s14586_s15 = sld [smem:[#allocation11_spill]] }
 0x32b   : > { %v2131_v43 = vmul.f32 %v7250_v52, %v9772_v38  ;;  %v2002_v12 = vsel %vm1394_vm11, 1.5707964, %v1986_v33  ;;  %vm2193_vm1 = vcmp.lt.f32.partialorder %v9338_v61, 0.0  ;;  %v1987_v24 = vsel %vm1411_vm15, 0.7853982, %v14313_v37  ;;  %v2331_v38 = vpop.permute.xlu0 %2330  ;;  %v2335_v13 = vpop.permute.xlu2 %2334 }
 0x32c   : > { %v2209_v41 = vsub.f32 0.0, %v2177_v21  ;;  %v2268_v49 = vmul.f32 1.442695, %v2240_v60  ;;  %v2178_v10 = vadd.f32 %v2162_v7, %v2002_v12  ;;  %v2003_v61 = vsel %vm1395_vm14, 1.5707964, %v1987_v24  ;;  %v2644_v12 = vld [vmem:[%s8162_s24 + $0x8] sm:$0xff] }
 0x32d   : > { %v7741_v48 = vpop.eup %7740  ;;  %v2147_v39 = vmul.f32 %v2131_v43, %v9761_v16  ;;  %vm2194_vm10 = vcmp.lt.f32.partialorder %v9372_v5, 0.0  ;;  %vm2195_vm2 = vcmp.lt.f32.partialorder %v14360_v23, 0.0  ;;  %vm14361_vm12 = vcmask 261120  }
 0x32e   : > { %7259 = vmatmul.msk.f32.gmra.mxu3 %vm14255_vm0, %v2364_v63  ;;  %7371 = vmatmul.msk.f32.gmra.mxu2 %vm14255_vm0, %v2364_v63  ;;  %v2286_v20 = vmul.f32 %v8051_v59, %v7741_v48  ;;  %v2225_v17 = vsel %vm2193_vm1, %v2209_v41, %v2177_v21  ;;  %7744 = vpow2.f32 %v2268_v49  ;;  %v2210_v56 = vsub.f32 0.0, %v2178_v10  ;;  %v2645_v48 = vld [vmem:[%s8162_s24 + $0x10] sm:$0xff]  ;;  %vm14362_vm11 = vmmov %vm14361_vm12 }
 0x32f   : > { %v2163_v42 = vadd.f32 %v2147_v39, %v9761_v16  ;;  %v2241_v45 = vmul.f32 1.272, %v2225_v17  ;;  %2712 = vmatpush.msrb.mxu3 %v2645_v48  ;;  %vm14363_vm4 = vmmov %vm14362_vm11 }
 0x330   : > { %v2366_v31 = vadd.f32 %v2329_v9, %v2286_v20  ;;  %v7743_v62 = vpop.eup %7742  ;;  %v2226_v11 = vsel %vm2194_vm10, %v2210_v56, %v2178_v10  ;;  %vm14364_vm9 = vmmov %vm14363_vm4 }
 0x331   : > { %v2287_v28 = vmul.f32 %v8052_v30, %v7743_v62  ;;  %v2179_v53 = vadd.f32 %v2163_v42, %v2003_v61  ;;  %v2270_v34 = vmul.f32 1.442695, %v2241_v45  ;;  %v2242_v16 = vmul.f32 1.272, %v2226_v11  ;;  %vm14365_vm15 = vmmov %vm14363_vm4  ;;  %2713 = vmatpush.msrb.mxu3 %v2644_v12  ;;  %v2643_v61 = vld [vmem:[%s8162_s24] sm:$0xff] }
 0x332   : > { %vm14366_vm14 = vmmov %vm14363_vm4 }
 0x333   : > { %v2367_v4 = vadd.f32 %v2331_v38, %v2287_v28  ;;  %v2211_v27 = vsub.f32 0.0, %v2179_v53  ;;  %7746 = vpow2.f32 %v2270_v34  ;;  %v2272_v5 = vmul.f32 1.442695, %v2242_v16  ;;  %vm14367_vm3 = vmmov %vm14363_vm4  ;;  %2714 = vmatpush.msrb.mxu3 %v2643_v61 }
 0x334   : > { %v7745_v35 = vpop.eup %7744  ;;  %vm14368_vm7 = vmmov %vm14367_vm3 }
 0x335   : > { %v2288_v47 = vmul.f32 %v8053_v50, %v7745_v35  ;;  %v2227_v63 = vsel %vm2195_vm2, %v2211_v27, %v2179_v53  ;;  %7748 = vpow2.f32 %v2272_v5  ;;  %vm14369_vm5 = vmmov %vm14367_vm3 }
 0x336   : > { %7260 = vmatmul.msk.f32.gmra.mxu3 %vm14255_vm0, %v2365_v51  ;;  %7372 = vmatmul.msk.f32.gmra.mxu2 %vm14255_vm0, %v2365_v51  ;;  %v2243_v44 = vmul.f32 1.272, %v2227_v63  ;;  %vm14370_vm13 = vmmov %vm14367_vm3 }
 0x337   : > { %v2368_v0 = vadd.f32 %v2333_v46, %v2288_v47  ;;  %vm14371_vm8 = vmmov %vm14367_vm3 }
 0x338   : > { %v2274_v14 = vmul.f32 1.442695, %v2243_v44  ;;  %v2337_v1 = vpop.permute.xlu0 %2336  ;;  %vm14372_vm6 = vmmov %vm14367_vm3 }
 0x339   : > { %v7747_v36 = vpop.eup %7746  ;;  %vm14373_vm1 = vmmov %vm14367_vm3 }
 0x33a   : > { %v2289_v22 = vmul.f32 %v8054_v57, %v7747_v36  ;;  %7750 = vpow2.f32 %v2274_v14  ;;  %vm14374_vm10 = vmmov %vm14373_vm1 }
 0x33b   : > { %v7749_v3 = vpop.eup %7748  ;;  %vm14375_vm2 = vmmov %vm14373_vm1 }
 0x33c   : > { %v2369_v19 = vadd.f32 %v2335_v13, %v2289_v22  ;;  %v2290_v15 = vmul.f32 %v8055_v26, %v7749_v3  ;;  %v9894_v22 = vld [vmem:[%s8157_s19] ss:$0 sm:$0xff] }
 0x33e   : > { %7261 = vmatmul.msk.f32.gmra.mxu3 %vm14255_vm0, %v2366_v31  ;;  %7373 = vmatmul.msk.f32.gmra.mxu2 %vm14255_vm0, %v2366_v31  ;;  %v2370_v58 = vadd.f32 %v2337_v1, %v2290_v15 }
 0x340   : > { %v7751_v55 = vpop.eup %7750 }
 0x341   : > { %v2291_v25 = vmul.f32 %v8056_v54, %v7751_v55 }
 0x346   : > { %7262 = vmatmul.msk.f32.gmra.mxu3 %vm14255_vm0, %v2367_v4  ;;  %7374 = vmatmul.msk.f32.gmra.mxu2 %vm14255_vm0, %v2367_v4 }
 0x34e   : > { %7263 = vmatmul.msk.f32.gmra.mxu3 %vm14255_vm0, %v2368_v0  ;;  %7375 = vmatmul.msk.f32.gmra.mxu2 %vm14255_vm0, %v2368_v0 }
 0x356   : > { %7264 = vmatmul.msk.f32.gmra.mxu3 %vm14255_vm0, %v2369_v19  ;;  %7376 = vmatmul.msk.f32.gmra.mxu2 %vm14255_vm0, %v2369_v19 }
 0x35a   : > { %v2339_v18 = vpop.permute.xlu1 %2338 }
 0x35b   : > { %v2371_v51 = vadd.f32 %v2339_v18, %v2291_v25 }
 0x35e   : > { %7265 = vmatmul.msk.f32.gmra.mxu3 %vm14255_vm0, %v2370_v58  ;;  %7377 = vmatmul.msk.f32.gmra.mxu2 %vm14255_vm0, %v2370_v58 }
 0x366   : > { %7266 = vmatmul.msk.f32.gmra.mxu3 %vm14255_vm0, %v2371_v51  ;;  %7378 = vmatmul.msk.f32.gmra.mxu2 %vm14255_vm0, %v2371_v51 }
 0x36a   : > { %v2442_v32 = vpop.f32.mrf.mxu3 }
 0x36b   : > { %v2443_v40 = vadd.f32 %v9858_v2, %v2442_v32 }
 0x36d   : > { %v2490_v52 = vmax.f32 %v2443_v40, 0.0 }
 0x36f   : > { %7267 = vmatmul.msk.f32.vlgmr.msrb.gmra.mxu0 %vm14361_vm12, %v2490_v52  ;;  %vm14376_vm12 = vmmov %vm14373_vm1 }
 0x372   : > { %v2445_v6 = vpop.f32.mrf.mxu3 }
 0x373   : > { %v2446_v21 = vadd.f32 %v9858_v2, %v2445_v6 }
 0x375   : > { %v2491_v8 = vmax.f32 %v2446_v21, 0.0 }
 0x377   : > { %7268 = vmatmul.msk.f32.gmra.mxu0 %vm14362_vm11, %v2491_v8  ;;  %vm14377_vm11 = vmmov %vm14373_vm1 }
 0x381   : > { %v2448_v60 = vpop.f32.mrf.mxu3 }
 0x382   : > { %v2449_v33 = vadd.f32 %v9858_v2, %v2448_v60 }
 0x384   : > { %v2492_v7 = vmax.f32 %v2449_v33, 0.0 }
 0x386   : > { %7269 = vmatmul.msk.f32.gmra.mxu0 %vm14363_vm4, %v2492_v7  ;;  %vm14378_vm4 = vmmov %vm14373_vm1 }
 0x389   : > { %v2451_v43 = vpop.f32.mrf.mxu3 }
 0x38a   : > { %v2452_v9 = vadd.f32 %v9858_v2, %v2451_v43 }
 0x38c   : > { %v2493_v41 = vmax.f32 %v2452_v9, 0.0 }
 0x38e   : > { %7270 = vmatmul.msk.f32.gmra.mxu0 %vm14364_vm9, %v2493_v41  ;;  %vm14379_vm9 = vmmov %vm14373_vm1 }
 0x391   : > { %v2454_v59 = vpop.f32.mrf.mxu3 }
 0x392   : > { %v2455_v20 = vadd.f32 %v9858_v2, %v2454_v59 }
 0x394   : > { %v2494_v49 = vmax.f32 %v2455_v20, 0.0 }
 0x396   : > { %7271 = vmatmul.msk.f32.gmra.mxu0 %vm14365_vm15, %v2494_v49  ;;  %vm14380_vm15 = vmmov %vm14373_vm1 }
 0x399   : > { %v2457_v10 = vpop.f32.mrf.mxu3 }
 0x39a   : > { %v2458_v39 = vadd.f32 %v9858_v2, %v2457_v10 }
 0x39c   : > { %v2495_v31 = vmax.f32 %v2458_v39, 0.0 }
 0x39e   : > { %7272 = vmatmul.msk.f32.gmra.mxu0 %vm14366_vm14, %v2495_v31  ;;  %vm14381_vm14 = vmmov %vm14373_vm1 }
 0x3a1   : > { %v2460_v62 = vpop.f32.mrf.mxu3 }
 0x3a2   : > { %v2461_v17 = vadd.f32 %v9858_v2, %v2460_v62 }
 0x3a4   : > { %v2496_v24 = vmax.f32 %v2461_v17, 0.0 }
 0x3a6   : > { %7273 = vmatmul.msk.f32.gmra.mxu0 %vm14367_vm3, %v2496_v24  ;;  %vm14382_vm3 = vmmov %vm14373_vm1 }
 0x3a9   : > { %v2463_v38 = vpop.f32.mrf.mxu3 }
 0x3aa   : > { %v2464_v56 = vadd.f32 %v9858_v2, %v2463_v38 }
 0x3ac   : > { %v2497_v42 = vmax.f32 %v2464_v56, 0.0 }
 0x3ae   : > { %7274 = vmatmul.msk.f32.gmra.mxu0 %vm14368_vm7, %v2497_v42  ;;  %vm14383_vm7 = vmmov %vm14373_vm1  ;;  %v3805_v42 = vld [vmem:[%s8177_s12] sm:$0xff] }
 0x3af   : > { %3869 = vmatpush.msrb.mxu1 %v3805_v42 }
 0x3b1   : > { %v2466_v30 = vpop.f32.mrf.mxu3 }
 0x3b2   : > { %v2467_v28 = vadd.f32 %v9858_v2, %v2466_v30 }
 0x3b4   : > { %v2498_v45 = vmax.f32 %v2467_v28, 0.0 }
 0x3b6   : > { %7275 = vmatmul.msk.f32.gmra.mxu0 %vm14369_vm5, %v2498_v45  ;;  %vm14384_vm5 = vmmov %vm14373_vm1 }
 0x3b9   : > { %v2469_v4 = vpop.f32.mrf.mxu3 }
 0x3ba   : > { %v2470_v11 = vadd.f32 %v9858_v2, %v2469_v4 }
 0x3bc   : > { %v2499_v53 = vmax.f32 %v2470_v11, 0.0 }
 0x3be   : > { %7276 = vmatmul.msk.f32.gmra.mxu0 %vm14370_vm13, %v2499_v53  ;;  %vm14385_vm13 = vmmov %vm14373_vm1 }
 0x3c1   : > { %v2472_v35 = vpop.f32.mrf.mxu3 }
 0x3c2   : > { %v2473_v34 = vadd.f32 %v9858_v2, %v2472_v35 }
 0x3c4   : > { %v2500_v16 = vmax.f32 %v2473_v34, 0.0 }
 0x3c6   : > { %7277 = vmatmul.msk.f32.gmra.mxu0 %vm14371_vm8, %v2500_v16  ;;  %vm14386_vm8 = vmmov %vm14373_vm1 }
 0x3c9   : > { %v2475_v46 = vpop.f32.mrf.mxu3 }
 0x3ca   : > { %v2476_v27 = vadd.f32 %v9858_v2, %v2475_v46 }
 0x3cc   : > { %v2501_v50 = vmax.f32 %v2476_v27, 0.0 }
 0x3ce   : > { %7278 = vmatmul.msk.f32.gmra.mxu0 %vm14372_vm6, %v2501_v50  ;;  %vm14387_vm6 = vmmov %vm14373_vm1  ;;  %v9932_v50 = vld [vmem:[%s14388_s18] ss:$0 sm:$0xff] }
 0x3d1   : > { %v2478_v47 = vpop.f32.mrf.mxu3 }
 0x3d2   : > { %v2479_v23 = vadd.f32 %v9858_v2, %v2478_v47 }
 0x3d4   : > { %v2502_v0 = vmax.f32 %v2479_v23, 0.0 }
 0x3d6   : > { %7279 = vmatmul.msk.f32.gmra.mxu0 %vm14373_vm1, %v2502_v0 }
 0x3d9   : > { %v2481_v5 = vpop.f32.mrf.mxu3 }
 0x3da   : > { %v2482_v63 = vadd.f32 %v9858_v2, %v2481_v5 }
 0x3dc   : > { %v2503_v36 = vmax.f32 %v2482_v63, 0.0 }
 0x3de   : > { %7280 = vmatmul.msk.f32.gmra.mxu0 %vm14374_vm10, %v2503_v36  ;;  %vm14389_vm10 = vmmov %vm14373_vm1 }
 0x3e1   : > { %v2484_v44 = vpop.f32.mrf.mxu3 }
 0x3e2   : > { %v2485_v29 = vadd.f32 %v9858_v2, %v2484_v44 }
 0x3e4   : > { %v2504_v13 = vmax.f32 %v2485_v29, 0.0 }
 0x3e6   : > { %7281 = vmatmul.msk.f32.gmra.mxu0 %vm14375_vm2, %v2504_v13  ;;  %vm14390_vm2 = vmmov %vm14373_vm1 }
 0x3e9   : > { %v2487_v57 = vpop.f32.mrf.mxu3 }
 0x3ea   : > { %v2488_v14 = vadd.f32 %v9858_v2, %v2487_v57 }
 0x3ec   : > { %v2505_v19 = vmax.f32 %v2488_v14, 0.0  ;;  %v2579_v3 = vpop.f32.mrf.mxu0 }
 0x3ed   : > { %v2580_v1 = vadd.f32 %v9894_v22, %v2579_v3 }
 0x3ee   : > { %7282 = vmatmul.msk.f32.gmra.mxu0 %vm14376_vm12, %v2505_v19  ;;  %vm14391_vm12 = vmmov %vm14373_vm1 }
 0x3ef   : > { %v2627_v26 = vmax.f32 %v2580_v1, 0.0 }
 0x3f1   : > { %7283 = vmatmul.msk.f32.vlgmr.msrb.gmra.mxu3 %vm14377_vm11, %v2627_v26  ;;  %vm14392_vm11 = vmmov %vm14373_vm1 }
 0x3f4   : > { %v2582_v15 = vpop.f32.mrf.mxu0 }
 0x3f5   : > { %v2583_v58 = vadd.f32 %v9894_v22, %v2582_v15 }
 0x3f7   : > { %v2628_v55 = vmax.f32 %v2583_v58, 0.0 }
 0x3f9   : > { %7284 = vmatmul.msk.f32.gmra.mxu3 %vm14378_vm4, %v2628_v55 }
 0x403   : > { %v2585_v18 = vpop.f32.mrf.mxu0 }
 0x404   : > { %v2586_v54 = vadd.f32 %v9894_v22, %v2585_v18 }
 0x406   : > { %v2629_v25 = vmax.f32 %v2586_v54, 0.0 }
 0x408   : > { %7285 = vmatmul.msk.f32.gmra.mxu3 %vm14379_vm9, %v2629_v25 }
 0x40b   : > { %v2588_v51 = vpop.f32.mrf.mxu0 }
 0x40c   : > { %v2589_v2 = vadd.f32 %v9894_v22, %v2588_v51 }
 0x40e   : > { %v2630_v32 = vmax.f32 %v2589_v2, 0.0 }
 0x410   : > { %7286 = vmatmul.msk.f32.gmra.mxu3 %vm14380_vm15, %v2630_v32 }
 0x413   : > { %v2591_v40 = vpop.f32.mrf.mxu0 }
 0x414   : > { %v2592_v52 = vadd.f32 %v9894_v22, %v2591_v40 }
 0x416   : > { %v2631_v6 = vmax.f32 %v2592_v52, 0.0 }
 0x418   : > { %7287 = vmatmul.msk.f32.gmra.mxu3 %vm14381_vm14, %v2631_v6 }
 0x41b   : > { %v2594_v21 = vpop.f32.mrf.mxu0 }
 0x41c   : > { %v2595_v8 = vadd.f32 %v9894_v22, %v2594_v21 }
 0x41e   : > { %v2632_v48 = vmax.f32 %v2595_v8, 0.0 }
 0x420   : > { %7288 = vmatmul.msk.f32.gmra.mxu3 %vm14382_vm3, %v2632_v48 }
 0x423   : > { %v2597_v60 = vpop.f32.mrf.mxu0 }
 0x424   : > { %v2598_v33 = vadd.f32 %v9894_v22, %v2597_v60 }
 0x426   : > { %v2633_v7 = vmax.f32 %v2598_v33, 0.0 }
 0x428   : > { %7289 = vmatmul.msk.f32.gmra.mxu3 %vm14383_vm7, %v2633_v7 }
 0x42b   : > { %v2600_v43 = vpop.f32.mrf.mxu0 }
 0x42c   : > { %v2601_v9 = vadd.f32 %v9894_v22, %v2600_v43 }
 0x42e   : > { %v2634_v41 = vmax.f32 %v2601_v9, 0.0 }
 0x430   : > { %7290 = vmatmul.msk.f32.gmra.mxu3 %vm14384_vm5, %v2634_v41 }
 0x433   : > { %v2603_v59 = vpop.f32.mrf.mxu0 }
 0x434   : > { %v2604_v20 = vadd.f32 %v9894_v22, %v2603_v59 }
 0x436   : > { %v2635_v49 = vmax.f32 %v2604_v20, 0.0 }
 0x438   : > { %7291 = vmatmul.msk.f32.gmra.mxu3 %vm14385_vm13, %v2635_v49 }
 0x43b   : > { %v2606_v12 = vpop.f32.mrf.mxu0 }
 0x43c   : > { %v2607_v10 = vadd.f32 %v9894_v22, %v2606_v12 }
 0x43e   : > { %v2636_v39 = vmax.f32 %v2607_v10, 0.0 }
 0x440   : > { %7292 = vmatmul.msk.f32.gmra.mxu3 %vm14386_vm8, %v2636_v39 }
 0x443   : > { %v2609_v31 = vpop.f32.mrf.mxu0 }
 0x444   : > { %v2610_v62 = vadd.f32 %v9894_v22, %v2609_v31 }
 0x446   : > { %v2637_v17 = vmax.f32 %v2610_v62, 0.0 }
 0x448   : > { %7293 = vmatmul.msk.f32.gmra.mxu3 %vm14387_vm6, %v2637_v17 }
 0x44b   : > { %v2612_v24 = vpop.f32.mrf.mxu0 }
 0x44c   : > { %v2613_v38 = vadd.f32 %v9894_v22, %v2612_v24 }
 0x44e   : > { %v2638_v56 = vmax.f32 %v2613_v38, 0.0 }
 0x450   : > { %7294 = vmatmul.msk.f32.gmra.mxu3 %vm14373_vm1, %v2638_v56 }
 0x453   : > { %v2615_v30 = vpop.f32.mrf.mxu0 }
 0x454   : > { %v2616_v28 = vadd.f32 %v9894_v22, %v2615_v30 }
 0x456   : > { %v2639_v45 = vmax.f32 %v2616_v28, 0.0 }
 0x458   : > { %7295 = vmatmul.msk.f32.gmra.mxu3 %vm14389_vm10, %v2639_v45 }
 0x45b   : > { %v2618_v61 = vpop.f32.mrf.mxu0 }
 0x45c   : > { %v2619_v4 = vadd.f32 %v9894_v22, %v2618_v61 }
 0x45e   : > { %v2640_v11 = vmax.f32 %v2619_v4, 0.0 }
 0x460   : > { %7296 = vmatmul.msk.f32.gmra.mxu3 %vm14390_vm2, %v2640_v11 }
 0x463   : > { %v2621_v53 = vpop.f32.mrf.mxu0 }
 0x464   : > { %v2622_v35 = vadd.f32 %v9894_v22, %v2621_v53 }
 0x466   : > { %v2641_v34 = vmax.f32 %v2622_v35, 0.0 }
 0x468   : > { %7297 = vmatmul.msk.f32.gmra.mxu3 %vm14391_vm12, %v2641_v34 }
 0x46b   : > { %v2624_v16 = vpop.f32.mrf.mxu0 }
 0x46c   : > { %v2625_v46 = vadd.f32 %v9894_v22, %v2624_v16 }
 0x46e   : > { %v2642_v27 = vmax.f32 %v2625_v46, 0.0 }
 0x470   : > { %7298 = vmatmul.msk.f32.gmra.mxu3 %vm14392_vm11, %v2642_v27 }
 0x474   : > { %v2716_v47 = vpop.f32.mrf.mxu3 }
 0x475   : > { %v2717_v23 = vadd.f32 %v9932_v50, %v2716_v47 }
 0x477   : > { %3740 = vrot.lane.b32.xlu2 %v2717_v23, %s8097_s16  ;;  %v9936_v0 = vmul.f32 0.5, %v2717_v23 }
 0x479   : > { %v9941_v36 = vand.u32 2147483647, %v9936_v0 }
 0x47b   : > { %v3100_v44 = vadd.f32 1.0, %v9941_v36  ;;  %v2828_v13 = vadd.f32 1e-30, %v9941_v36  ;;  %v7299_v20 = vadd.f32 -1.0, %v9941_v36  ;;  %vm2812_vm8 = vcmp.gt.f32.partialorder %v9941_v36, 0.41421357 }
 0x47c   : > { %v2719_v5 = vpop.f32.mrf.mxu3  ;;  %vm2796_vm6 = vcmp.gt.f32.partialorder %v9941_v36, 2.4142137 }
 0x47d   : > { %v2720_v63 = vadd.f32 %v9932_v50, %v2719_v5  ;;  %7752 = vrcp.f32 %v3100_v44  ;;  %v3127_v40 = vand.u32 2147483648, %v3100_v44  ;;  %vm3121_vm9 = vweird.f32 %v3100_v44 }
 0x47e   : > { %7754 = vrcp.f32 %v2828_v13  ;;  %v3125_v52 = vand.u32 2147483647, %v3100_v44  ;;  %v2855_v8 = vand.u32 2147483648, %v2828_v13  ;;  %vm2849_vm3 = vweird.f32 %v2828_v13 }
 0x47f   : > { %3742 = vrot.lane.b32.xlu0 %v2720_v63, %s8097_s16  ;;  %v9952_v55 = vmul.f32 0.5, %v2720_v63  ;;  %v2853_v33 = vand.u32 2147483647, %v2828_v13  ;;  %v3128_v7 = vor.u32 1.1754944e-38, %v3127_v40 }
 0x480   : > { %vm3126_vm5 = vcmp.eq.f32.partialorder %v3125_v52, 8.507059e+37  ;;  %v2856_v59 = vor.u32 1.1754944e-38, %v2855_v8 }
 0x481   : > { %v9960_v51 = vand.u32 2147483647, %v9952_v55  ;;  %vm2854_vm13 = vcmp.eq.f32.partialorder %v2853_v33, 8.507059e+37 }
 0x483   : > { %v7753_v22 = vpop.eup %7752  ;;  %v9963_v6 = vadd.f32 1.0, %v9960_v51  ;;  %v9966_v43 = vadd.f32 1e-30, %v9960_v51 }
 0x484   : > { %v7755_v3 = vpop.eup %7754  ;;  %v3117_v1 = vmul.f32 %v7753_v22, %v3100_v44  ;;  %vm3122_vm4 = vweird.f32 %v7753_v22 }
 0x485   : > { %v2845_v26 = vmul.f32 %v7755_v3, %v2828_v13  ;;  %vm2850_vm15 = vweird.f32 %v7755_v3  ;;  %vm3123_vm14 = vmor %vm3121_vm9, %vm3122_vm4  ;;  %7756 = vrcp.f32 %v9963_v6  ;;  %v3142_v5 = vand.u32 2147483648, %v9963_v6 }
 0x486   : > { %v3118_v15 = vsub.f32 1.0, %v3117_v1  ;;  %vm2851_vm7 = vmor %vm2849_vm3, %vm2850_vm15  ;;  %7758 = vrcp.f32 %v9966_v43  ;;  %vm3136_vm10 = vweird.f32 %v9963_v6  ;;  %v3140_v63 = vand.u32 2147483647, %v9963_v6 }
 0x487   : > { %v2846_v18 = vsub.f32 1.0, %v2845_v26  ;;  %vm2864_vm11 = vweird.f32 %v9966_v43  ;;  %v3143_v1 = vor.u32 1.1754944e-38, %v3142_v5  ;;  %vm2797_vm3 = vcmp.gt.f32.partialorder %v9960_v51, 2.4142137 }
 0x488   : > { %v3119_v25 = vmul.f32 %v7753_v22, %v3118_v15  ;;  %vm3141_vm9 = vcmp.eq.f32.partialorder %v3140_v63, 8.507059e+37 }
 0x489   : > { %v2847_v2 = vmul.f32 %v7755_v3, %v2846_v18 }
 0x48a   : > { %v3120_v32 = vadd.f32 %v7753_v22, %v3119_v25 }
 0x48b   : > { %v2722_v29 = vpop.f32.mrf.mxu3  ;;  %v2848_v21 = vadd.f32 %v7755_v3, %v2847_v2  ;;  %v7757_v10 = vpop.eup %7756  ;;  %v7300_v2 = vadd.f32 -1.0, %v9960_v51 }
 0x48c   : > { %v2723_v57 = vadd.f32 %v9932_v50, %v2722_v29  ;;  %v3124_v48 = vsel %vm3123_vm14, %v7753_v22, %v3120_v32  ;;  %v7759_v17 = vpop.eup %7758  ;;  %v3132_v24 = vmul.f32 %v7757_v10, %v9963_v6  ;;  %vm3137_vm1 = vweird.f32 %v7757_v10 }
 0x48d   : > { %v2852_v9 = vsel %vm2851_vm7, %v7755_v3, %v2848_v21  ;;  %v3129_v41 = vsel %vm3126_vm5, %v3128_v7, %v3124_v48  ;;  %v2860_v56 = vmul.f32 %v7759_v17, %v9966_v43  ;;  %vm2865_vm2 = vweird.f32 %v7759_v17  ;;  %vm3138_vm12 = vmor %vm3136_vm10, %vm3137_vm1 }
 0x48e   : > { %3744 = vrot.lane.b32.xlu1 %v2723_v57, %s8097_s16  ;;  %v2857_v49 = vsel %vm2854_vm13, %v2856_v59, %v2852_v9  ;;  %v3130_v12 = vmul.f32 %v7299_v20, %v3129_v41  ;;  %v9982_v42 = vmul.f32 0.5, %v2723_v57  ;;  %v3133_v30 = vsub.f32 1.0, %v3132_v24  ;;  %vm2866_vm4 = vmor %vm2864_vm11, %vm2865_vm2 }
 0x48f   : > { %v2858_v39 = vmul.f32 -1.0, %v2857_v49  ;;  %v2861_v45 = vsub.f32 1.0, %v2860_v56  ;;  %v2870_v22 = vand.u32 2147483648, %v9966_v43  ;;  %v2868_v3 = vand.u32 2147483647, %v9966_v43 }
 0x490   : > { %v3356_v31 = vsel %vm2812_vm8, %v3130_v12, %v9941_v36  ;;  %v9989_v61 = vand.u32 2147483647, %v9982_v42  ;;  %v3134_v11 = vmul.f32 %v7757_v10, %v3133_v30  ;;  %vm2813_vm14 = vcmp.gt.f32.partialorder %v9960_v51, 0.41421357 }
 0x491   : > { %v9979_v38 = vsel %vm2796_vm6, %v2858_v39, %v3356_v31  ;;  %v2862_v16 = vmul.f32 %v7759_v17, %v2861_v45  ;;  %v2871_v25 = vor.u32 1.1754944e-38, %v2870_v22  ;;  %vm2869_vm15 = vcmp.eq.f32.partialorder %v2868_v3, 8.507059e+37 }
 0x492   : > { %v9986_v28 = vmul.f32 %v9979_v38, %v9979_v38  ;;  %v10001_v46 = vadd.f32 1.0, %v9989_v61  ;;  %v3135_v47 = vadd.f32 %v7757_v10, %v3134_v11  ;;  %v10012_v44 = vadd.f32 1e-30, %v9989_v61 }
 0x493   : > { %v2725_v14 = vpop.f32.mrf.mxu3  ;;  %v2863_v13 = vadd.f32 %v7759_v17, %v2862_v16  ;;  %v3388_v30 = vsel %vm2812_vm8, 0.7853982, %v14313_v37  ;;  %vm3596_vm11 = vcmp.lt.f32.partialorder %v9936_v0, 0.0 }
 0x494   : > { %v9948_v19 = vadd.f32 %v9932_v50, %v2725_v14  ;;  %v3436_v53 = vmul.f32 0.080537446, %v9986_v28  ;;  %7760 = vrcp.f32 %v10001_v46  ;;  %v3139_v14 = vsel %vm3138_vm12, %v7757_v10, %v3135_v47 }
 0x495   : > { %7762 = vrcp.f32 %v10012_v44  ;;  %v2867_v26 = vsel %vm2866_vm4, %v7759_v17, %v2863_v13  ;;  %v3144_v15 = vsel %vm3141_vm9, %v3143_v1, %v3139_v14  ;;  %v3404_v5 = vsel %vm2796_vm6, 1.5707964, %v3388_v30 }
 0x496   : > { %3746 = vrot.lane.b32.xlu2 %v9948_v19, %s8097_s16  ;;  %v10004_v27 = vmul.f32 0.5, %v9948_v19  ;;  %v7315_v23 = vadd.f32 -0.13877685, %v3436_v53  ;;  %v2872_v52 = vsel %vm2869_vm15, %v2871_v25, %v2867_v26  ;;  %v3145_v6 = vmul.f32 %v7300_v2, %v3144_v15 }
 0x497   : > { %v2873_v7 = vmul.f32 -1.0, %v2872_v52  ;;  %v2883_v63 = vand.u32 2147483647, %v10012_v44  ;;  %vm3151_vm5 = vweird.f32 %v10001_v46  ;;  %v3155_v13 = vand.u32 2147483647, %v10001_v46 }
 0x498   : > { %v10019_v57 = vand.u32 2147483647, %v10004_v27  ;;  %v3468_v19 = vmul.f32 %v7315_v23, %v9986_v28  ;;  %v3357_v9 = vsel %vm2813_vm14, %v3145_v6, %v9960_v51  ;;  %v3157_v23 = vand.u32 2147483648, %v10001_v46 }
 0x499   : > { %v10063_v12 = vsel %vm2797_vm3, %v2873_v7, %v3357_v9  ;;  %v2885_v14 = vand.u32 2147483648, %v10012_v44  ;;  %vm2814_vm6 = vcmp.gt.f32.partialorder %v9989_v61, 0.41421357  ;;  %vm2879_vm1 = vweird.f32 %v10012_v44 }
 0x49a   : > { %v10032_v32 = vpop.eup %7760  ;;  %v3484_v40 = vadd.f32 0.19977711, %v3468_v19  ;;  %v10035_v21 = vadd.f32 1e-30, %v10019_v57  ;;  %v10072_v31 = vmul.f32 %v10063_v12, %v10063_v12  ;;  %v3158_v15 = vor.u32 1.1754944e-38, %v3157_v23 }
 0x49b   : > { %v2728_v58 = vpop.f32.mrf.mxu3  ;;  %v10041_v48 = vpop.eup %7762  ;;  %vm3152_vm7 = vweird.f32 %v10032_v32  ;;  %vm10122_vm2 = vcmp.eq.f32.partialorder %v2883_v63, 8.507059e+37  ;;  %v7301_v2 = vadd.f32 -1.0, %v9989_v61  ;;  %vm3156_vm12 = vcmp.eq.f32.partialorder %v3155_v13, 8.507059e+37 }
 0x49c   : > { %v9955_v54 = vadd.f32 %v9932_v50, %v2728_v58  ;;  %v10029_v58 = vadd.f32 1.0, %v10019_v57  ;;  %v3500_v33 = vmul.f32 %v3484_v40, %v9986_v28  ;;  %v2875_v41 = vmul.f32 %v10041_v48, %v10012_v44  ;;  %vm10106_vm8 = vmor %vm3151_vm5, %vm3152_vm7 }
 0x49d   : > { %v3437_v53 = vmul.f32 0.080537446, %v10072_v31  ;;  %vm2880_vm13 = vweird.f32 %v10041_v48  ;;  %v2886_v40 = vor.u32 1.1754944e-38, %v2885_v14  ;;  %vm2894_vm15 = vweird.f32 %v10035_v21 }
 0x49e   : > { %3748 = vrot.lane.b32.xlu0 %v9955_v54, %s8097_s16  ;;  %7764 = vrcp.f32 %v10029_v58  ;;  %v10050_v43 = vmul.f32 0.5, %v9955_v54  ;;  %v7331_v49 = vadd.f32 -0.3333295, %v3500_v33  ;;  %v2876_v10 = vsub.f32 1.0, %v2875_v41  ;;  %vm10118_vm10 = vmor %vm2879_vm1, %vm2880_vm13 }
 0x49f   : > { %7766 = vrcp.f32 %v10035_v21  ;;  %v7316_v3 = vadd.f32 -0.13877685, %v3437_v53  ;;  %vm3166_vm9 = vweird.f32 %v10029_v58  ;;  %v3172_v9 = vand.u32 2147483648, %v10029_v58 }
 0x4a0   : > { %v10066_v54 = vand.u32 2147483647, %v10050_v43  ;;  %v3532_v24 = vmul.f32 %v7331_v49, %v9986_v28  ;;  %v2877_v45 = vmul.f32 %v10041_v48, %v2876_v10  ;;  %v2900_v30 = vand.u32 2147483648, %v10035_v21 }
 0x4a1   : > { %vm2798_vm1 = vcmp.gt.f32.partialorder %v9989_v61, 2.4142137  ;;  %v7302_v13 = vadd.f32 -1.0, %v10019_v57 }
 0x4a2   : > { %v10079_v56 = vadd.f32 1.0, %v10066_v54  ;;  %v10091_v28 = vadd.f32 1e-30, %v10066_v54  ;;  %v3548_v47 = vmul.f32 %v3532_v24, %v9979_v38  ;;  %v2878_v22 = vadd.f32 %v10041_v48, %v2877_v45 }
 0x4a3   : > { %v2731_v60 = vpop.f32.mrf.mxu3  ;;  %v2901_v19 = vor.u32 1.1754944e-38, %v2900_v30 }
 0x4a4   : > { %v9992_v4 = vadd.f32 %v9932_v50, %v2731_v60  ;;  %v3147_v60 = vmul.f32 %v10032_v32, %v10001_v46  ;;  %v10059_v20 = vpop.eup %7764  ;;  %7768 = vrcp.f32 %v10079_v56  ;;  %v3564_v26 = vadd.f32 %v3548_v47, %v9979_v38 }
 0x4a5   : > { %v10068_v39 = vpop.eup %7766  ;;  %v3162_v17 = vmul.f32 %v10059_v20, %v10029_v58  ;;  %7770 = vrcp.f32 %v10091_v28  ;;  %v2882_v44 = vsel %vm10118_vm10, %v10041_v48, %v2878_v22  ;;  %vm3167_vm4 = vweird.f32 %v10059_v20 }
 0x4a6   : > { %3750 = vrot.lane.b32.xlu1 %v9992_v4, %s8097_s16  ;;  %v3148_v59 = vsub.f32 1.0, %v3147_v60  ;;  %v2890_v11 = vmul.f32 %v10068_v39, %v10035_v21  ;;  %v3469_v60 = vmul.f32 %v7316_v3, %v10072_v31  ;;  %v3580_v7 = vadd.f32 %v3564_v26, %v3404_v5  ;;  %vm10161_vm5 = vmor %vm3166_vm9, %vm3167_vm4 }
 0x4a7   : > { %v3163_v16 = vsub.f32 1.0, %v3162_v17  ;;  %v3170_v48 = vand.u32 2147483647, %v10029_v58  ;;  %vm2895_vm7 = vweird.f32 %v10068_v39  ;;  %v2898_v58 = vand.u32 2147483647, %v10035_v21 }
 0x4a8   : > { %v2891_v36 = vsub.f32 1.0, %v2890_v11  ;;  %v3485_v24 = vadd.f32 0.19977711, %v3469_v60  ;;  %v3612_v53 = vsub.f32 0.0, %v3580_v7  ;;  %vm10177_vm13 = vmor %vm2894_vm15, %vm2895_vm7  ;;  %vm3181_vm4 = vweird.f32 %v10079_v56 }
 0x4a9   : > { %v3164_v46 = vmul.f32 %v10059_v20, %v3163_v16  ;;  %v3173_v16 = vor.u32 1.1754944e-38, %v3172_v9  ;;  %vm2899_vm10 = vcmp.eq.f32.partialorder %v2898_v58, 8.507059e+37  ;;  %vm2909_vm7 = vweird.f32 %v10091_v28 }
 0x4aa   : > { %v10130_v38 = vpop.eup %7768  ;;  %v2892_v6 = vmul.f32 %v10068_v39, %v2891_v36  ;;  %v3501_v14 = vmul.f32 %v3485_v24, %v10072_v31  ;;  %v3628_v3 = vsel %vm3596_vm11, %v3612_v53, %v3580_v7  ;;  %v3187_v7 = vand.u32 2147483648, %v10079_v56 }
 0x4ab   : > { %v2734_v62 = vpop.f32.mrf.mxu3  ;;  %v3165_v33 = vadd.f32 %v10059_v20, %v3164_v46  ;;  %v10146_v41 = vpop.eup %7770  ;;  %v3177_v10 = vmul.f32 %v10130_v38, %v10079_v56  ;;  %vm14225_vm11 = vcmp.gt.f32.partialorder %v10019_v57, 2.4142137  ;;  %v2915_v53 = vand.u32 2147483648, %v10091_v28 }
 0x4ac   : > { %v9998_v34 = vadd.f32 %v9932_v50, %v2734_v62  ;;  %v3149_v62 = vmul.f32 %v10032_v32, %v3148_v59  ;;  %v2887_v59 = vsel %vm10122_vm2, %v2886_v40, %v2882_v44  ;;  %v2905_v47 = vmul.f32 %v10146_v41, %v10091_v28 }
 0x4ad   : > { %v3169_v45 = vsel %vm10161_vm5, %v10059_v20, %v3165_v33  ;;  %v3178_v21 = vsub.f32 1.0, %v3177_v10  ;;  %vm2815_vm2 = vcmp.gt.f32.partialorder %v10019_v57, 0.41421357  ;;  %v3644_v40 = vmul.f32 1.272, %v3628_v3 }
 0x4ae   : > { %3752 = vrot.lane.b32.xlu2 %v9998_v34, %s8097_s16  ;;  %v2906_v46 = vsub.f32 1.0, %v2905_v47  ;;  %v7332_v60 = vadd.f32 -0.3333295, %v3501_v14  ;;  %vm2910_vm9 = vweird.f32 %v10146_v41 }
 0x4af   : > { %v3179_v25 = vmul.f32 %v10130_v38, %v3178_v21  ;;  %v3660_v24 = vmul.f32 1.442695, %v3644_v40  ;;  %vm10265_vm5 = vmor %vm2909_vm7, %vm2910_vm9  ;;  %v2913_v21 = vand.u32 2147483647, %v10091_v28 }
 0x4b0   : > { %v3533_v30 = vmul.f32 %v7332_v60, %v10072_v31 }
 0x4b1   : > { %v3180_v33 = vadd.f32 %v10130_v38, %v3179_v25 }
 0x4b3   : > { %v2737_v35 = vpop.f32.mrf.mxu3 }
 0x4b4   : > { %v10015_v29 = vadd.f32 %v9932_v50, %v2737_v35  ;;  %v3150_v35 = vadd.f32 %v10032_v32, %v3149_v62 }
 0x4b6   : > { %3754 = vrot.lane.b32.xlu0 %v10015_v29, %s8097_s16  ;;  %v3154_v1 = vsel %vm10106_vm8, %v10032_v32, %v3150_v35  ;;  %v10128_v32 = vmul.f32 0.5, %v9992_v4  ;;  %v10141_v4 = vmul.f32 0.5, %v9998_v34  ;;  %v2893_v34 = vadd.f32 %v10068_v39, %v2892_v6 }
 0x4b7   : > { %v3159_v52 = vsel %vm3156_vm12, %v3158_v15, %v3154_v1  ;;  %v2888_v35 = vmul.f32 -1.0, %v2887_v59  ;;  %vm3171_vm8 = vcmp.eq.f32.partialorder %v3170_v48, 8.507059e+37  ;;  %v10208_v0 = vmul.f32 0.5, %v10015_v29 }
 0x4b8   : > { %v3160_v49 = vmul.f32 %v7301_v2, %v3159_v52  ;;  %v10153_v62 = vand.u32 2147483647, %v10128_v32  ;;  %v10170_v11 = vand.u32 2147483647, %v10141_v4  ;;  %v2897_v63 = vsel %vm10177_vm13, %v10068_v39, %v2893_v34 }
 0x4b9   : > { %v3174_v22 = vsel %vm3171_vm8, %v3173_v16, %v3169_v45  ;;  %v2902_v15 = vsel %vm2899_vm10, %v2901_v19, %v2897_v63  ;;  %v2907_v6 = vmul.f32 %v10146_v41, %v2906_v46  ;;  %vm3182_vm12 = vweird.f32 %v10130_v38 }
 0x4ba   : > { %v3358_v23 = vsel %vm2814_vm6, %v3160_v49, %v9989_v61  ;;  %v10182_v20 = vadd.f32 1.0, %v10153_v62  ;;  %v10191_v36 = vadd.f32 1.0, %v10170_v11  ;;  %v10200_v39 = vadd.f32 1e-30, %v10153_v62  ;;  %vm10240_vm15 = vmor %vm3181_vm4, %vm3182_vm12 }
 0x4bb   : > { %v2740_v18 = vpop.f32.mrf.mxu3  ;;  %v10197_v1 = vsel %vm2798_vm1, %v2888_v35, %v3358_v23  ;;  %v10205_v2 = vadd.f32 1e-30, %v10170_v11  ;;  %v2903_v52 = vmul.f32 -1.0, %v2902_v15  ;;  %v10226_v48 = vand.u32 2147483647, %v10208_v0 }
 0x4bc   : > { %v10038_v8 = vadd.f32 %v9932_v50, %v2740_v18  ;;  %v3175_v18 = vmul.f32 %v7302_v13, %v3174_v22  ;;  %7772 = vrcp.f32 %v10182_v20  ;;  %v10212_v44 = vmul.f32 %v10197_v1, %v10197_v1 }
 0x4bd   : > { %7774 = vrcp.f32 %v10191_v36  ;;  %v3185_v49 = vand.u32 2147483647, %v10079_v56  ;;  %v2908_v34 = vadd.f32 %v10146_v41, %v2907_v6  ;;  %v3184_v56 = vsel %vm10240_vm15, %v10130_v38, %v3180_v33 }
 0x4be   : > { %3756 = vrot.lane.b32.xlu1 %v10038_v8, %s8097_s16  ;;  %7776 = vrcp.f32 %v10200_v39  ;;  %v3359_v29 = vsel %vm2815_vm2, %v3175_v18, %v10019_v57  ;;  %v3438_v59 = vmul.f32 0.080537446, %v10212_v44  ;;  %v3188_v35 = vor.u32 1.1754944e-38, %v3187_v7 }
 0x4bf   : > { %7778 = vrcp.f32 %v10205_v2  ;;  %v10236_v10 = vsel %vm14225_vm11, %v2903_v52, %v3359_v29  ;;  %v10257_v47 = vadd.f32 1.0, %v10226_v48  ;;  %vm3186_vm13 = vcmp.eq.f32.partialorder %v3185_v49, 8.507059e+37 }
 0x4c0   : > { %v7317_v5 = vadd.f32 -0.13877685, %v3438_v59  ;;  %v10261_v31 = vmul.f32 %v10236_v10, %v10236_v10  ;;  %v2912_v13 = vsel %vm10265_vm5, %v10146_v41, %v2908_v34  ;;  %v7303_v22 = vadd.f32 -1.0, %v10066_v54 }
 0x4c1   : > { %v3189_v14 = vsel %vm3186_vm13, %v3188_v35, %v3184_v56  ;;  %v10281_v46 = vadd.f32 1e-30, %v10226_v48  ;;  %v3549_v41 = vmul.f32 %v3533_v30, %v10063_v12  ;;  %v2916_v18 = vor.u32 1.1754944e-38, %v2915_v53 }
 0x4c2   : > { %v10228_v9 = vpop.eup %7772  ;;  %7780 = vrcp.f32 %v10257_v47  ;;  %v3470_v40 = vmul.f32 %v7317_v5, %v10212_v44  ;;  %v3439_v52 = vmul.f32 0.080537446, %v10261_v31  ;;  %vm2914_vm8 = vcmp.eq.f32.partialorder %v2913_v21, 8.507059e+37 }
 0x4c3   : > { %v2743_v26 = vpop.f32.mrf.mxu3  ;;  %v10244_v17 = vpop.eup %7774  ;;  %v3192_v16 = vmul.f32 %v10228_v9, %v10182_v20  ;;  %v3190_v60 = vmul.f32 %v7303_v22, %v3189_v14  ;;  %v10300_v33 = vmul.f32 0.5, %v10038_v8  ;;  %v10305_v7 = vsel %vm2813_vm14, 0.7853982, %v14313_v37 }
 0x4c4   : > { %v10251_v45 = vpop.eup %7776  ;;  %v3207_v19 = vmul.f32 %v10244_v17, %v10191_v36  ;;  %v10284_v28 = vadd.f32 %v9932_v50, %v2743_v26  ;;  %v2917_v26 = vsel %vm2914_vm8, %v2916_v18, %v2912_v13  ;;  %vm14224_vm10 = vcmp.gt.f32.partialorder %v10066_v54, 2.4142137 }
 0x4c5   : > { %v10270_v63 = vpop.eup %7778  ;;  %v2920_v3 = vmul.f32 %v10251_v45, %v10200_v39  ;;  %v3193_v25 = vsub.f32 1.0, %v3192_v16  ;;  %7782 = vrcp.f32 %v10281_v46  ;;  %v10310_v49 = vadd.f32 %v3549_v41, %v10063_v12 }
 0x4c6   : > { %v2935_v6 = vmul.f32 %v10270_v63, %v10205_v2  ;;  %3758 = vrot.lane.b32.xlu2 %v10284_v28, %s8097_s16  ;;  %v3208_v29 = vsub.f32 1.0, %v3207_v19  ;;  %7784 = vpow2.f32 %v3660_v24  ;;  %vm2816_vm12 = vcmp.gt.f32.partialorder %v10066_v54, 0.41421357 }
 0x4c7   : > { %v2921_v59 = vsub.f32 1.0, %v2920_v3  ;;  %v3194_v34 = vmul.f32 %v10228_v9, %v3193_v25  ;;  %v10314_v8 = vadd.f32 0.19977711, %v3470_v40  ;;  %v2918_v58 = vmul.f32 -1.0, %v2917_v26 }
 0x4c8   : > { %v2928_v30 = vand.u32 2147483647, %v10200_v39  ;;  %v2936_v56 = vsub.f32 1.0, %v2935_v6  ;;  %v10317_v53 = vpop.eup %7780  ;;  %v10319_v35 = vadd.f32 -0.13877685, %v3439_v52  ;;  %v3360_v24 = vsel %vm2816_vm12, %v3190_v60, %v10066_v54 }
 0x4c9   : > { %v3209_v12 = vmul.f32 %v10244_v17, %v3208_v29  ;;  %v10326_v16 = vand.u32 2147483647, %v10300_v33  ;;  %v7304_v5 = vadd.f32 -1.0, %v10153_v62  ;;  %v3200_v38 = vand.u32 2147483647, %v10182_v20 }
 0x4ca   : > { %v3202_v21 = vand.u32 2147483648, %v10182_v20  ;;  %vm2924_vm14 = vweird.f32 %v10200_v39  ;;  %v2930_v13 = vand.u32 2147483648, %v10200_v39  ;;  %v3195_v22 = vadd.f32 %v10228_v9, %v3194_v34 }
 0x4cb   : > { %v2746_v23 = vpop.f32.mrf.mxu3  ;;  %vm3197_vm4 = vweird.f32 %v10228_v9  ;;  %v10336_v14 = vpop.eup %7782  ;;  %v10340_v19 = vsel %vm14224_vm10, %v2918_v58, %v3360_v24  ;;  %vm10342_vm9 = vcmp.eq.f32.partialorder %v2928_v30, 8.507059e+37  ;;  %vm3196_vm15 = vweird.f32 %v10182_v20 }
 0x4cc   : > { %v10287_v15 = vadd.f32 %v9932_v50, %v2746_v23  ;;  %v2922_v23 = vmul.f32 %v10251_v45, %v2921_v59  ;;  %v2937_v41 = vmul.f32 %v10270_v63, %v2936_v56  ;;  %v3222_v18 = vmul.f32 %v10317_v53, %v10257_v47  ;;  %v10350_v25 = vpop.eup %7784  ;;  %vm10359_vm13 = vmor %vm3196_vm15, %vm3197_vm4 }
 0x4cd   : > { %vm2925_vm7 = vweird.f32 %v10251_v45  ;;  %v3210_v40 = vadd.f32 %v10244_v17, %v3209_v12  ;;  %vm3212_vm5 = vweird.f32 %v10244_v17  ;;  %v10356_v52 = vadd.f32 1.0, %v10326_v16 }
 0x4ce   : > { %3760 = vrot.lane.b32.xlu0 %v10287_v15, %s8097_s16  ;;  %v2923_v6 = vadd.f32 %v10251_v45, %v2922_v23  ;;  %vm10363_vm8 = vcmp.eq.f32.partialorder %v3200_v38, 8.507059e+37  ;;  %v3203_v60 = vor.u32 1.1754944e-38, %v3202_v21  ;;  %v3217_v29 = vand.u32 2147483648, %v10191_v36 }
 0x4cf   : > { %v3199_v59 = vsel %vm10359_vm13, %v10228_v9, %v3195_v22  ;;  %vm3211_vm10 = vweird.f32 %v10191_v36  ;;  %v3215_v34 = vand.u32 2147483647, %v10191_v36  ;;  %v2950_v58 = vmul.f32 %v10336_v14, %v10281_v46  ;;  %vm10388_vm13 = vmor %vm2924_vm14, %vm2925_vm7 }
 0x4d0   : > { %v2938_v30 = vadd.f32 %v10270_v63, %v2937_v41  ;;  %vm2940_vm4 = vweird.f32 %v10270_v63  ;;  %vm10377_vm15 = vmor %vm3211_vm10, %vm3212_vm5  ;;  %v3223_v24 = vsub.f32 1.0, %v3222_v18  ;;  %v10382_v12 = vadd.f32 1e-30, %v10326_v16 }
 0x4d1   : > { %vm2939_vm11 = vweird.f32 %v10205_v2  ;;  %v2945_v9 = vand.u32 2147483648, %v10205_v2  ;;  %v3214_v23 = vsel %vm10377_vm15, %v10244_v17, %v3210_v40  ;;  %7786 = vrcp.f32 %v10356_v52 }
 0x4d2   : > { %v2927_v38 = vsel %vm10388_vm13, %v10251_v45, %v2923_v6  ;;  %v3204_v39 = vsel %vm10363_vm8, %v3203_v60, %v3199_v59  ;;  %v2943_v21 = vand.u32 2147483647, %v10205_v2  ;;  %v3218_v22 = vor.u32 1.1754944e-38, %v3217_v29  ;;  %vm10410_vm10 = vmor %vm2939_vm11, %vm2940_vm4 }
 0x4d3   : > { %v10406_v41 = vmul.f32 %v10340_v19, %v10340_v19  ;;  %v2931_v18 = vor.u32 1.1754944e-38, %v2930_v13  ;;  %vm3216_vm14 = vcmp.eq.f32.partialorder %v3215_v34, 8.507059e+37  ;;  %v2951_v40 = vsub.f32 1.0, %v2950_v58 }
 0x4d4   : > { %v2942_v45 = vsel %vm10410_vm10, %v10270_v63, %v2938_v30  ;;  %v3219_v6 = vsel %vm3216_vm14, %v3218_v22, %v3214_v23  ;;  %v3224_v2 = vmul.f32 %v10317_v53, %v3223_v24  ;;  %7788 = vrcp.f32 %v10382_v12  ;;  %v2749_v63 = vpop.f32.mrf.mxu3 }
 0x4d5   : > { %v2932_v13 = vsel %vm10342_vm9, %v2931_v18, %v2927_v38  ;;  %v3205_v20 = vmul.f32 %v7304_v5, %v3204_v39  ;;  %v2946_v26 = vor.u32 1.1754944e-38, %v2945_v9  ;;  %v7305_v60 = vadd.f32 -1.0, %v10170_v11 }
 0x4d6   : > { %v3502_v29 = vmul.f32 %v10314_v8, %v10212_v44  ;;  %vm2801_vm11 = vcmp.gt.f32.partialorder %v10153_v62, 2.4142137  ;;  %vm2817_vm7 = vcmp.gt.f32.partialorder %v10153_v62, 0.41421357  ;;  %vm2944_vm5 = vcmp.eq.f32.partialorder %v2943_v21, 8.507059e+37 }
 0x4d7   : > { %v10426_v59 = vpop.eup %7786  ;;  %v3440_v34 = vmul.f32 0.080537446, %v10406_v41  ;;  %v2947_v58 = vsel %vm2944_vm5, %v2946_v26, %v2942_v45  ;;  %v3220_v3 = vmul.f32 %v7305_v60, %v3219_v6  ;;  %v2952_v5 = vmul.f32 %v10336_v14, %v2951_v40 }
 0x4d8   : > { %v3471_v30 = vmul.f32 %v10319_v35, %v10261_v31  ;;  %v2933_v56 = vmul.f32 -1.0, %v2932_v13  ;;  %v3225_v8 = vadd.f32 %v10317_v53, %v3224_v2  ;;  %vm3227_vm9 = vweird.f32 %v10317_v53 }
 0x4d9   : > { %v3361_v24 = vsel %vm2817_vm7, %v3205_v20, %v10153_v62  ;;  %vm2802_vm8 = vcmp.gt.f32.partialorder %v10170_v11, 2.4142137  ;;  %vm2818_vm4 = vcmp.gt.f32.partialorder %v10170_v11, 0.41421357  ;;  %v3232_v36 = vand.u32 2147483648, %v10257_v47 }
 0x4da   : > { %v10440_v9 = vpop.eup %7788  ;;  %v2948_v23 = vmul.f32 -1.0, %v2947_v58  ;;  %vm3226_vm15 = vweird.f32 %v10257_v47  ;;  %v3230_v35 = vand.u32 2147483647, %v10257_v47  ;;  %v3237_v38 = vmul.f32 %v10426_v59, %v10356_v52 }
 0x4db   : > { %v7319_v39 = vadd.f32 -0.13877685, %v3440_v34  ;;  %v3362_v21 = vsel %vm2818_vm4, %v3220_v3, %v10170_v11  ;;  %v2953_v22 = vadd.f32 %v10336_v14, %v2952_v5  ;;  %vm2955_vm13 = vweird.f32 %v10336_v14  ;;  %vm10451_vm10 = vmor %vm3226_vm15, %vm3227_vm9  ;;  %v3741_v3 = vpop.permute.xlu2 %3740 }
 0x4dc   : > { %v10457_v17 = vsel %vm2801_vm11, %v2933_v56, %v3361_v24  ;;  %v2960_v47 = vand.u32 2147483648, %v10281_v46  ;;  %v3229_v40 = vsel %vm10451_vm10, %v10317_v53, %v3225_v8  ;;  %v10464_v45 = vmul.f32 0.5, %v10284_v28  ;;  %v14423_v8 = vld [vmem:[#allocation14_spill] sm:$0xff] }
 0x4dd   : > { %vm2954_vm14 = vweird.f32 %v10281_v46  ;;  %v2958_v6 = vand.u32 2147483647, %v10281_v46  ;;  %v3233_v2 = vor.u32 1.1754944e-38, %v3232_v36  ;;  %v2965_v13 = vmul.f32 %v10440_v9, %v10382_v12  ;;  %v2752_v36 = vpop.f32.mrf.mxu3 }
 0x4de   : > { %v3487_v20 = vadd.f32 0.19977711, %v3471_v30  ;;  %v10472_v26 = vsel %vm2802_vm8, %v2948_v23, %v3362_v21  ;;  %vm10474_vm5 = vmor %vm2954_vm14, %vm2955_vm13  ;;  %vm3231_vm9 = vcmp.eq.f32.partialorder %v3230_v35, 8.507059e+37  ;;  %v3238_v28 = vsub.f32 1.0, %v3237_v38 }
 0x4df   : > { %v10480_v53 = vmul.f32 %v10457_v17, %v10457_v17  ;;  %v2957_v46 = vsel %vm10474_vm5, %v10336_v14, %v2953_v22  ;;  %v7306_v34 = vadd.f32 -1.0, %v10226_v48  ;;  %v3234_v58 = vsel %vm3231_vm9, %v3233_v2, %v3229_v40 }
 0x4e0   : > { %v2961_v5 = vor.u32 1.1754944e-38, %v2960_v47  ;;  %v10487_v30 = vand.u32 2147483647, %v10464_v45  ;;  %v10490_v56 = vadd.f32 %v9932_v50, %v2749_v63  ;;  %v3708_v24 = vmul.f32 %v10350_v25, %v14423_v8 }
 0x4e1   : > { %v3472_v23 = vmul.f32 %v7319_v39, %v10406_v41  ;;  %v10497_v14 = vmul.f32 %v10472_v26, %v10472_v26  ;;  %vm2959_vm15 = vcmp.eq.f32.partialorder %v2958_v6, 8.507059e+37  ;;  %v2966_v35 = vsub.f32 1.0, %v2965_v13 }
 0x4e2   : > { %v2962_v38 = vsel %vm2959_vm15, %v2961_v5, %v2957_v46  ;;  %v3235_v21 = vmul.f32 %v7306_v34, %v3234_v58  ;;  %v3239_v22 = vmul.f32 %v10426_v59, %v3238_v28  ;;  %3762 = vrot.lane.b32.xlu1 %v10490_v56, %s8097_s16  ;;  %v3788_v63 = vadd.f32 %v3741_v3, %v3708_v24 }
 0x4e3   : > { %v3405_v25 = vsel %vm2797_vm3, 1.5707964, %v10305_v7  ;;  %v7333_v18 = vadd.f32 -0.3333295, %v3502_v29  ;;  %v10506_v39 = vadd.f32 %v9932_v50, %v2752_v36  ;;  %v3503_v40 = vmul.f32 %v3487_v20, %v10261_v31 }
 0x4e4   : > { %v3581_v47 = vadd.f32 %v10310_v49, %v3405_v25  ;;  %v3441_v6 = vmul.f32 0.080537446, %v10480_v53  ;;  %v10512_v2 = vadd.f32 1.0, %v10487_v30  ;;  %7347 = vmatmul.msk.f32.vlgmr.msrb.gmra.mxu1 %vm14255_vm0, %v3788_v63  ;;  %v3442_v13 = vmul.f32 0.080537446, %v10497_v14 }
 0x4e5   : > { %vm2819_vm13 = vcmp.gt.f32.partialorder %v10226_v48, 0.41421357  ;;  %v2963_v51 = vmul.f32 -1.0, %v2962_v38  ;;  %v2967_v7 = vmul.f32 %v10440_v9, %v2966_v35  ;;  %3764 = vrot.lane.b32.xlu2 %v10506_v39, %s8097_s16  ;;  %v3488_v49 = vadd.f32 0.19977711, %v3472_v23  ;;  %v2755_v25 = vpop.f32.mrf.mxu3 }
 0x4e6   : > { %v3363_v29 = vsel %vm2819_vm13, %v3235_v21, %v10226_v48  ;;  %v3240_v20 = vadd.f32 %v10426_v59, %v3239_v22  ;;  %vm3242_vm3 = vweird.f32 %v10426_v59  ;;  %v3534_v60 = vmul.f32 %v7333_v18, %v10212_v44 }
 0x4e7   : > { %vm2803_vm10 = vcmp.gt.f32.partialorder %v10226_v48, 2.4142137  ;;  %v3247_v28 = vand.u32 2147483648, %v10356_v52  ;;  %v10529_v46 = vadd.f32 1e-30, %v10487_v30  ;;  %vm3241_vm14 = vweird.f32 %v10356_v52 }
 0x4e8   : > { %v7320_v34 = vadd.f32 -0.13877685, %v3441_v6  ;;  %v3245_v58 = vand.u32 2147483647, %v10356_v52  ;;  %7790 = vrcp.f32 %v10512_v2  ;;  %v7321_v3 = vadd.f32 -0.13877685, %v3442_v13  ;;  %vm10540_vm9 = vmor %vm3241_vm14, %vm3242_vm3 }
 0x4e9   : > { %v10536_v5 = vsel %vm2803_vm10, %v2963_v51, %v3363_v29  ;;  %v2968_v44 = vadd.f32 %v10440_v9, %v2967_v7  ;;  %vm2970_vm5 = vweird.f32 %v10440_v9  ;;  %v7334_v24 = vadd.f32 -0.3333295, %v3503_v40 }
 0x4ea   : > { %v3504_v36 = vmul.f32 %v3488_v49, %v10406_v41  ;;  %v2975_v52 = vand.u32 2147483648, %v10382_v12  ;;  %v3244_v23 = vsel %vm10540_vm9, %v10426_v59, %v3240_v20  ;;  %vm2969_vm15 = vweird.f32 %v10382_v12 }
 0x4eb   : > { %v2973_v35 = vand.u32 2147483647, %v10382_v12  ;;  %v3248_v38 = vor.u32 1.1754944e-38, %v3247_v28  ;;  %7792 = vrcp.f32 %v10529_v46  ;;  %v3473_v21 = vmul.f32 %v7320_v34, %v10480_v53  ;;  %vm10557_vm3 = vmor %vm2969_vm15, %vm2970_vm5 }
 0x4ec   : > { %v10555_v22 = vmul.f32 %v10536_v5, %v10536_v5  ;;  %vm3246_vm14 = vcmp.eq.f32.partialorder %v3245_v58, 8.507059e+37  ;;  %v3474_v59 = vmul.f32 %v7321_v3, %v10497_v14  ;;  %v2972_v12 = vsel %vm10557_vm3, %v10440_v9, %v2968_v44 }
 0x4ed   : > { %v3249_v18 = vsel %vm3246_vm14, %v3248_v38, %v3244_v23  ;;  %v3613_v6 = vsub.f32 0.0, %v3581_v47  ;;  %v3550_v13 = vmul.f32 %v3534_v60, %v10197_v1  ;;  %v2976_v51 = vor.u32 1.1754944e-38, %v2975_v52 }
 0x4ee   : > { %v10565_v40 = vpop.eup %7790  ;;  %v7307_v7 = vadd.f32 -1.0, %v10326_v16  ;;  %v3535_v49 = vmul.f32 %v7334_v24, %v10261_v31  ;;  %v7335_v29 = vadd.f32 -0.3333295, %v3504_v36  ;;  %vm2974_vm5 = vcmp.eq.f32.partialorder %v2973_v35, 8.507059e+37 }
 0x4ef   : > { %v10571_v20 = vadd.f32 %v9932_v50, %v2755_v25  ;;  %v3489_v28 = vadd.f32 0.19977711, %v3473_v21  ;;  %v3443_v34 = vmul.f32 0.080537446, %v10555_v22  ;;  %v2977_v9 = vsel %vm2974_vm5, %v2976_v51, %v2972_v12 }
 0x4f0   : > { %v3250_v58 = vmul.f32 %v7307_v7, %v3249_v18  ;;  %vm3597_vm9 = vcmp.lt.f32.partialorder %v9952_v55, 0.0  ;;  %v3490_v60 = vadd.f32 0.19977711, %v3474_v59  ;;  %v3252_v44 = vmul.f32 %v10565_v40, %v10512_v2 }
 0x4f1   : > { %v10574_v3 = vpop.eup %7792  ;;  %3766 = vrot.lane.b32.xlu0 %v10571_v20, %s8097_s16  ;;  %v3629_v31 = vsel %vm3597_vm9, %v3613_v6, %v3581_v47  ;;  %v3390_v50 = vsel %vm2814_vm6, 0.7853982, %v14313_v37  ;;  %v3566_v8 = vadd.f32 %v3550_v13, %v10197_v1  ;;  %v10586_v24 = vmul.f32 0.5, %v10287_v15 }
 0x4f2   : > { %v3551_v36 = vmul.f32 %v3535_v49, %v10236_v10  ;;  %v3536_v55 = vmul.f32 %v7335_v29, %v10406_v41  ;;  %vm2820_vm15 = vcmp.gt.f32.partialorder %v10326_v16, 0.41421357  ;;  %v2978_v52 = vmul.f32 -1.0, %v2977_v9 }
 0x4f3   : > { %v3505_v23 = vmul.f32 %v3489_v28, %v10480_v53  ;;  %v7322_v35 = vadd.f32 -0.13877685, %v3443_v34  ;;  %v3364_v47 = vsel %vm2820_vm15, %v3250_v58, %v10326_v16  ;;  %v2980_v1 = vmul.f32 %v10574_v3, %v10529_v46 }
 0x4f4   : > { %v3406_v15 = vsel %vm2798_vm1, 1.5707964, %v3390_v50  ;;  %v3391_v41 = vsel %vm2815_vm2, 0.7853982, %v14313_v37  ;;  %v3506_v38 = vmul.f32 %v3490_v60, %v10497_v14  ;;  %v3253_v21 = vsub.f32 1.0, %v3252_v44 }
 0x4f5   : > { %v3582_v63 = vadd.f32 %v3566_v8, %v3406_v15  ;;  %v3392_v25 = vsel %vm2816_vm12, 0.7853982, %v14313_v37  ;;  %vm2804_vm6 = vcmp.gt.f32.partialorder %v10326_v16, 2.4142137  ;;  %v10608_v59 = vand.u32 2147483647, %v10586_v24 }
 0x4f6   : > { %v3645_v12 = vmul.f32 1.272, %v3629_v31  ;;  %v3567_v61 = vadd.f32 %v3551_v36, %v10236_v10  ;;  %v3552_v18 = vmul.f32 %v3536_v55, %v10340_v19  ;;  %v10614_v6 = vsel %vm2804_vm6, %v2978_v52, %v3364_v47  ;;  %v2758_v10 = vpop.f32.mrf.mxu3  ;;  %v10637_v55 = vld [vmem:[%s14388_s18] ss:$0 sm:$0xff] }
 0x4f7   : > { %v7336_v13 = vadd.f32 -0.3333295, %v3505_v23  ;;  %v3475_v51 = vmul.f32 %v7322_v35, %v10555_v22  ;;  %v2981_v7 = vsub.f32 1.0, %v2980_v1  ;;  %vm3598_vm1 = vcmp.lt.f32.partialorder %v9982_v42, 0.0 }
 0x4f8   : > { %vm14428_vm2 = vcmp.gt.f32.partialorder %v10019_v57, 2.4142137  ;;  %v7337_v29 = vadd.f32 -0.3333295, %v3506_v38  ;;  %v3254_v28 = vmul.f32 %v10565_v40, %v3253_v21  ;;  %v3614_v34 = vsub.f32 0.0, %v3582_v63 }
 0x4f9   : > { %v3407_v49 = vsel %vm14428_vm2, 1.5707964, %v3391_v41  ;;  %vm14429_vm12 = vcmp.gt.f32.partialorder %v10066_v54, 2.4142137  ;;  %v10625_v58 = vmul.f32 %v10614_v6, %v10614_v6  ;;  %v10628_v60 = vadd.f32 1.0, %v10608_v59 }
 0x4fa   : > { %v3408_v9 = vsel %vm14429_vm12, 1.5707964, %v3392_v25  ;;  %v3662_v44 = vmul.f32 1.442695, %v3645_v12  ;;  %v3583_v31 = vadd.f32 %v3567_v61, %v3407_v49  ;;  %v3568_v57 = vadd.f32 %v3552_v18, %v10340_v19 }
 0x4fb   : > { %v3393_v50 = vsel %vm2817_vm7, 0.7853982, %v14313_v37  ;;  %v3537_v8 = vmul.f32 %v7336_v13, %v10480_v53  ;;  %v3491_v36 = vadd.f32 0.19977711, %v3475_v51  ;;  %v2982_v54 = vmul.f32 %v10574_v3, %v2981_v7 }
 0x4fc   : > { %v10640_v52 = vadd.f32 %v10637_v55, %v2758_v10  ;;  %vm3599_vm3 = vcmp.lt.f32.partialorder %v10004_v27, 0.0  ;;  %v3538_v23 = vmul.f32 %v7337_v29, %v10497_v14  ;;  %v3255_v19 = vadd.f32 %v10565_v40, %v3254_v28 }
 0x4fd   : > { %vm3257_vm14 = vweird.f32 %v10565_v40  ;;  %v10647_v35 = vadd.f32 1e-30, %v10608_v59  ;;  %v3630_v53 = vsel %vm3598_vm1, %v3614_v34, %v3582_v63  ;;  %v3444_v47 = vmul.f32 0.080537446, %v10625_v58 }
 0x4fe   : > { %v3262_v1 = vand.u32 2147483648, %v10512_v2  ;;  %7794 = vrcp.f32 %v10628_v60  ;;  %3768 = vrot.lane.b32.xlu1 %v10640_v52, %s8097_s16  ;;  %v3615_v14 = vsub.f32 0.0, %v3583_v31  ;;  %v3584_v15 = vadd.f32 %v3568_v57, %v3408_v9 }
 0x4ff   : > { %vm3256_vm7 = vweird.f32 %v10512_v2  ;;  %v3260_v41 = vand.u32 2147483647, %v10512_v2  ;;  %v3553_v38 = vmul.f32 %v3537_v8, %v10457_v17  ;;  %v3507_v42 = vmul.f32 %v3491_v36, %v10555_v22 }
 0x500   : > { %v2983_v21 = vadd.f32 %v10574_v3, %v2982_v54  ;;  %vm2985_vm5 = vweird.f32 %v10574_v3  ;;  %vm10664_vm9 = vmor %vm3256_vm7, %vm3257_vm14  ;;  %vm3600_vm1 = vcmp.lt.f32.partialorder %v10050_v43, 0.0  ;;  %v3554_v25 = vmul.f32 %v3538_v23, %v10472_v26 }
 0x501   : > { %v2990_v2 = vand.u32 2147483648, %v10529_v46  ;;  %v3259_v12 = vsel %vm10664_vm9, %v10565_v40, %v3255_v19  ;;  %7796 = vrcp.f32 %v10647_v35  ;;  %v7323_v61 = vadd.f32 -0.13877685, %v3444_v47 }
 0x502   : > { %vm2984_vm2 = vweird.f32 %v10529_v46  ;;  %v2988_v18 = vand.u32 2147483647, %v10529_v46  ;;  %v3263_v13 = vor.u32 1.1754944e-38, %v3262_v1  ;;  %v3646_v51 = vmul.f32 1.272, %v3630_v53 }
 0x503   : > { %v3409_v7 = vsel %vm2801_vm11, 1.5707964, %v3393_v50  ;;  %vm10679_vm12 = vmor %vm2984_vm2, %vm2985_vm5  ;;  %vm3261_vm14 = vcmp.eq.f32.partialorder %v3260_v41, 8.507059e+37  ;;  %v10684_v29 = vmul.f32 0.5, %v10490_v56  ;;  %v3569_v28 = vadd.f32 %v3553_v38, %v10457_v17  ;;  %v2761_v38 = vpop.f32.mrf.mxu3 }
 0x504   : > { %v10686_v40 = vpop.eup %7794  ;;  %v7338_v10 = vadd.f32 -0.3333295, %v3507_v42  ;;  %v2987_v46 = vsel %vm10679_vm12, %v10574_v3, %v2983_v21  ;;  %v3264_v34 = vsel %vm3261_vm14, %v3263_v13, %v3259_v12  ;;  %v3394_v62 = vsel %vm2818_vm4, 0.7853982, %v14313_v37 }
 0x505   : > { %v3570_v9 = vadd.f32 %v3554_v25, %v10472_v26  ;;  %v2991_v57 = vor.u32 1.1754944e-38, %v2990_v2  ;;  %v7308_v56 = vadd.f32 -1.0, %v10487_v30  ;;  %v3631_v50 = vsel %vm3599_vm3, %v3615_v14, %v3583_v31 }
 0x506   : > { %v3616_v8 = vsub.f32 0.0, %v3584_v15  ;;  %v3476_v17 = vmul.f32 %v7323_v61, %v10625_v58  ;;  %vm2989_vm11 = vcmp.eq.f32.partialorder %v2988_v18, 8.507059e+37  ;;  %v3267_v23 = vmul.f32 %v10686_v40, %v10628_v60 }
 0x507   : > { %v10700_v36 = vpop.eup %7796  ;;  %v2992_v3 = vsel %vm2989_vm11, %v2991_v57, %v2987_v46  ;;  %v3265_v54 = vmul.f32 %v7308_v56, %v3264_v34  ;;  %v10705_v19 = vand.u32 2147483647, %v10684_v29  ;;  %7798 = vpow2.f32 %v3662_v44 }
 0x508   : > { %v3585_v26 = vadd.f32 %v3569_v28, %v3409_v7  ;;  %v3410_v27 = vsel %vm2802_vm8, 1.5707964, %v3394_v62  ;;  %v3539_v31 = vmul.f32 %v7338_v10, %v10555_v22  ;;  %v3664_v53 = vmul.f32 1.442695, %v3646_v51 }
 0x509   : > { %v3647_v47 = vmul.f32 1.272, %v3631_v50  ;;  %vm3601_vm4 = vcmp.lt.f32.partialorder %v10128_v32, 0.0  ;;  %v3586_v1 = vadd.f32 %v3570_v9, %v3410_v27  ;;  %v3632_v14 = vsel %vm3600_vm1, %v3616_v8, %v3584_v15 }
 0x50a   : > { %vm2821_vm3 = vcmp.gt.f32.partialorder %v10487_v30, 0.41421357  ;;  %v2993_v41 = vmul.f32 -1.0, %v2992_v3  ;;  %v2995_v44 = vmul.f32 %v10700_v36, %v10647_v35  ;;  %v3492_v42 = vadd.f32 0.19977711, %v3476_v17 }
 0x50b   : > { %v3365_v11 = vsel %vm2821_vm3, %v3265_v54, %v10487_v30  ;;  %v3268_v22 = vsub.f32 1.0, %v3267_v23  ;;  %v10720_v21 = vadd.f32 1.0, %v10705_v19  ;;  %v3617_v63 = vsub.f32 0.0, %v3585_v26 }
 0x50c   : > { %v3555_v43 = vmul.f32 %v3539_v31, %v10536_v5  ;;  %v10724_v15 = vadd.f32 1e-30, %v10705_v19  ;;  %v10727_v25 = vmul.f32 0.5, %v10506_v39  ;;  %vm3602_vm8 = vcmp.lt.f32.partialorder %v10141_v4, 0.0 }
 0x50d   : > { %v3618_v2 = vsub.f32 0.0, %v3586_v1  ;;  %vm2805_vm7 = vcmp.gt.f32.partialorder %v10487_v30, 2.4142137  ;;  %v10732_v12 = vadd.f32 %v10637_v55, %v2761_v38  ;;  %v10734_v61 = vpop.eup %7798  ;;  %v3666_v18 = vmul.f32 1.442695, %v3647_v47 }
 0x50e   : > { %v3648_v13 = vmul.f32 1.272, %v3632_v14  ;;  %v10738_v51 = vsel %vm2805_vm7, %v2993_v41, %v3365_v11  ;;  %v2996_v7 = vsub.f32 1.0, %v2995_v44  ;;  %v3395_v39 = vsel %vm2819_vm13, 0.7853982, %v14313_v37 }
 0x50f   : > { %v3508_v49 = vmul.f32 %v3492_v42, %v10625_v58  ;;  %v3269_v28 = vmul.f32 %v10686_v40, %v3268_v22  ;;  %7800 = vrcp.f32 %v10720_v21  ;;  %3770 = vrot.lane.b32.xlu2 %v10732_v12, %s8097_s16  ;;  %v3633_v55 = vsel %vm3601_vm4, %v3617_v63, %v3585_v26 }
 0x510   : > { %v3571_v10 = vadd.f32 %v3555_v43, %v10536_v5  ;;  %7802 = vrcp.f32 %v10724_v15  ;;  %v10753_v46 = vand.u32 2147483647, %v10727_v25  ;;  %v3634_v34 = vsel %vm3602_vm8, %v3618_v2, %v3586_v1 }
 0x511   : > { %7804 = vpow2.f32 %v3664_v53  ;;  %v10759_v62 = vmul.f32 %v10738_v51, %v10738_v51  ;;  %v3668_v9 = vmul.f32 1.442695, %v3648_v13  ;;  %v3411_v32 = vsel %vm2803_vm10, 1.5707964, %v3395_v39 }
 0x512   : > { %7806 = vpow2.f32 %v3666_v18  ;;  %v2997_v5 = vmul.f32 %v10700_v36, %v2996_v7  ;;  %v3649_v57 = vmul.f32 1.272, %v3633_v55  ;;  %vm3603_vm13 = vcmp.lt.f32.partialorder %v10208_v0, 0.0 }
 0x513   : > { %v7339_v56 = vadd.f32 -0.3333295, %v3508_v49  ;;  %v3270_v50 = vadd.f32 %v10686_v40, %v3269_v28  ;;  %vm3272_vm5 = vweird.f32 %v10686_v40  ;;  %v3650_v4 = vmul.f32 1.272, %v3634_v34 }
 0x514   : > { %v3587_v8 = vadd.f32 %v3571_v10, %v3411_v32  ;;  %v3277_v17 = vand.u32 2147483648, %v10628_v60  ;;  %v10769_v3 = vadd.f32 1e-30, %v10753_v46  ;;  %v3445_v48 = vmul.f32 0.080537446, %v10759_v62 }
 0x515   : > { %v10771_v54 = vpop.eup %7800  ;;  %vm3271_vm10 = vweird.f32 %v10628_v60  ;;  %v3275_v23 = vand.u32 2147483647, %v10628_v60  ;;  %v10777_v26 = vadd.f32 1.0, %v10753_v46  ;;  %v2998_v31 = vadd.f32 %v10700_v36, %v2997_v5 }
 0x516   : > { %v10779_v27 = vpop.eup %7802  ;;  %vm2999_vm9 = vweird.f32 %v10647_v35  ;;  %vm3000_vm1 = vweird.f32 %v10700_v36  ;;  %vm10784_vm2 = vmor %vm3271_vm10, %vm3272_vm5  ;;  %v10789_v47 = vmul.f32 0.5, %v10571_v20  ;;  %v3540_v60 = vmul.f32 %v7339_v56, %v10625_v58 }
 0x517   : > { %v10791_v1 = vpop.eup %7804  ;;  %v3003_v14 = vand.u32 2147483647, %v10647_v35  ;;  %v3005_v41 = vand.u32 2147483648, %v10647_v35  ;;  %v3274_v44 = vsel %vm10784_vm2, %v10686_v40, %v3270_v50  ;;  %v3619_v42 = vsub.f32 0.0, %v3587_v8  ;;  %vm10806_vm12 = vmor %vm2999_vm9, %vm3000_vm1 }
 0x518   : > { %v10799_v38 = vpop.eup %7806  ;;  %v3278_v11 = vor.u32 1.1754944e-38, %v3277_v17  ;;  %v3282_v20 = vmul.f32 %v10771_v54, %v10720_v21  ;;  %7808 = vrcp.f32 %v10769_v3  ;;  %v7324_v22 = vadd.f32 -0.13877685, %v3445_v48 }
 0x519   : > { %vm3276_vm14 = vcmp.eq.f32.partialorder %v3275_v23, 8.507059e+37  ;;  %v3010_v40 = vmul.f32 %v10779_v27, %v10724_v15  ;;  %7810 = vrcp.f32 %v10777_v26  ;;  %v3396_v63 = vsel %vm2820_vm15, 0.7853982, %v14313_v37 }
 0x51a   : > { %v3002_v43 = vsel %vm10806_vm12, %v10700_v36, %v2998_v31  ;;  %v3279_v2 = vsel %vm3276_vm14, %v3278_v11, %v3274_v44  ;;  %v10820_v35 = vand.u32 2147483647, %v10789_v47  ;;  %v3670_v18 = vmul.f32 1.442695, %v3649_v57 }
 0x51b   : > { %v3556_v13 = vmul.f32 %v3540_v60, %v10614_v6  ;;  %v3006_v7 = vor.u32 1.1754944e-38, %v3005_v41  ;;  %v7309_v39 = vadd.f32 -1.0, %v10608_v59  ;;  %v3672_v49 = vmul.f32 1.442695, %v3650_v4 }
 0x51c   : > { %v3635_v28 = vsel %vm3603_vm13, %v3619_v42, %v3587_v8  ;;  %vm3004_vm11 = vcmp.eq.f32.partialorder %v3003_v14, 8.507059e+37  ;;  %v3283_v55 = vsub.f32 1.0, %v3282_v20  ;;  %v3477_v10 = vmul.f32 %v7324_v22, %v10759_v62 }
 0x51d   : > { %v3007_v34 = vsel %vm3004_vm11, %v3006_v7, %v3002_v43  ;;  %v3280_v36 = vmul.f32 %v7309_v39, %v3279_v2  ;;  %v3011_v32 = vsub.f32 1.0, %v3010_v40  ;;  %7812 = vpow2.f32 %v3668_v9 }
 0x51e   : > { %v10827_v5 = vpop.eup %7808  ;;  %v3412_v57 = vsel %vm2804_vm6, 1.5707964, %v3396_v63  ;;  %v10832_v56 = vadd.f32 1.0, %v10820_v35  ;;  %v10835_v50 = vmul.f32 0.5, %v10640_v52  ;;  %7814 = vpow2.f32 %v3670_v18 }
 0x51f   : > { %v10837_v0 = vpop.eup %7810  ;;  %v3651_v4 = vmul.f32 1.272, %v3635_v28  ;;  %v3572_v8 = vadd.f32 %v3556_v13, %v10614_v6  ;;  %v10841_v17 = vadd.f32 1e-30, %v10820_v35  ;;  %v10846_v16 = vsel %vm2821_vm3, 0.7853982, %v14313_v37 }
 0x520   : > { %vm2822_vm15 = vcmp.gt.f32.partialorder %v10608_v59, 0.41421357  ;;  %v3008_v9 = vmul.f32 -1.0, %v3007_v34  ;;  %v3284_v52 = vmul.f32 %v10771_v54, %v3283_v55  ;;  %7816 = vpow2.f32 %v3672_v49  ;;  %v14440_v28 = vld [vmem:[#allocation17_spill] sm:$0xff] }
 0x521   : > { %v3493_v48 = vadd.f32 0.19977711, %v3477_v10  ;;  %v3366_v23 = vsel %vm2822_vm15, %v3280_v36, %v10608_v59  ;;  %v3012_v6 = vmul.f32 %v10779_v27, %v3011_v32  ;;  %v3025_v31 = vmul.f32 %v10827_v5, %v10769_v3 }
 0x522   : > { %v3297_v53 = vmul.f32 %v10837_v0, %v10777_v26  ;;  %7818 = vrcp.f32 %v10832_v56  ;;  %v10860_v60 = vand.u32 2147483647, %v10835_v50  ;;  %v10862_v14 = vmul.f32 1.442695, %v3651_v4 }
 0x523   : > { %v10864_v41 = vadd.f32 %v3572_v8, %v3412_v57  ;;  %vm2806_vm6 = vcmp.gt.f32.partialorder %v10608_v59, 2.4142137  ;;  %7820 = vrcp.f32 %v10841_v17  ;;  %v10868_v44 = vpop.eup %7812  ;;  %v3285_v11 = vadd.f32 %v10771_v54, %v3284_v52 }
 0x524   : > { %v10872_v42 = vsel %vm2806_vm6, %v3008_v9, %v3366_v23  ;;  %vm3286_vm4 = vweird.f32 %v10720_v21  ;;  %vm3287_vm3 = vweird.f32 %v10771_v54  ;;  %v10877_v20 = vpop.eup %7814  ;;  %v3509_v22 = vmul.f32 %v3493_v48, %v10759_v62 }
 0x525   : > { %vm3015_vm8 = vweird.f32 %v10779_v27  ;;  %v3290_v58 = vand.u32 2147483647, %v10720_v21  ;;  %v3292_v40 = vand.u32 2147483648, %v10720_v21  ;;  %v3013_v63 = vadd.f32 %v10779_v27, %v3012_v6  ;;  %vm10897_vm5 = vmor %vm3286_vm4, %vm3287_vm3 }
 0x526   : > { %v3026_v43 = vsub.f32 1.0, %v3025_v31  ;;  %v3298_v2 = vsub.f32 1.0, %v3297_v53  ;;  %v10885_v18 = vadd.f32 1.0, %v10860_v60  ;;  %v10887_v13 = vpop.eup %7816  ;;  %v10891_v7 = vmul.f32 %v10872_v42, %v10872_v42 }
 0x527   : > { %vm3014_vm13 = vweird.f32 %v10724_v15  ;;  %v3020_v39 = vand.u32 2147483648, %v10724_v15  ;;  %v10903_v55 = vmul.f32 %v10799_v38, %v14440_v28  ;;  %v3018_v34 = vand.u32 2147483647, %v10724_v15 }
 0x528   : > { %v10905_v10 = vpop.eup %7818  ;;  %v3289_v36 = vsel %vm10897_vm5, %v10771_v54, %v3285_v11  ;;  %v10912_v32 = vadd.f32 1e-30, %v10860_v60  ;;  %v10915_v21 = vmul.f32 0.5, %v10732_v12  ;;  %v7340_v4 = vadd.f32 -0.3333295, %v3509_v22  ;;  %vm10922_vm9 = vmor %vm3014_vm13, %vm3015_vm8 }
 0x529   : > { %v10917_v57 = vpop.eup %7820  ;;  %vm2823_vm10 = vcmp.gt.f32.partialorder %v10705_v19, 0.41421357  ;;  %v7310_v15 = vadd.f32 -1.0, %v10705_v19  ;;  %vm3291_vm1 = vcmp.eq.f32.partialorder %v3290_v58, 8.507059e+37  ;;  %v3293_v54 = vor.u32 1.1754944e-38, %v3292_v40 }
 0x52a   : > { %v3017_v12 = vsel %vm10922_vm9, %v10779_v27, %v3013_v63  ;;  %v3027_v8 = vmul.f32 %v10827_v5, %v3026_v43  ;;  %v3299_v9 = vmul.f32 %v10837_v0, %v3298_v2  ;;  %7822 = vrcp.f32 %v10885_v18 }
 0x52b   : > { %v3446_v52 = vmul.f32 0.080537446, %v10891_v7  ;;  %v3021_v48 = vor.u32 1.1754944e-38, %v3020_v39  ;;  %v3294_v23 = vsel %vm3291_vm1, %v3293_v54, %v3289_v36  ;;  %v3312_v6 = vmul.f32 %v10905_v10, %v10832_v56 }
 0x52c   : > { %vm3019_vm2 = vcmp.eq.f32.partialorder %v3018_v34, 8.507059e+37  ;;  %v3040_v31 = vmul.f32 %v10917_v57, %v10841_v17  ;;  %7824 = vrcp.f32 %v10912_v32  ;;  %v10940_v27 = vand.u32 2147483647, %v10915_v21 }
 0x52d   : > { %v10943_v53 = vmul.f32 %v7340_v4, %v10759_v62  ;;  %vm2807_vm12 = vcmp.gt.f32.partialorder %v10705_v19, 2.4142137  ;;  %v3022_v11 = vsel %vm3019_vm2, %v3021_v48, %v3017_v12  ;;  %vm3030_vm14 = vweird.f32 %v10827_v5  ;;  %v3743_v4 = vpop.permute.xlu0 %3742 }
 0x52e   : > { %v3307_v22 = vand.u32 2147483648, %v10777_v26  ;;  %v3295_v58 = vmul.f32 %v7310_v15, %v3294_v23  ;;  %v3028_v40 = vadd.f32 %v10827_v5, %v3027_v8  ;;  %v3300_v63 = vadd.f32 %v10837_v0, %v3299_v9  ;;  %v14447_v8 = vld [vmem:[#allocation15_spill] sm:$0xff] }
 0x52f   : > { %vm3302_vm11 = vweird.f32 %v10837_v0  ;;  %v7325_v43 = vadd.f32 -0.13877685, %v3446_v52  ;;  %vm3029_vm4 = vweird.f32 %v10769_v3  ;;  %v3035_v62 = vand.u32 2147483648, %v10769_v3 }
 0x530   : > { %v3313_v2 = vsub.f32 1.0, %v3312_v6  ;;  %v10953_v39 = vpop.eup %7822  ;;  %vm10955_vm3 = vmor %vm3029_vm4, %vm3030_vm14  ;;  %vm3301_vm8 = vweird.f32 %v10777_v26  ;;  %v3305_v28 = vand.u32 2147483647, %v10777_v26  ;;  %v3041_v34 = vsub.f32 1.0, %v3040_v31 }
 0x531   : > { %v10962_v36 = vadd.f32 1.0, %v10940_v27  ;;  %v3023_v38 = vmul.f32 -1.0, %v3022_v11  ;;  %v3033_v15 = vand.u32 2147483647, %v10769_v3  ;;  %v7311_v54 = vadd.f32 -1.0, %v10753_v46  ;;  %vm10968_vm13 = vmor %vm3301_vm8, %vm3302_vm11 }
 0x532   : > { %v3709_v9 = vmul.f32 %v10734_v61, %v14447_v8  ;;  %v10974_v26 = vpop.eup %7824  ;;  %v3367_v52 = vsel %vm2823_vm10, %v3295_v58, %v10705_v19  ;;  %v3032_v3 = vsel %vm10955_vm3, %v10827_v5, %v3028_v40  ;;  %v3304_v48 = vsel %vm10968_vm13, %v10837_v0, %v3300_v63  ;;  %v14465_v19 = vld [vmem:[#allocation22_spill] sm:$0xff] }
 0x533   : > { %v3308_v23 = vor.u32 1.1754944e-38, %v3307_v22  ;;  %v3314_v6 = vmul.f32 %v10905_v10, %v3313_v2  ;;  %v3327_v61 = vmul.f32 %v10953_v39, %v10885_v18  ;;  %v10989_v31 = vadd.f32 1e-30, %v10940_v27  ;;  %v3745_v2 = vpop.permute.xlu1 %3744 }
 0x534   : > { %v3789_v11 = vadd.f32 %v3743_v4, %v3709_v9  ;;  %v3036_v8 = vor.u32 1.1754944e-38, %v3035_v62  ;;  %vm3306_vm5 = vcmp.eq.f32.partialorder %v3305_v28, 8.507059e+37  ;;  %v3042_v58 = vmul.f32 %v10917_v57, %v3041_v34  ;;  %v14448_v28 = vld [vmem:[#allocation16_spill] sm:$0xff] }
 0x535   : > { %7826 = vrcp.f32 %v10962_v36  ;;  %v3478_v5 = vmul.f32 %v7325_v43, %v10891_v7  ;;  %vm3034_vm9 = vcmp.eq.f32.partialorder %v3033_v15, 8.507059e+37  ;;  %v3309_v0 = vsel %vm3306_vm5, %v3308_v23, %v3304_v48 }
 0x536   : > { %v3055_v22 = vmul.f32 %v10974_v26, %v10912_v32  ;;  %7348 = vmatmul.msk.f32.gmra.mxu1 %vm14255_vm0, %v3789_v11  ;;  %v10999_v40 = vsel %vm2807_vm12, %v3023_v38, %v3367_v52  ;;  %v3037_v63 = vsel %vm3034_vm9, %v3036_v8, %v3032_v3  ;;  %v3050_v62 = vand.u32 2147483648, %v10841_v17 }
 0x537   : > { %vm3317_vm1 = vweird.f32 %v10905_v10  ;;  %v3315_v49 = vadd.f32 %v10905_v10, %v3314_v6  ;;  %v3328_v43 = vsub.f32 1.0, %v3327_v61  ;;  %7828 = vrcp.f32 %v10989_v31 }
 0x538   : > { %v3710_v34 = vmul.f32 %v10791_v1, %v14448_v28  ;;  %v3310_v4 = vmul.f32 %v7311_v54, %v3309_v0  ;;  %v3043_v15 = vadd.f32 %v10917_v57, %v3042_v58  ;;  %vm3045_vm2 = vweird.f32 %v10917_v57 }
 0x539   : > { %v3322_v38 = vand.u32 2147483648, %v10832_v56  ;;  %vm3316_vm14 = vweird.f32 %v10832_v56  ;;  %v3320_v12 = vand.u32 2147483647, %v10832_v56  ;;  %v3056_v9 = vsub.f32 1.0, %v3055_v22 }
 0x53a   : > { %v3790_v52 = vadd.f32 %v3745_v2, %v3710_v34  ;;  %v11016_v48 = vmul.f32 %v10999_v40, %v10999_v40  ;;  %vm2808_vm11 = vcmp.gt.f32.partialorder %v10753_v46, 2.4142137  ;;  %vm3044_vm4 = vweird.f32 %v10841_v17  ;;  %vm11023_vm3 = vmor %vm3316_vm14, %vm3317_vm1 }
 0x53b   : > { %v11012_v3 = vpop.eup %7826  ;;  %v3048_v1 = vand.u32 2147483647, %v10841_v17  ;;  %vm2824_vm8 = vcmp.gt.f32.partialorder %v10753_v46, 0.41421357  ;;  %v3038_v56 = vmul.f32 -1.0, %v3037_v63  ;;  %vm11028_vm13 = vmor %vm3044_vm4, %vm3045_vm2  ;;  %v3319_v6 = vsel %vm11023_vm3, %v10905_v10, %v3315_v49 }
 0x53c   : > { %v3329_v61 = vmul.f32 %v10953_v39, %v3328_v43  ;;  %v3494_v17 = vadd.f32 0.19977711, %v3478_v5  ;;  %v3368_v11 = vsel %vm2824_vm8, %v3310_v4, %v10753_v46  ;;  %v3047_v8 = vsel %vm11028_vm13, %v10917_v57, %v3043_v15  ;;  %v3747_v4 = vpop.permute.xlu2 %3746 }
 0x53d   : > { %v3323_v58 = vor.u32 1.1754944e-38, %v3322_v38  ;;  %v11042_v0 = vpop.eup %7828  ;;  %v3051_v22 = vor.u32 1.1754944e-38, %v3050_v62  ;;  %vm3321_vm5 = vcmp.eq.f32.partialorder %v3320_v12, 8.507059e+37  ;;  %v3057_v63 = vmul.f32 %v10974_v26, %v3056_v9 }
 0x53e   : > { %v3342_v10 = vmul.f32 %v11012_v3, %v10962_v36  ;;  %7349 = vmatmul.msk.f32.gmra.mxu1 %vm14255_vm0, %v3790_v52  ;;  %v3447_v5 = vmul.f32 0.080537446, %v11016_v48  ;;  %vm3049_vm9 = vcmp.eq.f32.partialorder %v3048_v1, 8.507059e+37  ;;  %v7312_v2 = vadd.f32 -1.0, %v10820_v35 }
 0x53f   : > { %v3324_v49 = vsel %vm3321_vm5, %v3323_v58, %v3319_v6  ;;  %v11052_v57 = vsel %vm2808_vm11, %v3038_v56, %v3368_v11  ;;  %v3052_v43 = vsel %vm3049_vm9, %v3051_v22, %v3047_v8  ;;  %v3330_v62 = vadd.f32 %v10953_v39, %v3329_v61 }
 0x540   : > { %vm3332_vm1 = vweird.f32 %v10953_v39  ;;  %vm3331_vm2 = vweird.f32 %v10885_v18  ;;  %v3335_v28 = vand.u32 2147483647, %v10885_v18  ;;  %v3337_v34 = vand.u32 2147483648, %v10885_v18 }
 0x541   : > { %v3070_v15 = vmul.f32 %v11042_v0, %v10989_v31  ;;  %v3325_v38 = vmul.f32 %v7312_v2, %v3324_v49  ;;  %v3058_v12 = vadd.f32 %v10974_v26, %v3057_v63  ;;  %vm3060_vm14 = vweird.f32 %v10974_v26  ;;  %vm11066_vm3 = vmor %vm3331_vm2, %vm3332_vm1  ;;  %v3749_v2 = vpop.permute.xlu0 %3748 }
 0x542   : > { %v3343_v9 = vsub.f32 1.0, %v3342_v10  ;;  %v3510_v52 = vmul.f32 %v3494_v17, %v10891_v7  ;;  %v7326_v1 = vadd.f32 -0.13877685, %v3447_v5  ;;  %vm2825_vm4 = vcmp.gt.f32.partialorder %v10820_v35, 0.41421357 }
 0x543   : > { %v3065_v54 = vand.u32 2147483648, %v10912_v32  ;;  %vm3059_vm13 = vweird.f32 %v10912_v32  ;;  %v3063_v18 = vand.u32 2147483647, %v10912_v32  ;;  %v3334_v23 = vsel %vm11066_vm3, %v10953_v39, %v3330_v62 }
 0x544   : > { %v3791_v6 = vadd.f32 %v3747_v4, %v10903_v55  ;;  %v11078_v61 = vmul.f32 %v11052_v57, %v11052_v57  ;;  %v3053_v17 = vmul.f32 -1.0, %v3052_v43  ;;  %vm11080_vm5 = vmor %vm3059_vm13, %vm3060_vm14  ;;  %v3338_v8 = vor.u32 1.1754944e-38, %v3337_v34  ;;  %v14457_v43 = vld [vmem:[#allocation18_spill] sm:$0xff] }
 0x545   : > { %v3071_v58 = vsub.f32 1.0, %v3070_v15  ;;  %v3369_v32 = vsel %vm2825_vm4, %v3325_v38, %v10820_v35  ;;  %v3062_v39 = vsel %vm11080_vm5, %v10974_v26, %v3058_v12  ;;  %vm3336_vm9 = vcmp.eq.f32.partialorder %v3335_v28, 8.507059e+37 }
 0x546   : > { %v3344_v55 = vmul.f32 %v11012_v3, %v3343_v9  ;;  %7350 = vmatmul.msk.f32.gmra.mxu1 %vm14255_vm0, %v3791_v6  ;;  %v7341_v22 = vadd.f32 -0.3333295, %v3510_v52  ;;  %v3479_v63 = vmul.f32 %v7326_v1, %v11016_v48  ;;  %v3066_v10 = vor.u32 1.1754944e-38, %v3065_v54 }
 0x547   : > { %v3339_v5 = vsel %vm3336_vm9, %v3338_v8, %v3334_v23  ;;  %vm14227_vm1 = vcmp.gt.f32.partialorder %v10820_v35, 2.4142137  ;;  %vm3064_vm2 = vcmp.eq.f32.partialorder %v3063_v18, 8.507059e+37  ;;  %v7313_v49 = vadd.f32 -1.0, %v10860_v60 }
 0x548   : > { %v3712_v62 = vmul.f32 %v10868_v44, %v14457_v43  ;;  %v3448_v26 = vmul.f32 0.080537446, %v11078_v61  ;;  %v11100_v28 = vsel %vm14227_vm1, %v3053_v17, %v3369_v32  ;;  %v3067_v34 = vsel %vm3064_vm2, %v3066_v10, %v3062_v39  ;;  %v3751_v39 = vpop.permute.xlu1 %3750 }
 0x549   : > { %v3072_v4 = vmul.f32 %v11042_v0, %v3071_v58  ;;  %vm3604_vm14 = vcmp.lt.f32.partialorder %v10300_v33, 0.0  ;;  %v3340_v15 = vmul.f32 %v7313_v49, %v3339_v5  ;;  %v3345_v38 = vadd.f32 %v11012_v3, %v3344_v55 }
 0x54a   : > { %vm3347_vm3 = vweird.f32 %v11012_v3  ;;  %v3792_v12 = vadd.f32 %v3749_v2, %v3712_v62  ;;  %v3620_v9 = vsub.f32 0.0, %v10864_v41  ;;  %v3557_v44 = vmul.f32 %v10943_v53, %v10738_v51  ;;  %v14463_v53 = vld [vmem:[#allocation20_spill] sm:$0xff] }
 0x54b   : > { %v3495_v52 = vadd.f32 0.19977711, %v3479_v63  ;;  %v3352_v1 = vand.u32 2147483648, %v10962_v36  ;;  %v3542_v54 = vmul.f32 %v7341_v22, %v10891_v7  ;;  %v11113_v56 = vmul.f32 %v11100_v28, %v11100_v28 }
 0x54c   : > { %vm3346_vm13 = vweird.f32 %v10962_v36  ;;  %v3350_v18 = vand.u32 2147483647, %v10962_v36  ;;  %vm14226_vm5 = vcmp.gt.f32.partialorder %v10860_v60, 0.41421357  ;;  %v3068_v23 = vmul.f32 -1.0, %v3067_v34 }
 0x54d   : > { %v3073_v6 = vadd.f32 %v11042_v0, %v3072_v4  ;;  %vm3075_vm9 = vweird.f32 %v11042_v0  ;;  %vm11120_vm2 = vmor %vm3346_vm13, %vm3347_vm3  ;;  %v7327_v7 = vadd.f32 -0.13877685, %v3448_v26  ;;  %v3370_v17 = vsel %vm14226_vm5, %v3340_v15, %v10860_v60 }
 0x54e   : > { %v3080_v11 = vand.u32 2147483648, %v10989_v31  ;;  %v3349_v36 = vsel %vm11120_vm2, %v11012_v3, %v3345_v38  ;;  %7351 = vmatmul.msk.f32.gmra.mxu1 %vm14255_vm0, %v3792_v12  ;;  %v3511_v8 = vmul.f32 %v3495_v52, %v11016_v48  ;;  %vm3074_vm3 = vweird.f32 %v10989_v31  ;;  %v14462_v3 = vld [vmem:[#allocation19_spill] sm:$0xff] }
 0x54f   : > { %v3078_v58 = vand.u32 2147483647, %v10989_v31  ;;  %v3353_v32 = vor.u32 1.1754944e-38, %v3352_v1  ;;  %v3449_v55 = vmul.f32 0.080537446, %v11113_v56  ;;  %vm11137_vm5 = vmor %vm3074_vm3, %vm3075_vm9  ;;  %vm3351_vm1 = vcmp.eq.f32.partialorder %v3350_v18, 8.507059e+37 }
 0x550   : > { %vm2810_vm13 = vcmp.gt.f32.partialorder %v10860_v60, 2.4142137  ;;  %v3713_v63 = vmul.f32 %v10877_v20, %v14462_v3  ;;  %v3573_v10 = vadd.f32 %v3557_v44, %v10738_v51  ;;  %v3077_v31 = vsel %vm11137_vm5, %v11042_v0, %v3073_v6 }
 0x551   : > { %v11146_v5 = vsel %vm2810_vm13, %v3068_v23, %v3370_v17  ;;  %v3354_v2 = vsel %vm3351_vm1, %v3353_v32, %v3349_v36  ;;  %v3480_v49 = vmul.f32 %v7327_v7, %v11078_v61  ;;  %v3081_v43 = vor.u32 1.1754944e-38, %v3080_v11  ;;  %v3753_v23 = vpop.permute.xlu2 %3752 }
 0x552   : > { %v7314_v62 = vadd.f32 -1.0, %v10940_v27  ;;  %v3793_v26 = vadd.f32 %v3751_v39, %v3713_v63  ;;  %v3636_v20 = vsel %vm3604_vm14, %v3620_v9, %v10864_v41  ;;  %v3558_v51 = vmul.f32 %v3542_v54, %v10872_v42  ;;  %v3755_v63 = vpop.permute.xlu0 %3754 }
 0x553   : > { %v7342_v34 = vadd.f32 -0.3333295, %v3511_v8  ;;  %vm3079_vm9 = vcmp.eq.f32.partialorder %v3078_v58, 8.507059e+37  ;;  %v7328_v4 = vadd.f32 -0.13877685, %v3449_v55  ;;  %v11159_v15 = vmul.f32 %v11146_v5, %v11146_v5 }
 0x554   : > { %v3082_v0 = vsel %vm3079_vm9, %v3081_v43, %v3077_v31  ;;  %v3355_v38 = vmul.f32 %v7314_v62, %v3354_v2  ;;  %v3413_v12 = vsel %vm2805_vm7, 1.5707964, %v10846_v16  ;;  %7830 = vpow2.f32 %v10862_v14  ;;  %v14464_v2 = vld [vmem:[#allocation21_spill] sm:$0xff] }
 0x555   : > { %v3589_v44 = vadd.f32 %v3573_v10, %v3413_v12  ;;  %v3398_v33 = vsel %vm2822_vm15, 0.7853982, %v14313_v37  ;;  %v3496_v41 = vadd.f32 0.19977711, %v3480_v49  ;;  %v3652_v9 = vmul.f32 1.272, %v3636_v20 }
 0x556   : > { %7352 = vmatmul.msk.f32.gmra.mxu1 %vm14255_vm0, %v3793_v26  ;;  %v3574_v52 = vadd.f32 %v3558_v51, %v10872_v42  ;;  %vm2827_vm1 = vcmp.gt.f32.partialorder %v10940_v27, 0.41421357  ;;  %v3083_v1 = vmul.f32 -1.0, %v3082_v0  ;;  %v3543_v54 = vmul.f32 %v7342_v34, %v11016_v48 }
 0x557   : > { %v3481_v30 = vmul.f32 %v7328_v4, %v11113_v56  ;;  %v3450_v16 = vmul.f32 0.080537446, %v11159_v15  ;;  %v3371_v14 = vsel %vm2827_vm1, %v3355_v38, %v10940_v27  ;;  %v3414_v18 = vsel %vm2806_vm6, 1.5707964, %v3398_v33 }
 0x558   : > { %v3621_v6 = vsub.f32 0.0, %v3589_v44  ;;  %v3512_v42 = vmul.f32 %v3496_v41, %v11078_v61  ;;  %vm2811_vm7 = vcmp.gt.f32.partialorder %v10940_v27, 2.4142137  ;;  %v3714_v48 = vmul.f32 %v10887_v13, %v14463_v53  ;;  %v3757_v41 = vpop.permute.xlu1 %3756  ;;  %v3936_v53 = vpop.f32.mrf.mxu2 }
 0x559   : > { %v3676_v7 = vmul.f32 1.442695, %v3652_v9  ;;  %v3590_v17 = vadd.f32 %v3574_v52, %v3414_v18  ;;  %v11185_v11 = vsel %vm2811_vm7, %v3083_v1, %v3371_v14  ;;  %v3559_v8 = vmul.f32 %v3543_v54, %v10999_v40 }
 0x55a   : > { %v7831_v36 = vpop.eup %7830  ;;  %v3497_v59 = vadd.f32 0.19977711, %v3481_v30  ;;  %v7329_v58 = vadd.f32 -0.13877685, %v3450_v16  ;;  %v3794_v32 = vadd.f32 %v3753_v23, %v3714_v48  ;;  %vm3605_vm15 = vcmp.lt.f32.partialorder %v10464_v45, 0.0 }
 0x55b   : > { %v3637_v39 = vsel %vm3605_vm15, %v3621_v6, %v3589_v44  ;;  %v7343_v55 = vadd.f32 -0.3333295, %v3512_v42  ;;  %v11191_v22 = vmul.f32 %v11185_v11, %v11185_v11  ;;  %7832 = vpow2.f32 %v3676_v7 }
 0x55c   : > { %v3622_v13 = vsub.f32 0.0, %v3590_v17  ;;  %v3399_v3 = vsel %vm2823_vm10, 0.7853982, %v14313_v37  ;;  %v3575_v10 = vadd.f32 %v3559_v8, %v10999_v40  ;;  %v3513_v31 = vmul.f32 %v3497_v59, %v11113_v56 }
 0x55d   : > { %v3482_v45 = vmul.f32 %v7329_v58, %v11159_v15  ;;  %v3715_v49 = vmul.f32 %v7831_v36, %v14464_v2  ;;  %v3653_v43 = vmul.f32 1.272, %v3637_v39  ;;  %v3544_v62 = vmul.f32 %v7343_v55, %v11078_v61  ;;  %v3759_v58 = vpop.permute.xlu2 %3758  ;;  %v14466_v55 = vld [vmem:[#allocation23_spill] sm:$0xff] }
 0x55e   : > { %7353 = vmatmul.msk.f32.gmra.mxu1 %vm14255_vm0, %v3794_v32  ;;  %v3451_v26 = vmul.f32 0.080537446, %v11191_v22  ;;  %vm3606_vm6 = vcmp.lt.f32.partialorder %v10586_v24, 0.0  ;;  %v3415_v51 = vsel %vm2807_vm12, 1.5707964, %v3399_v3  ;;  %vm3607_vm10 = vcmp.lt.f32.partialorder %v10684_v29, 0.0 }
 0x55f   : > { %v3795_v20 = vadd.f32 %v3755_v63, %v3715_v49  ;;  %v3638_v34 = vsel %vm3606_vm6, %v3622_v13, %v3590_v17  ;;  %v3591_v4 = vadd.f32 %v3575_v10, %v3415_v51  ;;  %v7344_v40 = vadd.f32 -0.3333295, %v3513_v31  ;;  %v3761_v49 = vpop.permute.xlu0 %3760 }
 0x560   : > { %v3498_v0 = vadd.f32 0.19977711, %v3482_v45  ;;  %v3678_v12 = vmul.f32 1.442695, %v3653_v43  ;;  %v3560_v44 = vmul.f32 %v3544_v62, %v11052_v57  ;;  %v7330_v33 = vadd.f32 -0.13877685, %v3451_v26 }
 0x561   : > { %v7833_v38 = vpop.eup %7832  ;;  %v3654_v61 = vmul.f32 1.272, %v3638_v34  ;;  %v3623_v9 = vsub.f32 0.0, %v3591_v4  ;;  %v3545_v52 = vmul.f32 %v7344_v40, %v11113_v56  ;;  %v3400_v54 = vsel %vm2824_vm8, 0.7853982, %v14313_v37  ;;  %v3871_v17 = vpop.f32.mrf.mxu1  ;;  %v14470_v26 = vld [vmem:[#allocation24_spill] sm:$0xff] }
 0x562   : > { %v3514_v24 = vmul.f32 %v3498_v0, %v11159_v15  ;;  %v3716_v1 = vmul.f32 %v7833_v38, %v14465_v19  ;;  %7834 = vpow2.f32 %v3678_v12  ;;  %v3576_v30 = vadd.f32 %v3560_v44, %v11052_v57 }
 0x563   : > { %v3483_v16 = vmul.f32 %v7330_v33, %v11191_v22  ;;  %v3680_v18 = vmul.f32 1.442695, %v3654_v61  ;;  %v3639_v23 = vsel %vm3607_vm10, %v3623_v9, %v3591_v4  ;;  %v3561_v56 = vmul.f32 %v3545_v52, %v11100_v28  ;;  %v3763_v61 = vpop.permute.xlu1 %3762 }
 0x564   : > { %v3796_v14 = vadd.f32 %v3757_v41, %v3716_v1  ;;  %v7345_v6 = vadd.f32 -0.3333295, %v3514_v24  ;;  %v3416_v42 = vsel %vm2808_vm11, 1.5707964, %v3400_v54  ;;  %v3655_v36 = vmul.f32 1.272, %v3639_v23 }
 0x565   : > { %v3592_v48 = vadd.f32 %v3576_v30, %v3416_v42  ;;  %v3499_v7 = vadd.f32 0.19977711, %v3483_v16  ;;  %7836 = vpow2.f32 %v3680_v18  ;;  %v11221_v8 = vadd.f32 %v3936_v53, %v3871_v17  ;;  %v14472_v23 = vld [vmem:[#allocation26_spill] sm:$0xff]  ;;  %v14473_v53 = vld [vmem:[#allocation27_spill] sm:$0xff] }
 0x566   : > { %7354 = vmatmul.msk.f32.gmra.mxu1 %vm14255_vm0, %v3795_v20  ;;  %v3401_v29 = vsel %vm2825_vm4, 0.7853982, %v14313_v37  ;;  %v3577_v59 = vadd.f32 %v3561_v56, %v11100_v28  ;;  %v3546_v46 = vmul.f32 %v7345_v6, %v11159_v15  ;;  %v3682_v3 = vmul.f32 1.442695, %v3655_v36 }
 0x567   : > { %4005 = vrot.lane.b32.xlu0 %v11221_v8, %s8097_s16  ;;  %v3624_v32 = vsub.f32 0.0, %v3592_v48  ;;  %v3515_v39 = vmul.f32 %v3499_v7, %v11191_v22  ;;  %vm14467_vm12 = vcmp.gt.f32.partialorder %v10820_v35, 2.4142137  ;;  %vm3608_vm11 = vcmp.lt.f32.partialorder %v10727_v25, 0.0  ;;  %v3767_v27 = vpop.permute.xlu0 %3766 }
 0x568   : > { %v7835_v57 = vpop.eup %7834  ;;  %v3417_v63 = vsel %vm14467_vm12, 1.5707964, %v3401_v29  ;;  %v3562_v31 = vmul.f32 %v3546_v46, %v11146_v5  ;;  %7838 = vpow2.f32 %v3682_v3  ;;  %vm14469_vm8 = vcmp.gt.f32.partialorder %v10860_v60, 0.41421357  ;;  %v3939_v29 = vpop.f32.mrf.mxu2  ;;  %v14474_v46 = vld [vmem:[#allocation28_spill] sm:$0xff] }
 0x569   : > { %v3717_v13 = vmul.f32 %v7835_v57, %v14466_v55  ;;  %v3593_v10 = vadd.f32 %v3577_v59, %v3417_v63  ;;  %v3640_v15 = vsel %vm3608_vm11, %v3624_v32, %v3592_v48  ;;  %v7346_v2 = vadd.f32 -0.3333295, %v3515_v39 }
 0x56a   : > { %v3402_v35 = vsel %vm14469_vm8, 0.7853982, %v14313_v37  ;;  %v3578_v62 = vadd.f32 %v3562_v31, %v11146_v5  ;;  %v3656_v51 = vmul.f32 1.272, %v3640_v15  ;;  %vm3609_vm4 = vcmp.lt.f32.partialorder %v10789_v47, 0.0  ;;  %v3984_v5 = vld [vmem:[%s14468_s22] sm:$0xff] }
 0x56b   : > { %v3797_v45 = vadd.f32 %v3759_v58, %v3717_v13  ;;  %v7837_v28 = vpop.eup %7836  ;;  %v3625_v43 = vsub.f32 0.0, %v3593_v10  ;;  %v3547_v34 = vmul.f32 %v7346_v2, %v11191_v22  ;;  %v3418_v4 = vsel %vm2810_vm13, 1.5707964, %v3402_v35  ;;  %4084 = vmatpush.msra.mxu0 %v3984_v5  ;;  %v14471_v22 = vld [vmem:[#allocation25_spill] sm:$0xff]  ;;  %s14598_s22 = sld [smem:[#allocation10_spill]] }
 0x56c   : > { %v3718_v20 = vmul.f32 %v7837_v28, %v14470_v26  ;;  %v3594_v0 = vadd.f32 %v3578_v62, %v3418_v4  ;;  %v3684_v12 = vmul.f32 1.442695, %v3656_v51  ;;  %v3403_v47 = vsel %vm2827_vm1, 0.7853982, %v14313_v37  ;;  %v14475_v13 = vld [vmem:[#allocation29_spill] sm:$0xff] }
 0x56d   : > { %v3641_v40 = vsel %vm3609_vm4, %v3625_v43, %v3593_v10  ;;  %v3563_v44 = vmul.f32 %v3547_v34, %v11185_v11  ;;  %vm3610_vm14 = vcmp.lt.f32.partialorder %v10835_v50, 0.0  ;;  %v3419_v1 = vsel %vm2811_vm7, 1.5707964, %v3403_v47 }
 0x56e   : > { %7355 = vmatmul.msk.f32.gmra.mxu1 %vm14255_vm0, %v3796_v14  ;;  %v3798_v25 = vadd.f32 %v3761_v49, %v3718_v20  ;;  %v7839_v38 = vpop.eup %7838  ;;  %v3657_v33 = vmul.f32 1.272, %v3641_v40  ;;  %v3626_v41 = vsub.f32 0.0, %v3594_v0  ;;  %7840 = vpow2.f32 %v3684_v12  ;;  %v3765_v14 = vpop.permute.xlu2 %3764 }
 0x56f   : > { %v3719_v9 = vmul.f32 %v7839_v38, %v14471_v22  ;;  %v3579_v60 = vadd.f32 %v3563_v44, %v11185_v11  ;;  %vm3611_vm5 = vcmp.lt.f32.partialorder %v10915_v21, 0.0  ;;  %vm14499_vm2 = vcmask 261120  }
 0x570   : > { %v3686_v24 = vmul.f32 1.442695, %v3657_v33  ;;  %v3642_v19 = vsel %vm3610_vm14, %v3626_v41, %v3594_v0  ;;  %v3769_v59 = vpop.permute.xlu1 %3768  ;;  %v3942_v39 = vpop.f32.mrf.mxu2  ;;  %vm14506_vm3 = vmmov %vm14499_vm2 }
 0x571   : > { %v3799_v52 = vadd.f32 %v3763_v61, %v3719_v9  ;;  %v3595_v54 = vadd.f32 %v3579_v60, %v3419_v1  ;;  %v3658_v16 = vmul.f32 1.272, %v3642_v19  ;;  %v4153_v1 = vld [vmem:[%s14479_s23 + $0x18] sm:$0xff]  ;;  %vm14507_vm13 = vmmov %vm14499_vm2 }
 0x572   : > { %7842 = vpow2.f32 %v3686_v24  ;;  %4218 = vmatpush.msra.mxu3 %v4153_v1  ;;  %vm14508_vm9 = vmmov %vm14499_vm2 }
 0x573   : > { %v3627_v18 = vsub.f32 0.0, %v3595_v54  ;;  %v3688_v6 = vmul.f32 1.442695, %v3658_v16  ;;  %vm14509_vm1 = vmmov %vm14499_vm2 }
 0x574   : > { %v7841_v30 = vpop.eup %7840  ;;  %vm14510_vm7 = vmmov %vm14509_vm1 }
 0x575   : > { %v3720_v56 = vmul.f32 %v7841_v30, %v14472_v23  ;;  %v3643_v50 = vsel %vm3611_vm5, %v3627_v18, %v3595_v54  ;;  %7844 = vpow2.f32 %v3688_v6  ;;  %vm14511_vm15 = vmmov %vm14509_vm1 }
 0x576   : > { %7356 = vmatmul.msk.f32.gmra.mxu1 %vm14255_vm0, %v3797_v45  ;;  %v3659_v7 = vmul.f32 1.272, %v3643_v50  ;;  %v3771_v55 = vpop.permute.xlu2 %3770  ;;  %vm14513_vm6 = vmmov %vm14509_vm1 }
 0x577   : > { %v3800_v11 = vadd.f32 %v3765_v14, %v3720_v56  ;;  %vm14514_vm10 = vmmov %vm14509_vm1 }
 0x578   : > { %v7843_v42 = vpop.eup %7842  ;;  %v3690_v36 = vmul.f32 1.442695, %v3659_v7  ;;  %v3945_v10 = vpop.f32.mrf.mxu2  ;;  %vm14515_vm12 = vmmov %vm14509_vm1 }
 0x579   : > { %v3721_v48 = vmul.f32 %v7843_v42, %v14473_v53  ;;  %v4152_v42 = vld [vmem:[%s14479_s23 + $0x10] sm:$0xff]  ;;  %vm14516_vm11 = vmmov %vm14509_vm1 }
 0x57a   : > { %7846 = vpow2.f32 %v3690_v36  ;;  %4219 = vmatpush.msra.mxu3 %v4152_v42  ;;  %v4151_v36 = vld [vmem:[%s14479_s23 + $0x8] sm:$0xff]  ;;  %vm14517_vm8 = vmmov %vm14509_vm1 }
 0x57b   : > { %v3801_v17 = vadd.f32 %v3767_v27, %v3721_v48  ;;  %v7845_v57 = vpop.eup %7844  ;;  %vm14518_vm4 = vmmov %vm14509_vm1 }
 0x57c   : > { %v3722_v58 = vmul.f32 %v7845_v57, %v14474_v46  ;;  %4220 = vmatpush.msra.mxu3 %v4151_v36  ;;  %vm14519_vm14 = vmmov %vm14509_vm1 }
 0x57d   : > { %vm14520_vm5 = vmmov %vm14509_vm1 }
 0x57e   : > { %7357 = vmatmul.msk.f32.gmra.mxu1 %vm14255_vm0, %v3798_v25  ;;  %v3802_v32 = vadd.f32 %v3769_v59, %v3722_v58 }
 0x580   : > { %v7847_v21 = vpop.eup %7846  ;;  %v3948_v28 = vpop.f32.mrf.mxu2 }
 0x581   : > { %v3723_v3 = vmul.f32 %v7847_v21, %v14475_v13  ;;  %v11368_v21 = vld [vmem:[%s14490_s26] ss:$0 sm:$0xff]  ;;  %s14601_s26 = sld [smem:[#allocation13_spill]] }
 0x583   : > { %v3803_v63 = vadd.f32 %v3771_v55, %v3723_v3 }
 0x586   : > { %7358 = vmatmul.msk.f32.gmra.mxu1 %vm14255_vm0, %v3799_v52 }
 0x588   : > { %v3951_v49 = vpop.f32.mrf.mxu2 }
 0x58e   : > { %7359 = vmatmul.msk.f32.gmra.mxu1 %vm14255_vm0, %v3800_v11 }
 0x590   : > { %v3954_v62 = vpop.f32.mrf.mxu2 }
 0x596   : > { %7360 = vmatmul.msk.f32.gmra.mxu1 %vm14255_vm0, %v3801_v17 }
 0x598   : > { %v3957_v51 = vpop.f32.mrf.mxu2 }
 0x59e   : > { %7361 = vmatmul.msk.f32.gmra.mxu1 %vm14255_vm0, %v3802_v32  ;;  %v4150_v32 = vld [vmem:[%s14479_s23] sm:$0xff] }
 0x59f   : > { %4221 = vmatpush.msra.mxu3 %v4150_v32 }
 0x5a0   : > { %v3960_v0 = vpop.f32.mrf.mxu2 }
 0x5a6   : > { %7362 = vmatmul.msk.f32.gmra.mxu1 %vm14255_vm0, %v3803_v63 }
 0x5a8   : > { %v3963_v5 = vpop.f32.mrf.mxu2 }
 0x5b0   : > { %v3966_v41 = vpop.f32.mrf.mxu2 }
 0x5b3   : > { %v3874_v31 = vpop.f32.mrf.mxu1 }
 0x5b4   : > { %v11267_v45 = vadd.f32 %v3939_v29, %v3874_v31 }
 0x5b6   : > { %4007 = vrot.lane.b32.xlu1 %v11267_v45, %s8097_s16 }
 0x5b8   : > { %v3969_v47 = vpop.f32.mrf.mxu2 }
 0x5bb   : > { %v3877_v15 = vpop.f32.mrf.mxu1 }
 0x5bc   : > { %v11271_v2 = vadd.f32 %v3942_v39, %v3877_v15  ;;  %v4290_v15 = vld [vmem:[%s14497_s28 + $0x18] sm:$0xff] }
 0x5bd   : > { %4355 = vmatpush.msra.mxu1 %v4290_v15  ;;  %v4287_v15 = vld [vmem:[%s14497_s28] sm:$0xff] }
 0x5be   : > { %4009 = vrot.lane.b32.xlu2 %v11271_v2, %s8097_s16 }
 0x5c0   : > { %v3972_v54 = vpop.f32.mrf.mxu2 }
 0x5c3   : > { %v3880_v43 = vpop.f32.mrf.mxu1 }
 0x5c4   : > { %v11275_v35 = vadd.f32 %v3945_v10, %v3880_v43 }
 0x5c6   : > { %4011 = vrot.lane.b32.xlu0 %v11275_v35, %s8097_s16 }
 0x5c8   : > { %v3975_v14 = vpop.f32.mrf.mxu2 }
 0x5cb   : > { %v3883_v26 = vpop.f32.mrf.mxu1 }
 0x5cc   : > { %v11279_v20 = vadd.f32 %v3948_v28, %v3883_v26 }
 0x5ce   : > { %4013 = vrot.lane.b32.xlu1 %v11279_v20, %s8097_s16 }
 0x5d0   : > { %v3978_v56 = vpop.f32.mrf.mxu2 }
 0x5d3   : > { %v3886_v34 = vpop.f32.mrf.mxu1 }
 0x5d4   : > { %v11283_v25 = vadd.f32 %v3951_v49, %v3886_v34  ;;  %v4289_v34 = vld [vmem:[%s14497_s28 + $0x10] sm:$0xff] }
 0x5d5   : > { %4356 = vmatpush.msra.mxu1 %v4289_v34  ;;  %v11424_v34 = vld [vmem:[%s14512_s1] ss:$0 sm:$0xff]  ;;  %s14613_s1 = sld [smem:[#allocation12_spill]] }
 0x5d6   : > { %4015 = vrot.lane.b32.xlu2 %v11283_v25, %s8097_s16 }
 0x5d8   : > { %v3981_v50 = vpop.f32.mrf.mxu2 }
 0x5d9   : > { %v11295_v44 = vpop.permute.xlu0 %4005 }
 0x5da   : > { %14478 = vst [vmem:[#allocation17_spill] sm:$0xff] %v11295_v44  ;;  %7379 = vmatmul.msk.f32.vlgmr.msra.gmra.mxu0 %vm14255_vm0, %v11295_v44 }
 0x5db   : > { %v3889_v4 = vpop.f32.mrf.mxu1 }
 0x5dc   : > { %v11287_v40 = vadd.f32 %v3954_v62, %v3889_v4 }
 0x5de   : > { %14476 = vst [vmem:[#allocation30_spill] sm:$0xff] %v11287_v40  ;;  %4017 = vrot.lane.b32.xlu0 %v11287_v40, %s8097_s16 }
 0x5e3   : > { %v3892_v38 = vpop.f32.mrf.mxu1 }
 0x5e4   : > { %v11291_v12 = vadd.f32 %v3957_v51, %v3892_v38 }
 0x5e6   : > { %14477 = vst [vmem:[#allocation14_spill] sm:$0xff] %v11291_v12  ;;  %4019 = vrot.lane.b32.xlu1 %v11291_v12, %s8097_s16 }
 0x5eb   : > { %v3895_v33 = vpop.f32.mrf.mxu1 }
 0x5ec   : > { %v11299_v61 = vadd.f32 %v3960_v0, %v3895_v33 }
 0x5ee   : > { %14480 = vst [vmem:[#allocation15_spill] sm:$0xff] %v11299_v61  ;;  %4021 = vrot.lane.b32.xlu2 %v11299_v61, %s8097_s16 }
 0x5f3   : > { %v3898_v22 = vpop.f32.mrf.mxu1 }
 0x5f4   : > { %v11303_v9 = vadd.f32 %v3963_v5, %v3898_v22 }
 0x5f6   : > { %14481 = vst [vmem:[#allocation16_spill] sm:$0xff] %v11303_v9  ;;  %4023 = vrot.lane.b32.xlu0 %v11303_v9, %s8097_s16 }
 0x5fb   : > { %v3901_v60 = vpop.f32.mrf.mxu1 }
 0x5fc   : > { %v11307_v52 = vadd.f32 %v3966_v41, %v3901_v60 }
 0x5fe   : > { %14482 = vst [vmem:[#allocation18_spill] sm:$0xff] %v11307_v52  ;;  %4025 = vrot.lane.b32.xlu1 %v11307_v52, %s8097_s16 }
 0x603   : > { %v3904_v24 = vpop.f32.mrf.mxu1 }
 0x604   : > { %v11311_v19 = vadd.f32 %v3969_v47, %v3904_v24 }
 0x606   : > { %14483 = vst [vmem:[#allocation19_spill] sm:$0xff] %v11311_v19  ;;  %4027 = vrot.lane.b32.xlu2 %v11311_v19, %s8097_s16 }
 0x60b   : > { %v3907_v30 = vpop.f32.mrf.mxu1 }
 0x60c   : > { %v11316_v16 = vadd.f32 %v3972_v54, %v3907_v30  ;;  %v4288_v30 = vld [vmem:[%s14497_s28 + $0x8] sm:$0xff] }
 0x60d   : > { %4357 = vmatpush.msra.mxu1 %v4288_v30 }
 0x60e   : > { %14484 = vst [vmem:[#allocation20_spill] sm:$0xff] %v11316_v16  ;;  %4029 = vrot.lane.b32.xlu0 %v11316_v16, %s8097_s16 }
 0x60f   : > { %4358 = vmatpush.msra.mxu1 %v4287_v15 }
 0x613   : > { %v3910_v18 = vpop.f32.mrf.mxu1 }
 0x614   : > { %v11320_v23 = vadd.f32 %v3975_v14, %v3910_v18 }
 0x616   : > { %14485 = vst [vmem:[#allocation21_spill] sm:$0xff] %v11320_v23  ;;  %4031 = vrot.lane.b32.xlu1 %v11320_v23, %s8097_s16 }
 0x618   : > { %v11337_v7 = vpop.permute.xlu2 %4009 }
 0x619   : > { %14489 = vst [vmem:[#allocation25_spill] sm:$0xff] %v11337_v7 }
 0x61b   : > { %v3913_v6 = vpop.f32.mrf.mxu1 }
 0x61c   : > { %v11324_v11 = vadd.f32 %v3978_v56, %v3913_v6 }
 0x61e   : > { %14486 = vst [vmem:[#allocation22_spill] sm:$0xff] %v11324_v11  ;;  %4033 = vrot.lane.b32.xlu2 %v11324_v11, %s8097_s16 }
 0x623   : > { %v3916_v27 = vpop.f32.mrf.mxu1 }
 0x624   : > { %v11329_v53 = vadd.f32 %v3981_v50, %v3916_v27 }
 0x626   : > { %14487 = vst [vmem:[#allocation23_spill] sm:$0xff] %v11329_v53  ;;  %4035 = vrot.lane.b32.xlu0 %v11329_v53, %s8097_s16 }
 0x628   : > { %v11333_v48 = vpop.permute.xlu1 %4007 }
 0x629   : > { %14488 = vst [vmem:[#allocation24_spill] sm:$0xff] %v11333_v48  ;;  %7380 = vmatmul.msk.f32.gmra.mxu0 %vm14255_vm0, %v11333_v48 }
 0x630   : > { %v11350_v29 = vpop.permute.xlu2 %4015 }
 0x631   : > { %7381 = vmatmul.msk.f32.gmra.mxu0 %vm14255_vm0, %v11337_v7  ;;  %14493 = vst [vmem:[#allocation28_spill] sm:$0xff] %v11350_v29 }
 0x638   : > { %v11341_v17 = vpop.permute.xlu0 %4011 }
 0x639   : > { %14491 = vst [vmem:[#allocation26_spill] sm:$0xff] %v11341_v17  ;;  %7382 = vmatmul.msk.f32.gmra.mxu0 %vm14255_vm0, %v11341_v17 }
 0x640   : > { %v11345_v57 = vpop.permute.xlu1 %4013 }
 0x641   : > { %14492 = vst [vmem:[#allocation27_spill] sm:$0xff] %v11345_v57  ;;  %7383 = vmatmul.msk.f32.gmra.mxu0 %vm14255_vm0, %v11345_v57 }
 0x648   : > { %v11362_v58 = vpop.permute.xlu2 %4021 }
 0x649   : > { %7384 = vmatmul.msk.f32.gmra.mxu0 %vm14255_vm0, %v11350_v29  ;;  %14496 = vst [vmem:[#allocation32_spill] sm:$0xff] %v11362_v58 }
 0x650   : > { %v11354_v59 = vpop.permute.xlu0 %4017 }
 0x651   : > { %14494 = vst [vmem:[#allocation29_spill] sm:$0xff] %v11354_v59  ;;  %7385 = vmatmul.msk.f32.gmra.mxu0 %vm14255_vm0, %v11354_v59 }
 0x657   : > { %v4086_v39 = vpop.f32.mrf.mxu0 }
 0x658   : > { %v11358_v46 = vpop.permute.xlu1 %4019  ;;  %v4087_v55 = vadd.f32 %v11368_v21, %v4086_v39 }
 0x659   : > { %14495 = vst [vmem:[#allocation31_spill] sm:$0xff] %v11358_v46  ;;  %7386 = vmatmul.msk.f32.gmra.mxu0 %vm14255_vm0, %v11358_v46 }
 0x65a   : > { %v4134_v13 = vmax.f32 %v4087_v55, 0.0 }
 0x65c   : > { %7395 = vmatmul.msk.f32.vlgmr.msra.gmra.mxu3 %vm14499_vm2, %v4134_v13  ;;  %vm14521_vm2 = vmmov %vm14509_vm1 }
 0x660   : > { %v11380_v10 = vpop.permute.xlu2 %4027 }
 0x661   : > { %7387 = vmatmul.msk.f32.gmra.mxu0 %vm14255_vm0, %v11362_v58  ;;  %14501 = vst [vmem:[#allocation35_spill] sm:$0xff] %v11380_v10 }
 0x668   : > { %v11371_v3 = vpop.permute.xlu0 %4023 }
 0x669   : > { %14498 = vst [vmem:[#allocation33_spill] sm:$0xff] %v11371_v3  ;;  %7388 = vmatmul.msk.f32.gmra.mxu0 %vm14255_vm0, %v11371_v3 }
 0x670   : > { %v11376_v63 = vpop.permute.xlu1 %4025 }
 0x671   : > { %14500 = vst [vmem:[#allocation34_spill] sm:$0xff] %v11376_v63  ;;  %7389 = vmatmul.msk.f32.gmra.mxu0 %vm14255_vm0, %v11376_v63 }
 0x678   : > { %v11393_v49 = vpop.permute.xlu2 %4033 }
 0x679   : > { %7390 = vmatmul.msk.f32.gmra.mxu0 %vm14255_vm0, %v11380_v10  ;;  %14504 = vst [vmem:[#allocation38_spill] sm:$0xff] %v11393_v49 }
 0x680   : > { %v11384_v31 = vpop.permute.xlu0 %4029 }
 0x681   : > { %14502 = vst [vmem:[#allocation36_spill] sm:$0xff] %v11384_v31  ;;  %7391 = vmatmul.msk.f32.gmra.mxu0 %vm14255_vm0, %v11384_v31 }
 0x688   : > { %v11388_v28 = vpop.permute.xlu1 %4031 }
 0x689   : > { %14503 = vst [vmem:[#allocation37_spill] sm:$0xff] %v11388_v28  ;;  %7392 = vmatmul.msk.f32.gmra.mxu0 %vm14255_vm0, %v11388_v28 }
 0x691   : > { %7393 = vmatmul.msk.f32.gmra.mxu0 %vm14255_vm0, %v11393_v49 }
 0x698   : > { %v11397_v43 = vpop.permute.xlu0 %4035 }
 0x699   : > { %14505 = vst [vmem:[#allocation39_spill] sm:$0xff] %v11397_v43  ;;  %7394 = vmatmul.msk.f32.gmra.mxu0 %vm14255_vm0, %v11397_v43 }
 0x6a6   : > { %v4089_v62 = vpop.f32.mrf.mxu0 }
 0x6a7   : > { %v4090_v26 = vadd.f32 %v11368_v21, %v4089_v62 }
 0x6a9   : > { %v4135_v51 = vmax.f32 %v4090_v26, 0.0 }
 0x6ab   : > { %7396 = vmatmul.msk.f32.gmra.mxu3 %vm14506_vm3, %v4135_v51  ;;  %vm14522_vm3 = vmmov %vm14509_vm1 }
 0x6ae   : > { %v4092_v4 = vpop.f32.mrf.mxu0 }
 0x6af   : > { %v4093_v0 = vadd.f32 %v11368_v21, %v4092_v4 }
 0x6b1   : > { %v4136_v38 = vmax.f32 %v4093_v0, 0.0 }
 0x6b3   : > { %7397 = vmatmul.msk.f32.gmra.mxu3 %vm14507_vm13, %v4136_v38  ;;  %vm14523_vm13 = vmmov %vm14509_vm1 }
 0x6b6   : > { %v4095_v5 = vpop.f32.mrf.mxu0 }
 0x6b7   : > { %v4096_v33 = vadd.f32 %v11368_v21, %v4095_v5 }
 0x6b9   : > { %v4137_v41 = vmax.f32 %v4096_v33, 0.0 }
 0x6bb   : > { %7398 = vmatmul.msk.f32.gmra.mxu3 %vm14508_vm9, %v4137_v41  ;;  %vm14524_vm9 = vmmov %vm14509_vm1 }
 0x6be   : > { %v4098_v22 = vpop.f32.mrf.mxu0 }
 0x6bf   : > { %v4099_v47 = vadd.f32 %v11368_v21, %v4098_v22 }
 0x6c1   : > { %v4138_v60 = vmax.f32 %v4099_v47, 0.0 }
 0x6c3   : > { %7399 = vmatmul.msk.f32.gmra.mxu3 %vm14509_vm1, %v4138_v60 }
 0x6c6   : > { %v4101_v24 = vpop.f32.mrf.mxu0 }
 0x6c7   : > { %v4102_v1 = vadd.f32 %v11368_v21, %v4101_v24 }
 0x6c9   : > { %v4139_v54 = vmax.f32 %v4102_v1, 0.0 }
 0x6cb   : > { %7400 = vmatmul.msk.f32.gmra.mxu3 %vm14510_vm7, %v4139_v54  ;;  %vm14525_vm7 = vmmov %vm14509_vm1 }
 0x6ce   : > { %v4104_v14 = vpop.f32.mrf.mxu0 }
 0x6cf   : > { %v4105_v18 = vadd.f32 %v11368_v21, %v4104_v14 }
 0x6d1   : > { %v4140_v56 = vmax.f32 %v4105_v18, 0.0 }
 0x6d3   : > { %7401 = vmatmul.msk.f32.gmra.mxu3 %vm14511_vm15, %v4140_v56  ;;  %vm14526_vm15 = vmmov %vm14509_vm1 }
 0x6d6   : > { %v4107_v6 = vpop.f32.mrf.mxu0 }
 0x6d7   : > { %v4108_v42 = vadd.f32 %v11368_v21, %v4107_v6 }
 0x6d9   : > { %v4141_v50 = vmax.f32 %v4108_v42, 0.0 }
 0x6db   : > { %7402 = vmatmul.msk.f32.gmra.mxu3 %vm14513_vm6, %v4141_v50  ;;  %vm14528_vm6 = vmmov %vm14509_vm1 }
 0x6de   : > { %v4110_v27 = vpop.f32.mrf.mxu0 }
 0x6df   : > { %v4111_v36 = vadd.f32 %v11368_v21, %v4110_v27  ;;  %v4223_v4 = vpop.f32.mrf.mxu3 }
 0x6e0   : > { %v4224_v0 = vadd.f32 %v11424_v34, %v4223_v4 }
 0x6e1   : > { %v4142_v32 = vmax.f32 %v4111_v36, 0.0 }
 0x6e2   : > { %v4271_v38 = vmax.f32 %v4224_v0, 0.0 }
 0x6e3   : > { %7403 = vmatmul.msk.f32.gmra.mxu3 %vm14514_vm10, %v4142_v32  ;;  %vm14529_vm10 = vmmov %vm14509_vm1 }
 0x6e4   : > { %7411 = vmatmul.msk.f32.vlgmr.msra.gmra.mxu1 %vm14517_vm8, %v4271_v38  ;;  %vm14533_vm8 = vmmov %vm14509_vm1 }
 0x6e6   : > { %v4113_v39 = vpop.f32.mrf.mxu0 }
 0x6e7   : > { %v4114_v55 = vadd.f32 %v11368_v21, %v4113_v39 }
 0x6e9   : > { %v4143_v13 = vmax.f32 %v4114_v55, 0.0 }
 0x6eb   : > { %7404 = vmatmul.msk.f32.gmra.mxu3 %vm14515_vm12, %v4143_v13  ;;  %vm14530_vm12 = vmmov %vm14509_vm1 }
 0x6ee   : > { %v4116_v62 = vpop.f32.mrf.mxu0 }
 0x6ef   : > { %v4117_v26 = vadd.f32 %v11368_v21, %v4116_v62 }
 0x6f1   : > { %v4144_v51 = vmax.f32 %v4117_v26, 0.0 }
 0x6f3   : > { %7405 = vmatmul.msk.f32.gmra.mxu3 %vm14516_vm11, %v4144_v51  ;;  %vm14531_vm11 = vmmov %vm14509_vm1 }
 0x6f6   : > { %v4119_v5 = vpop.f32.mrf.mxu0 }
 0x6f7   : > { %v4120_v33 = vadd.f32 %v11368_v21, %v4119_v5 }
 0x6f9   : > { %v4145_v41 = vmax.f32 %v4120_v33, 0.0 }
 0x6fb   : > { %7406 = vmatmul.msk.f32.gmra.mxu3 %vm14518_vm4, %v4145_v41  ;;  %vm14534_vm4 = vmmov %vm14509_vm1 }
 0x6fe   : > { %v4122_v22 = vpop.f32.mrf.mxu0 }
 0x6ff   : > { %v4123_v47 = vadd.f32 %v11368_v21, %v4122_v22 }
 0x701   : > { %v4146_v60 = vmax.f32 %v4123_v47, 0.0 }
 0x703   : > { %7407 = vmatmul.msk.f32.gmra.mxu3 %vm14519_vm14, %v4146_v60  ;;  %vm14535_vm14 = vmmov %vm14509_vm1 }
 0x706   : > { %v4125_v24 = vpop.f32.mrf.mxu0 }
 0x707   : > { %v4126_v1 = vadd.f32 %v11368_v21, %v4125_v24 }
 0x709   : > { %v4147_v54 = vmax.f32 %v4126_v1, 0.0 }
 0x70b   : > { %7408 = vmatmul.msk.f32.gmra.mxu3 %vm14520_vm5, %v4147_v54  ;;  %vm14536_vm5 = vmmov %vm14509_vm1 }
 0x70e   : > { %v4128_v30 = vpop.f32.mrf.mxu0 }
 0x70f   : > { %v4129_v14 = vadd.f32 %v11368_v21, %v4128_v30 }
 0x711   : > { %v4148_v18 = vmax.f32 %v4129_v14, 0.0 }
 0x713   : > { %7409 = vmatmul.msk.f32.gmra.mxu3 %vm14521_vm2, %v4148_v18  ;;  %vm14537_vm2 = vmmov %vm14509_vm1 }
 0x716   : > { %v4131_v56 = vpop.f32.mrf.mxu0 }
 0x717   : > { %v4132_v6 = vadd.f32 %v11368_v21, %v4131_v56  ;;  %v11457_v56 = vld [vmem:[%s14527_s2] ss:$0 sm:$0xff] }
 0x719   : > { %v4149_v42 = vmax.f32 %v4132_v6, 0.0 }
 0x71b   : > { %7410 = vmatmul.msk.f32.gmra.mxu3 %vm14522_vm3, %v4149_v42  ;;  %vm14538_vm3 = vmmov %vm14509_vm1 }
 0x72e   : > { %v4226_v50 = vpop.f32.mrf.mxu3 }
 0x72f   : > { %v4227_v27 = vadd.f32 %v11424_v34, %v4226_v50 }
 0x731   : > { %v4272_v36 = vmax.f32 %v4227_v27, 0.0 }
 0x733   : > { %7412 = vmatmul.msk.f32.gmra.mxu1 %vm14523_vm13, %v4272_v36 }
 0x736   : > { %v4229_v32 = vpop.f32.mrf.mxu3 }
 0x737   : > { %v4230_v39 = vadd.f32 %v11424_v34, %v4229_v32 }
 0x739   : > { %v4273_v55 = vmax.f32 %v4230_v39, 0.0 }
 0x73b   : > { %7413 = vmatmul.msk.f32.gmra.mxu1 %vm14524_vm9, %v4273_v55 }
 0x73e   : > { %v4232_v13 = vpop.f32.mrf.mxu3 }
 0x73f   : > { %v4233_v15 = vadd.f32 %v11424_v34, %v4232_v13 }
 0x741   : > { %v4274_v62 = vmax.f32 %v4233_v15, 0.0 }
 0x743   : > { %7414 = vmatmul.msk.f32.gmra.mxu1 %vm14509_vm1, %v4274_v62 }
 0x746   : > { %v4235_v21 = vpop.f32.mrf.mxu3 }
 0x747   : > { %v4236_v26 = vadd.f32 %v11424_v34, %v4235_v21 }
 0x749   : > { %v4275_v51 = vmax.f32 %v4236_v26, 0.0 }
 0x74b   : > { %7415 = vmatmul.msk.f32.gmra.mxu1 %vm14525_vm7, %v4275_v51  ;;  %v5432_v51 = vld [vmem:[%s14532_s10] sm:$0xff] }
 0x74c   : > { %5500 = vmatpush.msra.mxu2 %v5432_v51 }
 0x74e   : > { %v4238_v4 = vpop.f32.mrf.mxu3 }
 0x74f   : > { %v4239_v0 = vadd.f32 %v11424_v34, %v4238_v4 }
 0x751   : > { %v4276_v38 = vmax.f32 %v4239_v0, 0.0 }
 0x753   : > { %7416 = vmatmul.msk.f32.gmra.mxu1 %vm14526_vm15, %v4276_v38 }
 0x756   : > { %v4241_v5 = vpop.f32.mrf.mxu3 }
 0x757   : > { %v4242_v33 = vadd.f32 %v11424_v34, %v4241_v5 }
 0x759   : > { %v4277_v41 = vmax.f32 %v4242_v33, 0.0 }
 0x75b   : > { %7417 = vmatmul.msk.f32.gmra.mxu1 %vm14528_vm6, %v4277_v41 }
 0x75e   : > { %v4244_v22 = vpop.f32.mrf.mxu3 }
 0x75f   : > { %v4245_v47 = vadd.f32 %v11424_v34, %v4244_v22 }
 0x761   : > { %v4278_v60 = vmax.f32 %v4245_v47, 0.0  ;;  %v4360_v6 = vpop.f32.mrf.mxu1 }
 0x762   : > { %v4361_v42 = vadd.f32 %v11457_v56, %v4360_v6 }
 0x763   : > { %7418 = vmatmul.msk.f32.gmra.mxu1 %vm14529_vm10, %v4278_v60 }
 0x764   : > { %5368 = vrot.lane.b32.xlu1 %v4361_v42, %s8097_s16  ;;  %v11471_v0 = vmul.f32 0.5, %v4361_v42 }
 0x766   : > { %v4247_v24 = vpop.f32.mrf.mxu3  ;;  %v11475_v33 = vand.u32 2147483647, %v11471_v0 }
 0x767   : > { %v4248_v1 = vadd.f32 %v11424_v34, %v4247_v24 }
 0x768   : > { %v4744_v22 = vadd.f32 1.0, %v11475_v33  ;;  %v4472_v24 = vadd.f32 1e-30, %v11475_v33 }
 0x769   : > { %v4279_v54 = vmax.f32 %v4248_v1, 0.0 }
 0x76a   : > { %7848 = vrcp.f32 %v4744_v22  ;;  %vm4765_vm9 = vweird.f32 %v4744_v22  ;;  %vm4493_vm15 = vweird.f32 %v4472_v24 }
 0x76b   : > { %7419 = vmatmul.msk.f32.gmra.mxu1 %vm14530_vm12, %v4279_v54  ;;  %7850 = vrcp.f32 %v4472_v24 }
 0x76e   : > { %v4250_v30 = vpop.f32.mrf.mxu3 }
 0x76f   : > { %v4251_v14 = vadd.f32 %v11424_v34, %v4250_v30 }
 0x770   : > { %v7849_v54 = vpop.eup %7848 }
 0x771   : > { %v4280_v18 = vmax.f32 %v4251_v14, 0.0  ;;  %v7851_v30 = vpop.eup %7850  ;;  %v4761_v14 = vmul.f32 %v7849_v54, %v4744_v22  ;;  %vm4766_vm13 = vweird.f32 %v7849_v54 }
 0x772   : > { %vm4494_vm1 = vweird.f32 %v7851_v30  ;;  %vm4767_vm7 = vmor %vm4765_vm9, %vm4766_vm13 }
 0x773   : > { %7420 = vmatmul.msk.f32.gmra.mxu1 %vm14531_vm11, %v4280_v18  ;;  %v4489_v18 = vmul.f32 %v7851_v30, %v4472_v24  ;;  %v4762_v6 = vsub.f32 1.0, %v4761_v14  ;;  %vm4495_vm6 = vmor %vm4493_vm15, %vm4494_vm1  ;;  %vm4456_vm11 = vcmp.gt.f32.partialorder %v11475_v33, 0.41421357 }
 0x776   : > { %v4253_v50 = vpop.f32.mrf.mxu3 }
 0x777   : > { %v4254_v27 = vadd.f32 %v11424_v34, %v4253_v50  ;;  %v4490_v50 = vsub.f32 1.0, %v4489_v18 }
 0x779   : > { %v4281_v36 = vmax.f32 %v4254_v27, 0.0 }
 0x77b   : > { %7421 = vmatmul.msk.f32.gmra.mxu1 %vm14533_vm8, %v4281_v36  ;;  %v4763_v36 = vmul.f32 %v7849_v54, %v4762_v6  ;;  %vm4440_vm8 = vcmp.gt.f32.partialorder %v11475_v33, 2.4142137 }
 0x77e   : > { %v4256_v32 = vpop.f32.mrf.mxu3 }
 0x77f   : > { %v4257_v39 = vadd.f32 %v11424_v34, %v4256_v32  ;;  %v4764_v32 = vadd.f32 %v7849_v54, %v4763_v36 }
 0x781   : > { %v4282_v55 = vmax.f32 %v4257_v39, 0.0  ;;  %v4771_v39 = vand.u32 2147483648, %v4744_v22 }
 0x783   : > { %7422 = vmatmul.msk.f32.gmra.mxu1 %vm14534_vm4, %v4282_v55  ;;  %v4772_v51 = vor.u32 1.1754944e-38, %v4771_v39 }
 0x786   : > { %v4259_v13 = vpop.f32.mrf.mxu3 }
 0x787   : > { %v4260_v15 = vadd.f32 %v11424_v34, %v4259_v13  ;;  %v4769_v13 = vand.u32 2147483647, %v4744_v22 }
 0x789   : > { %v4283_v62 = vmax.f32 %v4260_v15, 0.0  ;;  %vm4770_vm10 = vcmp.eq.f32.partialorder %v4769_v13, 8.507059e+37 }
 0x78b   : > { %7423 = vmatmul.msk.f32.gmra.mxu1 %vm14535_vm14, %v4283_v62  ;;  %v4499_v62 = vand.u32 2147483648, %v4472_v24 }
 0x78e   : > { %v4262_v21 = vpop.f32.mrf.mxu3 }
 0x78f   : > { %v4263_v26 = vadd.f32 %v11424_v34, %v4262_v21  ;;  %v4768_v21 = vsel %vm4767_vm7, %v7849_v54, %v4764_v32 }
 0x791   : > { %v4284_v4 = vmax.f32 %v4263_v26, 0.0  ;;  %v4497_v26 = vand.u32 2147483647, %v4472_v24 }
 0x793   : > { %7424 = vmatmul.msk.f32.gmra.mxu1 %vm14536_vm5, %v4284_v4  ;;  %vm4498_vm12 = vcmp.eq.f32.partialorder %v4497_v26, 8.507059e+37 }
 0x796   : > { %v4265_v38 = vpop.f32.mrf.mxu3 }
 0x797   : > { %v4266_v5 = vadd.f32 %v11424_v34, %v4265_v38 }
 0x799   : > { %v4285_v41 = vmax.f32 %v4266_v5, 0.0  ;;  %v4773_v5 = vsel %vm4770_vm10, %v4772_v51, %v4768_v21 }
 0x79b   : > { %7425 = vmatmul.msk.f32.gmra.mxu1 %vm14537_vm2, %v4285_v41  ;;  %v4500_v41 = vor.u32 1.1754944e-38, %v4499_v62 }
 0x79e   : > { %v4268_v47 = vpop.f32.mrf.mxu3 }
 0x79f   : > { %v4269_v60 = vadd.f32 %v11424_v34, %v4268_v47  ;;  %v4491_v34 = vmul.f32 %v7851_v30, %v4490_v50  ;;  %v7427_v47 = vadd.f32 -1.0, %v11475_v33 }
 0x7a1   : > { %v4286_v1 = vmax.f32 %v4269_v60, 0.0  ;;  %v4492_v15 = vadd.f32 %v7851_v30, %v4491_v34  ;;  %v4774_v54 = vmul.f32 %v7427_v47, %v4773_v5 }
 0x7a3   : > { %7426 = vmatmul.msk.f32.gmra.mxu1 %vm14538_vm3, %v4286_v1  ;;  %v4496_v38 = vsel %vm4495_vm6, %v7851_v30, %v4492_v15  ;;  %v5000_v6 = vsel %vm4456_vm11, %v4774_v54, %v11475_v33 }
 0x7a4   : > { %v4501_v1 = vsel %vm4498_vm12, %v4500_v41, %v4496_v38 }
 0x7a5   : > { %v4502_v30 = vmul.f32 -1.0, %v4501_v1 }
 0x7b0   : > { %v4363_v42 = vpop.f32.mrf.mxu1 }
 0x7b1   : > { %v4364_v27 = vadd.f32 %v11457_v56, %v4363_v42  ;;  %v11509_v42 = vsel %vm4440_vm8, %v4502_v30, %v5000_v6 }
 0x7b2   : > { %v11516_v34 = vmul.f32 %v11509_v42, %v11509_v42 }
 0x7b3   : > { %5370 = vrot.lane.b32.xlu2 %v4364_v27, %s8097_s16  ;;  %v11484_v55 = vmul.f32 0.5, %v4364_v27 }
 0x7b4   : > { %v5080_v62 = vmul.f32 0.080537446, %v11516_v34 }
 0x7b5   : > { %v11487_v4 = vand.u32 2147483647, %v11484_v55 }
 0x7b6   : > { %v7443_v47 = vadd.f32 -0.13877685, %v5080_v62 }
 0x7b7   : > { %v11491_v22 = vadd.f32 1.0, %v11487_v4  ;;  %v11495_v14 = vadd.f32 1e-30, %v11487_v4  ;;  %v7428_v63 = vadd.f32 -1.0, %v11487_v4  ;;  %vm4457_vm15 = vcmp.gt.f32.partialorder %v11487_v4, 0.41421357 }
 0x7b8   : > { %v4366_v60 = vpop.f32.mrf.mxu1  ;;  %v5112_v30 = vmul.f32 %v7443_v47, %v11516_v34  ;;  %vm4441_vm10 = vcmp.gt.f32.partialorder %v11487_v4, 2.4142137 }
 0x7b9   : > { %v4367_v24 = vadd.f32 %v11457_v56, %v4366_v60  ;;  %7852 = vrcp.f32 %v11491_v22  ;;  %vm4780_vm14 = vweird.f32 %v11491_v22  ;;  %v4784_v43 = vand.u32 2147483647, %v11491_v22 }
 0x7ba   : > { %7854 = vrcp.f32 %v11495_v14  ;;  %v4514_v28 = vand.u32 2147483648, %v11495_v14  ;;  %vm4508_vm3 = vweird.f32 %v11495_v14 }
 0x7bb   : > { %5372 = vrot.lane.b32.xlu0 %v4367_v24, %s8097_s16  ;;  %v11500_v18 = vmul.f32 0.5, %v4367_v24  ;;  %vm4785_vm9 = vcmp.eq.f32.partialorder %v4784_v43, 8.507059e+37 }
 0x7bd   : > { %v11512_v50 = vand.u32 2147483647, %v11500_v18 }
 0x7bf   : > { %v7853_v36 = vpop.eup %7852  ;;  %v11519_v32 = vadd.f32 1.0, %v11512_v50  ;;  %v11525_v21 = vadd.f32 1e-30, %v11512_v50 }
 0x7c0   : > { %v4369_v27 = vpop.f32.mrf.mxu1  ;;  %v7855_v39 = vpop.eup %7854  ;;  %v4776_v13 = vmul.f32 %v7853_v36, %v11491_v22  ;;  %vm4781_vm4 = vweird.f32 %v7853_v36 }
 0x7c1   : > { %v4370_v15 = vadd.f32 %v11457_v56, %v4369_v27  ;;  %v4504_v26 = vmul.f32 %v7855_v39, %v11495_v14  ;;  %7856 = vrcp.f32 %v11519_v32  ;;  %vm4509_vm5 = vweird.f32 %v7855_v39  ;;  %vm11551_vm2 = vmor %vm4780_vm14, %vm4781_vm4 }
 0x7c2   : > { %v4777_v38 = vsub.f32 1.0, %v4776_v13  ;;  %7858 = vrcp.f32 %v11525_v21  ;;  %vm4510_vm13 = vmor %vm4508_vm3, %vm4509_vm5  ;;  %vm4795_vm6 = vweird.f32 %v11519_v32  ;;  %vm4523_vm12 = vweird.f32 %v11525_v21 }
 0x7c3   : > { %5374 = vrot.lane.b32.xlu1 %v4370_v15, %s8097_s16  ;;  %v11530_v5 = vmul.f32 0.5, %v4370_v15  ;;  %v4505_v60 = vsub.f32 1.0, %v4504_v26  ;;  %v4786_v26 = vand.u32 2147483648, %v11491_v22  ;;  %v4512_v22 = vand.u32 2147483647, %v11495_v14 }
 0x7c4   : > { %v4778_v1 = vmul.f32 %v7853_v36, %v4777_v38  ;;  %v5128_v38 = vadd.f32 0.19977711, %v5112_v30 }
 0x7c5   : > { %v11538_v24 = vand.u32 2147483647, %v11530_v5  ;;  %v4506_v6 = vmul.f32 %v7855_v39, %v4505_v60  ;;  %vm4513_vm1 = vcmp.eq.f32.partialorder %v4512_v22, 8.507059e+37 }
 0x7c6   : > { %v4779_v13 = vadd.f32 %v7853_v36, %v4778_v1  ;;  %v5144_v14 = vmul.f32 %v5128_v38, %v11516_v34  ;;  %v4801_v38 = vand.u32 2147483648, %v11519_v32 }
 0x7c7   : > { %v11535_v54 = vpop.eup %7856  ;;  %v4507_v47 = vadd.f32 %v7855_v39, %v4506_v6  ;;  %v11562_v10 = vadd.f32 1e-30, %v11538_v24  ;;  %v4787_v6 = vor.u32 1.1754944e-38, %v4786_v26 }
 0x7c8   : > { %v4372_v51 = vpop.f32.mrf.mxu1  ;;  %v11541_v27 = vpop.eup %7858  ;;  %v4791_v15 = vmul.f32 %v11535_v54, %v11519_v32  ;;  %v4783_v30 = vsel %vm11551_vm2, %v7853_v36, %v4779_v13  ;;  %v4515_v13 = vor.u32 1.1754944e-38, %v4514_v28  ;;  %vm4796_vm7 = vweird.f32 %v11535_v54 }
 0x7c9   : > { %v4373_v41 = vadd.f32 %v11457_v56, %v4372_v51  ;;  %v11547_v51 = vadd.f32 1.0, %v11538_v24  ;;  %v4519_v1 = vmul.f32 %v11541_v27, %v11525_v21  ;;  %v4788_v60 = vsel %vm4785_vm9, %v4787_v6, %v4783_v30  ;;  %vm4797_vm14 = vmor %vm4795_vm6, %vm4796_vm7 }
 0x7ca   : > { %v4792_v31 = vsub.f32 1.0, %v4791_v15  ;;  %v4789_v58 = vmul.f32 %v7428_v63, %v4788_v60  ;;  %vm4524_vm4 = vweird.f32 %v11541_v27  ;;  %vm4442_vm9 = vcmp.gt.f32.partialorder %v11512_v50, 2.4142137 }
 0x7cb   : > { %5376 = vrot.lane.b32.xlu2 %v4373_v41, %s8097_s16  ;;  %7860 = vrcp.f32 %v11547_v51  ;;  %v4520_v36 = vsub.f32 1.0, %v4519_v1  ;;  %v11571_v3 = vmul.f32 0.5, %v4373_v41  ;;  %v4799_v1 = vand.u32 2147483647, %v11519_v32  ;;  %vm4525_vm5 = vmor %vm4523_vm12, %vm4524_vm4 }
 0x7cc   : > { %v4793_v15 = vmul.f32 %v11535_v54, %v4792_v31  ;;  %7862 = vrcp.f32 %v11562_v10  ;;  %v7459_v31 = vadd.f32 -0.3333295, %v5144_v14  ;;  %v5001_v63 = vsel %vm4457_vm15, %v4789_v58, %v11487_v4 }
 0x7cd   : > { %v4521_v43 = vmul.f32 %v11541_v27, %v4520_v36  ;;  %v11580_v28 = vand.u32 2147483647, %v11571_v3  ;;  %v4527_v58 = vand.u32 2147483647, %v11525_v21  ;;  %vm4800_vm2 = vcmp.eq.f32.partialorder %v4799_v1, 8.507059e+37 }
 0x7ce   : > { %vm4538_vm6 = vweird.f32 %v11562_v10 }
 0x7cf   : > { %v4522_v6 = vadd.f32 %v11541_v27, %v4521_v43  ;;  %v11603_v60 = vadd.f32 1.0, %v11580_v28  ;;  %vm4528_vm3 = vcmp.eq.f32.partialorder %v4527_v58, 8.507059e+37 }
 0x7d0   : > { %v4375_v62 = vpop.f32.mrf.mxu1 }
 0x7d1   : > { %v4376_v49 = vadd.f32 %v11457_v56, %v4375_v62  ;;  %v4511_v62 = vsel %vm4510_vm13, %v7855_v39, %v4507_v47  ;;  %v11574_v46 = vpop.eup %7860  ;;  %v4794_v39 = vadd.f32 %v11535_v54, %v4793_v15  ;;  %7864 = vrcp.f32 %v11603_v60 }
 0x7d2   : > { %v4516_v26 = vsel %vm4513_vm1, %v4515_v13, %v4511_v62  ;;  %v11584_v47 = vpop.eup %7862  ;;  %v4806_v30 = vmul.f32 %v11574_v46, %v11547_v51  ;;  %v4529_v62 = vand.u32 2147483648, %v11525_v21  ;;  %v4802_v13 = vor.u32 1.1754944e-38, %v4801_v38 }
 0x7d3   : > { %5378 = vrot.lane.b32.xlu0 %v4376_v49, %s8097_s16  ;;  %v4517_v41 = vmul.f32 -1.0, %v4516_v26  ;;  %v4798_v32 = vsel %vm4797_vm14, %v11535_v54, %v4794_v39  ;;  %v4534_v15 = vmul.f32 %v11584_v47, %v11562_v10  ;;  %v5176_v26 = vmul.f32 %v7459_v31, %v11516_v34 }
 0x7d4   : > { %v4807_v21 = vsub.f32 1.0, %v4806_v30  ;;  %v4526_v54 = vsel %vm4525_vm5, %v11541_v27, %v4522_v6  ;;  %v4803_v43 = vsel %vm4800_vm2, %v4802_v13, %v4798_v32  ;;  %v11615_v39 = vadd.f32 1e-30, %v11580_v28 }
 0x7d5   : > { %v11607_v36 = vsel %vm4441_vm10, %v4517_v41, %v5001_v63  ;;  %v11617_v59 = vmul.f32 0.5, %v4376_v49  ;;  %v4530_v38 = vor.u32 1.1754944e-38, %v4529_v62  ;;  %v7429_v34 = vadd.f32 -1.0, %v11512_v50 }
 0x7d6   : > { %v11622_v41 = vmul.f32 %v11607_v36, %v11607_v36  ;;  %v4535_v31 = vsub.f32 1.0, %v4534_v15  ;;  %v4808_v1 = vmul.f32 %v11574_v46, %v4807_v21  ;;  %v5032_v49 = vsel %vm4456_vm11, 0.7853982, %v14313_v37 }
 0x7d7   : > { %v4531_v27 = vsel %vm4528_vm3, %v4530_v38, %v4526_v54  ;;  %v4804_v63 = vmul.f32 %v7429_v34, %v4803_v43  ;;  %v5192_v30 = vmul.f32 %v5176_v26, %v11509_v42  ;;  %7866 = vrcp.f32 %v11615_v39  ;;  %v11638_v32 = vpop.eup %7864 }
 0x7d8   : > { %v4378_v22 = vpop.f32.mrf.mxu1  ;;  %v5081_v6 = vmul.f32 0.080537446, %v11622_v41  ;;  %vm4458_vm13 = vcmp.gt.f32.partialorder %v11512_v50, 0.41421357  ;;  %v4532_v58 = vmul.f32 -1.0, %v4531_v27  ;;  %v4536_v62 = vmul.f32 %v11584_v47, %v4535_v31 }
 0x7d9   : > { %v4379_v14 = vadd.f32 %v11457_v56, %v4378_v22  ;;  %v11633_v22 = vand.u32 2147483647, %v11617_v59  ;;  %v5048_v13 = vsel %vm4440_vm8, 1.5707964, %v5032_v49  ;;  %v5002_v15 = vsel %vm4458_vm13, %v4804_v63, %v11512_v50 }
 0x7da   : > { %v4809_v26 = vadd.f32 %v11574_v46, %v4808_v1  ;;  %vm4811_vm11 = vweird.f32 %v11574_v46  ;;  %v5208_v21 = vadd.f32 %v5192_v30, %v11509_v42  ;;  %v4816_v54 = vand.u32 2147483648, %v11547_v51 }
 0x7db   : > { %5380 = vrot.lane.b32.xlu1 %v4379_v14, %s8097_s16  ;;  %v11651_v43 = vadd.f32 1.0, %v11633_v22  ;;  %v7444_v33 = vadd.f32 -0.13877685, %v5081_v6  ;;  %v4544_v34 = vand.u32 2147483648, %v11562_v10  ;;  %vm4810_vm8 = vweird.f32 %v11547_v51 }
 0x7dc   : > { %v4814_v31 = vand.u32 2147483647, %v11547_v51  ;;  %v11660_v42 = vsel %vm4442_vm9, %v4532_v58, %v5002_v15  ;;  %v4537_v63 = vadd.f32 %v11584_v47, %v4536_v62  ;;  %vm4539_vm1 = vweird.f32 %v11584_v47  ;;  %vm11664_vm7 = vmor %vm4810_vm8, %vm4811_vm11 }
 0x7dd   : > { %v11656_v27 = vpop.eup %7866  ;;  %v4821_v49 = vmul.f32 %v11638_v32, %v11603_v60  ;;  %v4813_v51 = vsel %vm11664_vm7, %v11574_v46, %v4809_v26  ;;  %v11674_v30 = vadd.f32 1e-30, %v11633_v22  ;;  %v11676_v6 = vmul.f32 0.5, %v4379_v14  ;;  %vm4540_vm12 = vmor %vm4538_vm6, %vm4539_vm1 }
 0x7de   : > { %v4542_v62 = vand.u32 2147483647, %v11562_v10  ;;  %v4817_v15 = vor.u32 1.1754944e-38, %v4816_v54  ;;  %7868 = vrcp.f32 %v11651_v43  ;;  %v5224_v29 = vadd.f32 %v5208_v21, %v5048_v13 }
 0x7df   : > { %vm4815_vm4 = vcmp.eq.f32.partialorder %v4814_v31, 8.507059e+37  ;;  %v4549_v46 = vmul.f32 %v11656_v27, %v11615_v39  ;;  %v11685_v26 = vand.u32 2147483647, %v11676_v6  ;;  %v11690_v14 = vmul.f32 %v11660_v42, %v11660_v42 }
 0x7e0   : > { %v4381_v38 = vpop.f32.mrf.mxu1  ;;  %v4541_v10 = vsel %vm4540_vm12, %v11584_v47, %v4537_v63  ;;  %v4818_v54 = vsel %vm4815_vm4, %v4817_v15, %v4813_v51  ;;  %v5113_v13 = vmul.f32 %v7444_v33, %v11622_v41  ;;  %v4545_v21 = vor.u32 1.1754944e-38, %v4544_v34 }
 0x7e1   : > { %v4382_v58 = vadd.f32 %v11457_v56, %v4381_v38  ;;  %v4822_v38 = vsub.f32 1.0, %v4821_v49  ;;  %v7430_v31 = vadd.f32 -1.0, %v11538_v24  ;;  %7870 = vrcp.f32 %v11674_v30 }
 0x7e2   : > { %vm4543_vm14 = vcmp.eq.f32.partialorder %v4542_v62, 8.507059e+37  ;;  %v4550_v17 = vsub.f32 1.0, %v4549_v46  ;;  %v11697_v7 = vadd.f32 1.0, %v11685_v26  ;;  %v5256_v44 = vsub.f32 0.0, %v5224_v29 }
 0x7e3   : > { %5382 = vrot.lane.b32.xlu2 %v4382_v58, %s8097_s16  ;;  %v4546_v1 = vsel %vm4543_vm14, %v4545_v21, %v4541_v10  ;;  %v4819_v57 = vmul.f32 %v7430_v31, %v4818_v54  ;;  %v5082_v47 = vmul.f32 0.080537446, %v11690_v14  ;;  %v4823_v63 = vmul.f32 %v11638_v32, %v4822_v38 }
 0x7e4   : > { %v11699_v48 = vpop.eup %7868  ;;  %v5129_v34 = vadd.f32 0.19977711, %v5113_v13  ;;  %vm5240_vm5 = vcmp.lt.f32.partialorder %v11471_v0, 0.0  ;;  %vm4459_vm2 = vcmp.gt.f32.partialorder %v11538_v24, 0.41421357  ;;  %v4547_v49 = vmul.f32 -1.0, %v4546_v1 }
 0x7e5   : > { %v11706_v51 = vadd.f32 1e-30, %v11685_v26  ;;  %v5003_v15 = vsel %vm4459_vm2, %v4819_v57, %v11538_v24  ;;  %v4551_v46 = vmul.f32 %v11656_v27, %v4550_v17  ;;  %v4836_v10 = vmul.f32 %v11699_v48, %v11651_v43 }
 0x7e6   : > { %7872 = vrcp.f32 %v11697_v7  ;;  %v11717_v0 = vsel %vm5240_vm5, %v5256_v44, %v5224_v29  ;;  %v7445_v54 = vadd.f32 -0.13877685, %v5082_v47  ;;  %v4824_v38 = vadd.f32 %v11638_v32, %v4823_v63 }
 0x7e7   : > { %v11708_v62 = vpop.eup %7870  ;;  %vm4826_vm3 = vweird.f32 %v11638_v32  ;;  %v5145_v13 = vmul.f32 %v5129_v34, %v11622_v41  ;;  %vm4443_vm11 = vcmp.gt.f32.partialorder %v11538_v24, 2.4142137  ;;  %vm4825_vm8 = vweird.f32 %v11603_v60 }
 0x7e8   : > { %v4384_v33 = vpop.f32.mrf.mxu1  ;;  %v4831_v17 = vand.u32 2147483648, %v11603_v60  ;;  %v11727_v57 = vsel %vm4443_vm11, %v4547_v49, %v5003_v15  ;;  %v4829_v44 = vand.u32 2147483647, %v11603_v60  ;;  %v4564_v29 = vmul.f32 %v11708_v62, %v11674_v30  ;;  %vm11736_vm6 = vmor %vm4825_vm8, %vm4826_vm3 }
 0x7e9   : > { %7874 = vrcp.f32 %v11706_v51  ;;  %v4552_v21 = vadd.f32 %v11656_v27, %v4551_v46  ;;  %vm4553_vm1 = vweird.f32 %v11615_v39  ;;  %vm4554_vm7 = vweird.f32 %v11656_v27 }
 0x7ea   : > { %v4837_v1 = vsub.f32 1.0, %v4836_v10  ;;  %v5114_v47 = vmul.f32 %v7445_v54, %v11690_v14  ;;  %v4557_v60 = vand.u32 2147483647, %v11615_v39  ;;  %v4559_v63 = vand.u32 2147483648, %v11615_v39  ;;  %vm11762_vm12 = vmor %vm4553_vm1, %vm4554_vm7 }
 0x7eb   : > { %v4828_v34 = vsel %vm11736_vm6, %v11638_v32, %v4824_v38  ;;  %v11750_v15 = vmul.f32 %v11727_v57, %v11727_v57  ;;  %v4832_v46 = vor.u32 1.1754944e-38, %v4831_v17  ;;  %v11752_v53 = vmul.f32 0.5, %v4382_v58 }
 0x7ec   : > { %v11746_v49 = vpop.eup %7872  ;;  %v4385_v10 = vadd.f32 %v11457_v56, %v4384_v33  ;;  %v11758_v54 = vsel %vm4457_vm15, 0.7853982, %v14313_v37  ;;  %v7460_v11 = vadd.f32 -0.3333295, %v5145_v13  ;;  %vm4830_vm4 = vcmp.eq.f32.partialorder %v4829_v44, 8.507059e+37 }
 0x7ed   : > { %v4565_v38 = vsub.f32 1.0, %v4564_v29  ;;  %v4556_v58 = vsel %vm11762_vm12, %v11656_v27, %v4552_v21  ;;  %v4833_v33 = vsel %vm4830_vm4, %v4832_v46, %v4828_v34  ;;  %v4838_v17 = vmul.f32 %v11699_v48, %v4837_v1 }
 0x7ee   : > { %v11771_v23 = vand.u32 2147483647, %v11752_v53  ;;  %5384 = vrot.lane.b32.xlu0 %v4385_v10, %s8097_s16  ;;  %v5130_v13 = vadd.f32 0.19977711, %v5114_v47  ;;  %v4560_v16 = vor.u32 1.1754944e-38, %v4559_v63  ;;  %v7431_v44 = vadd.f32 -1.0, %v11580_v28 }
 0x7ef   : > { %v11774_v39 = vpop.eup %7874  ;;  %v4851_v29 = vmul.f32 %v11746_v49, %v11697_v7  ;;  %v5083_v32 = vmul.f32 0.080537446, %v11750_v15  ;;  %vm4444_vm15 = vcmp.gt.f32.partialorder %v11580_v28, 2.4142137  ;;  %vm4558_vm14 = vcmp.eq.f32.partialorder %v4557_v60, 8.507059e+37 }
 0x7f0   : > { %v4387_v31 = vpop.f32.mrf.mxu1  ;;  %v4561_v21 = vsel %vm4558_vm14, %v4560_v16, %v4556_v58  ;;  %v4834_v1 = vmul.f32 %v7431_v44, %v4833_v33  ;;  %v4566_v34 = vmul.f32 %v11708_v62, %v4565_v38  ;;  %v11786_v47 = vadd.f32 1e-30, %v11771_v23 }
 0x7f1   : > { %v11782_v27 = vadd.f32 %v11457_v56, %v4387_v31  ;;  %v4839_v63 = vadd.f32 %v11699_v48, %v4838_v17  ;;  %vm4841_vm5 = vweird.f32 %v11699_v48  ;;  %v4579_v46 = vmul.f32 %v11774_v39, %v11706_v51 }
 0x7f2   : > { %v11793_v19 = vadd.f32 1.0, %v11771_v23  ;;  %v5146_v16 = vmul.f32 %v5130_v13, %v11690_v14  ;;  %vm4460_vm3 = vcmp.gt.f32.partialorder %v11580_v28, 0.41421357  ;;  %v4846_v60 = vand.u32 2147483648, %v11651_v43 }
 0x7f3   : > { %5386 = vrot.lane.b32.xlu1 %v11782_v27, %s8097_s16  ;;  %v4852_v38 = vsub.f32 1.0, %v4851_v29  ;;  %v7446_v31 = vadd.f32 -0.13877685, %v5083_v32  ;;  %v4562_v58 = vmul.f32 -1.0, %v4561_v21  ;;  %vm4840_vm8 = vweird.f32 %v11651_v43 }
 0x7f4   : > { %v4844_v33 = vand.u32 2147483647, %v11651_v43  ;;  %v5004_v17 = vsel %vm4460_vm3, %v4834_v1, %v11580_v28  ;;  %v4567_v44 = vadd.f32 %v11708_v62, %v4566_v34  ;;  %vm4569_vm1 = vweird.f32 %v11708_v62  ;;  %vm11809_vm7 = vmor %vm4840_vm8, %vm4841_vm5 }
 0x7f5   : > { %7876 = vrcp.f32 %v11786_v47  ;;  %v4574_v29 = vand.u32 2147483648, %v11674_v30  ;;  %v4843_v43 = vsel %vm11809_vm7, %v11699_v48, %v4839_v63  ;;  %v4580_v32 = vsub.f32 1.0, %v4579_v46 }
 0x7f6   : > { %7878 = vrcp.f32 %v11793_v19  ;;  %vm4568_vm6 = vweird.f32 %v11674_v30  ;;  %v4572_v21 = vand.u32 2147483647, %v11674_v30  ;;  %v4847_v1 = vor.u32 1.1754944e-38, %v4846_v60 }
 0x7f7   : > { %v4853_v34 = vmul.f32 %v11746_v49, %v4852_v38  ;;  %v5177_v52 = vmul.f32 %v7460_v11, %v11622_v41  ;;  %v7461_v9 = vadd.f32 -0.3333295, %v5146_v16  ;;  %v11825_v61 = vsel %vm4444_vm15, %v4562_v58, %v5004_v17  ;;  %vm11827_vm12 = vmor %vm4568_vm6, %vm4569_vm1 }
 0x7f8   : > { %vm4845_vm4 = vcmp.eq.f32.partialorder %v4844_v33, 8.507059e+37  ;;  %v4571_v48 = vsel %vm11827_vm12, %v11708_v62, %v4567_v44  ;;  %v7432_v30 = vadd.f32 -1.0, %v11633_v22  ;;  %v11835_v46 = vmul.f32 0.5, %v4385_v10 }
 0x7f9   : > { %v4848_v63 = vsel %vm4845_vm4, %v4847_v1, %v4843_v43  ;;  %v5115_v11 = vmul.f32 %v7446_v31, %v11750_v15  ;;  %vm4445_vm14 = vcmp.gt.f32.partialorder %v11633_v22, 2.4142137  ;;  %vm4461_vm5 = vcmp.gt.f32.partialorder %v11633_v22, 0.41421357 }
 0x7fa   : > { %v4575_v41 = vor.u32 1.1754944e-38, %v4574_v29  ;;  %v4581_v16 = vmul.f32 %v11774_v39, %v4580_v32  ;;  %v11845_v38 = vmul.f32 %v11825_v61, %v11825_v61  ;;  %vm4573_vm8 = vcmp.eq.f32.partialorder %v4572_v21, 8.507059e+37 }
 0x7fb   : > { %v11841_v60 = vpop.eup %7876  ;;  %v4854_v62 = vadd.f32 %v11746_v49, %v4853_v34  ;;  %vm4856_vm1 = vweird.f32 %v11746_v49  ;;  %v4849_v58 = vmul.f32 %v7432_v30, %v4848_v63  ;;  %v4861_v33 = vand.u32 2147483648, %v11697_v7 }
 0x7fc   : > { %v11849_v10 = vpop.eup %7878  ;;  %v4576_v31 = vsel %vm4573_vm8, %v4575_v41, %v4571_v48  ;;  %v11853_v17 = vand.u32 2147483647, %v11835_v46  ;;  %vm4583_vm7 = vweird.f32 %v11706_v51  ;;  %vm4855_vm6 = vweird.f32 %v11697_v7 }
 0x7fd   : > { %v4859_v44 = vand.u32 2147483647, %v11697_v7  ;;  %v4866_v29 = vmul.f32 %v11849_v10, %v11793_v19  ;;  %v4582_v43 = vadd.f32 %v11774_v39, %v4581_v16  ;;  %vm4584_vm12 = vweird.f32 %v11774_v39  ;;  %vm11864_vm4 = vmor %vm4855_vm6, %vm4856_vm1 }
 0x7fe   : > { %v4587_v32 = vand.u32 2147483647, %v11706_v51  ;;  %v4589_v21 = vand.u32 2147483648, %v11706_v51  ;;  %v4577_v34 = vmul.f32 -1.0, %v4576_v31  ;;  %v4858_v7 = vsel %vm11864_vm4, %v11746_v49, %v4854_v62  ;;  %vm4585_vm8 = vmor %vm4583_vm7, %vm4584_vm12 }
 0x7ff   : > { %v4594_v13 = vmul.f32 %v11841_v60, %v11786_v47  ;;  %v11874_v48 = vadd.f32 1e-30, %v11853_v17  ;;  %v5005_v30 = vsel %vm4461_vm5, %v4849_v58, %v11633_v22  ;;  %v4862_v63 = vor.u32 1.1754944e-38, %v4861_v33 }
 0x800   : > { %v4867_v41 = vsub.f32 1.0, %v4866_v29  ;;  %v11880_v16 = vadd.f32 1.0, %v11853_v17  ;;  %v5193_v31 = vmul.f32 %v5177_v52, %v11607_v36  ;;  %v5131_v12 = vadd.f32 0.19977711, %v5115_v11 }
 0x801   : > { %v5084_v49 = vmul.f32 0.080537446, %v11845_v38  ;;  %vm4860_vm1 = vcmp.eq.f32.partialorder %v4859_v44, 8.507059e+37  ;;  %v4586_v62 = vsel %vm4585_vm8, %v11774_v39, %v4582_v43  ;;  %v7433_v58 = vadd.f32 -1.0, %v11685_v26 }
 0x802   : > { %v4863_v33 = vsel %vm4860_vm1, %v4862_v63, %v4858_v7  ;;  %7880 = vrcp.f32 %v11874_v48  ;;  %v11893_v29 = vsel %vm4445_vm14, %v4577_v34, %v5005_v30  ;;  %v4590_v52 = vor.u32 1.1754944e-38, %v4589_v21 }
 0x803   : > { %v4595_v11 = vsub.f32 1.0, %v4594_v13  ;;  %7882 = vrcp.f32 %v11880_v16  ;;  %vm4588_vm6 = vcmp.eq.f32.partialorder %v4587_v32, 8.507059e+37  ;;  %v4868_v51 = vmul.f32 %v11849_v10, %v4867_v41 }
 0x804   : > { %v5288_v44 = vmul.f32 1.272, %v11717_v0  ;;  %v4591_v1 = vsel %vm4588_vm6, %v4590_v52, %v4586_v62  ;;  %v4864_v39 = vmul.f32 %v7433_v58, %v4863_v33  ;;  %v5049_v43 = vsel %vm4441_vm10, 1.5707964, %v11758_v54 }
 0x805   : > { %v5209_v7 = vadd.f32 %v5193_v31, %v11607_v36  ;;  %v5034_v21 = vsel %vm4458_vm13, 0.7853982, %v14313_v37  ;;  %v11907_v34 = vmul.f32 %v11893_v29, %v11893_v29  ;;  %v5178_v32 = vmul.f32 %v7461_v9, %v11690_v14 }
 0x806   : > { %v5147_v0 = vmul.f32 %v5131_v12, %v11750_v15  ;;  %v7447_v13 = vadd.f32 -0.13877685, %v5084_v49  ;;  %v4596_v30 = vmul.f32 %v11841_v60, %v4595_v11  ;;  %vm4462_vm10 = vcmp.gt.f32.partialorder %v11685_v26, 0.41421357 }
 0x807   : > { %v4592_v4 = vmul.f32 -1.0, %v4591_v1  ;;  %v4869_v36 = vadd.f32 %v11849_v10, %v4868_v51  ;;  %vm4871_vm13 = vweird.f32 %v11849_v10  ;;  %vm4446_vm7 = vcmp.gt.f32.partialorder %v11685_v26, 2.4142137  ;;  %v4390_v51 = vpop.f32.mrf.mxu1 }
 0x808   : > { %v11912_v63 = vpop.eup %7880  ;;  %v5006_v12 = vsel %vm4462_vm10, %v4864_v39, %v11685_v26  ;;  %v4876_v9 = vand.u32 2147483648, %v11793_v19  ;;  %v11925_v14 = vmul.f32 0.5, %v11782_v27  ;;  %v5085_v41 = vmul.f32 0.080537446, %v11907_v34 }
 0x809   : > { %v11917_v54 = vpop.eup %7882  ;;  %vm4870_vm12 = vweird.f32 %v11793_v19  ;;  %v4874_v31 = vand.u32 2147483647, %v11793_v19  ;;  %v5116_v62 = vmul.f32 %v7447_v13, %v11845_v38  ;;  %v4597_v58 = vadd.f32 %v11841_v60, %v4596_v30 }
 0x80a   : > { %14553 = vst [vmem:[#allocation40_spill] sm:$0xff] %v11925_v14  ;;  %v4881_v49 = vmul.f32 %v11917_v54, %v11880_v16  ;;  %vm4598_vm4 = vweird.f32 %v11786_v47  ;;  %vm4599_vm8 = vweird.f32 %v11841_v60  ;;  %vm11936_vm1 = vmor %vm4870_vm12, %vm4871_vm13  ;;  %v11942_v33 = vsel %vm4446_vm7, %v4592_v4, %v5006_v12 }
 0x80b   : > { %v4604_v19 = vand.u32 2147483648, %v11786_v47  ;;  %v4873_v52 = vsel %vm11936_vm1, %v11849_v10, %v4869_v36  ;;  %v4609_v11 = vmul.f32 %v11912_v63, %v11874_v48  ;;  %v4602_v1 = vand.u32 2147483647, %v11786_v47  ;;  %vm11959_vm6 = vmor %vm4598_vm4, %vm4599_vm8 }
 0x80c   : > { %v4877_v39 = vor.u32 1.1754944e-38, %v4876_v9  ;;  %v4882_v13 = vsub.f32 1.0, %v4881_v49  ;;  %v11952_v30 = vand.u32 2147483647, %v11925_v14  ;;  %v11954_v40 = vadd.f32 %v5209_v7, %v5049_v43 }
 0x80d   : > { %v5194_v4 = vmul.f32 %v5178_v32, %v11660_v42  ;;  %v7448_v12 = vadd.f32 -0.13877685, %v5085_v41  ;;  %vm4875_vm13 = vcmp.eq.f32.partialorder %v4874_v31, 8.507059e+37  ;;  %v5132_v36 = vadd.f32 0.19977711, %v5116_v62 }
 0x80e   : > { %v11965_v9 = vmul.f32 %v11942_v33, %v11942_v33  ;;  %v4601_v43 = vsel %vm11959_vm6, %v11841_v60, %v4597_v58  ;;  %v4878_v7 = vsel %vm4875_vm13, %v4877_v39, %v4873_v52  ;;  %v7462_v49 = vadd.f32 -0.3333295, %v5147_v0 }
 0x80f   : > { %v4605_v32 = vor.u32 1.1754944e-38, %v4604_v19  ;;  %v7434_v41 = vadd.f32 -1.0, %v11771_v23  ;;  %v4610_v47 = vsub.f32 1.0, %v4609_v11  ;;  %v11971_v27 = vmul.f32 1.442695, %v5288_v44 }
 0x810   : > { %vm4603_vm12 = vcmp.eq.f32.partialorder %v4602_v1, 8.507059e+37  ;;  %v4883_v31 = vmul.f32 %v11917_v54, %v4882_v13  ;;  %v11975_v62 = vadd.f32 1.0, %v11952_v30  ;;  %v5050_v14 = vsel %vm4442_vm9, 1.5707964, %v5034_v21 }
 0x811   : > { %v5117_v10 = vmul.f32 %v7448_v12, %v11907_v34  ;;  %v4606_v60 = vsel %vm4603_vm12, %v4605_v32, %v4601_v43  ;;  %v4879_v58 = vmul.f32 %v7434_v41, %v4878_v7  ;;  %v5257_v0 = vsub.f32 0.0, %v11954_v40  ;;  %v4393_v12 = vpop.f32.mrf.mxu1 }
 0x812   : > { %v5210_v19 = vadd.f32 %v5194_v4, %v11660_v42  ;;  %v5148_v44 = vmul.f32 %v5132_v36, %v11845_v38  ;;  %v5086_v52 = vmul.f32 0.080537446, %v11965_v9  ;;  %vm5241_vm4 = vcmp.lt.f32.partialorder %v11484_v55, 0.0 }
 0x813   : > { %v5179_v11 = vmul.f32 %v7462_v49, %v11750_v15  ;;  %vm4463_vm8 = vcmp.gt.f32.partialorder %v11771_v23, 0.41421357  ;;  %v4611_v50 = vmul.f32 %v11912_v63, %v4610_v47  ;;  %v11989_v21 = vadd.f32 1e-30, %v11952_v30 }
 0x814   : > { %v4607_v1 = vmul.f32 -1.0, %v4606_v60  ;;  %v4884_v39 = vadd.f32 %v11917_v54, %v4883_v31  ;;  %vm4886_vm9 = vweird.f32 %v11917_v54  ;;  %7884 = vrcp.f32 %v11975_v62 }
 0x815   : > { %v5133_v42 = vadd.f32 0.19977711, %v5117_v10  ;;  %v5007_v13 = vsel %vm4463_vm8, %v4879_v58, %v11771_v23  ;;  %v4891_v15 = vand.u32 2147483648, %v11880_v16  ;;  %v4391_v4 = vadd.f32 %v11457_v56, %v4390_v51 }
 0x816   : > { %v7463_v36 = vadd.f32 -0.3333295, %v5148_v44  ;;  %v7449_v43 = vadd.f32 -0.13877685, %v5086_v52  ;;  %vm4885_vm1 = vweird.f32 %v11880_v16  ;;  %v4889_v7 = vand.u32 2147483647, %v11880_v16 }
 0x817   : > { %vm4447_vm6 = vcmp.gt.f32.partialorder %v11771_v23, 2.4142137  ;;  %v4612_v49 = vadd.f32 %v11912_v63, %v4611_v50  ;;  %vm4614_vm13 = vweird.f32 %v11912_v63  ;;  %vm12004_vm12 = vmor %vm4885_vm1, %vm4886_vm9  ;;  %7886 = vrcp.f32 %v11989_v21  ;;  %5388 = vrot.lane.b32.xlu2 %v4391_v4, %s8097_s16 }
 0x818   : > { %v12012_v51 = vsel %vm4447_vm6, %v4607_v1, %v5007_v13  ;;  %v4619_v16 = vand.u32 2147483648, %v11874_v48  ;;  %v4888_v41 = vsel %vm12004_vm12, %v11917_v54, %v4884_v39  ;;  %v12019_v47 = vadd.f32 %v11457_v56, %v4393_v12 }
 0x819   : > { %v5149_v31 = vmul.f32 %v5133_v42, %v11907_v34  ;;  %vm4613_vm9 = vweird.f32 %v11874_v48  ;;  %v4617_v10 = vand.u32 2147483647, %v11874_v48  ;;  %v4892_v60 = vor.u32 1.1754944e-38, %v4891_v15 }
 0x81a   : > { %v12024_v58 = vpop.eup %7884  ;;  %v5035_v44 = vsel %vm4459_vm2, 0.7853982, %v14313_v37  ;;  %v5180_v52 = vmul.f32 %v7463_v36, %v11845_v38  ;;  %v5118_v54 = vmul.f32 %v7449_v43, %v11965_v9  ;;  %vm12033_vm1 = vmor %vm4613_vm9, %vm4614_vm13  ;;  %vm4890_vm12 = vcmp.eq.f32.partialorder %v4889_v7, 8.507059e+37  ;;  %5390 = vrot.lane.b32.xlu0 %v12019_v47, %s8097_s16 }
 0x81b   : > { %v5036_v48 = vsel %vm4460_vm3, 0.7853982, %v14313_v37  ;;  %v12044_v50 = vmul.f32 %v12012_v51, %v12012_v51  ;;  %v4616_v38 = vsel %vm12033_vm1, %v11912_v63, %v4612_v49  ;;  %v4893_v1 = vsel %vm4890_vm12, %v4892_v60, %v4888_v41 }
 0x81c   : > { %v5273_v39 = vsel %vm5241_vm4, %v5257_v0, %v11954_v40  ;;  %v5226_v42 = vadd.f32 %v5210_v19, %v5050_v14  ;;  %v4620_v13 = vor.u32 1.1754944e-38, %v4619_v16  ;;  %v7435_v15 = vadd.f32 -1.0, %v11853_v17 }
 0x81d   : > { %v12053_v12 = vpop.eup %7886  ;;  %v5195_v36 = vmul.f32 %v5179_v11, %v11727_v57  ;;  %v7464_v43 = vadd.f32 -0.3333295, %v5149_v31  ;;  %vm4618_vm2 = vcmp.eq.f32.partialorder %v4617_v10, 8.507059e+37  ;;  %v4896_v7 = vmul.f32 %v12024_v58, %v11975_v62 }
 0x81e   : > { %v5196_v63 = vmul.f32 %v5180_v52, %v11825_v61  ;;  %v5134_v49 = vadd.f32 0.19977711, %v5118_v54  ;;  %v4621_v32 = vsel %vm4618_vm2, %v4620_v13, %v4616_v38  ;;  %v4894_v41 = vmul.f32 %v7435_v15, %v4893_v1 }
 0x81f   : > { %v5289_v55 = vmul.f32 1.272, %v5273_v39  ;;  %v5051_v40 = vsel %vm4443_vm11, 1.5707964, %v5035_v44  ;;  %v5087_v14 = vmul.f32 0.080537446, %v12044_v50  ;;  %v4624_v11 = vmul.f32 %v12053_v12, %v11989_v21 }
 0x820   : > { %v5258_v0 = vsub.f32 0.0, %v5226_v42  ;;  %v5052_v19 = vsel %vm4444_vm15, 1.5707964, %v5036_v48  ;;  %v12066_v16 = vmul.f32 0.5, %v4391_v4  ;;  %v5181_v31 = vmul.f32 %v7464_v43, %v11907_v34 }
 0x821   : > { %vm4464_vm3 = vcmp.gt.f32.partialorder %v11853_v17, 0.41421357  ;;  %v4622_v10 = vmul.f32 -1.0, %v4621_v32  ;;  %v4897_v60 = vsub.f32 1.0, %v4896_v7  ;;  %v5211_v24 = vadd.f32 %v5195_v36, %v11727_v57 }
 0x822   : > { %v5212_v44 = vadd.f32 %v5196_v63, %v11825_v61  ;;  %v5150_v52 = vmul.f32 %v5134_v49, %v11965_v9  ;;  %v5008_v28 = vsel %vm4464_vm3, %v4894_v41, %v11853_v17  ;;  %v5306_v54 = vmul.f32 1.442695, %v5289_v55 }
 0x823   : > { %v5037_v4 = vsel %vm4461_vm5, 0.7853982, %v14313_v37  ;;  %v7450_v34 = vadd.f32 -0.13877685, %v5087_v14  ;;  %vm5242_vm11 = vcmp.lt.f32.partialorder %v11500_v18, 0.0  ;;  %v4625_v56 = vsub.f32 1.0, %v4624_v11 }
 0x824   : > { %vm4448_vm15 = vcmp.gt.f32.partialorder %v11853_v17, 2.4142137  ;;  %v12082_v57 = vand.u32 2147483647, %v12066_v16  ;;  %v5274_v61 = vsel %vm5242_vm11, %v5258_v0, %v5226_v42  ;;  %v5197_v48 = vmul.f32 %v5181_v31, %v11893_v29 }
 0x825   : > { %v12087_v38 = vsel %vm4448_vm15, %v4622_v10, %v5008_v28  ;;  %v4898_v1 = vmul.f32 %v12024_v58, %v4897_v60  ;;  %7888 = vpow2.f32 %v11971_v27  ;;  %v5227_v39 = vadd.f32 %v5211_v24, %v5051_v40 }
 0x826   : > { %v5228_v13 = vadd.f32 %v5212_v44, %v5052_v19  ;;  %v7465_v18 = vadd.f32 -0.3333295, %v5150_v52  ;;  %7890 = vpow2.f32 %v5306_v54  ;;  %vm5243_vm5 = vcmp.lt.f32.partialorder %v11530_v5, 0.0 }
 0x827   : > { %v5053_v15 = vsel %vm4445_vm14, 1.5707964, %v5037_v4  ;;  %v5119_v42 = vmul.f32 %v7450_v34, %v12044_v50  ;;  %v12095_v36 = vmul.f32 1.272, %v5274_v61  ;;  %v12099_v43 = vmul.f32 %v12087_v38, %v12087_v38  ;;  %v4396_v34 = vpop.f32.mrf.mxu1 }
 0x828   : > { %v4626_v7 = vmul.f32 %v12053_v12, %v4625_v56  ;;  %v12103_v27 = vadd.f32 1.0, %v12082_v57  ;;  %vm5244_vm4 = vcmp.lt.f32.partialorder %v11571_v3, 0.0  ;;  %v5213_v63 = vadd.f32 %v5197_v48, %v11893_v29  ;;  %v5369_v48 = vpop.permute.xlu1 %5368 }
 0x829   : > { %v4899_v22 = vadd.f32 %v12024_v58, %v4898_v1  ;;  %vm4901_vm14 = vweird.f32 %v12024_v58  ;;  %v12110_v49 = vmul.f32 0.5, %v12019_v47  ;;  %v5259_v32 = vsub.f32 0.0, %v5227_v39 }
 0x82a   : > { %v5260_v41 = vsub.f32 0.0, %v5228_v13  ;;  %v5182_v55 = vmul.f32 %v7465_v18, %v11965_v9  ;;  %v4906_v40 = vand.u32 2147483648, %v11975_v62  ;;  %v5135_v14 = vadd.f32 0.19977711, %v5119_v42 }
 0x82b   : > { %vm4900_vm13 = vweird.f32 %v11975_v62  ;;  %v4904_v0 = vand.u32 2147483647, %v11975_v62  ;;  %v12117_v29 = vadd.f32 1e-30, %v12082_v57  ;;  %v7889_v19 = vpop.eup %7888  ;;  %v5088_v11 = vmul.f32 0.080537446, %v12099_v43 }
 0x82c   : > { %v4627_v47 = vadd.f32 %v12053_v12, %v4626_v7  ;;  %vm4629_vm9 = vweird.f32 %v12053_v12  ;;  %vm12122_vm1 = vmor %vm4900_vm13, %vm4901_vm14  ;;  %7892 = vrcp.f32 %v12103_v27  ;;  %v7891_v9 = vpop.eup %7890  ;;  %v5229_v10 = vadd.f32 %v5213_v63, %v5053_v15 }
 0x82d   : > { %vm5245_vm12 = vcmp.lt.f32.partialorder %v11617_v59, 0.0  ;;  %v4634_v62 = vand.u32 2147483648, %v11989_v21  ;;  %v4903_v60 = vsel %vm12122_vm1, %v12024_v58, %v4899_v22  ;;  %v12133_v24 = vand.u32 2147483647, %v12110_v49 }
 0x82e   : > { %v5198_v44 = vmul.f32 %v5182_v55, %v11942_v33  ;;  %vm4628_vm2 = vweird.f32 %v11989_v21  ;;  %v4632_v52 = vand.u32 2147483647, %v11989_v21  ;;  %v4907_v28 = vor.u32 1.1754944e-38, %v4906_v40 }
 0x82f   : > { %v5275_v54 = vsel %vm5243_vm5, %v5259_v32, %v5227_v39  ;;  %v5038_v4 = vsel %vm4462_vm10, 0.7853982, %v14313_v37  ;;  %vm12145_vm11 = vmor %vm4628_vm2, %vm4629_vm9  ;;  %vm4905_vm14 = vcmp.eq.f32.partialorder %v4904_v0, 8.507059e+37  ;;  %7894 = vrcp.f32 %v12117_v29 }
 0x830   : > { %v5151_v21 = vmul.f32 %v5135_v14, %v12044_v50  ;;  %v7451_v56 = vadd.f32 -0.13877685, %v5088_v11  ;;  %v4631_v5 = vsel %vm12145_vm11, %v12053_v12, %v4627_v47  ;;  %v4908_v61 = vsel %vm4905_vm14, %v4907_v28, %v4903_v60  ;;  %v4399_v28 = vpop.f32.mrf.mxu1 }
 0x831   : > { %v4635_v1 = vor.u32 1.1754944e-38, %v4634_v62  ;;  %v7436_v39 = vadd.f32 -1.0, %v11952_v30  ;;  %v12156_v18 = vadd.f32 1.0, %v12133_v24  ;;  %v5336_v15 = vmul.f32 %v7889_v19, %v11221_v8  ;;  %v12173_v19 = vld [vmem:[%s14527_s2] ss:$0 sm:$0xff]  ;;  %v5371_v62 = vpop.permute.xlu2 %5370 }
 0x832   : > { %v12159_v42 = vpop.eup %7892  ;;  %v5276_v7 = vsel %vm5244_vm4, %v5260_v41, %v5228_v13  ;;  %v5261_v63 = vsub.f32 0.0, %v5229_v10  ;;  %v5214_v22 = vadd.f32 %v5198_v44, %v11942_v33  ;;  %vm4633_vm10 = vcmp.eq.f32.partialorder %v4632_v52, 8.507059e+37 }
 0x833   : > { %v4636_v12 = vsel %vm4633_vm10, %v4635_v1, %v4631_v5  ;;  %v4909_v32 = vmul.f32 %v7436_v39, %v4908_v61  ;;  %v12165_v55 = vadd.f32 1e-30, %v12133_v24  ;;  %v12167_v40 = vadd.f32 %v5369_v48, %v5336_v15 }
 0x834   : > { %v5054_v14 = vsel %vm4446_vm7, 1.5707964, %v5038_v4  ;;  %v7466_v8 = vadd.f32 -0.3333295, %v5151_v21  ;;  %v5120_v0 = vmul.f32 %v7451_v56, %v12099_v43  ;;  %v4397_v3 = vadd.f32 %v12173_v19, %v4396_v34 }
 0x835   : > { %v12176_v13 = vpop.eup %7894  ;;  %v5291_v33 = vmul.f32 1.272, %v5275_v54  ;;  %v5292_v41 = vmul.f32 1.272, %v5276_v7  ;;  %v4911_v11 = vmul.f32 %v12159_v42, %v12103_v27  ;;  %7896 = vrcp.f32 %v12156_v18  ;;  %7475 = vmatmul.msk.f32.vlgmr.msra.gmra.mxu2 %vm14255_vm0, %v12167_v40 }
 0x836   : > { %v5277_v26 = vsel %vm5245_vm12, %v5261_v63, %v5229_v10  ;;  %vm4465_vm7 = vcmp.gt.f32.partialorder %v11952_v30, 0.41421357  ;;  %v4637_v47 = vmul.f32 -1.0, %v4636_v12  ;;  %v12186_v31 = vmul.f32 0.5, %v4397_v3  ;;  %5392 = vrot.lane.b32.xlu1 %v4397_v3, %s8097_s16 }
 0x837   : > { %v5230_v60 = vadd.f32 %v5214_v22, %v5054_v14  ;;  %v5009_v44 = vsel %vm4465_vm7, %v4909_v32, %v11952_v30  ;;  %7898 = vrcp.f32 %v12165_v55  ;;  %v5337_v52 = vmul.f32 %v7891_v9, %v11267_v45 }
 0x838   : > { %v5183_v59 = vmul.f32 %v7466_v8, %v12044_v50  ;;  %v5136_v10 = vadd.f32 0.19977711, %v5120_v0  ;;  %v4639_v54 = vmul.f32 %v12176_v13, %v12117_v29  ;;  %v4400_v4 = vadd.f32 %v12173_v19, %v4399_v28 }
 0x839   : > { %v5308_v58 = vmul.f32 1.442695, %v12095_v36  ;;  %vm4449_vm5 = vcmp.gt.f32.partialorder %v11952_v30, 2.4142137  ;;  %v4912_v34 = vsub.f32 1.0, %v4911_v11  ;;  %v12200_v21 = vadd.f32 %v5371_v62, %v5337_v52 }
 0x83a   : > { %v5310_v56 = vmul.f32 1.442695, %v5291_v33  ;;  %v5039_v45 = vsel %vm4463_vm8, 0.7853982, %v14313_v37  ;;  %v12207_v50 = vsel %vm4449_vm5, %v4637_v47, %v5009_v44  ;;  %v12210_v9 = vand.u32 2147483647, %v12186_v31  ;;  %5394 = vrot.lane.b32.xlu2 %v4400_v4, %s8097_s16 }
 0x83b   : > { %v12213_v36 = vpop.eup %7896  ;;  %v5312_v5 = vmul.f32 1.442695, %v5292_v41  ;;  %v5293_v61 = vmul.f32 1.272, %v5277_v26  ;;  %v5262_v48 = vsub.f32 0.0, %v5230_v60  ;;  %v5199_v1 = vmul.f32 %v5183_v59, %v12012_v51  ;;  %v4402_v26 = vpop.f32.mrf.mxu1 }
 0x83c   : > { %v5040_v39 = vsel %vm4464_vm3, 0.7853982, %v14313_v37  ;;  %v5152_v15 = vmul.f32 %v5136_v10, %v12099_v43  ;;  %v4640_v7 = vsub.f32 1.0, %v4639_v54  ;;  %7900 = vpow2.f32 %v5308_v58 }
 0x83d   : > { %v12220_v63 = vpop.eup %7898  ;;  %vm5246_vm8 = vcmp.lt.f32.partialorder %v11676_v6, 0.0  ;;  %v12225_v22 = vmul.f32 %v12207_v50, %v12207_v50  ;;  %v4913_v12 = vmul.f32 %v12159_v42, %v4912_v34  ;;  %7476 = vmatmul.msk.f32.gmra.mxu2 %vm14255_vm0, %v12200_v21  ;;  %7902 = vpow2.f32 %v5310_v56 }
 0x83e   : > { %v5055_v32 = vsel %vm4447_vm6, 1.5707964, %v5039_v45  ;;  %v4926_v14 = vmul.f32 %v12213_v36, %v12156_v18  ;;  %v12235_v8 = vadd.f32 1.0, %v12210_v9  ;;  %7904 = vpow2.f32 %v5312_v5 }
 0x83f   : > { %v12237_v6 = vmul.f32 1.442695, %v5293_v61  ;;  %v5278_v0 = vsel %vm5246_vm8, %v5262_v48, %v5230_v60  ;;  %v12241_v3 = vsel %vm4448_vm15, 1.5707964, %v5040_v39  ;;  %v5215_v33 = vadd.f32 %v5199_v1, %v12012_v51 }
 0x840   : > { %v7467_v41 = vadd.f32 -0.3333295, %v5152_v15  ;;  %v4641_v23 = vmul.f32 %v12176_v13, %v4640_v7  ;;  %v4654_v11 = vmul.f32 %v12220_v63, %v12165_v55  ;;  %v5089_v47 = vmul.f32 0.080537446, %v12225_v22 }
 0x841   : > { %v4914_v62 = vadd.f32 %v12159_v42, %v4913_v12  ;;  %vm4916_vm6 = vweird.f32 %v12159_v42  ;;  %v12251_v60 = vadd.f32 1e-30, %v12210_v9  ;;  %v4921_v17 = vand.u32 2147483648, %v12103_v27 }
 0x842   : > { %v4927_v44 = vsub.f32 1.0, %v4926_v14  ;;  %7906 = vrcp.f32 %v12235_v8  ;;  %v12255_v51 = vmul.f32 0.5, %v4400_v4  ;;  %v12257_v52 = vpop.eup %7900  ;;  %v4647_v28 = vand.u32 2147483647, %v12117_v29 }
 0x843   : > { %vm4915_vm3 = vweird.f32 %v12103_v27  ;;  %v4919_v59 = vand.u32 2147483647, %v12103_v27  ;;  %v4403_v10 = vadd.f32 %v12173_v19, %v4402_v26  ;;  %v12263_v54 = vpop.eup %7902  ;;  %v4642_v58 = vadd.f32 %v12176_v13, %v4641_v23 }
 0x844   : > { %vm4644_vm15 = vweird.f32 %v12176_v13  ;;  %v4649_v34 = vand.u32 2147483648, %v12117_v29  ;;  %vm12270_vm4 = vmor %vm4915_vm3, %vm4916_vm6  ;;  %v4655_v56 = vsub.f32 1.0, %v4654_v11  ;;  %v12274_v45 = vpop.eup %7904  ;;  %v5184_v27 = vmul.f32 %v7467_v41, %v12099_v43 }
 0x845   : > { %v7452_v5 = vadd.f32 -0.13877685, %v5089_v47  ;;  %v4918_v61 = vsel %vm12270_vm4, %v12159_v42, %v4914_v62  ;;  %7908 = vrcp.f32 %v12251_v60  ;;  %5396 = vrot.lane.b32.xlu0 %v4403_v10, %s8097_s16  ;;  %vm4643_vm13 = vweird.f32 %v12117_v29 }
 0x846   : > { %v4922_v48 = vor.u32 1.1754944e-38, %v4921_v17  ;;  %v4928_v1 = vmul.f32 %v12213_v36, %v4927_v44  ;;  %v12285_v39 = vand.u32 2147483647, %v12255_v51  ;;  %v5294_v15 = vmul.f32 1.272, %v5278_v0  ;;  %vm12290_vm1 = vmor %vm4643_vm13, %vm4644_vm15 }
 0x847   : > { %vm4466_vm9 = vcmp.gt.f32.partialorder %v12082_v57, 0.41421357  ;;  %v7437_v42 = vadd.f32 -1.0, %v12082_v57  ;;  %vm4920_vm12 = vcmp.eq.f32.partialorder %v4919_v59, 8.507059e+37  ;;  %v5231_v29 = vadd.f32 %v5215_v33, %v5055_v32 }
 0x848   : > { %v12295_v7 = vpop.eup %7906  ;;  %v4646_v12 = vsel %vm12290_vm1, %v12176_v13, %v4642_v58  ;;  %v4923_v14 = vsel %vm4920_vm12, %v4922_v48, %v4918_v61  ;;  %v4656_v0 = vmul.f32 %v12220_v63, %v4655_v56  ;;  %v5200_v41 = vmul.f32 %v5184_v27, %v12087_v38 }
 0x849   : > { %v5121_v23 = vmul.f32 %v7452_v5, %v12225_v22  ;;  %vm4450_vm2 = vcmp.gt.f32.partialorder %v12082_v57, 2.4142137  ;;  %vm4648_vm11 = vcmp.eq.f32.partialorder %v4647_v28, 8.507059e+37  ;;  %v4650_v11 = vor.u32 1.1754944e-38, %v4649_v34 }
 0x84a   : > { %vm4658_vm14 = vweird.f32 %v12165_v55  ;;  %v4929_v26 = vadd.f32 %v12213_v36, %v4928_v1  ;;  %vm4931_vm10 = vweird.f32 %v12213_v36  ;;  %v12308_v32 = vadd.f32 1.0, %v12285_v39 }
 0x84b   : > { %v12310_v13 = vpop.eup %7908  ;;  %vm5247_vm8 = vcmp.lt.f32.partialorder %v11752_v53, 0.0  ;;  %v4651_v33 = vsel %vm4648_vm11, %v4650_v11, %v4646_v12  ;;  %v4924_v47 = vmul.f32 %v7437_v42, %v4923_v14  ;;  %v4936_v62 = vand.u32 2147483648, %v12156_v18 }
 0x84c   : > { %v4941_v17 = vmul.f32 %v12295_v7, %v12235_v8  ;;  %v4657_v44 = vadd.f32 %v12220_v63, %v4656_v0  ;;  %vm4659_vm6 = vweird.f32 %v12220_v63  ;;  %vm4930_vm3 = vweird.f32 %v12156_v18 }
 0x84d   : > { %v4934_v28 = vand.u32 2147483647, %v12156_v18  ;;  %v4662_v59 = vand.u32 2147483647, %v12165_v55  ;;  %v4664_v58 = vand.u32 2147483648, %v12165_v55  ;;  %vm12322_vm15 = vmor %vm4930_vm3, %vm4931_vm10  ;;  %v12329_v56 = vmul.f32 0.5, %v4403_v10 }
 0x84e   : > { %v12327_v4 = vadd.f32 1e-30, %v12285_v39  ;;  %v4652_v27 = vmul.f32 -1.0, %v4651_v33  ;;  %v4933_v5 = vsel %vm12322_vm15, %v12213_v36, %v4929_v26  ;;  %v4669_v18 = vmul.f32 %v12310_v13, %v12251_v60  ;;  %vm12342_vm4 = vmor %vm4658_vm14, %vm4659_vm6 }
 0x84f   : > { %7910 = vrcp.f32 %v12308_v32  ;;  %v5263_v61 = vsub.f32 0.0, %v5231_v29  ;;  %v5010_v48 = vsel %vm4466_vm9, %v4924_v47, %v12082_v57  ;;  %v4937_v1 = vor.u32 1.1754944e-38, %v4936_v62 }
 0x850   : > { %v4942_v43 = vsub.f32 1.0, %v4941_v17  ;;  %v5216_v36 = vadd.f32 %v5200_v41, %v12087_v38  ;;  %v5137_v42 = vadd.f32 0.19977711, %v5121_v23  ;;  %v4661_v12 = vsel %vm12342_vm4, %v12220_v63, %v4657_v44 }
 0x851   : > { %vm4935_vm13 = vcmp.eq.f32.partialorder %v4934_v28, 8.507059e+37  ;;  %v4665_v14 = vor.u32 1.1754944e-38, %v4664_v58  ;;  %7912 = vrcp.f32 %v12327_v4  ;;  %v12352_v55 = vand.u32 2147483647, %v12329_v56 }
 0x852   : > { %v4938_v0 = vsel %vm4935_vm13, %v4937_v1, %v4933_v5  ;;  %v12356_v11 = vsel %vm4450_vm2, %v4652_v27, %v5010_v48  ;;  %vm4663_vm1 = vcmp.eq.f32.partialorder %v4662_v59, 8.507059e+37  ;;  %v7438_v38 = vadd.f32 -1.0, %v12133_v24 }
 0x853   : > { %v4670_v41 = vsub.f32 1.0, %v4669_v18  ;;  %7914 = vpow2.f32 %v12237_v6  ;;  %v12363_v63 = vsel %vm4465_vm7, 0.7853982, %v14313_v37  ;;  %v4666_v23 = vsel %vm4663_vm1, %v4665_v14, %v4661_v12 }
 0x854   : > { %v4943_v26 = vmul.f32 %v12295_v7, %v4942_v43  ;;  %v12368_v47 = vmul.f32 1.442695, %v5294_v15  ;;  %v12372_v62 = vsel %vm5247_vm8, %v5263_v61, %v5231_v29  ;;  %v5153_v17 = vmul.f32 %v5137_v42, %v12225_v22  ;;  %v4405_v42 = vpop.f32.mrf.mxu1 }
 0x855   : > { %v12366_v33 = vpop.eup %7910  ;;  %v4939_v44 = vmul.f32 %v7438_v38, %v4938_v0  ;;  %v12377_v6 = vmul.f32 %v12356_v11, %v12356_v11  ;;  %vm4451_vm7 = vcmp.gt.f32.partialorder %v12133_v24, 2.4142137  ;;  %v12381_v28 = vadd.f32 1e-30, %v12352_v55 }
 0x856   : > { %v12384_v59 = vadd.f32 1.0, %v12352_v55  ;;  %v12387_v15 = vadd.f32 %v5216_v36, %v12241_v3  ;;  %vm4467_vm12 = vcmp.gt.f32.partialorder %v12133_v24, 0.41421357  ;;  %v4667_v53 = vmul.f32 -1.0, %v4666_v23 }
 0x857   : > { %v4671_v29 = vmul.f32 %v12310_v13, %v4670_v41  ;;  %v12391_v58 = vpop.eup %7912  ;;  %v4944_v34 = vadd.f32 %v12295_v7, %v4943_v26  ;;  %vm4946_vm11 = vweird.f32 %v12295_v7  ;;  %v4956_v27 = vmul.f32 %v12366_v33, %v12308_v32 }
 0x858   : > { %7916 = vrcp.f32 %v12381_v28  ;;  %v7468_v5 = vadd.f32 -0.3333295, %v5153_v17  ;;  %v5011_v3 = vsel %vm4467_vm12, %v4939_v44, %v12133_v24  ;;  %v4951_v18 = vand.u32 2147483648, %v12235_v8 }
 0x859   : > { %v5338_v61 = vmul.f32 %v12257_v52, %v11271_v2  ;;  %v12404_v48 = vpop.eup %7914  ;;  %v5090_v10 = vmul.f32 0.080537446, %v12377_v6  ;;  %vm4945_vm14 = vweird.f32 %v12235_v8  ;;  %v4949_v1 = vand.u32 2147483647, %v12235_v8 }
 0x85a   : > { %7918 = vrcp.f32 %v12384_v59  ;;  %v5264_v43 = vsub.f32 0.0, %v12387_v15  ;;  %v4672_v36 = vadd.f32 %v12310_v13, %v4671_v29  ;;  %vm4674_vm10 = vweird.f32 %v12310_v13  ;;  %vm12415_vm8 = vmor %vm4945_vm14, %vm4946_vm11 }
 0x85b   : > { %v4684_v52 = vmul.f32 %v12391_v58, %v12327_v4  ;;  %v12423_v8 = vsel %vm4451_vm7, %v4667_v53, %v5011_v3  ;;  %v4679_v12 = vand.u32 2147483648, %v12251_v60  ;;  %v4948_v14 = vsel %vm12415_vm8, %v12295_v7, %v4944_v34 }
 0x85c   : > { %v4957_v0 = vsub.f32 1.0, %v4956_v27  ;;  %v12430_v38 = vmul.f32 %v7468_v5, %v12225_v22  ;;  %vm4673_vm6 = vweird.f32 %v12251_v60  ;;  %v4677_v41 = vand.u32 2147483647, %v12251_v60 }
 0x85d   : > { %v4952_v23 = vor.u32 1.1754944e-38, %v4951_v18  ;;  %v7453_v17 = vadd.f32 -0.13877685, %v5090_v10  ;;  %vm12436_vm3 = vmor %vm4673_vm6, %vm4674_vm10  ;;  %vm4950_vm15 = vcmp.eq.f32.partialorder %v4949_v1, 8.507059e+37  ;;  %v4406_v53 = vadd.f32 %v12173_v19, %v4405_v42  ;;  %v5373_v42 = vpop.permute.xlu0 %5372 }
 0x85e   : > { %v12434_v26 = vpop.eup %7916  ;;  %v12443_v7 = vmul.f32 %v12263_v54, %v11275_v35  ;;  %v12447_v22 = vmul.f32 %v12423_v8, %v12423_v8  ;;  %v4676_v60 = vsel %vm12436_vm3, %v12310_v13, %v4672_v36  ;;  %v4685_v34 = vsub.f32 1.0, %v4684_v52 }
 0x85f   : > { %v4953_v29 = vsel %vm4950_vm15, %v4952_v23, %v4948_v14  ;;  %v4680_v5 = vor.u32 1.1754944e-38, %v4679_v12  ;;  %v7439_v3 = vadd.f32 -1.0, %v12210_v9  ;;  %v4958_v19 = vmul.f32 %v12366_v33, %v4957_v0  ;;  %5398 = vrot.lane.b32.xlu1 %v4406_v53, %s8097_s16 }
 0x860   : > { %v12452_v27 = vpop.eup %7918  ;;  %v12456_v18 = vmul.f32 0.5, %v4406_v53  ;;  %vm4452_vm4 = vcmp.gt.f32.partialorder %v12210_v9, 2.4142137  ;;  %vm4468_vm13 = vcmp.gt.f32.partialorder %v12210_v9, 0.41421357  ;;  %vm4678_vm1 = vcmp.eq.f32.partialorder %v4677_v41, 8.507059e+37 }
 0x861   : > { %v4699_v35 = vmul.f32 %v12434_v26, %v12381_v28  ;;  %v4681_v54 = vsel %vm4678_vm1, %v4680_v5, %v4676_v60  ;;  %v4954_v13 = vmul.f32 %v7439_v3, %v4953_v29  ;;  %v4971_v10 = vmul.f32 %v12452_v27, %v12384_v59 }
 0x862   : > { %v12466_v1 = vand.u32 2147483647, %v12456_v18  ;;  %v5122_v36 = vmul.f32 %v7453_v17, %v12377_v6  ;;  %v5091_v2 = vmul.f32 0.080537446, %v12447_v22  ;;  %v4686_v52 = vmul.f32 %v12391_v58, %v4685_v34 }
 0x863   : > { %vm4960_vm11 = vweird.f32 %v12308_v32  ;;  %v4959_v12 = vadd.f32 %v12366_v33, %v4958_v19  ;;  %vm4961_vm14 = vweird.f32 %v12366_v33  ;;  %v4964_v14 = vand.u32 2147483647, %v12308_v32 }
 0x864   : > { %v4972_v0 = vsub.f32 1.0, %v4971_v10  ;;  %v4682_v41 = vmul.f32 -1.0, %v4681_v54  ;;  %v4966_v23 = vand.u32 2147483648, %v12308_v32  ;;  %v4700_v44 = vsub.f32 1.0, %v4699_v35  ;;  %vm12492_vm8 = vmor %vm4960_vm11, %vm4961_vm14 }
 0x865   : > { %v12477_v17 = vadd.f32 1e-30, %v12466_v1  ;;  %v5012_v53 = vsel %vm4468_vm13, %v4954_v13, %v12210_v9  ;;  %v12484_v29 = vadd.f32 1.0, %v12466_v1  ;;  %v12486_v34 = vadd.f32 %v5373_v42, %v5338_v61 }
 0x866   : > { %v4973_v60 = vmul.f32 %v12452_v27, %v4972_v0  ;;  %v5138_v5 = vadd.f32 0.19977711, %v5122_v36  ;;  %v4687_v3 = vadd.f32 %v12391_v58, %v4686_v52  ;;  %vm4689_vm10 = vweird.f32 %v12391_v58 }
 0x867   : > { %7920 = vrcp.f32 %v12477_v17  ;;  %v7454_v35 = vadd.f32 -0.13877685, %v5091_v2  ;;  %vm4688_vm6 = vweird.f32 %v12327_v4  ;;  %v4694_v54 = vand.u32 2147483648, %v12327_v4  ;;  %7477 = vmatmul.msk.f32.gmra.mxu2 %vm14255_vm0, %v12486_v34 }
 0x868   : > { %v4963_v61 = vsel %vm12492_vm8, %v12366_v33, %v4959_v12  ;;  %v12506_v32 = vsel %vm4452_vm4, %v4682_v41, %v5012_v53  ;;  %v4692_v13 = vand.u32 2147483647, %v12327_v4  ;;  %v4967_v10 = vor.u32 1.1754944e-38, %v4966_v23  ;;  %vm12510_vm3 = vmor %vm4688_vm6, %vm4689_vm10  ;;  %v5375_v33 = vpop.permute.xlu1 %5374 }
 0x869   : > { %v4701_v36 = vmul.f32 %v12434_v26, %v4700_v44  ;;  %vm4965_vm15 = vcmp.eq.f32.partialorder %v4964_v14, 8.507059e+37  ;;  %v4974_v52 = vadd.f32 %v12452_v27, %v4973_v60  ;;  %vm4976_vm1 = vweird.f32 %v12452_v27 }
 0x86a   : > { %7922 = vrcp.f32 %v12484_v29  ;;  %v4691_v42 = vsel %vm12510_vm3, %v12391_v58, %v4687_v3  ;;  %v7440_v4 = vadd.f32 -1.0, %v12285_v39  ;;  %v4968_v12 = vsel %vm4965_vm15, %v4967_v10, %v4963_v61 }
 0x86b   : > { %v4981_v0 = vand.u32 2147483648, %v12384_v59  ;;  %v12524_v41 = vmul.f32 %v12506_v32, %v12506_v32  ;;  %v4695_v14 = vor.u32 1.1754944e-38, %v4694_v54  ;;  %vm4975_vm11 = vweird.f32 %v12384_v59 }
 0x86c   : > { %v4979_v23 = vand.u32 2147483647, %v12384_v59  ;;  %vm4693_vm14 = vcmp.eq.f32.partialorder %v4692_v13, 8.507059e+37  ;;  %v4702_v53 = vadd.f32 %v12434_v26, %v4701_v36  ;;  %vm4704_vm10 = vweird.f32 %v12434_v26  ;;  %vm12534_vm8 = vmor %vm4975_vm11, %vm4976_vm1 }
 0x86d   : > { %v12528_v44 = vpop.eup %7920  ;;  %v12539_v60 = vadd.f32 %v5375_v33, %v12443_v7  ;;  %v4696_v3 = vsel %vm4693_vm14, %v4695_v14, %v4691_v42  ;;  %v4969_v19 = vmul.f32 %v7440_v4, %v4968_v12  ;;  %v4709_v59 = vand.u32 2147483648, %v12381_v28 }
 0x86e   : > { %v4978_v54 = vsel %vm12534_vm8, %v12452_v27, %v4974_v52  ;;  %vm5248_vm6 = vcmp.lt.f32.partialorder %v11835_v46, 0.0  ;;  %vm4469_vm3 = vcmp.gt.f32.partialorder %v12285_v39, 0.41421357  ;;  %vm4703_vm15 = vweird.f32 %v12381_v28 }
 0x86f   : > { %v4707_v61 = vand.u32 2147483647, %v12381_v28  ;;  %v4982_v13 = vor.u32 1.1754944e-38, %v4981_v0  ;;  %v5123_v7 = vmul.f32 %v7454_v35, %v12447_v22  ;;  %v5092_v36 = vmul.f32 0.080537446, %v12524_v41  ;;  %vm12555_vm1 = vmor %vm4703_vm15, %vm4704_vm10  ;;  %7478 = vmatmul.msk.f32.gmra.mxu2 %vm14255_vm0, %v12539_v60 }
 0x870   : > { %v12549_v10 = vpop.eup %7922  ;;  %vm4980_vm11 = vcmp.eq.f32.partialorder %v4979_v23, 8.507059e+37  ;;  %v4714_v27 = vmul.f32 %v12528_v44, %v12477_v17  ;;  %v4697_v28 = vmul.f32 -1.0, %v4696_v3  ;;  %v4706_v35 = vsel %vm12555_vm1, %v12434_v26, %v4702_v53  ;;  %v5377_v53 = vpop.permute.xlu2 %5376 }
 0x871   : > { %v4983_v52 = vsel %vm4980_vm11, %v4982_v13, %v4978_v54  ;;  %v4986_v33 = vmul.f32 %v12549_v10, %v12484_v29  ;;  %v5201_v42 = vmul.f32 %v12430_v38, %v12207_v50  ;;  %v5013_v4 = vsel %vm4469_vm3, %v4969_v19, %v12285_v39 }
 0x872   : > { %v4710_v12 = vor.u32 1.1754944e-38, %v4709_v59  ;;  %v7441_v0 = vadd.f32 -1.0, %v12352_v55  ;;  %v5154_v14 = vmul.f32 %v5138_v5, %v12377_v6  ;;  %vm4708_vm14 = vcmp.eq.f32.partialorder %v4707_v61, 8.507059e+37 }
 0x873   : > { %v4987_v23 = vsub.f32 1.0, %v4986_v33  ;;  %v5340_v26 = vmul.f32 %v12274_v45, %v11279_v20  ;;  %vm4453_vm10 = vcmp.gt.f32.partialorder %v12285_v39, 2.4142137  ;;  %v4715_v38 = vsub.f32 1.0, %v4714_v27 }
 0x874   : > { %v4711_v58 = vsel %vm4708_vm14, %v4710_v12, %v4706_v35  ;;  %v4984_v3 = vmul.f32 %v7441_v0, %v4983_v52  ;;  %v5139_v54 = vadd.f32 0.19977711, %v5123_v7  ;;  %v7455_v13 = vadd.f32 -0.13877685, %v5092_v36 }
 0x875   : > { %v12580_v19 = vsel %vm4453_vm10, %v4697_v28, %v5013_v4  ;;  %v4988_v59 = vmul.f32 %v12549_v10, %v4987_v23  ;;  %v5295_v5 = vmul.f32 1.272, %v12372_v62  ;;  %v5057_v20 = vsel %vm4449_vm5, 1.5707964, %v12363_v63 }
 0x876   : > { %v5217_v45 = vadd.f32 %v5201_v42, %v12207_v50  ;;  %v12588_v61 = vadd.f32 %v5377_v53, %v5340_v26  ;;  %7924 = vpow2.f32 %v12368_v47  ;;  %v7469_v7 = vadd.f32 -0.3333295, %v5154_v14 }
 0x877   : > { %vm4470_vm8 = vcmp.gt.f32.partialorder %v12352_v55, 0.41421357  ;;  %v4712_v36 = vmul.f32 -1.0, %v4711_v58  ;;  %v5280_v62 = vsel %vm5248_vm6, %v5264_v43, %v12387_v15  ;;  %v12599_v30 = vmul.f32 %v12580_v19, %v12580_v19  ;;  %v5379_v15 = vpop.permute.xlu0 %5378 }
 0x878   : > { %v5014_v50 = vsel %vm4470_vm8, %v4984_v3, %v12352_v55  ;;  %v4716_v63 = vmul.f32 %v12528_v44, %v4715_v38  ;;  %7479 = vmatmul.msk.f32.gmra.mxu2 %vm14255_vm0, %v12588_v61  ;;  %v5155_v47 = vmul.f32 %v5139_v54, %v12447_v22  ;;  %v5124_v2 = vmul.f32 %v7455_v13, %v12524_v41  ;;  %v5383_v13 = vpop.permute.xlu2 %5382 }
 0x879   : > { %v4989_v46 = vadd.f32 %v12549_v10, %v4988_v59  ;;  %vm4991_vm5 = vweird.f32 %v12549_v10  ;;  %v5233_v43 = vadd.f32 %v5217_v45, %v5057_v20  ;;  %vm4454_vm6 = vcmp.gt.f32.partialorder %v12352_v55, 2.4142137 }
 0x87a   : > { %v4996_v27 = vand.u32 2147483648, %v12484_v29  ;;  %v5341_v28 = vmul.f32 %v12404_v48, %v11283_v25  ;;  %v5186_v35 = vmul.f32 %v7469_v7, %v12377_v6  ;;  %v12618_v52 = vsel %vm4454_vm6, %v4712_v36, %v5014_v50  ;;  %v5569_v25 = vld [vmem:[%s14586_s15 + $0x18] sm:$0xff]  ;;  %v5568_v48 = vld [vmem:[%s14586_s15 + $0x10] sm:$0xff]  ;;  %v5381_v50 = vpop.permute.xlu1 %5380 }
 0x87b   : > { %vm4990_vm15 = vweird.f32 %v12484_v29  ;;  %v4994_v33 = vand.u32 2147483647, %v12484_v29  ;;  %v5093_v42 = vmul.f32 0.080537446, %v12599_v30  ;;  %v4717_v4 = vadd.f32 %v12528_v44, %v4716_v63  ;;  %5634 = vmatpush.msrb.mxu0 %v5569_v25 }
 0x87c   : > { %vm4719_vm1 = vweird.f32 %v12528_v44  ;;  %vm12625_vm11 = vmor %vm4990_vm15, %vm4991_vm5  ;;  %v12630_v6 = vadd.f32 %v5379_v15, %v5341_v28  ;;  %v7925_v0 = vpop.eup %7924  ;;  %v7470_v14 = vadd.f32 -0.3333295, %v5155_v47  ;;  %v5140_v23 = vadd.f32 0.19977711, %v5124_v2  ;;  %v14591_v2 = vld [vmem:[#allocation30_spill] sm:$0xff] }
 0x87d   : > { %v4724_v26 = vand.u32 2147483648, %v12477_v17  ;;  %v4993_v29 = vsel %vm12625_vm11, %v12549_v10, %v4989_v46  ;;  %v12639_v53 = vmul.f32 %v12618_v52, %v12618_v52  ;;  %vm4718_vm14 = vweird.f32 %v12477_v17  ;;  %5635 = vmatpush.msrb.mxu0 %v5568_v48  ;;  %v14592_v46 = vld [vmem:[#allocation40_spill] sm:$0xff] }
 0x87e   : > { %v4722_v58 = vand.u32 2147483647, %v12477_v17  ;;  %v4997_v3 = vor.u32 1.1754944e-38, %v4996_v27  ;;  %v5318_v38 = vmul.f32 1.442695, %v5295_v5  ;;  %vm12645_vm5 = vmor %vm4718_vm14, %vm4719_vm1  ;;  %vm4995_vm15 = vcmp.eq.f32.partialorder %v4994_v33, 8.507059e+37 }
 0x87f   : > { %v5296_v54 = vmul.f32 1.272, %v5280_v62  ;;  %v5202_v10 = vmul.f32 %v5186_v35, %v12356_v11  ;;  %v7456_v59 = vadd.f32 -0.13877685, %v5093_v42  ;;  %v4721_v20 = vsel %vm12645_vm5, %v12528_v44, %v4717_v4  ;;  %v5567_v17 = vld [vmem:[%s14586_s15 + $0x8] sm:$0xff] }
 0x880   : > { %v4998_v45 = vsel %vm4995_vm15, %v4997_v3, %v4993_v29  ;;  %7480 = vmatmul.msk.f32.gmra.mxu2 %vm14255_vm0, %v12630_v6  ;;  %v5265_v5 = vsub.f32 0.0, %v5233_v43  ;;  %v5156_v7 = vmul.f32 %v5140_v23, %v12524_v41  ;;  %v4725_v36 = vor.u32 1.1754944e-38, %v4724_v26  ;;  %5636 = vmatpush.msrb.mxu0 %v5567_v17 }
 0x881   : > { %v7442_v62 = vadd.f32 -1.0, %v12466_v1  ;;  %v5187_v63 = vmul.f32 %v7470_v14, %v12447_v22  ;;  %v5094_v47 = vmul.f32 0.080537446, %v12639_v53  ;;  %vm4723_vm1 = vcmp.eq.f32.partialorder %v4722_v58, 8.507059e+37 }
 0x882   : > { %v5342_v44 = vmul.f32 %v7925_v0, %v14591_v2  ;;  %7926 = vpow2.f32 %v5318_v38  ;;  %vm5249_vm11 = vcmp.lt.f32.partialorder %v14592_v46, 0.0  ;;  %v4726_v15 = vsel %vm4723_vm1, %v4725_v36, %v4721_v20  ;;  %v14593_v20 = vld [vmem:[#allocation14_spill] sm:$0xff] }
 0x883   : > { %v4999_v27 = vmul.f32 %v7442_v62, %v4998_v45  ;;  %v5042_v28 = vsel %vm4466_vm9, 0.7853982, %v14313_v37  ;;  %v5218_v35 = vadd.f32 %v5202_v10, %v12356_v11  ;;  %v5125_v33 = vmul.f32 %v7456_v59, %v12599_v30 }
 0x884   : > { %v12667_v42 = vadd.f32 %v5381_v50, %v5342_v44  ;;  %v5320_v22 = vmul.f32 1.442695, %v5296_v54  ;;  %v5281_v4 = vsel %vm5249_vm11, %v5265_v5, %v5233_v43  ;;  %v7471_v12 = vadd.f32 -0.3333295, %v5156_v7  ;;  %v5385_v44 = vpop.permute.xlu0 %5384 }
 0x885   : > { %v5203_v25 = vmul.f32 %v5187_v63, %v12423_v8  ;;  %v7457_v48 = vadd.f32 -0.13877685, %v5094_v47  ;;  %vm4471_vm14 = vcmp.gt.f32.partialorder %v12466_v1, 0.41421357  ;;  %v4727_v0 = vmul.f32 -1.0, %v4726_v15 }
 0x886   : > { %v5058_v14 = vsel %vm4450_vm2, 1.5707964, %v5042_v28  ;;  %v5015_v11 = vsel %vm4471_vm14, %v4999_v27, %v12466_v1  ;;  %v5141_v26 = vadd.f32 0.19977711, %v5125_v33  ;;  %7928 = vpow2.f32 %v5320_v22  ;;  %v14594_v28 = vld [vmem:[#allocation15_spill] sm:$0xff] }
 0x887   : > { %v5234_v23 = vadd.f32 %v5218_v35, %v5058_v14  ;;  %v5297_v29 = vmul.f32 1.272, %v5281_v4  ;;  %v5043_v58 = vsel %vm4467_vm12, 0.7853982, %v14313_v37  ;;  %vm4455_vm9 = vcmp.gt.f32.partialorder %v12466_v1, 2.4142137 }
 0x888   : > { %7481 = vmatmul.msk.f32.gmra.mxu2 %vm14255_vm0, %v12667_v42  ;;  %v7927_v43 = vpop.eup %7926  ;;  %v5219_v57 = vadd.f32 %v5203_v25, %v12423_v8  ;;  %v5188_v3 = vmul.f32 %v7471_v12, %v12524_v41  ;;  %v5126_v38 = vmul.f32 %v7457_v48, %v12639_v53  ;;  %v12687_v54 = vsel %vm4455_vm9, %v4727_v0, %v5015_v11  ;;  %v14600_v1 = vld [vmem:[#allocation21_spill] sm:$0xff] }
 0x889   : > { %v5266_v10 = vsub.f32 0.0, %v5234_v23  ;;  %v5157_v59 = vmul.f32 %v5141_v26, %v12599_v30  ;;  %v5343_v45 = vmul.f32 %v7927_v43, %v14593_v20  ;;  %v5322_v17 = vmul.f32 1.442695, %v5297_v29  ;;  %v5387_v26 = vpop.permute.xlu1 %5386  ;;  %v14595_v43 = vld [vmem:[#allocation16_spill] sm:$0xff] }
 0x88a   : > { %v5059_v5 = vsel %vm4451_vm7, 1.5707964, %v5043_v58  ;;  %v12695_v8 = vmul.f32 %v12687_v54, %v12687_v54  ;;  %v5204_v7 = vmul.f32 %v5188_v3, %v12506_v32  ;;  %v5142_v36 = vadd.f32 0.19977711, %v5126_v38 }
 0x88b   : > { %v5235_v41 = vadd.f32 %v5219_v57, %v5059_v5  ;;  %v12698_v62 = vadd.f32 %v5383_v13, %v5343_v45  ;;  %vm5250_vm2 = vcmp.lt.f32.partialorder %v12066_v16, 0.0  ;;  %v7472_v47 = vadd.f32 -0.3333295, %v5157_v59  ;;  %v5566_v45 = vld [vmem:[%s14586_s15] sm:$0xff] }
 0x88c   : > { %v7929_v50 = vpop.eup %7928  ;;  %v5282_v63 = vsel %vm5250_vm2, %v5266_v10, %v5234_v23  ;;  %7930 = vpow2.f32 %v5322_v17  ;;  %v5044_v24 = vsel %vm4468_vm13, 0.7853982, %v14313_v37  ;;  %v5095_v2 = vmul.f32 0.080537446, %v12695_v8  ;;  %5637 = vmatpush.msrb.mxu0 %v5566_v45 }
 0x88d   : > { %v5267_v46 = vsub.f32 0.0, %v5235_v41  ;;  %v5220_v15 = vadd.f32 %v5204_v7, %v12506_v32  ;;  %v5158_v27 = vmul.f32 %v5142_v36, %v12639_v53  ;;  %v5344_v16 = vmul.f32 %v7929_v50, %v14594_v28  ;;  %v5389_v7 = vpop.permute.xlu2 %5388  ;;  %v14596_v36 = vld [vmem:[#allocation18_spill] sm:$0xff] }
 0x88e   : > { %v5298_v35 = vmul.f32 1.272, %v5282_v63  ;;  %v5189_v33 = vmul.f32 %v7472_v47, %v12599_v30  ;;  %vm5251_vm7 = vcmp.lt.f32.partialorder %v12110_v49, 0.0  ;;  %v5060_v4 = vsel %vm4452_vm4, 1.5707964, %v5044_v24 }
 0x88f   : > { %v12711_v22 = vadd.f32 %v5385_v44, %v5344_v16  ;;  %v7458_v12 = vadd.f32 -0.13877685, %v5095_v2  ;;  %v5283_v25 = vsel %vm5251_vm7, %v5267_v46, %v5235_v41  ;;  %v5236_v48 = vadd.f32 %v5220_v15, %v5060_v4  ;;  %v14597_v16 = vld [vmem:[#allocation19_spill] sm:$0xff] }
 0x890   : > { %7482 = vmatmul.msk.f32.gmra.mxu2 %vm14255_vm0, %v12698_v62  ;;  %v7473_v0 = vadd.f32 -0.3333295, %v5158_v27  ;;  %v5324_v32 = vmul.f32 1.442695, %v5298_v35  ;;  %v5205_v11 = vmul.f32 %v5189_v33, %v12580_v19  ;;  %v5299_v23 = vmul.f32 1.272, %v5283_v25  ;;  %v5391_v27 = vpop.permute.xlu0 %5390 }
 0x891   : > { %v5127_v30 = vmul.f32 %v7458_v12, %v12695_v8  ;;  %v5268_v49 = vsub.f32 0.0, %v5236_v48  ;;  %v5045_v58 = vsel %vm4469_vm3, 0.7853982, %v14313_v37  ;;  %vm5252_vm12 = vcmp.lt.f32.partialorder %v12186_v31, 0.0 }
 0x892   : > { %v7931_v14 = vpop.eup %7930  ;;  %v5190_v9 = vmul.f32 %v7473_v0, %v12639_v53  ;;  %7932 = vpow2.f32 %v5324_v32  ;;  %v5221_v57 = vadd.f32 %v5205_v11, %v12580_v19  ;;  %v5326_v38 = vmul.f32 1.442695, %v5299_v23  ;;  %v14599_v32 = vld [vmem:[#allocation20_spill] sm:$0xff] }
 0x893   : > { %v5345_v29 = vmul.f32 %v7931_v14, %v14595_v43  ;;  %v5143_v13 = vadd.f32 0.19977711, %v5127_v30  ;;  %v5284_v10 = vsel %vm5252_vm12, %v5268_v49, %v5236_v48  ;;  %v5061_v53 = vsel %vm4453_vm10, 1.5707964, %v5045_v58  ;;  %v6864_v49 = vld [vmem:[%s8242_s20] sm:$0xff] }
 0x894   : > { %v5206_v59 = vmul.f32 %v5190_v9, %v12618_v52  ;;  %v5237_v20 = vadd.f32 %v5221_v57, %v5061_v53  ;;  %7934 = vpow2.f32 %v5326_v38  ;;  %v5300_v19 = vmul.f32 1.272, %v5284_v10  ;;  %v12767_v9 = vld [vmem:[%s14598_s22] ss:$0 sm:$0xff]  ;;  %6994 = vmatpush.msrb.mxu2 %v6864_v49 }
 0x895   : > { %v12726_v3 = vadd.f32 %v5387_v26, %v5345_v29  ;;  %v5159_v5 = vmul.f32 %v5143_v13, %v12695_v8  ;;  %v5046_v31 = vsel %vm4470_vm8, 0.7853982, %v14313_v37  ;;  %vm5253_vm4 = vcmp.lt.f32.partialorder %v12255_v51, 0.0  ;;  %v5395_v57 = vpop.permute.xlu2 %5394 }
 0x896   : > { %v5222_v41 = vadd.f32 %v5206_v59, %v12618_v52  ;;  %v5269_v39 = vsub.f32 0.0, %v5237_v20  ;;  %v5328_v63 = vmul.f32 1.442695, %v5300_v19  ;;  %v5062_v47 = vsel %vm4454_vm6, 1.5707964, %v5046_v31  ;;  %v14603_v19 = vld [vmem:[#allocation22_spill] sm:$0xff] }
 0x897   : > { %v7474_v24 = vadd.f32 -0.3333295, %v5159_v5  ;;  %vm5254_vm13 = vcmp.lt.f32.partialorder %v12329_v56, 0.0  ;;  %v5047_v48 = vsel %vm4471_vm14, 0.7853982, %v14313_v37  ;;  %vm5255_vm3 = vcmp.lt.f32.partialorder %v12456_v18, 0.0 }
 0x898   : > { %7483 = vmatmul.msk.f32.gmra.mxu2 %vm14255_vm0, %v12711_v22  ;;  %v7933_v17 = vpop.eup %7932  ;;  %v5238_v2 = vadd.f32 %v5222_v41, %v5062_v47  ;;  %v5285_v15 = vsel %vm5253_vm4, %v5269_v39, %v5237_v20  ;;  %7936 = vpow2.f32 %v5328_v63  ;;  %v5063_v11 = vsel %vm4455_vm9, 1.5707964, %v5047_v48  ;;  %v5706_v39 = vld [vmem:[%s14601_s26 + $0x18] sm:$0xff] }
 0x899   : > { %v5346_v50 = vmul.f32 %v7933_v17, %v14596_v36  ;;  %v5191_v52 = vmul.f32 %v7474_v24, %v12695_v8  ;;  %v5301_v55 = vmul.f32 1.272, %v5285_v15  ;;  %vm14602_vm10 = vcmask 261120   ;;  %5771 = vmatpush.msrb.mxu3 %v5706_v39 }
 0x89a   : > { %v7935_v46 = vpop.eup %7934  ;;  %v5270_v28 = vsub.f32 0.0, %v5238_v2  ;;  %vm14604_vm8 = vmmov %vm14602_vm10 }
 0x89b   : > { %v12743_v44 = vadd.f32 %v5389_v7, %v5346_v50  ;;  %v5347_v35 = vmul.f32 %v7935_v46, %v14597_v16  ;;  %v5207_v4 = vmul.f32 %v5191_v52, %v12687_v54  ;;  %v5330_v25 = vmul.f32 1.442695, %v5301_v55  ;;  %v14605_v50 = vld [vmem:[#allocation23_spill] sm:$0xff]  ;;  %vm14606_vm6 = vmmov %vm14604_vm8 }
 0x89c   : > { %v5286_v51 = vsel %vm5254_vm13, %v5270_v28, %v5238_v2  ;;  %v5705_v2 = vld [vmem:[%s14601_s26 + $0x10] sm:$0xff]  ;;  %vm14607_vm5 = vmmov %vm14606_vm6 }
 0x89d   : > { %v12750_v33 = vadd.f32 %v5391_v27, %v5347_v35  ;;  %v5302_v8 = vmul.f32 1.272, %v5286_v51  ;;  %v5223_v0 = vadd.f32 %v5207_v4, %v12687_v54  ;;  %7938 = vpow2.f32 %v5330_v25  ;;  %5772 = vmatpush.msrb.mxu3 %v5705_v2  ;;  %vm14608_vm15 = vmmov %vm14607_vm5  ;;  %v5704_v4 = vld [vmem:[%s14601_s26 + $0x8] sm:$0xff] }
 0x89e   : > { %v7937_v12 = vpop.eup %7936  ;;  %vm14609_vm1 = vmmov %vm14607_vm5 }
 0x89f   : > { %v5348_v56 = vmul.f32 %v7937_v12, %v14599_v32  ;;  %v5332_v30 = vmul.f32 1.442695, %v5302_v8  ;;  %v5239_v26 = vadd.f32 %v5223_v0, %v5063_v11  ;;  %5773 = vmatpush.msrb.mxu3 %v5704_v4  ;;  %vm14610_vm11 = vmmov %vm14609_vm1 }
 0x8a0   : > { %7484 = vmatmul.msk.f32.gmra.mxu2 %vm14255_vm0, %v12726_v3  ;;  %vm14611_vm14 = vmmov %vm14609_vm1 }
 0x8a1   : > { %7940 = vpow2.f32 %v5332_v30  ;;  %v5271_v54 = vsub.f32 0.0, %v5239_v26  ;;  %vm14612_vm9 = vmmov %vm14609_vm1 }
 0x8a2   : > { %vm14614_vm2 = vmmov %vm14609_vm1 }
 0x8a3   : > { %v7939_v43 = vpop.eup %7938  ;;  %v5287_v10 = vsel %vm5255_vm3, %v5271_v54, %v5239_v26  ;;  %vm14615_vm7 = vmmov %vm14609_vm1 }
 0x8a4   : > { %v5349_v38 = vmul.f32 %v7939_v43, %v14600_v1  ;;  %v5303_v20 = vmul.f32 1.272, %v5287_v10  ;;  %vm14616_vm12 = vmmov %vm14609_vm1  ;;  %v12840_v43 = vld [vmem:[%s14613_s1] ss:$0 sm:$0xff] }
 0x8a5   : > { %vm14617_vm4 = vmmov %vm14609_vm1 }
 0x8a6   : > { %v12774_v59 = vadd.f32 %v5395_v57, %v5349_v38  ;;  %v5334_v31 = vmul.f32 1.442695, %v5303_v20  ;;  %vm14618_vm13 = vmmov %vm14609_vm1 }
 0x8a7   : > { %v7941_v53 = vpop.eup %7940  ;;  %vm14619_vm3 = vmmov %vm14609_vm1 }
 0x8a8   : > { %7485 = vmatmul.msk.f32.gmra.mxu2 %vm14255_vm0, %v12743_v44  ;;  %v5393_v14 = vpop.permute.xlu1 %5392  ;;  %v5350_v5 = vmul.f32 %v7941_v53, %v14603_v19  ;;  %7942 = vpow2.f32 %v5334_v31 }
 0x8a9   : > { %v12763_v23 = vadd.f32 %v5393_v14, %v5348_v56 }
 0x8ae   : > { %v7943_v36 = vpop.eup %7942 }
 0x8af   : > { %v5351_v63 = vmul.f32 %v7943_v36, %v14605_v50 }
 0x8b0   : > { %7486 = vmatmul.msk.f32.gmra.mxu2 %vm14255_vm0, %v12750_v33 }
 0x8b7   : > { %v5397_v45 = vpop.permute.xlu0 %5396 }
 0x8b8   : > { %7487 = vmatmul.msk.f32.gmra.mxu2 %vm14255_vm0, %v12763_v23  ;;  %v5502_v29 = vpop.f32.mrf.mxu2  ;;  %v12781_v41 = vadd.f32 %v5397_v45, %v5350_v5 }
 0x8b9   : > { %v5503_v58 = vadd.f32 %v12767_v9, %v5502_v29 }
 0x8bb   : > { %v5550_v13 = vmax.f32 %v5503_v58, 0.0 }
 0x8bd   : > { %7491 = vmatmul.msk.f32.vlgmr.msrb.gmra.mxu0 %vm14602_vm10, %v5550_v13  ;;  %vm14620_vm10 = vmmov %vm14609_vm1 }
 0x8c0   : > { %7488 = vmatmul.msk.f32.gmra.mxu2 %vm14255_vm0, %v12774_v59  ;;  %v5505_v17 = vpop.f32.mrf.mxu2 }
 0x8c1   : > { %v5506_v18 = vadd.f32 %v12767_v9, %v5505_v17 }
 0x8c3   : > { %v5551_v7 = vmax.f32 %v5506_v18, 0.0 }
 0x8c5   : > { %7492 = vmatmul.msk.f32.gmra.mxu0 %vm14604_vm8, %v5551_v7  ;;  %vm14621_vm8 = vmmov %vm14609_vm1 }
 0x8c8   : > { %7489 = vmatmul.msk.f32.gmra.mxu2 %vm14255_vm0, %v12781_v41 }
 0x8d1   : > { %v5399_v47 = vpop.permute.xlu1 %5398 }
 0x8d2   : > { %v12788_v24 = vadd.f32 %v5399_v47, %v5351_v63 }
 0x8d4   : > { %7490 = vmatmul.msk.f32.gmra.mxu2 %vm14255_vm0, %v12788_v24 }
 0x8dc   : > { %7587 = vmatmul.msk.f32.vlgmr.msrb.gmra.mxu2 %vm14255_vm0, %v12167_v40 }
 0x8e4   : > { %7588 = vmatmul.msk.f32.gmra.mxu2 %vm14255_vm0, %v12200_v21 }
 0x8ea   : > { %v5508_v46 = vpop.f32.mrf.mxu2 }
 0x8eb   : > { %v5509_v15 = vadd.f32 %v12767_v9, %v5508_v46 }
 0x8ec   : > { %7589 = vmatmul.msk.f32.gmra.mxu2 %vm14255_vm0, %v12486_v34 }
 0x8ed   : > { %v5552_v52 = vmax.f32 %v5509_v15, 0.0 }
 0x8ef   : > { %7493 = vmatmul.msk.f32.gmra.mxu0 %vm14606_vm6, %v5552_v52  ;;  %vm14622_vm6 = vmmov %vm14609_vm1 }
 0x8f2   : > { %v5511_v27 = vpop.f32.mrf.mxu2 }
 0x8f3   : > { %v5512_v28 = vadd.f32 %v12767_v9, %v5511_v27 }
 0x8f4   : > { %7590 = vmatmul.msk.f32.gmra.mxu2 %vm14255_vm0, %v12539_v60 }
 0x8f5   : > { %v5553_v40 = vmax.f32 %v5512_v28, 0.0 }
 0x8f7   : > { %7494 = vmatmul.msk.f32.gmra.mxu0 %vm14607_vm5, %v5553_v40  ;;  %vm14623_vm5 = vmmov %vm14609_vm1 }
 0x8fb   : > { %v5514_v21 = vpop.f32.mrf.mxu2 }
 0x8fc   : > { %v5515_v16 = vadd.f32 %v12767_v9, %v5514_v21  ;;  %7591 = vmatmul.msk.f32.gmra.mxu2 %vm14255_vm0, %v12588_v61 }
 0x8fe   : > { %v5554_v34 = vmax.f32 %v5515_v16, 0.0 }
 0x900   : > { %7495 = vmatmul.msk.f32.gmra.mxu0 %vm14608_vm15, %v5554_v34  ;;  %vm14624_vm15 = vmmov %vm14609_vm1 }
 0x903   : > { %v5517_v35 = vpop.f32.mrf.mxu2 }
 0x904   : > { %v5518_v55 = vadd.f32 %v12767_v9, %v5517_v35  ;;  %7592 = vmatmul.msk.f32.gmra.mxu2 %vm14255_vm0, %v12630_v6 }
 0x906   : > { %v5555_v60 = vmax.f32 %v5518_v55, 0.0 }
 0x908   : > { %7496 = vmatmul.msk.f32.gmra.mxu0 %vm14609_vm1, %v5555_v60 }
 0x90b   : > { %v5520_v51 = vpop.f32.mrf.mxu2 }
 0x90c   : > { %v5521_v12 = vadd.f32 %v12767_v9, %v5520_v51  ;;  %7593 = vmatmul.msk.f32.gmra.mxu2 %vm14255_vm0, %v12667_v42 }
 0x90e   : > { %v5556_v61 = vmax.f32 %v5521_v12, 0.0 }
 0x910   : > { %7497 = vmatmul.msk.f32.gmra.mxu0 %vm14610_vm11, %v5556_v61  ;;  %vm14625_vm11 = vmmov %vm14609_vm1 }
 0x913   : > { %v5523_v25 = vpop.f32.mrf.mxu2 }
 0x914   : > { %v5524_v8 = vadd.f32 %v12767_v9, %v5523_v25  ;;  %7594 = vmatmul.msk.f32.gmra.mxu2 %vm14255_vm0, %v12698_v62  ;;  %v5703_v62 = vld [vmem:[%s14601_s26] sm:$0xff] }
 0x915   : > { %5774 = vmatpush.msrb.mxu3 %v5703_v62 }
 0x916   : > { %v5557_v6 = vmax.f32 %v5524_v8, 0.0 }
 0x918   : > { %7498 = vmatmul.msk.f32.gmra.mxu0 %vm14611_vm14, %v5557_v6  ;;  %vm14626_vm14 = vmmov %vm14609_vm1 }
 0x91b   : > { %v5526_v48 = vpop.f32.mrf.mxu2 }
 0x91c   : > { %v5527_v0 = vadd.f32 %v12767_v9, %v5526_v48  ;;  %7595 = vmatmul.msk.f32.gmra.mxu2 %vm14255_vm0, %v12711_v22 }
 0x91e   : > { %v5558_v42 = vmax.f32 %v5527_v0, 0.0 }
 0x920   : > { %7499 = vmatmul.msk.f32.gmra.mxu0 %vm14612_vm9, %v5558_v42  ;;  %vm14627_vm9 = vmmov %vm14609_vm1  ;;  %v12884_v42 = vld [vmem:[%s8237_s30] ss:$0 sm:$0xff] }
 0x923   : > { %v5529_v14 = vpop.f32.mrf.mxu2 }
 0x924   : > { %v5530_v32 = vadd.f32 %v12767_v9, %v5529_v14  ;;  %7596 = vmatmul.msk.f32.gmra.mxu2 %vm14255_vm0, %v12726_v3 }
 0x926   : > { %v5559_v56 = vmax.f32 %v5530_v32, 0.0 }
 0x928   : > { %7500 = vmatmul.msk.f32.gmra.mxu0 %vm14614_vm2, %v5559_v56  ;;  %vm14628_vm2 = vmmov %vm14609_vm1 }
 0x92b   : > { %v5532_v11 = vpop.f32.mrf.mxu2 }
 0x92c   : > { %v5533_v30 = vadd.f32 %v12767_v9, %v5532_v11  ;;  %7597 = vmatmul.msk.f32.gmra.mxu2 %vm14255_vm0, %v12743_v44 }
 0x92e   : > { %v5560_v22 = vmax.f32 %v5533_v30, 0.0 }
 0x930   : > { %7501 = vmatmul.msk.f32.gmra.mxu0 %vm14615_vm7, %v5560_v22  ;;  %vm14629_vm7 = vmmov %vm14609_vm1 }
 0x933   : > { %v5535_v26 = vpop.f32.mrf.mxu2 }
 0x934   : > { %v5536_v49 = vadd.f32 %v12767_v9, %v5535_v26  ;;  %7598 = vmatmul.msk.f32.gmra.mxu2 %vm14255_vm0, %v12750_v33 }
 0x936   : > { %v5561_v3 = vmax.f32 %v5536_v49, 0.0 }
 0x938   : > { %7502 = vmatmul.msk.f32.gmra.mxu0 %vm14616_vm12, %v5561_v3  ;;  %vm14630_vm12 = vmmov %vm14609_vm1 }
 0x93a   : > { %v5639_v29 = vpop.f32.mrf.mxu0 }
 0x93b   : > { %v5538_v54 = vpop.f32.mrf.mxu2  ;;  %v5640_v44 = vadd.f32 %v12840_v43, %v5639_v29 }
 0x93c   : > { %v5539_v58 = vadd.f32 %v12767_v9, %v5538_v54  ;;  %7599 = vmatmul.msk.f32.gmra.mxu2 %vm14255_vm0, %v12763_v23 }
 0x93d   : > { %v5687_v1 = vmax.f32 %v5640_v44, 0.0 }
 0x93e   : > { %v5562_v57 = vmax.f32 %v5539_v58, 0.0 }
 0x93f   : > { %7507 = vmatmul.msk.f32.vlgmr.msrb.gmra.mxu3 %vm14618_vm13, %v5687_v1  ;;  %vm14632_vm13 = vmmov %vm14609_vm1 }
 0x940   : > { %7503 = vmatmul.msk.f32.gmra.mxu0 %vm14617_vm4, %v5562_v57  ;;  %vm14631_vm4 = vmmov %vm14609_vm1 }
 0x942   : > { %v5642_v38 = vpop.f32.mrf.mxu0 }
 0x943   : > { %v5541_v33 = vpop.f32.mrf.mxu2  ;;  %v5643_v10 = vadd.f32 %v12840_v43, %v5642_v38 }
 0x944   : > { %v5542_v13 = vadd.f32 %v12767_v9, %v5541_v33  ;;  %7600 = vmatmul.msk.f32.gmra.mxu2 %vm14255_vm0, %v12774_v59 }
 0x945   : > { %v5688_v20 = vmax.f32 %v5643_v10, 0.0 }
 0x946   : > { %v5563_v53 = vmax.f32 %v5542_v13, 0.0 }
 0x947   : > { %7508 = vmatmul.msk.f32.gmra.mxu3 %vm14620_vm10, %v5688_v20  ;;  %vm14634_vm10 = vmmov %vm14609_vm1 }
 0x948   : > { %7504 = vmatmul.msk.f32.gmra.mxu0 %vm14619_vm3, %v5563_v53  ;;  %vm14633_vm3 = vmmov %vm14609_vm1 }
 0x94b   : > { %v5544_v23 = vpop.f32.mrf.mxu2 }
 0x94c   : > { %v5545_v45 = vadd.f32 %v12767_v9, %v5544_v23  ;;  %7601 = vmatmul.msk.f32.gmra.mxu2 %vm14255_vm0, %v12781_v41 }
 0x94e   : > { %v5564_v17 = vmax.f32 %v5545_v45, 0.0 }
 0x950   : > { %7505 = vmatmul.msk.f32.gmra.mxu0 %vm14621_vm8, %v5564_v17 }
 0x954   : > { %7602 = vmatmul.msk.f32.gmra.mxu2 %vm14255_vm0, %v12788_v24 }
 0x957   : > { %v5547_v19 = vpop.f32.mrf.mxu2 }
 0x958   : > { %v5548_v59 = vadd.f32 %v12767_v9, %v5547_v19 }
 0x95a   : > { %v5565_v5 = vmax.f32 %v5548_v59, 0.0 }
 0x95c   : > { %7506 = vmatmul.msk.f32.gmra.mxu0 %vm14622_vm6, %v5565_v5 }
 0x96c   : > { %v5645_v18 = vpop.f32.mrf.mxu0 }
 0x96d   : > { %v5646_v31 = vadd.f32 %v12840_v43, %v5645_v18 }
 0x96f   : > { %v5689_v7 = vmax.f32 %v5646_v31, 0.0 }
 0x971   : > { %7509 = vmatmul.msk.f32.gmra.mxu3 %vm14623_vm5, %v5689_v7  ;;  %vm14635_vm5 = vmmov %vm14609_vm1 }
 0x974   : > { %v5648_v39 = vpop.f32.mrf.mxu0 }
 0x975   : > { %v5649_v41 = vadd.f32 %v12840_v43, %v5648_v39 }
 0x977   : > { %v5690_v36 = vmax.f32 %v5649_v41, 0.0 }
 0x979   : > { %7510 = vmatmul.msk.f32.gmra.mxu3 %vm14624_vm15, %v5690_v36 }
 0x97d   : > { %v5651_v50 = vpop.f32.mrf.mxu0 }
 0x97e   : > { %v5652_v63 = vadd.f32 %v12840_v43, %v5651_v50 }
 0x980   : > { %v5691_v47 = vmax.f32 %v5652_v63, 0.0 }
 0x982   : > { %7511 = vmatmul.msk.f32.gmra.mxu3 %vm14609_vm1, %v5691_v47 }
 0x985   : > { %v5654_v9 = vpop.f32.mrf.mxu0 }
 0x986   : > { %v5655_v24 = vadd.f32 %v12840_v43, %v5654_v9 }
 0x988   : > { %v5692_v2 = vmax.f32 %v5655_v24, 0.0 }
 0x98a   : > { %7512 = vmatmul.msk.f32.gmra.mxu3 %vm14625_vm11, %v5692_v2 }
 0x98d   : > { %v5657_v46 = vpop.f32.mrf.mxu0 }
 0x98e   : > { %v5658_v15 = vadd.f32 %v12840_v43, %v5657_v46 }
 0x990   : > { %v5693_v52 = vmax.f32 %v5658_v15, 0.0 }
 0x992   : > { %7513 = vmatmul.msk.f32.gmra.mxu3 %vm14626_vm14, %v5693_v52 }
 0x995   : > { %v5660_v27 = vpop.f32.mrf.mxu0 }
 0x996   : > { %v5661_v28 = vadd.f32 %v12840_v43, %v5660_v27 }
 0x998   : > { %v5694_v40 = vmax.f32 %v5661_v28, 0.0 }
 0x99a   : > { %7514 = vmatmul.msk.f32.gmra.mxu3 %vm14627_vm9, %v5694_v40 }
 0x99d   : > { %v5663_v21 = vpop.f32.mrf.mxu0 }
 0x99e   : > { %v5664_v16 = vadd.f32 %v12840_v43, %v5663_v21 }
 0x9a0   : > { %v5695_v34 = vmax.f32 %v5664_v16, 0.0 }
 0x9a2   : > { %7515 = vmatmul.msk.f32.gmra.mxu3 %vm14628_vm2, %v5695_v34 }
 0x9a5   : > { %v5666_v35 = vpop.f32.mrf.mxu0 }
 0x9a6   : > { %v5667_v55 = vadd.f32 %v12840_v43, %v5666_v35  ;;  %v6865_v35 = vld [vmem:[%s8247_s27] sm:$0xff] }
 0x9a7   : > { %6929 = vmatpush.msrb.mxu1 %v6865_v35 }
 0x9a8   : > { %v5696_v4 = vmax.f32 %v5667_v55, 0.0 }
 0x9aa   : > { %7516 = vmatmul.msk.f32.gmra.mxu3 %vm14629_vm7, %v5696_v4 }
 0x9ad   : > { %v5669_v60 = vpop.f32.mrf.mxu0 }
 0x9ae   : > { %v5670_v51 = vadd.f32 %v12840_v43, %v5669_v60 }
 0x9b0   : > { %v5697_v12 = vmax.f32 %v5670_v51, 0.0 }
 0x9b2   : > { %7517 = vmatmul.msk.f32.gmra.mxu3 %vm14630_vm12, %v5697_v12 }
 0x9b5   : > { %v5672_v61 = vpop.f32.mrf.mxu0 }
 0x9b6   : > { %v5673_v25 = vadd.f32 %v12840_v43, %v5672_v61 }
 0x9b8   : > { %v5698_v8 = vmax.f32 %v5673_v25, 0.0 }
 0x9ba   : > { %7518 = vmatmul.msk.f32.gmra.mxu3 %vm14631_vm4, %v5698_v8 }
 0x9bd   : > { %v5675_v6 = vpop.f32.mrf.mxu0 }
 0x9be   : > { %v5676_v48 = vadd.f32 %v12840_v43, %v5675_v6 }
 0x9c0   : > { %v5699_v0 = vmax.f32 %v5676_v48, 0.0 }
 0x9c2   : > { %7519 = vmatmul.msk.f32.gmra.mxu3 %vm14632_vm13, %v5699_v0  ;;  %v5776_v14 = vpop.f32.mrf.mxu3 }
 0x9c3   : > { %v5777_v32 = vadd.f32 %v12884_v42, %v5776_v14 }
 0x9c5   : > { %v5678_v62 = vpop.f32.mrf.mxu0  ;;  %v12889_v11 = vmul.f32 0.5, %v5777_v32  ;;  %6800 = vrot.lane.b32.xlu2 %v5777_v32, %s8097_s16 }
 0x9c6   : > { %v5679_v56 = vadd.f32 %v12840_v43, %v5678_v62 }
 0x9c7   : > { %v12893_v22 = vand.u32 2147483647, %v12889_v11 }
 0x9c8   : > { %v5700_v30 = vmax.f32 %v5679_v56, 0.0 }
 0x9c9   : > { %v5888_v26 = vadd.f32 1e-30, %v12893_v22  ;;  %v6160_v49 = vadd.f32 1.0, %v12893_v22  ;;  %v7523_v24 = vadd.f32 -1.0, %v12893_v22  ;;  %vm5872_vm7 = vcmp.gt.f32.partialorder %v12893_v22, 0.41421357 }
 0x9ca   : > { %7520 = vmatmul.msk.f32.gmra.mxu3 %vm14633_vm3, %v5700_v30  ;;  %v5779_v33 = vpop.f32.mrf.mxu3  ;;  %vm5856_vm12 = vcmp.gt.f32.partialorder %v12893_v22, 2.4142137 }
 0x9cb   : > { %7944 = vrcp.f32 %v5888_v26  ;;  %v5780_v13 = vadd.f32 %v12884_v42, %v5779_v33  ;;  %v6187_v5 = vand.u32 2147483648, %v6160_v49  ;;  %vm6181_vm6 = vweird.f32 %v6160_v49 }
 0x9cc   : > { %7946 = vrcp.f32 %v6160_v49  ;;  %v6185_v18 = vand.u32 2147483647, %v6160_v49  ;;  %v5915_v39 = vand.u32 2147483648, %v5888_v26  ;;  %vm5909_vm11 = vweird.f32 %v5888_v26 }
 0x9cd   : > { %v5681_v3 = vpop.f32.mrf.mxu0  ;;  %6802 = vrot.lane.b32.xlu0 %v5780_v13, %s8097_s16  ;;  %v12903_v17 = vmul.f32 0.5, %v5780_v13  ;;  %v6188_v36 = vor.u32 1.1754944e-38, %v6187_v5 }
 0x9ce   : > { %v5682_v54 = vadd.f32 %v12840_v43, %v5681_v3  ;;  %vm6186_vm9 = vcmp.eq.f32.partialorder %v6185_v18, 8.507059e+37  ;;  %v5916_v9 = vor.u32 1.1754944e-38, %v5915_v39 }
 0x9cf   : > { %v12907_v7 = vand.u32 2147483647, %v12903_v17 }
 0x9d0   : > { %v5701_v29 = vmax.f32 %v5682_v54, 0.0 }
 0x9d1   : > { %v7945_v58 = vpop.eup %7944  ;;  %v6161_v47 = vadd.f32 1.0, %v12907_v7  ;;  %v5889_v15 = vadd.f32 1e-30, %v12907_v7  ;;  %v7524_v13 = vadd.f32 -1.0, %v12907_v7 }
 0x9d2   : > { %7521 = vmatmul.msk.f32.gmra.mxu3 %vm14634_vm10, %v5701_v29  ;;  %v7947_v44 = vpop.eup %7946  ;;  %v5905_v57 = vmul.f32 %v7945_v58, %v5888_v26  ;;  %vm5910_vm15 = vweird.f32 %v7945_v58 }
 0x9d3   : > { %v6177_v1 = vmul.f32 %v7947_v44, %v6160_v49  ;;  %vm6182_vm8 = vweird.f32 %v7947_v44  ;;  %vm5911_vm14 = vmor %vm5909_vm11, %vm5910_vm15  ;;  %7948 = vrcp.f32 %v6161_v47  ;;  %v6202_v32 = vand.u32 2147483648, %v6161_v47 }
 0x9d4   : > { %v5906_v10 = vsub.f32 1.0, %v5905_v57  ;;  %vm6183_vm1 = vmor %vm6181_vm6, %vm6182_vm8  ;;  %7950 = vrcp.f32 %v5889_v15  ;;  %vm6196_vm13 = vweird.f32 %v6161_v47  ;;  %v6200_v62 = vand.u32 2147483647, %v6161_v47 }
 0x9d5   : > { %v6178_v38 = vsub.f32 1.0, %v6177_v1  ;;  %v5930_v49 = vand.u32 2147483648, %v5889_v15  ;;  %vm5924_vm8 = vweird.f32 %v5889_v15  ;;  %v5928_v29 = vand.u32 2147483647, %v5889_v15 }
 0x9d6   : > { %v5907_v45 = vmul.f32 %v7945_v58, %v5906_v10  ;;  %vm5857_vm11 = vcmp.gt.f32.partialorder %v12907_v7, 2.4142137 }
 0x9d7   : > { %v6179_v53 = vmul.f32 %v7947_v44, %v6178_v38  ;;  %v5931_v38 = vor.u32 1.1754944e-38, %v5930_v49  ;;  %vm5929_vm15 = vcmp.eq.f32.partialorder %v5928_v29, 8.507059e+37 }
 0x9d8   : > { %v5908_v31 = vadd.f32 %v7945_v58, %v5907_v45 }
 0x9d9   : > { %v5684_v20 = vpop.f32.mrf.mxu0  ;;  %v6180_v19 = vadd.f32 %v7947_v44, %v6179_v53  ;;  %v7949_v28 = vpop.eup %7948 }
 0x9da   : > { %v5685_v23 = vadd.f32 %v12840_v43, %v5684_v20  ;;  %v5913_v43 = vand.u32 2147483647, %v5888_v26  ;;  %v5912_v50 = vsel %vm5911_vm14, %v7945_v58, %v5908_v31  ;;  %v7951_v21 = vpop.eup %7950  ;;  %v6192_v34 = vmul.f32 %v7949_v28, %v6161_v47 }
 0x9db   : > { %v6184_v41 = vsel %vm6183_vm1, %v7947_v44, %v6180_v19  ;;  %v5920_v55 = vmul.f32 %v7951_v21, %v5889_v15  ;;  %vm6197_vm4 = vweird.f32 %v7949_v28  ;;  %vm5925_vm3 = vweird.f32 %v7951_v21 }
 0x9dc   : > { %v5702_v59 = vmax.f32 %v5685_v23, 0.0  ;;  %v6189_v63 = vsel %vm6186_vm9, %v6188_v36, %v6184_v41  ;;  %vm5914_vm2 = vcmp.eq.f32.partialorder %v5913_v43, 8.507059e+37  ;;  %v6193_v60 = vsub.f32 1.0, %v6192_v34  ;;  %vm6198_vm10 = vmor %vm6196_vm13, %vm6197_vm4 }
 0x9dd   : > { %v5917_v2 = vsel %vm5914_vm2, %v5916_v9, %v5912_v50  ;;  %v6190_v46 = vmul.f32 %v7523_v24, %v6189_v63  ;;  %v5921_v61 = vsub.f32 1.0, %v5920_v55  ;;  %v6203_v58 = vor.u32 1.1754944e-38, %v6202_v32  ;;  %vm5926_vm6 = vmor %vm5924_vm8, %vm5925_vm3 }
 0x9de   : > { %7522 = vmatmul.msk.f32.gmra.mxu3 %vm14635_vm5, %v5702_v59  ;;  %v5918_v52 = vmul.f32 -1.0, %v5917_v2  ;;  %v6194_v8 = vmul.f32 %v7949_v28, %v6193_v60  ;;  %vm6201_vm5 = vcmp.eq.f32.partialorder %v6200_v62, 8.507059e+37  ;;  %vm5873_vm1 = vcmp.gt.f32.partialorder %v12907_v7, 0.41421357 }
 0x9df   : > { %v6416_v27 = vsel %vm5872_vm7, %v6190_v46, %v12893_v22  ;;  %v5922_v6 = vmul.f32 %v7951_v21, %v5921_v61  ;;  %v6448_v24 = vsel %vm5872_vm7, 0.7853982, %v14313_v37  ;;  %vm6656_vm14 = vcmp.lt.f32.partialorder %v12889_v11, 0.0 }
 0x9e0   : > { %v12919_v40 = vsel %vm5856_vm12, %v5918_v52, %v6416_v27  ;;  %v6195_v0 = vadd.f32 %v7949_v28, %v6194_v8 }
 0x9e1   : > { %v6480_v16 = vmul.f32 %v12919_v40, %v12919_v40  ;;  %v5923_v56 = vadd.f32 %v7951_v21, %v5922_v6 }
 0x9e2   : > { %v6199_v3 = vsel %vm6198_vm10, %v7949_v28, %v6195_v0 }
 0x9e3   : > { %v6496_v4 = vmul.f32 0.080537446, %v6480_v16  ;;  %v5927_v44 = vsel %vm5926_vm6, %v7951_v21, %v5923_v56  ;;  %v6204_v57 = vsel %vm6201_vm5, %v6203_v58, %v6199_v3 }
 0x9e4   : > { %v5932_v20 = vsel %vm5929_vm15, %v5931_v38, %v5927_v44  ;;  %v6205_v23 = vmul.f32 %v7524_v13, %v6204_v57 }
 0x9e5   : > { %v7539_v25 = vadd.f32 -0.13877685, %v6496_v4  ;;  %v5933_v59 = vmul.f32 -1.0, %v5932_v20 }
 0x9e6   : > { %v6417_v18 = vsel %vm5873_vm1, %v6205_v23, %v12907_v7 }
 0x9e7   : > { %v6528_v48 = vmul.f32 %v7539_v25, %v6480_v16  ;;  %v12950_v41 = vsel %vm5857_vm11, %v5933_v59, %v6417_v18 }
 0x9e8   : > { %v12958_v50 = vmul.f32 %v12950_v41, %v12950_v41 }
 0x9e9   : > { %v6544_v26 = vadd.f32 0.19977711, %v6528_v48 }
 0x9ea   : > { %v6497_v46 = vmul.f32 0.080537446, %v12958_v50 }
 0x9eb   : > { %v6560_v33 = vmul.f32 %v6544_v26, %v6480_v16 }
 0x9ec   : > { %v7540_v35 = vadd.f32 -0.13877685, %v6497_v46 }
 0x9ed   : > { %v7555_v19 = vadd.f32 -0.3333295, %v6560_v33 }
 0x9ee   : > { %v6529_v22 = vmul.f32 %v7540_v35, %v12958_v50 }
 0x9ef   : > { %v6592_v31 = vmul.f32 %v7555_v19, %v6480_v16  ;;  %v6464_v16 = vsel %vm5856_vm12, 1.5707964, %v6448_v24 }
 0x9f0   : > { %v6545_v26 = vadd.f32 0.19977711, %v6529_v22 }
 0x9f1   : > { %v6608_v36 = vmul.f32 %v6592_v31, %v12919_v40 }
 0x9f2   : > { %v6561_v13 = vmul.f32 %v6545_v26, %v12958_v50 }
 0x9f3   : > { %v6624_v2 = vadd.f32 %v6608_v36, %v12919_v40 }
 0x9f4   : > { %v5782_v51 = vpop.f32.mrf.mxu3  ;;  %v7556_v46 = vadd.f32 -0.3333295, %v6561_v13 }
 0x9f5   : > { %v5783_v12 = vadd.f32 %v12884_v42, %v5782_v51  ;;  %v6640_v34 = vadd.f32 %v6624_v2, %v6464_v16 }
 0x9f7   : > { %6804 = vrot.lane.b32.xlu1 %v5783_v12, %s8097_s16  ;;  %v12926_v30 = vmul.f32 0.5, %v5783_v12  ;;  %v6672_v61 = vsub.f32 0.0, %v6640_v34 }
 0x9f9   : > { %v12931_v1 = vand.u32 2147483647, %v12926_v30  ;;  %v6688_v56 = vsel %vm6656_vm14, %v6672_v61, %v6640_v34 }
 0x9fa   : > { %v6704_v44 = vmul.f32 1.272, %v6688_v56 }
 0x9fb   : > { %v12936_v45 = vadd.f32 1.0, %v12931_v1  ;;  %v12941_v5 = vadd.f32 1e-30, %v12931_v1  ;;  %vm5858_vm8 = vcmp.gt.f32.partialorder %v12931_v1, 2.4142137 }
 0x9fc   : > { %v5785_v14 = vpop.f32.mrf.mxu3  ;;  %v6720_v2 = vmul.f32 1.442695, %v6704_v44  ;;  %vm5874_vm6 = vcmp.gt.f32.partialorder %v12931_v1, 0.41421357 }
 0x9fd   : > { %v5786_v54 = vadd.f32 %v12884_v42, %v5785_v14  ;;  %7952 = vrcp.f32 %v12936_v45  ;;  %vm6211_vm2 = vweird.f32 %v12936_v45  ;;  %v6217_v3 = vand.u32 2147483648, %v12936_v45 }
 0x9fe   : > { %7954 = vrcp.f32 %v12941_v5  ;;  %v6215_v58 = vand.u32 2147483647, %v12936_v45  ;;  %v5945_v57 = vand.u32 2147483648, %v12941_v5  ;;  %vm5939_vm4 = vweird.f32 %v12941_v5 }
 0x9ff   : > { %6806 = vrot.lane.b32.xlu2 %v5786_v54, %s8097_s16  ;;  %v12953_v43 = vmul.f32 0.5, %v5786_v54  ;;  %v6218_v23 = vor.u32 1.1754944e-38, %v6217_v3 }
 0xa00   : > { %vm6216_vm3 = vcmp.eq.f32.partialorder %v6215_v58, 8.507059e+37 }
 0xa01   : > { %v12963_v47 = vand.u32 2147483647, %v12953_v43 }
 0xa03   : > { %v12960_v63 = vpop.eup %7952  ;;  %v12979_v21 = vadd.f32 1.0, %v12963_v47  ;;  %v12984_v55 = vadd.f32 1e-30, %v12963_v47 }
 0xa04   : > { %v12965_v9 = vpop.eup %7954  ;;  %v6207_v15 = vmul.f32 %v12960_v63, %v12936_v45  ;;  %vm6212_vm9 = vweird.f32 %v12960_v63 }
 0xa05   : > { %v5788_v10 = vpop.f32.mrf.mxu3  ;;  %v5935_v28 = vmul.f32 %v12965_v9, %v12941_v5  ;;  %7956 = vrcp.f32 %v12979_v21  ;;  %vm5940_vm7 = vweird.f32 %v12965_v9  ;;  %vm13029_vm12 = vmor %vm6211_vm2, %vm6212_vm9  ;;  %vm5954_vm15 = vweird.f32 %v12984_v55 }
 0xa06   : > { %v5789_v53 = vadd.f32 %v12884_v42, %v5788_v10  ;;  %v6208_v40 = vsub.f32 1.0, %v6207_v15  ;;  %7958 = vrcp.f32 %v12984_v55  ;;  %v5943_v10 = vand.u32 2147483647, %v12941_v5  ;;  %vm13041_vm13 = vmor %vm5939_vm4, %vm5940_vm7 }
 0xa07   : > { %v5936_v60 = vsub.f32 1.0, %v5935_v28  ;;  %vm6226_vm2 = vweird.f32 %v12979_v21  ;;  %vm5875_vm4 = vcmp.gt.f32.partialorder %v12963_v47, 0.41421357 }
 0xa08   : > { %6808 = vrot.lane.b32.xlu0 %v5789_v53, %s8097_s16  ;;  %v12974_v27 = vmul.f32 0.5, %v5789_v53  ;;  %v6209_v25 = vmul.f32 %v12960_v63, %v6208_v40  ;;  %vm5944_vm10 = vcmp.eq.f32.partialorder %v5943_v10, 8.507059e+37 }
 0xa09   : > { %v5937_v0 = vmul.f32 %v12965_v9, %v5936_v60  ;;  %v13076_v60 = vmul.f32 %v7556_v46, %v12958_v50  ;;  %v6232_v50 = vand.u32 2147483648, %v12979_v21 }
 0xa0a   : > { %v12987_v4 = vand.u32 2147483647, %v12974_v27  ;;  %v6210_v49 = vadd.f32 %v12960_v63, %v6209_v25 }
 0xa0b   : > { %v13010_v62 = vpop.eup %7956  ;;  %v5938_v29 = vadd.f32 %v12965_v9, %v5937_v0  ;;  %v6230_v0 = vand.u32 2147483647, %v12979_v21 }
 0xa0c   : > { %v12996_v6 = vadd.f32 1.0, %v12987_v4  ;;  %v13004_v14 = vadd.f32 1e-30, %v12987_v4  ;;  %v13022_v11 = vpop.eup %7958  ;;  %v6222_v38 = vmul.f32 %v13010_v62, %v12979_v21  ;;  %v6214_v53 = vsel %vm13029_vm12, %v12960_v63, %v6210_v49 }
 0xa0d   : > { %v5791_v39 = vpop.f32.mrf.mxu3  ;;  %v5950_v45 = vmul.f32 %v13022_v11, %v12984_v55  ;;  %v5942_v59 = vsel %vm13041_vm13, %v12965_v9, %v5938_v29  ;;  %v6219_v36 = vsel %vm6216_vm3, %v6218_v23, %v6214_v53  ;;  %v7525_v9 = vadd.f32 -1.0, %v12931_v1 }
 0xa0e   : > { %v5792_v51 = vadd.f32 %v12884_v42, %v5791_v39  ;;  %7960 = vrcp.f32 %v12996_v6  ;;  %v5946_v39 = vor.u32 1.1754944e-38, %v5945_v57  ;;  %v6223_v63 = vsub.f32 1.0, %v6222_v38 }
 0xa0f   : > { %7962 = vrcp.f32 %v13004_v14  ;;  %v6220_v28 = vmul.f32 %v7525_v9, %v6219_v36  ;;  %vm6227_vm5 = vweird.f32 %v13010_v62  ;;  %vm5955_vm9 = vweird.f32 %v13022_v11 }
 0xa10   : > { %v12998_v48 = vmul.f32 0.5, %v5792_v51  ;;  %6810 = vrot.lane.b32.xlu1 %v5792_v51, %s8097_s16  ;;  %v5947_v15 = vsel %vm5944_vm10, %v5946_v39, %v5942_v59  ;;  %v6224_v35 = vmul.f32 %v13010_v62, %v6223_v63  ;;  %v5958_v51 = vand.u32 2147483647, %v12984_v55  ;;  %vm13113_vm7 = vmor %vm6226_vm2, %vm6227_vm5 }
 0xa11   : > { %v5948_v22 = vmul.f32 -1.0, %v5947_v15  ;;  %v6418_v56 = vsel %vm5874_vm6, %v6220_v28, %v12931_v1  ;;  %vm13117_vm12 = vcmp.eq.f32.partialorder %v6230_v0, 8.507059e+37  ;;  %vm13137_vm13 = vmor %vm5954_vm15, %vm5955_vm9  ;;  %v7527_v46 = vadd.f32 -1.0, %v12987_v4 }
 0xa12   : > { %v13020_v54 = vand.u32 2147483647, %v12998_v48  ;;  %v6225_v3 = vadd.f32 %v13010_v62, %v6224_v35  ;;  %vm13100_vm14 = vcmp.eq.f32.partialorder %v5958_v51, 8.507059e+37  ;;  %vm5969_vm3 = vweird.f32 %v13004_v14 }
 0xa13   : > { %v13108_v13 = vsel %vm5858_vm8, %v5948_v22, %v6418_v56  ;;  %v6245_v28 = vand.u32 2147483647, %v12996_v6  ;;  %v6247_v35 = vand.u32 2147483648, %v12996_v6  ;;  %v14648_v22 = vld [vmem:[#allocation17_spill] sm:$0xff]  ;;  %vm6241_vm9 = vweird.f32 %v12996_v6 }
 0xa14   : > { %v13048_v19 = vadd.f32 1.0, %v13020_v54  ;;  %v13054_v5 = vadd.f32 1e-30, %v13020_v54  ;;  %v13058_v31 = vpop.eup %7960  ;;  %v6229_v39 = vsel %vm13113_vm7, %v13010_v62, %v6225_v3  ;;  %v13132_v63 = vmul.f32 %v13108_v13, %v13108_v13 }
 0xa15   : > { %v5794_v52 = vpop.f32.mrf.mxu3  ;;  %v13061_v24 = vpop.eup %7962  ;;  %v6237_v16 = vmul.f32 %v13058_v31, %v12996_v6  ;;  %v5973_v62 = vand.u32 2147483647, %v13004_v14  ;;  %vm6242_vm10 = vweird.f32 %v13058_v31  ;;  %vm5859_vm2 = vcmp.gt.f32.partialorder %v12963_v47, 2.4142137 }
 0xa16   : > { %v5795_v12 = vadd.f32 %v12884_v42, %v5794_v52  ;;  %7964 = vrcp.f32 %v13048_v19  ;;  %v5951_v52 = vsub.f32 1.0, %v5950_v45  ;;  %v5965_v40 = vmul.f32 %v13061_v24, %v13004_v14  ;;  %vm13172_vm7 = vmor %vm6241_vm9, %vm6242_vm10 }
 0xa17   : > { %7966 = vrcp.f32 %v13054_v5  ;;  %v6238_v26 = vsub.f32 1.0, %v6237_v16  ;;  %v6233_v45 = vor.u32 1.1754944e-38, %v6232_v50  ;;  %vm5970_vm5 = vweird.f32 %v13061_v24 }
 0xa18   : > { %6812 = vrot.lane.b32.xlu2 %v5795_v12, %s8097_s16  ;;  %v13056_v18 = vmul.f32 0.5, %v5795_v12  ;;  %7968 = vpow2.f32 %v6720_v2  ;;  %v5960_v12 = vand.u32 2147483648, %v12984_v55  ;;  %v5952_v25 = vmul.f32 %v13022_v11, %v5951_v52 }
 0xa19   : > { %v5966_v29 = vsub.f32 1.0, %v5965_v40  ;;  %v6239_v59 = vmul.f32 %v13058_v31, %v6238_v26  ;;  %v5975_v52 = vand.u32 2147483648, %v13004_v14  ;;  %v6234_v55 = vsel %vm13117_vm12, %v6233_v45, %v6229_v39 }
 0xa1a   : > { %v13068_v34 = vand.u32 2147483647, %v13056_v18  ;;  %v5961_v33 = vor.u32 1.1754944e-38, %v5960_v12  ;;  %v5953_v10 = vadd.f32 %v13022_v11, %v5952_v25  ;;  %vm13161_vm15 = vcmp.eq.f32.partialorder %v5973_v62, 8.507059e+37 }
 0xa1b   : > { %v5967_v21 = vmul.f32 %v13061_v24, %v5966_v29  ;;  %v6240_v16 = vadd.f32 %v13058_v31, %v6239_v59  ;;  %vm6246_vm12 = vcmp.eq.f32.partialorder %v6245_v28, 8.507059e+37  ;;  %vm5984_vm10 = vweird.f32 %v13054_v5 }
 0xa1c   : > { %v13080_v61 = vpop.eup %7964  ;;  %v13090_v49 = vadd.f32 1e-30, %v13068_v34  ;;  %v13095_v58 = vadd.f32 1.0, %v13068_v34  ;;  %v5957_v15 = vsel %vm13137_vm13, %v13022_v11, %v5953_v10 }
 0xa1d   : > { %v5797_v8 = vpop.f32.mrf.mxu3  ;;  %v13097_v44 = vpop.eup %7966  ;;  %v6252_v38 = vmul.f32 %v13080_v61, %v13048_v19  ;;  %v5968_v12 = vadd.f32 %v13061_v24, %v5967_v21  ;;  %v5962_v56 = vsel %vm13100_vm14, %v5961_v33, %v5957_v15  ;;  %vm13186_vm14 = vmor %vm5969_vm3, %vm5970_vm5  ;;  %vm6257_vm13 = vweird.f32 %v13080_v61 }
 0xa1e   : > { %v13007_v32 = vadd.f32 %v12884_v42, %v5797_v8  ;;  %v7526_v8 = vadd.f32 -1.0, %v12963_v47  ;;  %v7969_v53 = vpop.eup %7968  ;;  %7970 = vrcp.f32 %v13090_v49  ;;  %v5980_v36 = vmul.f32 %v13097_v44, %v13054_v5 }
 0xa1f   : > { %7972 = vrcp.f32 %v13095_v58  ;;  %v6253_v9 = vsub.f32 1.0, %v6252_v38  ;;  %v6801_v51 = vpop.permute.xlu2 %6800  ;;  %v6768_v25 = vmul.f32 %v7969_v53, %v14648_v22  ;;  %v6244_v53 = vsel %vm13172_vm7, %v13058_v31, %v6240_v16 }
 0xa20   : > { %6814 = vrot.lane.b32.xlu0 %v13007_v32, %s8097_s16  ;;  %v5981_v11 = vsub.f32 1.0, %v5980_v36  ;;  %v6235_v29 = vmul.f32 %v7526_v8, %v6234_v55  ;;  %v13177_v57 = vmul.f32 0.5, %v13007_v32  ;;  %v5976_v8 = vor.u32 1.1754944e-38, %v5975_v52 }
 0xa21   : > { %v6254_v26 = vmul.f32 %v13080_v61, %v6253_v9  ;;  %v6848_v6 = vadd.f32 %v6801_v51, %v6768_v25  ;;  %v6248_v32 = vor.u32 1.1754944e-38, %v6247_v35  ;;  %v5972_v20 = vsel %vm13186_vm14, %v13061_v24, %v5968_v12 }
 0xa22   : > { %v5982_v23 = vmul.f32 %v13097_v44, %v5981_v11  ;;  %v13200_v45 = vand.u32 2147483647, %v13177_v57  ;;  %v5963_v31 = vmul.f32 -1.0, %v5962_v56  ;;  %v6419_v39 = vsel %vm5875_vm4, %v6235_v29, %v12963_v47 }
 0xa23   : > { %7571 = vmatmul.msk.f32.vlgmr.msrb.gmra.mxu1 %vm14255_vm0, %v6848_v6  ;;  %v6255_v59 = vadd.f32 %v13080_v61, %v6254_v26  ;;  %v6249_v21 = vsel %vm6246_vm12, %v6248_v32, %v6244_v53  ;;  %v6262_v36 = vand.u32 2147483648, %v13048_v19  ;;  %vm5860_vm3 = vcmp.gt.f32.partialorder %v12987_v4, 2.4142137 }
 0xa24   : > { %v13157_v0 = vpop.eup %7970  ;;  %v5977_v62 = vsel %vm13161_vm15, %v5976_v8, %v5972_v20  ;;  %vm6256_vm5 = vweird.f32 %v13048_v19  ;;  %v6260_v9 = vand.u32 2147483647, %v13048_v19  ;;  %v5983_v15 = vadd.f32 %v13097_v44, %v5982_v23 }
 0xa25   : > { %v5800_v40 = vpop.f32.mrf.mxu3  ;;  %v13167_v3 = vpop.eup %7972  ;;  %v5995_v24 = vmul.f32 %v13157_v0, %v13090_v49  ;;  %vm5985_vm9 = vweird.f32 %v13097_v44  ;;  %vm13221_vm7 = vmor %vm6256_vm5, %vm6257_vm13  ;;  %v13226_v28 = vadd.f32 1e-30, %v13200_v45  ;;  %v13229_v55 = vadd.f32 1.0, %v13200_v45 }
 0xa26   : > { %v13180_v33 = vadd.f32 %v12884_v42, %v5800_v40  ;;  %v6267_v14 = vmul.f32 %v13167_v3, %v13095_v58  ;;  %v6250_v16 = vmul.f32 %v7527_v46, %v6249_v21  ;;  %v5990_v35 = vand.u32 2147483648, %v13054_v5  ;;  %vm13245_vm14 = vmor %vm5984_vm10, %vm5985_vm9 }
 0xa27   : > { %v6259_v19 = vsel %vm13221_vm7, %v13080_v61, %v6255_v59  ;;  %v5996_v40 = vsub.f32 1.0, %v5995_v24  ;;  %v5988_v51 = vand.u32 2147483647, %v13054_v5  ;;  %v6263_v12 = vor.u32 1.1754944e-38, %v6262_v36 }
 0xa28   : > { %6816 = vrot.lane.b32.xlu1 %v13180_v33, %s8097_s16  ;;  %v6268_v2 = vsub.f32 1.0, %v6267_v14  ;;  %7974 = vrcp.f32 %v13226_v28  ;;  %v13240_v22 = vsel %vm5859_vm2, %v5963_v31, %v6419_v39  ;;  %vm5876_vm15 = vcmp.gt.f32.partialorder %v12987_v4, 0.41421357 }
 0xa29   : > { %vm6261_vm12 = vcmp.eq.f32.partialorder %v6260_v9, 8.507059e+37  ;;  %7976 = vrcp.f32 %v13229_v55  ;;  %v6498_v61 = vmul.f32 0.080537446, %v13132_v63  ;;  %v5978_v25 = vmul.f32 -1.0, %v5977_v62 }
 0xa2a   : > { %v6269_v11 = vmul.f32 %v13167_v3, %v6268_v2  ;;  %v5987_v56 = vsel %vm13245_vm14, %v13097_v44, %v5983_v15  ;;  %v6264_v50 = vsel %vm6261_vm12, %v6263_v12, %v6259_v19  ;;  %v6420_v26 = vsel %vm5876_vm15, %v6250_v16, %v12987_v4 }
 0xa2b   : > { %v5991_v5 = vor.u32 1.1754944e-38, %v5990_v35  ;;  %v7528_v29 = vadd.f32 -1.0, %v13020_v54  ;;  %v5997_v38 = vmul.f32 %v13157_v0, %v5996_v40  ;;  %v13261_v10 = vmul.f32 %v13240_v22, %v13240_v22 }
 0xa2c   : > { %vm5989_vm13 = vcmp.eq.f32.partialorder %v5988_v51, 8.507059e+37  ;;  %v6270_v8 = vadd.f32 %v13167_v3, %v6269_v11  ;;  %vm6272_vm10 = vweird.f32 %v13167_v3  ;;  %vm5877_vm5 = vcmp.gt.f32.partialorder %v13020_v54, 0.41421357 }
 0xa2d   : > { %v5803_v6 = vpop.f32.mrf.mxu3  ;;  %v5992_v44 = vsel %vm5989_vm13, %v5991_v5, %v5987_v56  ;;  %v6265_v53 = vmul.f32 %v7528_v29, %v6264_v50  ;;  %v6277_v32 = vand.u32 2147483648, %v13095_v58  ;;  %v13271_v23 = vsel %vm5860_vm3, %v5978_v25, %v6420_v26 }
 0xa2e   : > { %v13267_v20 = vpop.eup %7974  ;;  %vm6271_vm9 = vweird.f32 %v13095_v58  ;;  %v6275_v14 = vand.u32 2147483647, %v13095_v58  ;;  %v13276_v31 = vadd.f32 %v12884_v42, %v5803_v6  ;;  %v5998_v24 = vadd.f32 %v13157_v0, %v5997_v38 }
 0xa2f   : > { %v13278_v59 = vpop.eup %7976  ;;  %vm5999_vm7 = vweird.f32 %v13090_v49  ;;  %vm6000_vm14 = vweird.f32 %v13157_v0  ;;  %v6005_v39 = vand.u32 2147483648, %v13090_v49  ;;  %vm13286_vm12 = vmor %vm6271_vm9, %vm6272_vm10  ;;  %v5993_v58 = vmul.f32 -1.0, %v5992_v44 }
 0xa30   : > { %v6274_v36 = vsel %vm13286_vm12, %v13167_v3, %v6270_v8  ;;  %v6010_v2 = vmul.f32 %v13267_v20, %v13226_v28  ;;  %v6282_v62 = vmul.f32 %v13278_v59, %v13229_v55  ;;  %6818 = vrot.lane.b32.xlu2 %v13276_v31, %s8097_s16  ;;  %v6421_v9 = vsel %vm5877_vm5, %v6265_v53, %v13020_v54  ;;  %vm13312_vm13 = vmor %vm5999_vm7, %vm6000_vm14 }
 0xa31   : > { %v6003_v15 = vand.u32 2147483647, %v13090_v49  ;;  %v6278_v52 = vor.u32 1.1754944e-38, %v6277_v32  ;;  %v13304_v16 = vmul.f32 0.5, %v13180_v33  ;;  %v7541_v3 = vadd.f32 -0.13877685, %v6498_v61 }
 0xa32   : > { %v13308_v35 = vmul.f32 %v13271_v23, %v13271_v23  ;;  %vm6276_vm10 = vcmp.eq.f32.partialorder %v6275_v14, 8.507059e+37  ;;  %v6283_v40 = vsub.f32 1.0, %v6282_v62  ;;  %v6499_v51 = vmul.f32 0.080537446, %v13261_v10 }
 0xa33   : > { %vm5861_vm9 = vcmp.gt.f32.partialorder %v13020_v54, 2.4142137  ;;  %v6002_v33 = vsel %vm13312_vm13, %v13157_v0, %v5998_v24  ;;  %v6279_v12 = vsel %vm6276_vm10, %v6278_v52, %v6274_v36  ;;  %v6006_v49 = vor.u32 1.1754944e-38, %v6005_v39 }
 0xa34   : > { %v13323_v11 = vsel %vm5861_vm9, %v5993_v58, %v6421_v9  ;;  %v7529_v46 = vadd.f32 -1.0, %v13068_v34  ;;  %v6011_v61 = vsub.f32 1.0, %v6010_v2  ;;  %vm6004_vm7 = vcmp.eq.f32.partialorder %v6003_v15, 8.507059e+37 }
 0xa35   : > { %v6284_v25 = vmul.f32 %v13278_v59, %v6283_v40  ;;  %v13328_v56 = vand.u32 2147483647, %v13304_v16  ;;  %v6530_v50 = vmul.f32 %v7541_v3, %v13132_v63  ;;  %v6500_v26 = vmul.f32 0.080537446, %v13308_v35  ;;  %v13340_v44 = vpop.f32.mrf.mxu3 }
 0xa36   : > { %v6007_v0 = vsel %vm6004_vm7, %v6006_v49, %v6002_v33  ;;  %v6280_v5 = vmul.f32 %v7529_v46, %v6279_v12  ;;  %v7542_v29 = vadd.f32 -0.13877685, %v6499_v51  ;;  %v13334_v38 = vmul.f32 %v13323_v11, %v13323_v11 }
 0xa37   : > { %v6609_v6 = vmul.f32 %v13076_v60, %v12950_v41  ;;  %vm5878_vm14 = vcmp.gt.f32.partialorder %v13068_v34, 0.41421357  ;;  %v6012_v8 = vmul.f32 %v13267_v20, %v6011_v61  ;;  %v6008_v53 = vmul.f32 -1.0, %v6007_v0 }
 0xa38   : > { %v6285_v32 = vadd.f32 %v13278_v59, %v6284_v25  ;;  %vm6287_vm12 = vweird.f32 %v13278_v59  ;;  %v13345_v14 = vadd.f32 1.0, %v13328_v56  ;;  %v6546_v24 = vadd.f32 0.19977711, %v6530_v50 }
 0xa39   : > { %v7543_v39 = vadd.f32 -0.13877685, %v6500_v26  ;;  %v6422_v60 = vsel %vm5878_vm14, %v6280_v5, %v13068_v34  ;;  %v6292_v21 = vand.u32 2147483648, %v13229_v55  ;;  %v6531_v58 = vmul.f32 %v7542_v29, %v13261_v10 }
 0xa3a   : > { %v6501_v36 = vmul.f32 0.080537446, %v13334_v38  ;;  %vm6286_vm13 = vweird.f32 %v13229_v55  ;;  %v6290_v2 = vand.u32 2147483647, %v13229_v55  ;;  %vm14256_vm10 = vcmp.gt.f32.partialorder %v13068_v34, 2.4142137 }
 0xa3b   : > { %v6013_v62 = vadd.f32 %v13267_v20, %v6012_v8  ;;  %vm6015_vm7 = vweird.f32 %v13267_v20  ;;  %vm13358_vm0 = vmor %vm6286_vm13, %vm6287_vm12  ;;  %v13363_v15 = vadd.f32 1e-30, %v13328_v56  ;;  %v13367_v52 = vsel %vm14256_vm10, %v6008_v53, %v6422_v60 }
 0xa3c   : > { %v6020_v3 = vand.u32 2147483648, %v13226_v28  ;;  %v6289_v55 = vsel %vm13358_vm0, %v13278_v59, %v6285_v32  ;;  %7978 = vrcp.f32 %v13345_v14  ;;  %v6532_v19 = vmul.f32 %v7543_v39, %v13308_v35 }
 0xa3d   : > { %vm6014_vm12 = vweird.f32 %v13226_v28  ;;  %v6018_v40 = vand.u32 2147483647, %v13226_v28  ;;  %v6293_v51 = vor.u32 1.1754944e-38, %v6292_v21  ;;  %v6562_v33 = vmul.f32 %v6546_v24, %v13132_v63  ;;  %v5809_v29 = vpop.f32.mrf.mxu3 }
 0xa3e   : > { %v6547_v12 = vadd.f32 0.19977711, %v6531_v58  ;;  %v7544_v49 = vadd.f32 -0.13877685, %v6501_v36  ;;  %vm13378_vm13 = vmor %vm6014_vm12, %vm6015_vm7  ;;  %vm6291_vm10 = vcmp.eq.f32.partialorder %v6290_v2, 8.507059e+37  ;;  %v13384_v59 = vmul.f32 %v13367_v52, %v13367_v52 }
 0xa3f   : > { %v6017_v61 = vsel %vm13378_vm13, %v13267_v20, %v6013_v62  ;;  %v6294_v25 = vsel %vm6291_vm10, %v6293_v51, %v6289_v55  ;;  %7980 = vrcp.f32 %v13363_v15  ;;  %v6449_v28 = vsel %vm5873_vm1, 0.7853982, %v14313_v37 }
 0xa40   : > { %v6625_v50 = vadd.f32 %v6609_v6, %v12950_v41  ;;  %v6021_v26 = vor.u32 1.1754944e-38, %v6020_v3  ;;  %v7530_v0 = vadd.f32 -1.0, %v13200_v45  ;;  %v6548_v5 = vadd.f32 0.19977711, %v6532_v19 }
 0xa41   : > { %vm6019_vm0 = vcmp.eq.f32.partialorder %v6018_v40, 8.507059e+37  ;;  %v7557_v53 = vadd.f32 -0.3333295, %v6562_v33  ;;  %v6563_v20 = vmul.f32 %v6547_v12, %v13261_v10  ;;  %v6465_v39 = vsel %vm5857_vm11, 1.5707964, %v6449_v28 }
 0xa42   : > { %v13395_v8 = vpop.eup %7978  ;;  %v6022_v32 = vsel %vm6019_vm0, %v6021_v26, %v6017_v61  ;;  %v6295_v24 = vmul.f32 %v7530_v0, %v6294_v25  ;;  %v6533_v60 = vmul.f32 %v7544_v49, %v13334_v38  ;;  %v6502_v41 = vmul.f32 0.080537446, %v13384_v59 }
 0xa43   : > { %v6641_v6 = vadd.f32 %v6625_v50, %v6465_v39  ;;  %v6564_v58 = vmul.f32 %v6548_v5, %v13308_v35  ;;  %vm5879_vm1 = vcmp.gt.f32.partialorder %v13200_v45, 0.41421357  ;;  %v6023_v36 = vmul.f32 -1.0, %v6022_v32 }
 0xa44   : > { %v6297_v2 = vmul.f32 %v13395_v8, %v13345_v14  ;;  %v6594_v62 = vmul.f32 %v7557_v53, %v13132_v63  ;;  %v7558_v9 = vadd.f32 -0.3333295, %v6563_v20  ;;  %v6423_v7 = vsel %vm5879_vm1, %v6295_v24, %v13200_v45 }
 0xa45   : > { %v13402_v21 = vpop.eup %7980  ;;  %v6549_v3 = vadd.f32 0.19977711, %v6533_v60  ;;  %v7545_v55 = vadd.f32 -0.13877685, %v6502_v41  ;;  %v6673_v19 = vsub.f32 0.0, %v6641_v6  ;;  %v13416_v51 = vmul.f32 0.5, %v13276_v31 }
 0xa46   : > { %vm5863_vm11 = vcmp.gt.f32.partialorder %v13200_v45, 2.4142137  ;;  %v6025_v40 = vmul.f32 %v13402_v21, %v13363_v15  ;;  %v7559_v33 = vadd.f32 -0.3333295, %v6564_v58  ;;  %v6298_v12 = vsub.f32 1.0, %v6297_v2 }
 0xa47   : > { %v13420_v63 = vsel %vm5863_vm11, %v6023_v36, %v6423_v7  ;;  %v13424_v49 = vadd.f32 %v12884_v42, %v13340_v44  ;;  %v6610_v46 = vmul.f32 %v6594_v62, %v13108_v13  ;;  %v6595_v61 = vmul.f32 %v7558_v9, %v13261_v10  ;;  %v5812_v44 = vpop.f32.mrf.mxu3 }
 0xa48   : > { %v13429_v25 = vadd.f32 %v12884_v42, %v5809_v29  ;;  %vm6657_vm10 = vcmp.lt.f32.partialorder %v12903_v17, 0.0  ;;  %v6450_v31 = vsel %vm5874_vm6, 0.7853982, %v14313_v37  ;;  %v6565_v28 = vmul.f32 %v6549_v3, %v13334_v38 }
 0xa49   : > { %v6534_v50 = vmul.f32 %v7545_v55, %v13384_v59  ;;  %6820 = vrot.lane.b32.xlu0 %v13424_v49, %s8097_s16  ;;  %v6689_v26 = vsel %vm6657_vm10, %v6673_v19, %v6641_v6  ;;  %v13441_v10 = vmul.f32 %v13420_v63, %v13420_v63  ;;  %v6026_v0 = vsub.f32 1.0, %v6025_v40 }
 0xa4a   : > { %v13444_v17 = vand.u32 2147483647, %v13416_v51  ;;  %6822 = vrot.lane.b32.xlu1 %v13429_v25, %s8097_s16  ;;  %v6451_v5 = vsel %vm5875_vm4, 0.7853982, %v14313_v37  ;;  %v6596_v29 = vmul.f32 %v7559_v33, %v13308_v35  ;;  %v6299_v53 = vmul.f32 %v13395_v8, %v6298_v12 }
 0xa4b   : > { %v6466_v20 = vsel %vm5858_vm8, 1.5707964, %v6450_v31  ;;  %v6626_v32 = vadd.f32 %v6610_v46, %v13108_v13  ;;  %v6611_v24 = vmul.f32 %v6595_v61, %v13240_v22  ;;  %v13458_v39 = vadd.f32 %v12884_v42, %v5812_v44 }
 0xa4c   : > { %v6705_v60 = vmul.f32 1.272, %v6689_v26  ;;  %v7560_v41 = vadd.f32 -0.3333295, %v6565_v28  ;;  %v6550_v6 = vadd.f32 0.19977711, %v6534_v50  ;;  %v6027_v36 = vmul.f32 %v13402_v21, %v6026_v0 }
 0xa4d   : > { %v6467_v58 = vsel %vm5859_vm2, 1.5707964, %v6451_v5  ;;  %v6503_v35 = vmul.f32 0.080537446, %v13441_v10  ;;  %v13465_v1 = vadd.f32 1.0, %v13444_v17  ;;  %6824 = vrot.lane.b32.xlu2 %v13458_v39, %s8097_s16  ;;  %v6612_v13 = vmul.f32 %v6596_v29, %v13271_v23 }
 0xa4e   : > { %v6452_v42 = vsel %vm5876_vm15, 0.7853982, %v14313_v37  ;;  %v6300_v2 = vadd.f32 %v13395_v8, %v6299_v53  ;;  %vm6302_vm8 = vweird.f32 %v13395_v8  ;;  %v6642_v47 = vadd.f32 %v6626_v32, %v6466_v20 }
 0xa4f   : > { %v6627_v62 = vadd.f32 %v6611_v24, %v13240_v22  ;;  %v6307_v9 = vand.u32 2147483648, %v13345_v14  ;;  %v13478_v7 = vadd.f32 1e-30, %v13444_v17  ;;  %v6597_v3 = vmul.f32 %v7560_v41, %v13334_v38 }
 0xa50   : > { %v6566_v55 = vmul.f32 %v6550_v6, %v13384_v59  ;;  %vm6301_vm6 = vweird.f32 %v13345_v14  ;;  %v6305_v19 = vand.u32 2147483647, %v13345_v14  ;;  %v7546_v40 = vadd.f32 -0.13877685, %v6503_v35 }
 0xa51   : > { %v6028_v33 = vadd.f32 %v13402_v21, %v6027_v36  ;;  %vm6030_vm4 = vweird.f32 %v13402_v21  ;;  %vm13486_vm2 = vmor %vm6301_vm6, %vm6302_vm8  ;;  %7982 = vrcp.f32 %v13465_v1  ;;  %v6468_v38 = vsel %vm5860_vm3, 1.5707964, %v6452_v42 }
 0xa52   : > { %v6628_v12 = vadd.f32 %v6612_v13, %v13271_v23  ;;  %v6035_v46 = vand.u32 2147483648, %v13363_v15  ;;  %v6304_v14 = vsel %vm13486_vm2, %v13395_v8, %v6300_v2  ;;  %vm6029_vm15 = vweird.f32 %v13363_v15 }
 0xa53   : > { %v6033_v61 = vand.u32 2147483647, %v13363_v15  ;;  %v6308_v31 = vor.u32 1.1754944e-38, %v6307_v9  ;;  %7984 = vrcp.f32 %v13478_v7  ;;  %v6674_v28 = vsub.f32 0.0, %v6642_v47  ;;  %vm13502_vm3 = vmor %vm6029_vm15, %vm6030_vm4 }
 0xa54   : > { %v6643_v50 = vadd.f32 %v6627_v62, %v6467_v58  ;;  %v6613_v4 = vmul.f32 %v6597_v3, %v13323_v11  ;;  %vm6306_vm7 = vcmp.eq.f32.partialorder %v6305_v19, 8.507059e+37  ;;  %v7561_v23 = vadd.f32 -0.3333295, %v6566_v55 }
 0xa55   : > { %v6535_v26 = vmul.f32 %v7546_v40, %v13441_v10  ;;  %v6032_v8 = vsel %vm13502_vm3, %v13402_v21, %v6028_v33  ;;  %v6309_v15 = vsel %vm6306_vm7, %v6308_v31, %v6304_v14  ;;  %v6644_v0 = vadd.f32 %v6628_v12, %v6468_v38 }
 0xa56   : > { %v6036_v5 = vor.u32 1.1754944e-38, %v6035_v46  ;;  %v7531_v29 = vadd.f32 -1.0, %v13328_v56  ;;  %v13512_v53 = vmul.f32 0.5, %v13424_v49  ;;  %vm6658_vm12 = vcmp.lt.f32.partialorder %v12926_v30, 0.0 }
 0xa57   : > { %v13514_v20 = vpop.eup %7982  ;;  %vm6034_vm13 = vcmp.eq.f32.partialorder %v6033_v61, 8.507059e+37  ;;  %v6690_v32 = vsel %vm6658_vm12, %v6674_v28, %v6642_v47  ;;  %v6453_v24 = vsel %vm5877_vm5, 0.7853982, %v14313_v37  ;;  %v6675_v58 = vsub.f32 0.0, %v6643_v50 }
 0xa58   : > { %v6037_v41 = vsel %vm6034_vm13, %v6036_v5, %v6032_v8  ;;  %v6310_v21 = vmul.f32 %v7531_v29, %v6309_v15  ;;  %v6629_v35 = vadd.f32 %v6613_v4, %v13323_v11  ;;  %v6598_v49 = vmul.f32 %v7561_v23, %v13384_v59 }
 0xa59   : > { %v13520_v6 = vpop.eup %7984  ;;  %v6551_v36 = vadd.f32 0.19977711, %v6535_v26  ;;  %v6722_v42 = vmul.f32 1.442695, %v6705_v60  ;;  %v6676_v13 = vsub.f32 0.0, %v6644_v0  ;;  %v6312_v30 = vmul.f32 %v13514_v20, %v13465_v1 }
 0xa5a   : > { %v13527_v2 = vand.u32 2147483647, %v13512_v53  ;;  %v6706_v47 = vmul.f32 1.272, %v6690_v32  ;;  %vm6659_vm5 = vcmp.lt.f32.partialorder %v12953_v43, 0.0  ;;  %v6038_v62 = vmul.f32 -1.0, %v6037_v41 }
 0xa5b   : > { %vm5880_vm0 = vcmp.gt.f32.partialorder %v13328_v56, 0.41421357  ;;  %vm6660_vm10 = vcmp.lt.f32.partialorder %v12974_v27, 0.0  ;;  %v6469_v11 = vsel %vm5861_vm9, 1.5707964, %v6453_v24  ;;  %v6040_v60 = vmul.f32 %v13520_v6, %v13478_v7 }
 0xa5c   : > { %v6424_v59 = vsel %vm5880_vm0, %v6310_v21, %v13328_v56  ;;  %v6691_v9 = vsel %vm6659_vm5, %v6675_v58, %v6643_v50  ;;  %v6645_v3 = vadd.f32 %v6629_v35, %v6469_v11  ;;  %v6614_v55 = vmul.f32 %v6598_v49, %v13367_v52  ;;  %v13556_v50 = vpop.f32.mrf.mxu3 }
 0xa5d   : > { %v6567_v43 = vmul.f32 %v6551_v36, %v13441_v10  ;;  %v6692_v19 = vsel %vm6660_vm10, %v6676_v13, %v6644_v0  ;;  %vm5864_vm8 = vcmp.gt.f32.partialorder %v13328_v56, 2.4142137  ;;  %v6313_v27 = vsub.f32 1.0, %v6312_v30 }
 0xa5e   : > { %v13543_v54 = vadd.f32 1.0, %v13527_v2  ;;  %v6724_v40 = vmul.f32 1.442695, %v6706_v47  ;;  %v6454_v33 = vsel %vm5878_vm14, 0.7853982, %v14313_v37  ;;  %v13550_v22 = vsel %vm5864_vm8, %v6038_v62, %v6424_v59 }
 0xa5f   : > { %7986 = vpow2.f32 %v6722_v42  ;;  %v6707_v38 = vmul.f32 1.272, %v6691_v9  ;;  %v6041_v12 = vsub.f32 1.0, %v6040_v60  ;;  %v13553_v46 = vadd.f32 1e-30, %v13527_v2 }
 0xa60   : > { %v6708_v14 = vmul.f32 1.272, %v6692_v19  ;;  %v6677_v61 = vsub.f32 0.0, %v6645_v3  ;;  %v6630_v31 = vadd.f32 %v6614_v55, %v13367_v52  ;;  %v7562_v28 = vadd.f32 -0.3333295, %v6567_v43 }
 0xa61   : > { %v13560_v4 = vmul.f32 %v13550_v22, %v13550_v22  ;;  %v6314_v44 = vmul.f32 %v13514_v20, %v6313_v27  ;;  %7988 = vrcp.f32 %v13543_v54  ;;  %v13565_v23 = vmul.f32 0.5, %v13429_v25 }
 0xa62   : > { %7990 = vpow2.f32 %v6724_v40  ;;  %vm6661_vm9 = vcmp.lt.f32.partialorder %v12998_v48, 0.0  ;;  %vm14671_vm14 = vcmp.gt.f32.partialorder %v13068_v34, 2.4142137  ;;  %v6726_v26 = vmul.f32 1.442695, %v6707_v38 }
 0xa63   : > { %v6470_v52 = vsel %vm14671_vm14, 1.5707964, %v6454_v33  ;;  %v6455_v8 = vsel %vm5879_vm1, 0.7853982, %v14313_v37  ;;  %v6042_v15 = vmul.f32 %v13520_v6, %v6041_v12  ;;  %7992 = vrcp.f32 %v13553_v46 }
 0xa64   : > { %v6728_v0 = vmul.f32 1.442695, %v6708_v14  ;;  %v6693_v5 = vsel %vm6661_vm9, %v6677_v61, %v6645_v3  ;;  %v6646_v29 = vadd.f32 %v6630_v31, %v6470_v52  ;;  %v6599_v25 = vmul.f32 %v7562_v28, %v13441_v10  ;;  %v5818_v19 = vpop.f32.mrf.mxu3  ;;  %v6803_v14 = vpop.permute.xlu0 %6802 }
 0xa65   : > { %v7987_v32 = vpop.eup %7986  ;;  %v6504_v48 = vmul.f32 0.080537446, %v13560_v4  ;;  %v6315_v34 = vadd.f32 %v13514_v20, %v6314_v44  ;;  %vm6317_vm6 = vweird.f32 %v13514_v20  ;;  %v13580_v24 = vand.u32 2147483647, %v13565_v23 }
 0xa66   : > { %vm6662_vm1 = vcmp.lt.f32.partialorder %v13056_v18, 0.0  ;;  %v6456_v41 = vsel %vm5880_vm0, 0.7853982, %v14313_v37  ;;  %v6048_v21 = vand.u32 2147483647, %v13478_v7  ;;  %v6322_v10 = vand.u32 2147483648, %v13465_v1 }
 0xa67   : > { %v13588_v58 = vpop.eup %7988  ;;  %v6043_v35 = vadd.f32 %v13520_v6, %v6042_v15  ;;  %vm6045_vm4 = vweird.f32 %v13520_v6  ;;  %vm6316_vm2 = vweird.f32 %v13465_v1  ;;  %v6320_v49 = vand.u32 2147483647, %v13465_v1 }
 0xa68   : > { %v13594_v36 = vpop.eup %7990  ;;  %v6709_v42 = vmul.f32 1.272, %v6693_v5  ;;  %v6678_v13 = vsub.f32 0.0, %v6646_v29  ;;  %vm6044_vm15 = vweird.f32 %v13478_v7  ;;  %v6050_v30 = vand.u32 2147483648, %v13478_v7  ;;  %vm13600_vm3 = vmor %vm6316_vm2, %vm6317_vm6 }
 0xa69   : > { %v13604_v62 = vpop.eup %7992  ;;  %v6615_v11 = vmul.f32 %v6599_v25, %v13420_v63  ;;  %v7547_v59 = vadd.f32 -0.13877685, %v6504_v48  ;;  %v6319_v1 = vsel %vm13600_vm3, %v13514_v20, %v6315_v34  ;;  %v13611_v60 = vadd.f32 1.0, %v13580_v24  ;;  %vm13613_vm7 = vmor %vm6044_vm15, %vm6045_vm4 }
 0xa6a   : > { %v7532_v9 = vadd.f32 -1.0, %v13444_v17  ;;  %v6323_v3 = vor.u32 1.1754944e-38, %v6322_v10  ;;  %v6327_v55 = vmul.f32 %v13588_v58, %v13543_v54  ;;  %v13621_v43 = vadd.f32 1e-30, %v13580_v24 }
 0xa6b   : > { %v6047_v20 = vsel %vm13613_vm7, %v13520_v6, %v6043_v35  ;;  %vm6049_vm12 = vcmp.eq.f32.partialorder %v6048_v21, 8.507059e+37  ;;  %vm6321_vm13 = vcmp.eq.f32.partialorder %v6320_v49, 8.507059e+37  ;;  %v13627_v27 = vmul.f32 0.5, %v13458_v39  ;;  %v14676_v6 = vld [vmem:[#allocation24_spill] sm:$0xff] }
 0xa6c   : > { %v6694_v40 = vsel %vm6662_vm1, %v6678_v13, %v6646_v29  ;;  %v6051_v33 = vor.u32 1.1754944e-38, %v6050_v30  ;;  %v6324_v38 = vsel %vm6321_vm13, %v6323_v3, %v6319_v1  ;;  %v6055_v12 = vmul.f32 %v13604_v62, %v13553_v46  ;;  %v8059_v29 = vld [vmem:[%s8237_s30] ss:$0 sm:$0xff]  ;;  %v5821_v30 = vpop.f32.mrf.mxu3 }
 0xa6d   : > { %v6631_v61 = vadd.f32 %v6615_v11, %v13420_v63  ;;  %v6536_v31 = vmul.f32 %v7547_v59, %v13560_v4  ;;  %7994 = vrcp.f32 %v13611_v60  ;;  %v6769_v28 = vmul.f32 %v7987_v32, %v14676_v6 }
 0xa6e   : > { %v6730_v39 = vmul.f32 1.442695, %v6709_v42  ;;  %v6052_v44 = vsel %vm6049_vm12, %v6051_v33, %v6047_v20  ;;  %v6328_v52 = vsub.f32 1.0, %v6327_v55  ;;  %7996 = vrcp.f32 %v13621_v43 }
 0xa6f   : > { %v6325_v18 = vmul.f32 %v7532_v9, %v6324_v38  ;;  %v13639_v15 = vand.u32 2147483647, %v13627_v27  ;;  %v6849_v5 = vadd.f32 %v6803_v14, %v6769_v28  ;;  %v5816_v25 = vadd.f32 %v8059_v29, %v13556_v50 }
 0xa70   : > { %7998 = vpow2.f32 %v6726_v26  ;;  %v6710_v63 = vmul.f32 1.272, %v6694_v40  ;;  %v6471_v48 = vsel %vm5863_vm11, 1.5707964, %v6455_v8  ;;  %v6056_v34 = vsub.f32 1.0, %v6055_v12 }
 0xa71   : > { %8000 = vpow2.f32 %v6728_v0  ;;  %v6647_v32 = vadd.f32 %v6631_v61, %v6471_v48  ;;  %v13647_v21 = vsel %vm5864_vm8, 1.5707964, %v6456_v41  ;;  %v6552_v10 = vadd.f32 0.19977711, %v6536_v31  ;;  %6826 = vrot.lane.b32.xlu0 %v5816_v25, %s8097_s16 }
 0xa72   : > { %vm14677_vm5 = vcmask 64512   ;;  %vm6663_vm0 = vcmp.lt.f32.partialorder %v13177_v57, 0.0  ;;  %vm5865_vm10 = vcmp.gt.f32.partialorder %v13444_v17, 2.4142137  ;;  %vm5881_vm9 = vcmp.gt.f32.partialorder %v13444_v17, 0.41421357 }
 0xa73   : > { %7572 = vmatmul.msk.f32.gmra.mxu1 %vm14677_vm5, %v6849_v5  ;;  %v6053_v45 = vmul.f32 -1.0, %v6052_v44  ;;  %v6329_v50 = vmul.f32 %v13588_v58, %v6328_v52  ;;  %v13655_v26 = vpop.eup %7994  ;;  %8002 = vpow2.f32 %v6730_v39  ;;  %v6425_v56 = vsel %vm5881_vm9, %v6325_v18, %v13444_v17 }
 0xa74   : > { %v13661_v8 = vadd.f32 1.0, %v13639_v15  ;;  %v5819_v0 = vadd.f32 %v8059_v29, %v5818_v19  ;;  %v13663_v41 = vpop.eup %7996  ;;  %v6732_v35 = vmul.f32 1.442695, %v6710_v63  ;;  %v6057_v49 = vmul.f32 %v13604_v62, %v6056_v34  ;;  %v14682_v34 = vld [vmem:[#allocation25_spill] sm:$0xff] }
 0xa75   : > { %v13667_v42 = vadd.f32 1e-30, %v13639_v15  ;;  %v13669_v13 = vmul.f32 0.5, %v5816_v25  ;;  %v6679_v47 = vsub.f32 0.0, %v6647_v32  ;;  %v6568_v11 = vmul.f32 %v6552_v10, %v13560_v4 }
 0xa76   : > { %vm6331_vm11 = vweird.f32 %v13543_v54  ;;  %v6335_v59 = vand.u32 2147483647, %v13543_v54  ;;  %6828 = vrot.lane.b32.xlu1 %v5819_v0, %s8097_s16  ;;  %v13675_v1 = vpop.eup %7998  ;;  %v13679_v7 = vsel %vm5865_vm10, %v6053_v45, %v6425_v56  ;;  %v6330_v9 = vadd.f32 %v13588_v58, %v6329_v50 }
 0xa77   : > { %vm6332_vm8 = vweird.f32 %v13588_v58  ;;  %v6342_v3 = vmul.f32 %v13655_v26, %v13611_v60  ;;  %v13685_v55 = vpop.eup %8000  ;;  %v6337_v19 = vand.u32 2147483648, %v13543_v54  ;;  %v6070_v20 = vmul.f32 %v13663_v41, %v13621_v43 }
 0xa78   : > { %8004 = vrcp.f32 %v13661_v8  ;;  %v13691_v40 = vadd.f32 %v8059_v29, %v5821_v30  ;;  %v6058_v33 = vadd.f32 %v13604_v62, %v6057_v49  ;;  %vm6060_vm14 = vweird.f32 %v13604_v62  ;;  %vm13715_vm6 = vmor %vm6331_vm11, %vm6332_vm8 }
 0xa79   : > { %8006 = vrcp.f32 %v13667_v42  ;;  %v13697_v38 = vand.u32 2147483647, %v13669_v13  ;;  %v13699_v12 = vpop.eup %8002  ;;  %v13704_v14 = vsel %vm5881_vm9, 0.7853982, %v14313_v37  ;;  %v13708_v61 = vmul.f32 %v13679_v7, %v13679_v7 }
 0xa7a   : > { %8008 = vpow2.f32 %v6732_v35  ;;  %v6065_v31 = vand.u32 2147483648, %v13553_v46  ;;  %6830 = vrot.lane.b32.xlu2 %v13691_v40, %s8097_s16  ;;  %vm6059_vm1 = vweird.f32 %v13553_v46  ;;  %v6063_v28 = vand.u32 2147483647, %v13553_v46  ;;  %s14064_s16 = scalar_lea.vmem %s8252_s4, %s7152_s0 }
 0xa7b   : > { %v6334_v39 = vsel %vm13715_vm6, %v13588_v58, %v6330_v9  ;;  %v6343_v44 = vsub.f32 1.0, %v6342_v3  ;;  %v6695_v52 = vsel %vm6663_vm0, %v6679_v47, %v6647_v32  ;;  %vm5882_vm4 = vcmp.gt.f32.partialorder %v13527_v2, 0.41421357  ;;  %vm13731_vm2 = vmor %vm6059_vm1, %vm6060_vm14  ;;  %v6805_v9 = vpop.permute.xlu1 %6804 }
 0xa7c   : > { %v6338_v18 = vor.u32 1.1754944e-38, %v6337_v19  ;;  %v6071_v5 = vsub.f32 1.0, %v6070_v20  ;;  %v7563_v29 = vadd.f32 -0.3333295, %v6568_v11  ;;  %v6062_v46 = vsel %vm13731_vm2, %v13604_v62, %v6058_v33 }
 0xa7d   : > { %vm6336_vm15 = vcmp.eq.f32.partialorder %v6335_v59, 8.507059e+37  ;;  %v13739_v58 = vadd.f32 1.0, %v13697_v38  ;;  %v6505_v25 = vmul.f32 0.080537446, %v13708_v61  ;;  %v6066_v63 = vor.u32 1.1754944e-38, %v6065_v31 }
 0xa7e   : > { %v13741_v57 = vpop.eup %8004  ;;  %v6339_v48 = vsel %vm6336_vm15, %v6338_v18, %v6334_v39  ;;  %v6770_v32 = vmul.f32 %v13594_v36, %v14682_v34  ;;  %vm5866_vm3 = vcmp.gt.f32.partialorder %v13527_v2, 2.4142137  ;;  %vm6064_vm7 = vcmp.eq.f32.partialorder %v6063_v28, 8.507059e+37 }
 0xa7f   : > { %v13746_v10 = vpop.eup %8006  ;;  %v7533_v62 = vadd.f32 -1.0, %v13527_v2  ;;  %v6344_v45 = vmul.f32 %v13655_v26, %v6343_v44  ;;  %v13752_v50 = vadd.f32 1e-30, %v13697_v38  ;;  %v6711_v35 = vmul.f32 1.272, %v6695_v52 }
 0xa80   : > { %v13754_v56 = vpop.eup %8008  ;;  %v6067_v49 = vsel %vm6064_vm7, %v6066_v63, %v6062_v46  ;;  %v6072_v30 = vmul.f32 %v13663_v41, %v6071_v5  ;;  %v13757_v47 = vmul.f32 0.5, %v5819_v0  ;;  %v6600_v36 = vmul.f32 %v7563_v29, %v13560_v4 }
 0xa81   : > { %v6340_v11 = vmul.f32 %v7533_v62, %v6339_v48  ;;  %v6357_v59 = vmul.f32 %v13741_v57, %v13661_v8  ;;  %8010 = vrcp.f32 %v13739_v58  ;;  %v7548_v3 = vadd.f32 -0.13877685, %v6505_v25  ;;  %v14688_v48 = vld [vmem:[#allocation26_spill] sm:$0xff] }
 0xa82   : > { %v6080_v19 = vand.u32 2147483648, %v13621_v43  ;;  %v6352_v20 = vand.u32 2147483648, %v13611_v60  ;;  %v6085_v33 = vmul.f32 %v13746_v10, %v13667_v42  ;;  %v6068_v31 = vmul.f32 -1.0, %v6067_v49 }
 0xa83   : > { %v6345_v0 = vadd.f32 %v13655_v26, %v6344_v45  ;;  %vm6347_vm12 = vweird.f32 %v13655_v26  ;;  %8012 = vrcp.f32 %v13752_v50  ;;  %v6073_v4 = vadd.f32 %v13663_v41, %v6072_v30 }
 0xa84   : > { %vm6075_vm13 = vweird.f32 %v13663_v41  ;;  %v13773_v6 = vand.u32 2147483647, %v13757_v47  ;;  %v6850_v28 = vadd.f32 %v6805_v9, %v6770_v32  ;;  %v6426_v39 = vsel %vm5882_vm4, %v6340_v11, %v13527_v2 }
 0xa85   : > { %vm6346_vm5 = vweird.f32 %v13611_v60  ;;  %v6350_v44 = vand.u32 2147483647, %v13611_v60  ;;  %v6358_v52 = vsub.f32 1.0, %v6357_v59  ;;  %v13780_v54 = vmul.f32 1.442695, %v6711_v35 }
 0xa86   : > { %vm6074_vm0 = vweird.f32 %v13621_v43  ;;  %v6078_v18 = vand.u32 2147483647, %v13621_v43  ;;  %vm13784_vm9 = vmor %vm6346_vm5, %vm6347_vm12  ;;  %v6086_v29 = vsub.f32 1.0, %v6085_v33  ;;  %vm14685_vm11 = vcmask 64512  }
 0xa87   : > { %7573 = vmatmul.msk.f32.gmra.mxu1 %vm14685_vm11, %v6850_v28  ;;  %v13789_v46 = vpop.eup %8010  ;;  %v6616_v25 = vmul.f32 %v6600_v36, %v13550_v22  ;;  %v6537_v60 = vmul.f32 %v7548_v3, %v13708_v61  ;;  %vm13795_vm8 = vmor %vm6074_vm0, %vm6075_vm13  ;;  %v6349_v43 = vsel %vm13784_vm9, %v13655_v26, %v6345_v0  ;;  %v6771_v34 = vmul.f32 %v13675_v1, %v14688_v48  ;;  %v6807_v36 = vpop.permute.xlu2 %6806 }
 0xa88   : > { %v13806_v32 = vsel %vm5866_vm3, %v6068_v31, %v6426_v39  ;;  %v6077_v62 = vsel %vm13795_vm8, %v13663_v41, %v6073_v4  ;;  %v6353_v45 = vor.u32 1.1754944e-38, %v6352_v20  ;;  %v13812_v35 = vadd.f32 1e-30, %v13773_v6  ;;  %vm14689_vm12 = vmmov %vm14685_vm11 }
 0xa89   : > { %v13814_v49 = vpop.eup %8012  ;;  %vm5883_vm14 = vcmp.gt.f32.partialorder %v13580_v24, 0.41421357  ;;  %v6081_v26 = vor.u32 1.1754944e-38, %v6080_v19  ;;  %v7534_v30 = vadd.f32 -1.0, %v13580_v24  ;;  %vm6351_vm6 = vcmp.eq.f32.partialorder %v6350_v44, 8.507059e+37 }
 0xa8a   : > { %v6359_v1 = vmul.f32 %v13741_v57, %v6358_v52  ;;  %vm6079_vm1 = vcmp.eq.f32.partialorder %v6078_v18, 8.507059e+37  ;;  %v6354_v11 = vsel %vm6351_vm6, %v6353_v45, %v6349_v43  ;;  %v6087_v59 = vmul.f32 %v13746_v10, %v6086_v29 }
 0xa8b   : > { %v6372_v41 = vmul.f32 %v13789_v46, %v13739_v58  ;;  %v6553_v9 = vadd.f32 0.19977711, %v6537_v60  ;;  %v13824_v3 = vmul.f32 %v13806_v32, %v13806_v32  ;;  %v6082_v20 = vsel %vm6079_vm1, %v6081_v26, %v6077_v62 }
 0xa8c   : > { %v13827_v19 = vmul.f32 0.5, %v13691_v40  ;;  %vm5867_vm2 = vcmp.gt.f32.partialorder %v13580_v24, 2.4142137  ;;  %v6100_v33 = vmul.f32 %v13814_v49, %v13752_v50  ;;  %8014 = vrcp.f32 %v13812_v35 }
 0xa8d   : > { %v13834_v31 = vadd.f32 1.0, %v13773_v6  ;;  %v6851_v0 = vadd.f32 %v6807_v36, %v6771_v34  ;;  %v6355_v4 = vmul.f32 %v7534_v30, %v6354_v11  ;;  %v6360_v28 = vadd.f32 %v13741_v57, %v6359_v1 }
 0xa8e   : > { %vm6362_vm15 = vweird.f32 %v13741_v57  ;;  %v6367_v39 = vand.u32 2147483648, %v13661_v8  ;;  %v6088_v40 = vadd.f32 %v13746_v10, %v6087_v59  ;;  %vm6090_vm7 = vweird.f32 %v13746_v10 }
 0xa8f   : > { %v6373_v44 = vsub.f32 1.0, %v6372_v41  ;;  %8016 = vrcp.f32 %v13834_v31  ;;  %7574 = vmatmul.msk.f32.gmra.mxu1 %vm14689_vm12, %v6851_v0  ;;  %v6095_v52 = vand.u32 2147483648, %v13667_v42  ;;  %vm6361_vm13 = vweird.f32 %v13661_v8 }
 0xa90   : > { %v6365_v18 = vand.u32 2147483647, %v13661_v8  ;;  %v13847_v5 = vand.u32 2147483647, %v13827_v19  ;;  %v6506_v29 = vmul.f32 0.080537446, %v13824_v3  ;;  %vm6089_vm5 = vweird.f32 %v13667_v42  ;;  %vm13852_vm0 = vmor %vm6361_vm13, %vm6362_vm15 }
 0xa91   : > { %v6093_v60 = vand.u32 2147483647, %v13667_v42  ;;  %v6101_v43 = vsub.f32 1.0, %v6100_v33  ;;  %v6632_v48 = vadd.f32 %v6616_v25, %v13550_v22  ;;  %v6569_v34 = vmul.f32 %v6553_v9, %v13708_v61  ;;  %vm13860_vm9 = vmor %vm6089_vm5, %vm6090_vm7 }
 0xa92   : > { %v6083_v62 = vmul.f32 -1.0, %v6082_v20  ;;  %v6364_v42 = vsel %vm13852_vm0, %v13741_v57, %v6360_v28  ;;  %v13867_v45 = vpop.eup %8014  ;;  %v6427_v26 = vsel %vm5883_vm14, %v6355_v4, %v13580_v24  ;;  %vm5884_vm11 = vcmp.gt.f32.partialorder %v13639_v15, 0.41421357  ;;  %v14714_v24 = vld [vmem:[#allocation32_spill] sm:$0xff] }
 0xa93   : > { %v6092_v22 = vsel %vm13860_vm9, %v13746_v10, %v6088_v40  ;;  %v6368_v25 = vor.u32 1.1754944e-38, %v6367_v39  ;;  %v6374_v30 = vmul.f32 %v13789_v46, %v6373_v44  ;;  %v6096_v1 = vor.u32 1.1754944e-38, %v6095_v52 }
 0xa94   : > { %v7535_v36 = vadd.f32 -1.0, %v13639_v15  ;;  %vm6366_vm8 = vcmp.eq.f32.partialorder %v6365_v18, 8.507059e+37  ;;  %v13879_v57 = vadd.f32 1e-30, %v13847_v5  ;;  %v7549_v59 = vadd.f32 -0.13877685, %v6506_v29 }
 0xa95   : > { %v13881_v11 = vpop.eup %8016  ;;  %vm6094_vm6 = vcmp.eq.f32.partialorder %v6093_v60, 8.507059e+37  ;;  %v6369_v41 = vsel %vm6366_vm8, %v6368_v25, %v6364_v42  ;;  %v6102_v9 = vmul.f32 %v13814_v49, %v6101_v43  ;;  %v13886_v10 = vsel %vm5867_vm2, %v6083_v62, %v6427_v26 }
 0xa96   : > { %v6097_v20 = vsel %vm6094_vm6, %v6096_v1, %v6092_v22  ;;  %v6115_v33 = vmul.f32 %v13867_v45, %v13812_v35  ;;  %v6387_v0 = vmul.f32 %v13881_v11, %v13834_v31  ;;  %v6375_v4 = vadd.f32 %v13789_v46, %v6374_v30 }
 0xa97   : > { %vm6376_vm1 = vweird.f32 %v13739_v58  ;;  %vm6377_vm15 = vweird.f32 %v13789_v46  ;;  %v13896_v28 = vadd.f32 1.0, %v13847_v5  ;;  %v6370_v39 = vmul.f32 %v7535_v36, %v6369_v41 }
 0xa98   : > { %v6382_v40 = vand.u32 2147483648, %v13739_v58  ;;  %v6388_v44 = vsub.f32 1.0, %v6387_v0  ;;  %8018 = vrcp.f32 %v13879_v57  ;;  %v6103_v52 = vadd.f32 %v13814_v49, %v6102_v9  ;;  %vm13910_vm12 = vmor %vm6376_vm1, %vm6377_vm15 }
 0xa99   : > { %vm6105_vm7 = vweird.f32 %v13814_v49  ;;  %v6380_v18 = vand.u32 2147483647, %v13739_v58  ;;  %8020 = vrcp.f32 %v13896_v28  ;;  %v6538_v29 = vmul.f32 %v7549_v59, %v13824_v3 }
 0xa9a   : > { %v13907_v60 = vmul.f32 %v13886_v10, %v13886_v10  ;;  %v6110_v63 = vand.u32 2147483648, %v13752_v50  ;;  %v6116_v62 = vsub.f32 1.0, %v6115_v33  ;;  %v6098_v8 = vmul.f32 -1.0, %v6097_v20 }
 0xa9b   : > { %vm6104_vm13 = vweird.f32 %v13752_v50  ;;  %v6108_v58 = vand.u32 2147483647, %v13752_v50  ;;  %v6379_v42 = vsel %vm13910_vm12, %v13789_v46, %v6375_v4  ;;  %v13920_v26 = vadd.f32 %v6632_v48, %v13647_v21 }
 0xa9c   : > { %v6428_v22 = vsel %vm5884_vm11, %v6370_v39, %v13639_v15  ;;  %vm13925_vm5 = vmor %vm6104_vm13, %vm6105_vm7  ;;  %v6383_v30 = vor.u32 1.1754944e-38, %v6382_v40  ;;  %v6389_v1 = vmul.f32 %v13881_v11, %v6388_v44  ;;  %v7564_v36 = vadd.f32 -0.3333295, %v6569_v34 }
 0xa9d   : > { %vm5868_vm0 = vcmp.gt.f32.partialorder %v13639_v15, 2.4142137  ;;  %v6107_v50 = vsel %vm13925_vm5, %v13814_v49, %v6103_v52  ;;  %vm6381_vm9 = vcmp.eq.f32.partialorder %v6380_v18, 8.507059e+37  ;;  %v6554_v46 = vadd.f32 0.19977711, %v6538_v29 }
 0xa9e   : > { %v13934_v21 = vpop.eup %8018  ;;  %v6111_v48 = vor.u32 1.1754944e-38, %v6110_v63  ;;  %v6384_v59 = vsel %vm6381_vm9, %v6383_v30, %v6379_v42  ;;  %v6117_v41 = vmul.f32 %v13867_v45, %v6116_v62  ;;  %v6507_v20 = vmul.f32 0.080537446, %v13907_v60 }
 0xa9f   : > { %v13937_v9 = vpop.eup %8020  ;;  %v13942_v34 = vsel %vm5868_vm0, %v6098_v8, %v6428_v22  ;;  %vm6109_vm8 = vcmp.eq.f32.partialorder %v6108_v58, 8.507059e+37  ;;  %v7536_v33 = vadd.f32 -1.0, %v13697_v38  ;;  %v6390_v0 = vadd.f32 %v13881_v11, %v6389_v1 }
 0xaa0   : > { %v6112_v49 = vsel %vm6109_vm8, %v6111_v48, %v6107_v50  ;;  %vm6392_vm6 = vweird.f32 %v13881_v11  ;;  %v6402_v4 = vmul.f32 %v13937_v9, %v13896_v28  ;;  %vm6391_vm1 = vweird.f32 %v13834_v31 }
 0xaa1   : > { %v6385_v39 = vmul.f32 %v7536_v33, %v6384_v59  ;;  %v6397_v40 = vand.u32 2147483648, %v13834_v31  ;;  %v6130_v44 = vmul.f32 %v13934_v21, %v13879_v57  ;;  %v6118_v52 = vadd.f32 %v13867_v45, %v6117_v41  ;;  %vm13959_vm7 = vmor %vm6391_vm1, %vm6392_vm6 }
 0xaa2   : > { %vm6120_vm15 = vweird.f32 %v13867_v45  ;;  %v6395_v18 = vand.u32 2147483647, %v13834_v31  ;;  %v6403_v29 = vsub.f32 1.0, %v6402_v4  ;;  %v6601_v63 = vmul.f32 %v7564_v36, %v13708_v61 }
 0xaa3   : > { %v6570_v43 = vmul.f32 %v6554_v46, %v13824_v3  ;;  %v7550_v62 = vadd.f32 -0.13877685, %v6507_v20  ;;  %v6125_v8 = vand.u32 2147483648, %v13812_v35  ;;  %vm5885_vm12 = vcmp.gt.f32.partialorder %v13697_v38, 0.41421357 }
 0xaa4   : > { %vm6119_vm13 = vweird.f32 %v13812_v35  ;;  %v6123_v42 = vand.u32 2147483647, %v13812_v35  ;;  %v6394_v31 = vsel %vm13959_vm7, %v13881_v11, %v6390_v0  ;;  %v13971_v61 = vmul.f32 %v13942_v34, %v13942_v34 }
 0xaa5   : > { %v6113_v22 = vmul.f32 -1.0, %v6112_v49  ;;  %vm13973_vm5 = vmor %vm6119_vm13, %vm6120_vm15  ;;  %v6398_v30 = vor.u32 1.1754944e-38, %v6397_v40  ;;  %v6131_v1 = vsub.f32 1.0, %v6130_v44  ;;  %v6429_v36 = vsel %vm5885_vm12, %v6385_v39, %v13697_v38  ;;  %v14702_v40 = vld [vmem:[#allocation27_spill] sm:$0xff] }
 0xaa6   : > { %v6122_v35 = vsel %vm13973_vm5, %v13867_v45, %v6118_v52  ;;  %vm6396_vm9 = vcmp.eq.f32.partialorder %v6395_v18, 8.507059e+37  ;;  %v6404_v11 = vmul.f32 %v13937_v9, %v6403_v29  ;;  %v7565_v50 = vadd.f32 -0.3333295, %v6570_v43 }
 0xaa7   : > { %v6539_v46 = vmul.f32 %v7550_v62, %v13907_v60  ;;  %v6126_v48 = vor.u32 1.1754944e-38, %v6125_v8  ;;  %v6399_v59 = vsel %vm6396_vm9, %v6398_v30, %v6394_v31  ;;  %v6680_v41 = vsub.f32 0.0, %v13920_v26  ;;  %v6809_v62 = vpop.permute.xlu0 %6808 }
 0xaa8   : > { %vm14258_vm8 = vcmp.gt.f32.partialorder %v13697_v38, 2.4142137  ;;  %vm6124_vm6 = vcmp.eq.f32.partialorder %v6123_v42, 8.507059e+37  ;;  %v7537_v20 = vadd.f32 -1.0, %v13773_v6  ;;  %v6508_v33 = vmul.f32 0.080537446, %v13971_v61 }
 0xaa9   : > { %v13991_v45 = vsel %vm14258_vm8, %v6113_v22, %v6429_v36  ;;  %v6127_v49 = vsel %vm6124_vm6, %v6126_v48, %v6122_v35  ;;  %v6132_v0 = vmul.f32 %v13934_v21, %v6131_v1  ;;  %vm6664_vm1 = vcmp.lt.f32.partialorder %v13304_v16, 0.0  ;;  %v6811_v35 = vpop.permute.xlu1 %6810 }
 0xaaa   : > { %v6400_v4 = vmul.f32 %v7537_v20, %v6399_v59  ;;  %v6405_v39 = vadd.f32 %v13937_v9, %v6404_v11  ;;  %vm6407_vm15 = vweird.f32 %v13937_v9  ;;  %v6772_v44 = vmul.f32 %v13685_v55, %v14702_v40 }
 0xaab   : > { %v6617_v52 = vmul.f32 %v6601_v63, %v13679_v7  ;;  %v6602_v18 = vmul.f32 %v7565_v50, %v13824_v3  ;;  %v6555_v29 = vadd.f32 0.19977711, %v6539_v46  ;;  %v6412_v43 = vand.u32 2147483648, %v13896_v28 }
 0xaac   : > { %v14004_v8 = vmul.f32 %v13991_v45, %v13991_v45  ;;  %vm6406_vm7 = vweird.f32 %v13896_v28  ;;  %v6410_v58 = vand.u32 2147483647, %v13896_v28  ;;  %v6852_v42 = vadd.f32 %v6809_v62, %v6772_v44  ;;  %v6931_v62 = vpop.f32.mrf.mxu1 }
 0xaad   : > { %vm14257_vm13 = vcmp.gt.f32.partialorder %v13773_v6, 0.41421357  ;;  %v6128_v55 = vmul.f32 -1.0, %v6127_v49  ;;  %v6133_v63 = vadd.f32 %v13934_v21, %v6132_v0  ;;  %vm6135_vm5 = vweird.f32 %v13934_v21  ;;  %vm14013_vm9 = vmor %vm6406_vm7, %vm6407_vm15 }
 0xaae   : > { %v7551_v31 = vadd.f32 -0.13877685, %v6508_v33  ;;  %v6430_v22 = vsel %vm14257_vm13, %v6400_v4, %v13773_v6  ;;  %v6140_v28 = vand.u32 2147483648, %v13879_v57  ;;  %v6409_v25 = vsel %vm14013_vm9, %v13937_v9, %v6405_v39  ;;  %v14708_v9 = vld [vmem:[#allocation28_spill] sm:$0xff] }
 0xaaf   : > { %vm14705_vm6 = vcmask 64512   ;;  %v6571_v30 = vmul.f32 %v6555_v29, %v13907_v60  ;;  %vm6134_vm15 = vweird.f32 %v13879_v57  ;;  %v6138_v1 = vand.u32 2147483647, %v13879_v57 }
 0xab0   : > { %7575 = vmatmul.msk.f32.gmra.mxu1 %vm14705_vm6, %v6852_v42  ;;  %v6413_v36 = vor.u32 1.1754944e-38, %v6412_v43  ;;  %v6509_v11 = vmul.f32 0.080537446, %v14004_v8  ;;  %vm5870_vm7 = vcmp.gt.f32.partialorder %v13773_v6, 2.4142137  ;;  %vm14030_vm13 = vmor %vm6134_vm15, %vm6135_vm5  ;;  %vm6411_vm8 = vcmp.eq.f32.partialorder %v6410_v58, 8.507059e+37 }
 0xab1   : > { %v6773_v46 = vmul.f32 %v13699_v12, %v14708_v9  ;;  %v6633_v48 = vadd.f32 %v6617_v52, %v13679_v7  ;;  %v14039_v59 = vsel %vm5870_vm7, %v6128_v55, %v6430_v22  ;;  %v6137_v57 = vsel %vm14030_vm13, %v13934_v21, %v6133_v63  ;;  %vm14711_vm13 = vmmov %vm14705_vm6 }
 0xab2   : > { %v6414_v20 = vsel %vm6411_vm8, %v6413_v36, %v6409_v25  ;;  %v6540_v33 = vmul.f32 %v7551_v31, %v13971_v61  ;;  %v6141_v49 = vor.u32 1.1754944e-38, %v6140_v28  ;;  %v7538_v0 = vadd.f32 -1.0, %v13847_v5  ;;  %vm14709_vm8 = vmmov %vm14705_vm6  ;;  %v6813_v31 = vpop.permute.xlu2 %6812 }
 0xab3   : > { %v6853_v4 = vadd.f32 %v6811_v35, %v6773_v46  ;;  %v6696_v7 = vsel %vm6664_vm1, %v6680_v41, %v13920_v26  ;;  %v6618_v12 = vmul.f32 %v6602_v18, %v13806_v32  ;;  %v7566_v39 = vadd.f32 -0.3333295, %v6571_v30  ;;  %v6996_v26 = vpop.f32.mrf.mxu2 }
 0xab4   : > { %vm6139_vm5 = vcmp.eq.f32.partialorder %v6138_v1, 8.507059e+37  ;;  %v7552_v40 = vadd.f32 -0.13877685, %v6509_v11  ;;  %v14052_v21 = vmul.f32 %v14039_v59, %v14039_v59  ;;  %v6415_v52 = vmul.f32 %v7538_v0, %v6414_v20  ;;  %v6815_v20 = vpop.permute.xlu0 %6814  ;;  %v14712_v0 = vld [vmem:[#allocation31_spill] sm:$0xff] }
 0xab5   : > { %v6142_v44 = vsel %vm6139_vm5, %v6141_v49, %v6137_v57  ;;  %8022 = vpow2.f32 %v13780_v54  ;;  %v6473_v29 = vsel %vm5865_vm10, 1.5707964, %v13704_v14  ;;  %v6458_v16 = vsel %vm5882_vm4, 0.7853982, %v14313_v37 }
 0xab6   : > { %v6712_v41 = vmul.f32 1.272, %v6696_v7  ;;  %v6649_v18 = vadd.f32 %v6633_v48, %v6473_v29  ;;  %v6556_v43 = vadd.f32 0.19977711, %v6540_v33  ;;  %vm7044_vm1 = vcmask 130048  }
 0xab7   : > { %v6634_v54 = vadd.f32 %v6618_v12, %v13806_v32  ;;  %vm5887_vm10 = vcmp.gt.f32.partialorder %v13847_v5, 0.41421357  ;;  %v6143_v17 = vmul.f32 -1.0, %v6142_v44  ;;  %v6997_v14 = vadd.f32 %v6996_v26, %v6931_v62  ;;  %v6817_v62 = vpop.permute.xlu1 %6816 }
 0xab8   : > { %7576 = vmatmul.msk.f32.gmra.mxu1 %vm14709_vm8, %v6853_v4  ;;  %v6603_v58 = vmul.f32 %v7566_v39, %v13907_v60  ;;  %v6541_v42 = vmul.f32 %v7552_v40, %v14004_v8  ;;  %v6510_v55 = vmul.f32 0.080537446, %v14052_v21  ;;  %v6431_v63 = vsel %vm5887_vm10, %v6415_v52, %v13847_v5  ;;  %v14710_v60 = vld [vmem:[#allocation29_spill] sm:$0xff]  ;;  %vm14720_vm8 = vmmov %vm14705_vm6 }
 0xab9   : > { %v6474_v3 = vsel %vm5866_vm3, 1.5707964, %v6458_v16  ;;  %7045 = vst.msk [vmem:[%s14064_s16] sm:$0xff] %vm7044_vm1, %v6997_v14  ;;  %v6681_v32 = vsub.f32 0.0, %v6649_v18  ;;  %v6572_v22 = vmul.f32 %v6556_v43, %v13971_v61  ;;  %vm5871_vm4 = vcmp.gt.f32.partialorder %v13847_v5, 2.4142137 }
 0xaba   : > { %v6774_v28 = vmul.f32 %v13754_v56, %v14710_v60  ;;  %v6736_v30 = vmul.f32 1.442695, %v6712_v41  ;;  %v6650_v1 = vadd.f32 %v6634_v54, %v6474_v3  ;;  %v14085_v36 = vsel %vm5871_vm4, %v6143_v17, %v6431_v63 }
 0xabb   : > { %v8023_v25 = vpop.eup %8022  ;;  %v6619_v2 = vmul.f32 %v6603_v58, %v13886_v10  ;;  %v6557_v35 = vadd.f32 0.19977711, %v6541_v42  ;;  %v7553_v11 = vadd.f32 -0.13877685, %v6510_v55  ;;  %vm6665_vm3 = vcmp.lt.f32.partialorder %v13416_v51, 0.0 }
 0xabc   : > { %v6854_v50 = vadd.f32 %v6813_v31, %v6774_v28  ;;  %v6697_v9 = vsel %vm6665_vm3, %v6681_v32, %v6649_v18  ;;  %v7567_v46 = vadd.f32 -0.3333295, %v6572_v22  ;;  %v14091_v48 = vmul.f32 %v14085_v36, %v14085_v36  ;;  %vm14722_vm3 = vmmov %vm14705_vm6 }
 0xabd   : > { %8024 = vpow2.f32 %v6736_v30  ;;  %v6682_v56 = vsub.f32 0.0, %v6650_v1  ;;  %v6459_v57 = vsel %vm5883_vm14, 0.7853982, %v14313_v37  ;;  %v6635_v33 = vadd.f32 %v6619_v2, %v13886_v10  ;;  %vm14713_vm14 = vmmov %vm14705_vm6  ;;  %v6819_v2 = vpop.permute.xlu2 %6818 }
 0xabe   : > { %v6573_v49 = vmul.f32 %v6557_v35, %v14004_v8  ;;  %v6542_v51 = vmul.f32 %v7553_v11, %v14052_v21  ;;  %v6775_v4 = vmul.f32 %v8023_v25, %v14712_v0  ;;  %v6713_v7 = vmul.f32 1.272, %v6697_v9  ;;  %v14715_v11 = vld [vmem:[#allocation33_spill] sm:$0xff] }
 0xabf   : > { %v6604_v12 = vmul.f32 %v7567_v46, %v13971_v61  ;;  %v6511_v39 = vmul.f32 0.080537446, %v14091_v48  ;;  %vm6666_vm9 = vcmp.lt.f32.partialorder %v13512_v53, 0.0  ;;  %v6475_v44 = vsel %vm5867_vm2, 1.5707964, %v6459_v57 }
 0xac0   : > { %7577 = vmatmul.msk.f32.gmra.mxu1 %vm14711_vm13, %v6854_v50  ;;  %v6855_v40 = vadd.f32 %v6815_v20, %v6775_v4  ;;  %v6698_v52 = vsel %vm6666_vm9, %v6682_v56, %v6650_v1  ;;  %v6651_v29 = vadd.f32 %v6635_v33, %v6475_v44  ;;  %v7568_v10 = vadd.f32 -0.3333295, %v6573_v49  ;;  %v14719_v4 = vld [vmem:[#allocation34_spill] sm:$0xff]  ;;  %vm14724_vm13 = vmmov %vm14722_vm3 }
 0xac1   : > { %v6558_v16 = vadd.f32 0.19977711, %v6542_v51  ;;  %v6738_v41 = vmul.f32 1.442695, %v6713_v7  ;;  %v6620_v18 = vmul.f32 %v6604_v12, %v13942_v34  ;;  %v7554_v43 = vadd.f32 -0.13877685, %v6511_v39  ;;  %vm14728_vm9 = vmmov %vm14722_vm3 }
 0xac2   : > { %v6714_v61 = vmul.f32 1.272, %v6698_v52  ;;  %v6683_v54 = vsub.f32 0.0, %v6651_v29  ;;  %v6605_v17 = vmul.f32 %v7568_v10, %v14004_v8  ;;  %v6460_v58 = vsel %vm5884_vm11, 0.7853982, %v14313_v37 }
 0xac3   : > { %v8025_v26 = vpop.eup %8024  ;;  %v6574_v53 = vmul.f32 %v6558_v16, %v14052_v21  ;;  %8026 = vpow2.f32 %v6738_v41  ;;  %v6636_v42 = vadd.f32 %v6620_v18, %v13942_v34  ;;  %v6543_v55 = vmul.f32 %v7554_v43, %v14091_v48  ;;  %v14721_v18 = vld [vmem:[#allocation35_spill] sm:$0xff] }
 0xac4   : > { %v6776_v14 = vmul.f32 %v8025_v26, %v14714_v24  ;;  %v6740_v3 = vmul.f32 1.442695, %v6714_v61  ;;  %vm6667_vm2 = vcmp.lt.f32.partialorder %v13565_v23, 0.0  ;;  %v6621_v8 = vmul.f32 %v6605_v17, %v13991_v45  ;;  %v6823_v26 = vpop.permute.xlu1 %6822 }
 0xac5   : > { %v6699_v31 = vsel %vm6667_vm2, %v6683_v54, %v6651_v29  ;;  %v7569_v32 = vadd.f32 -0.3333295, %v6574_v53  ;;  %v6476_v22 = vsel %vm5868_vm0, 1.5707964, %v6460_v58  ;;  %v6559_v28 = vadd.f32 0.19977711, %v6543_v55 }
 0xac6   : > { %v6856_v63 = vadd.f32 %v6817_v62, %v6776_v14  ;;  %v6652_v60 = vadd.f32 %v6636_v42, %v6476_v22  ;;  %8028 = vpow2.f32 %v6740_v3  ;;  %v6715_v34 = vmul.f32 1.272, %v6699_v31  ;;  %v6825_v14 = vpop.permute.xlu2 %6824  ;;  %v14723_v42 = vld [vmem:[#allocation36_spill] sm:$0xff]  ;;  %v6999_v3 = vpop.f32.mrf.mxu2  ;;  %v14725_v31 = vld [vmem:[#allocation37_spill] sm:$0xff] }
 0xac7   : > { %v6461_v30 = vsel %vm5885_vm12, 0.7853982, %v14313_v37  ;;  %v6637_v23 = vadd.f32 %v6621_v8, %v13991_v45  ;;  %v6606_v1 = vmul.f32 %v7569_v32, %v14052_v21  ;;  %v6575_v15 = vmul.f32 %v6559_v28, %v14091_v48  ;;  %vm14717_vm12 = vmmov %vm14705_vm6  ;;  %v6821_v21 = vpop.permute.xlu0 %6820 }
 0xac8   : > { %7578 = vmatmul.msk.f32.gmra.mxu1 %vm14713_vm14, %v6855_v40  ;;  %v6684_v35 = vsub.f32 0.0, %v6652_v60  ;;  %v6742_v9 = vmul.f32 1.442695, %v6715_v34  ;;  %vm14716_vm11 = vcmp.gt.f32.partialorder %v13697_v38, 2.4142137  ;;  %vm6668_vm0 = vcmp.lt.f32.partialorder %v13627_v27, 0.0  ;;  %vm14730_vm14 = vmmov %vm14722_vm3 }
 0xac9   : > { %v8027_v25 = vpop.eup %8026  ;;  %v6477_v46 = vsel %vm14716_vm11, 1.5707964, %v6461_v30  ;;  %v6622_v57 = vmul.f32 %v6606_v1, %v14039_v59  ;;  %v7570_v49 = vadd.f32 -0.3333295, %v6575_v15  ;;  %vm14718_vm15 = vcmp.gt.f32.partialorder %v13773_v6, 0.41421357 }
 0xaca   : > { %v6777_v50 = vmul.f32 %v8027_v25, %v14715_v11  ;;  %v6653_v56 = vadd.f32 %v6637_v23, %v6477_v46  ;;  %v6700_v45 = vsel %vm6668_vm0, %v6684_v35, %v6652_v60  ;;  %8030 = vpow2.f32 %v6742_v9  ;;  %v14727_v30 = vld [vmem:[#allocation38_spill] sm:$0xff]  ;;  %v14729_v11 = vld [vmem:[#allocation39_spill] sm:$0xff] }
 0xacb   : > { %v6462_v0 = vsel %vm14718_vm15, 0.7853982, %v14313_v37  ;;  %v6638_v38 = vadd.f32 %v6622_v57, %v14039_v59  ;;  %v6716_v12 = vmul.f32 1.272, %v6700_v45  ;;  %v6607_v39 = vmul.f32 %v7570_v49, %v14091_v48 }
 0xacc   : > { %v6857_v20 = vadd.f32 %v6819_v2, %v6777_v50  ;;  %v8029_v33 = vpop.eup %8028  ;;  %v6685_v51 = vsub.f32 0.0, %v6653_v56  ;;  %vm6669_vm5 = vcmp.lt.f32.partialorder %v13669_v13, 0.0  ;;  %v6478_v27 = vsel %vm5870_vm7, 1.5707964, %v6462_v0 }
 0xacd   : > { %v6778_v7 = vmul.f32 %v8029_v33, %v14719_v4  ;;  %v6654_v52 = vadd.f32 %v6638_v38, %v6478_v27  ;;  %v6744_v10 = vmul.f32 1.442695, %v6716_v12  ;;  %v6623_v16 = vmul.f32 %v6607_v39, %v14085_v36 }
 0xace   : > { %v6701_v44 = vsel %vm6669_vm5, %v6685_v51, %v6653_v56  ;;  %v6463_v13 = vsel %vm5887_vm10, 0.7853982, %v14313_v37  ;;  %vm6670_vm7 = vcmp.lt.f32.partialorder %v13757_v47, 0.0  ;;  %vm6671_vm10 = vcmp.lt.f32.partialorder %v13827_v19, 0.0  ;;  %v7002_v35 = vpop.f32.mrf.mxu2 }
 0xacf   : > { %v6858_v40 = vadd.f32 %v6821_v21, %v6778_v7  ;;  %v6717_v59 = vmul.f32 1.272, %v6701_v44  ;;  %v6686_v41 = vsub.f32 0.0, %v6654_v52  ;;  %8032 = vpow2.f32 %v6744_v10 }
 0xad0   : > { %7579 = vmatmul.msk.f32.gmra.mxu1 %vm14705_vm6, %v6856_v63  ;;  %v8031_v29 = vpop.eup %8030  ;;  %v6639_v6 = vadd.f32 %v6623_v16, %v14085_v36  ;;  %v6479_v54 = vsel %vm5871_vm4, 1.5707964, %v6463_v13  ;;  %vm14726_vm4 = vmmov %vm14722_vm3 }
 0xad1   : > { %v6779_v43 = vmul.f32 %v8031_v29, %v14721_v18  ;;  %v6746_v61 = vmul.f32 1.442695, %v6717_v59  ;;  %v6702_v62 = vsel %vm6670_vm7, %v6686_v41, %v6654_v52 }
 0xad2   : > { %v6655_v17 = vadd.f32 %v6639_v6, %v6479_v54  ;;  %v6718_v24 = vmul.f32 1.272, %v6702_v62 }
 0xad3   : > { %v6859_v48 = vadd.f32 %v6823_v26, %v6779_v43  ;;  %8034 = vpow2.f32 %v6746_v61 }
 0xad4   : > { %v6687_v58 = vsub.f32 0.0, %v6655_v17  ;;  %v6748_v36 = vmul.f32 1.442695, %v6718_v24  ;;  %v6831_v15 = vpop.permute.xlu2 %6830 }
 0xad5   : > { %v8033_v53 = vpop.eup %8032 }
 0xad6   : > { %v6780_v37 = vmul.f32 %v8033_v53, %v14723_v42  ;;  %v6703_v47 = vsel %vm6671_vm10, %v6687_v58, %v6655_v17  ;;  %8036 = vpow2.f32 %v6748_v36  ;;  %v7005_v57 = vpop.f32.mrf.mxu2 }
 0xad7   : > { %v6719_v22 = vmul.f32 1.272, %v6703_v47 }
 0xad8   : > { %7580 = vmatmul.msk.f32.gmra.mxu1 %vm14717_vm12, %v6857_v20  ;;  %v6860_v55 = vadd.f32 %v6825_v14, %v6780_v37 }
 0xad9   : > { %v8035_v63 = vpop.eup %8034  ;;  %v6750_v34 = vmul.f32 1.442695, %v6719_v22 }
 0xada   : > { %v6781_v8 = vmul.f32 %v8035_v63, %v14725_v31 }
 0xadb   : > { %8038 = vpow2.f32 %v6750_v34 }
 0xadc   : > { %v8037_v25 = vpop.eup %8036 }
 0xadd   : > { %v6782_v23 = vmul.f32 %v8037_v25, %v14727_v30 }
 0xade   : > { %v7008_v45 = vpop.f32.mrf.mxu2 }
 0xae0   : > { %7581 = vmatmul.msk.f32.gmra.mxu1 %vm14720_vm8, %v6858_v40 }
 0xae1   : > { %v8039_v2 = vpop.eup %8038 }
 0xae2   : > { %v6783_v50 = vmul.f32 %v8039_v2, %v14729_v11 }
 0xae3   : > { %v6827_v5 = vpop.permute.xlu0 %6826 }
 0xae4   : > { %v6861_v28 = vadd.f32 %v6827_v5, %v6781_v8  ;;  %v6863_v9 = vadd.f32 %v6831_v15, %v6783_v50 }
 0xae6   : > { %v7011_v49 = vpop.f32.mrf.mxu2 }
 0xae8   : > { %7582 = vmatmul.msk.f32.gmra.mxu1 %vm14722_vm3, %v6859_v48  ;;  %v6829_v19 = vpop.permute.xlu1 %6828 }
 0xae9   : > { %v6862_v1 = vadd.f32 %v6829_v19, %v6782_v23 }
 0xaee   : > { %v7014_v21 = vpop.f32.mrf.mxu2 }
 0xaf0   : > { %7583 = vmatmul.msk.f32.gmra.mxu1 %vm14724_vm13, %v6860_v55  ;;  %v6934_v32 = vpop.f32.mrf.mxu1 }
 0xaf1   : > { %v7000_v60 = vadd.f32 %v6999_v3, %v6934_v32 }
 0xaf3   : > { %7046 = vst.msk [vmem:[%s14064_s16 + $0x8] sm:$0xff] %vm7044_vm1, %v7000_v60 }
 0xaf6   : > { %v7017_v38 = vpop.f32.mrf.mxu2 }
 0xaf8   : > { %7584 = vmatmul.msk.f32.gmra.mxu1 %vm14726_vm4, %v6861_v28 }
 0xafe   : > { %v7020_v40 = vpop.f32.mrf.mxu2 }
 0xb00   : > { %7585 = vmatmul.msk.f32.gmra.mxu1 %vm14728_vm9, %v6862_v1 }
 0xb04   : > { %v6937_v46 = vpop.f32.mrf.mxu1 }
 0xb05   : > { %v7003_v56 = vadd.f32 %v7002_v35, %v6937_v46 }
 0xb06   : > { %v7023_v52 = vpop.f32.mrf.mxu2 }
 0xb07   : > { %7047 = vst.msk [vmem:[%s14064_s16 + $0x10] sm:$0xff] %vm7044_vm1, %v7003_v56 }
 0xb08   : > { %7586 = vmatmul.msk.f32.gmra.mxu1 %vm14730_vm14, %v6863_v9 }
 0xb0c   : > { %v6940_v20 = vpop.f32.mrf.mxu1 }
 0xb0d   : > { %v7006_v33 = vadd.f32 %v7005_v57, %v6940_v20 }
 0xb0e   : > { %v7026_v16 = vpop.f32.mrf.mxu2 }
 0xb0f   : > { %7048 = vst.msk [vmem:[%s14064_s16 + $0x18] sm:$0xff] %vm7044_vm1, %v7006_v33 }
 0xb16   : > { %v7029_v41 = vpop.f32.mrf.mxu2 }
 0xb1e   : > { %v7032_v48 = vpop.f32.mrf.mxu2 }
 0xb26   : > { %v7035_v54 = vpop.f32.mrf.mxu2 }
 0xb2d   : > { %v6943_v51 = vpop.f32.mrf.mxu1 }
 0xb2e   : > { %v7009_v0 = vadd.f32 %v7008_v45, %v6943_v51  ;;  %v7038_v24 = vpop.f32.mrf.mxu2 }
 0xb30   : > { %7049 = vst.msk [vmem:[%s14064_s16 + $0x20] sm:$0xff] %vm7044_vm1, %v7009_v0 }
 0xb35   : > { %v6946_v4 = vpop.f32.mrf.mxu1 }
 0xb36   : > { %v7012_v7 = vadd.f32 %v7011_v49, %v6946_v4  ;;  %v7041_v42 = vpop.f32.mrf.mxu2 }
 0xb38   : > { %7050 = vst.msk [vmem:[%s14064_s16 + $0x28] sm:$0xff] %vm7044_vm1, %v7012_v7 }
 0xb3d   : > { %v6949_v12 = vpop.f32.mrf.mxu1 }
 0xb3e   : > { %v7015_v39 = vadd.f32 %v7014_v21, %v6949_v12 }
 0xb40   : > { %7051 = vst.msk [vmem:[%s14064_s16 + $0x30] sm:$0xff] %vm7044_vm1, %v7015_v39 }
 0xb45   : > { %v6952_v27 = vpop.f32.mrf.mxu1 }
 0xb46   : > { %v7018_v44 = vadd.f32 %v7017_v38, %v6952_v27 }
 0xb48   : > { %7052 = vst.msk [vmem:[%s14064_s16 + $0x38] sm:$0xff] %vm7044_vm1, %v7018_v44 }
 0xb4d   : > { %v6955_v29 = vpop.f32.mrf.mxu1 }
 0xb4e   : > { %v7021_v10 = vadd.f32 %v7020_v40, %v6955_v29 }
 0xb50   : > { %7053 = vst.msk [vmem:[%s14064_s16 + $0x40] sm:$0xff] %vm7044_vm1, %v7021_v10 }
 0xb55   : > { %v6958_v59 = vpop.f32.mrf.mxu1 }
 0xb56   : > { %v7024_v26 = vadd.f32 %v7023_v52, %v6958_v59 }
 0xb58   : > { %7054 = vst.msk [vmem:[%s14064_s16 + $0x48] sm:$0xff] %vm7044_vm1, %v7024_v26 }
 0xb5d   : > { %v6961_v18 = vpop.f32.mrf.mxu1 }
 0xb5e   : > { %v7027_v43 = vadd.f32 %v7026_v16, %v6961_v18 }
 0xb60   : > { %7055 = vst.msk [vmem:[%s14064_s16 + $0x50] sm:$0xff] %vm7044_vm1, %v7027_v43 }
 0xb65   : > { %v6964_v13 = vpop.f32.mrf.mxu1 }
 0xb66   : > { %v7030_v6 = vadd.f32 %v7029_v41, %v6964_v13 }
 0xb68   : > { %7056 = vst.msk [vmem:[%s14064_s16 + $0x58] sm:$0xff] %vm7044_vm1, %v7030_v6 }
 0xb6d   : > { %v6967_v61 = vpop.f32.mrf.mxu1 }
 0xb6e   : > { %v7033_v62 = vadd.f32 %v7032_v48, %v6967_v61 }
 0xb70   : > { %7057 = vst.msk [vmem:[%s14064_s16 + $0x60] sm:$0xff] %vm7044_vm1, %v7033_v62 }
 0xb75   : > { %v6970_v17 = vpop.f32.mrf.mxu1 }
 0xb76   : > { %v7036_v53 = vadd.f32 %v7035_v54, %v6970_v17 }
 0xb78   : > { %7058 = vst.msk [vmem:[%s14064_s16 + $0x68] sm:$0xff] %vm7044_vm1, %v7036_v53 }
 0xb7d   : > { %v6973_v14 = vpop.f32.mrf.mxu1 }
 0xb7e   : > { %v7039_v58 = vadd.f32 %v7038_v24, %v6973_v14 }
 0xb80   : > { %7059 = vst.msk [vmem:[%s14064_s16 + $0x70] sm:$0xff] %vm7044_vm1, %v7039_v58 }
 0xb85   : > { %v6976_v37 = vpop.f32.mrf.mxu1 }
 0xb86   : > { %v7042_v36 = vadd.f32 %v7041_v42, %v6976_v37 }
 0xb88   : > { %7060 = vst.msk [vmem:[%s14064_s16 + $0x78] sm:$0xff] %vm7044_vm1, %v7042_v36 }
 0xb89 PF: > { %s69_s7 = sadd.s32 1, %s8066_s7  }
 0xb8a   : > { %p66_p4 = scmp.ge.s32.totalorder %s69_s7, 4  }
 0xb8c   :  { %68 = sbr.rel (!%p66_p4) target bundleno = 46 (0x2e), region = 195 }

</bundles_post_ra>
